<compile_context>
chip_gen: v6e
topology: v6e:2x2x1
jax: 0.10.0
libtpu: 0.0.40
codegen_flags: <defaults>
</compile_context>

<pallas_src>
import functools

import jax
import jax.numpy as jnp
from jax.experimental import pallas as pl
from jax.experimental.pallas import tpu as pltpu


def _round_up(x, m):
    return ((x + m - 1) // m) * m


def _conv_bn_act_kernel(x_ref, w_ref, shift_ref, o_ref, *, tap_offsets, cin_p,
                        leaky_slope):
    """Fused KxK conv (as K*K row-shifted thin matmuls) + BN shift + LeakyReLU.

    x_ref:     (P_in, cin_p)     bf16  flattened, spatially padded NHWC input
    w_ref:     (K*K*cin_p, Cout) bf16  conv weight with eval-BN scale folded in
    shift_ref: (1, Cout)         f32   eval-BN shift (beta - mean*scale)
    o_ref:     (P_out, Cout)     f32   one output row per padded spatial position
    """
    p_out = o_ref.shape[0]

    # Accumulate the K*K taps directly into the f32 output block (VMEM resident); each
    # tap is a static row-shifted view of the same input buffer -> one thin MXU dot.
    o_ref[...] = jnp.zeros_like(o_ref)
    for t, off in enumerate(tap_offsets):          # static Python loop (K*K = 9 taps)
        lhs = x_ref[pl.ds(off, p_out), :]          # (P_out, cin_p) bf16
        rhs = w_ref[pl.ds(t * cin_p, cin_p), :]    # (cin_p, Cout)  bf16
        o_ref[...] += jnp.dot(lhs, rhs, preferred_element_type=jnp.float32)

    # Epilogue: BN shift + LeakyReLU(0.1), f32.
    y = o_ref[...] + shift_ref[...]
    o_ref[...] = jnp.where(y > 0, y, leaky_slope * y)


@functools.partial(jax.jit, static_argnames=("stride", "pad", "leaky_slope"))
def conv_bn_leaky(x_nchw, w_oihw, bn_scale, bn_shift, *, stride=1, pad=1,
                  leaky_slope=0.1):
    """Fused Conv2d (no bias) + eval-mode BatchNorm2d + LeakyReLU.

    x_nchw:  [N, Cin, H, W]     float32
    w_oihw:  [Cout, Cin, K, K]  float32 (PyTorch conv weight layout)
    bn_scale, bn_shift: [Cout]  float32 (gamma/sqrt(var+eps), beta - mean*scale)
    """
    N, Cin, H, W = x_nchw.shape
    Cout, _, K, _ = w_oihw.shape
    Ho = (H + 2 * pad - K) // stride + 1
    Wo = (W + 2 * pad - K) // stride + 1
    Hp, Wp = H + 2 * pad, W + 2 * pad

    cin_p = _round_up(Cin, 8)            # channel-pad -> sublane-friendly contraction
    kdim_p = K * K * cin_p

    # ---- glue (cheap, shape-only): NCHW -> NHWC, one pad (spatial + channel), flatten --
    x = jnp.transpose(x_nchw, (0, 2, 3, 1))                                # [N,H,W,Cin]
    x = jnp.pad(x, ((0, 0), (pad, pad), (pad, pad), (0, cin_p - Cin)))     # [N,Hp,Wp,cin_p]
    x2 = x.reshape(N * Hp * Wp, cin_p)

    # The kernel produces one output row for EVERY padded position; tap (dy, dx) of the
    # conv is then simply the view shifted by dy*Wp + dx rows.  Valid rows (which never
    # read across image boundaries) are cropped afterwards.
    p_out = N * Hp * Wp
    tap_offsets = tuple(dy * Wp + dx for dy in range(K) for dx in range(K))
    p_in = _round_up(p_out + tap_offsets[-1], 8)
    x2 = jnp.pad(x2, ((0, p_in - p_out), (0, 0))).astype(jnp.bfloat16)     # (P_in, cin_p)

    # Weight: OIHW -> [dy, dx, ci, co], channel-pad, fold eval-BN scale, flatten, bf16.
    w = jnp.transpose(w_oihw, (2, 3, 1, 0)).astype(jnp.float32)            # [K,K,Cin,Cout]
    w = jnp.pad(w, ((0, 0), (0, 0), (0, cin_p - Cin), (0, 0)))
    w = (w * bn_scale.reshape(1, 1, 1, Cout)).reshape(kdim_p, Cout).astype(jnp.bfloat16)

    shift = bn_shift.reshape(1, Cout).astype(jnp.float32)

    # ---- Pallas hot path: single grid step (full arrays in VMEM, ~120 KiB working set,
    #      far under the 32 MiB default scoped VMEM on v5e/v6e/v7x). ----------------------
    out_full = pl.pallas_call(
        functools.partial(_conv_bn_act_kernel, tap_offsets=tap_offsets,
                          cin_p=cin_p, leaky_slope=leaky_slope),
        out_shape=jax.ShapeDtypeStruct((p_out, Cout), jnp.float32),
        grid_spec=pltpu.PrefetchScalarGridSpec(
            num_scalar_prefetch=0,
            grid=(1,),
            in_specs=[
                pl.BlockSpec((p_in, cin_p), lambda i: (0, 0)),     # flattened input
                pl.BlockSpec((kdim_p, Cout), lambda i: (0, 0)),    # BN-folded weight
                pl.BlockSpec((1, Cout), lambda i: (0, 0)),         # BN shift
            ],
            out_specs=pl.BlockSpec((p_out, Cout), lambda i: (0, 0)),
        ),
        compiler_params=pltpu.CompilerParams(
            dimension_semantics=("arbitrary",)),
    )(x2, w, shift)

    # ---- glue: crop the valid output window, back to NCHW ------------------------------
    out = out_full.reshape(N, Hp, Wp, Cout)
    out = out[:, : (Ho - 1) * stride + 1 : stride, : (Wo - 1) * stride + 1 : stride, :]
    return jnp.transpose(out, (0, 3, 1, 2))                                # [N,Cout,Ho,Wo]


if __name__ == "__main__":
    # Block definition: conv 3x3 stride 1, pad, 4 -> 32 channels, BN, leaky relu.
    N, Cin, H, W = 2, 4, 16, 16
    Cout, K, stride, pad = 32, 3, 1, 1
    eps = 1e-5

    key = jax.random.PRNGKey(0)
    kx, kw = jax.random.split(key)
    x = jax.random.normal(kx, (N, Cin, H, W), dtype=jnp.float32)
    # Conv weight (no conv bias since batch_normalize=1)
    w = 0.1 * jax.random.normal(kw, (Cout, Cin, K, K), dtype=jnp.float32)

    # BatchNorm2d after init_wight(): weight=1, bias=0; fresh running stats mean=0, var=1.
    gamma = jnp.ones((Cout,), jnp.float32)
    beta = jnp.zeros((Cout,), jnp.float32)
    running_mean = jnp.zeros((Cout,), jnp.float32)
    running_var = jnp.ones((Cout,), jnp.float32)
    bn_scale = gamma / jnp.sqrt(running_var + eps)
    bn_shift = beta - running_mean * bn_scale

    y = conv_bn_leaky(x, w, bn_scale, bn_shift, stride=stride, pad=pad)
    y = jax.block_until_ready(y)

    # Pure-JAX f32 reference: conv -> eval-mode BN -> LeakyReLU(0.1).
    ref = jax.lax.conv_general_dilated(
        x, w, window_strides=(stride, stride), padding=[(pad, pad), (pad, pad)],
        dimension_numbers=("NCHW", "OIHW", "NCHW"))
    ref = ref * bn_scale[None, :, None, None] + bn_shift[None, :, None, None]
    ref = jnp.where(ref > 0, ref, 0.1 * ref)

    assert y.shape == (N, Cout, H, W)
    err = float(jnp.max(jnp.abs(y - ref)))
    assert err < 5e-2, f"max abs err {err}"   # bf16 matmul operands, f32 accumulation

    print("KERNEL_OK")
</pallas_src>

<mosaic_0001>
module attributes {stable_mosaic.version = 11 : i64} {
  func.func @_conv_bn_act_kernel(%arg0: i32, %arg1: memref<688x8xbf16, #tpu.memory_space<vmem>>, %arg2: memref<72x32xbf16, #tpu.memory_space<vmem>>, %arg3: memref<1x32xf32, #tpu.memory_space<vmem>>, %arg4: memref<648x32xf32, #tpu.memory_space<vmem>>) attributes {dimension_semantics = [#tpu.dimension_semantics<arbitrary>], iteration_bounds = array<i64: 1>, scalar_prefetch = 0 : i64, scratch_operands = 0 : i64, tpu.core_type = #tpu.core_type<tc>, window_params = [{pipeline_mode = #tpu.pipeline_mode<synchronous>, transform_indices = @transform_0, window_bounds = array<i64: 688, 8>}, {pipeline_mode = #tpu.pipeline_mode<synchronous>, transform_indices = @transform_1, window_bounds = array<i64: 72, 32>}, {pipeline_mode = #tpu.pipeline_mode<synchronous>, transform_indices = @transform_2, window_bounds = array<i64: 1, 32>}, {pipeline_mode = #tpu.pipeline_mode<synchronous>, transform_indices = @transform_3, window_bounds = array<i64: 648, 32>}]} {
    %cst = arith.constant 0.000000e+00 : f32
    %0 = vector.broadcast %cst : f32 to vector<648x32xf32>
    %c0 = arith.constant 0 : index
    %c0_0 = arith.constant 0 : index
    %1 = vector.load %arg4[%c0, %c0_0] : memref<648x32xf32, #tpu.memory_space<vmem>>, vector<648x32xf32>
    tpu.vector_store %arg4[%c0, %c0_0], %0 {strides = array<i32>} : memref<648x32xf32, #tpu.memory_space<vmem>>, vector<648x32xf32>,
    %c0_1 = arith.constant 0 : index
    %c0_2 = arith.constant 0 : index
    %2 = vector.load %arg1[%c0_1, %c0_2] : memref<688x8xbf16, #tpu.memory_space<vmem>>, vector<648x8xbf16>
    %c0_3 = arith.constant 0 : index
    %c0_4 = arith.constant 0 : index
    %3 = vector.load %arg2[%c0_3, %c0_4] : memref<72x32xbf16, #tpu.memory_space<vmem>>, vector<8x32xbf16>
    %c0_5 = arith.constant 0 : index
    %c0_6 = arith.constant 0 : index
    %4 = vector.load %arg4[%c0_5, %c0_6] : memref<648x32xf32, #tpu.memory_space<vmem>>, vector<648x32xf32>
    %cst_7 = arith.constant dense<0.000000e+00> : vector<648x32xf32>
    %5 = tpu.matmul %2, %3, %cst_7 {dimension_numbers = #tpu.dot_dimension_numbers<[1], [0], [0], [1], [0, 0, 1, 1], [], []>} : vector<648x8xbf16>, vector<8x32xbf16>, vector<648x32xf32> -> vector<648x32xf32>
    %6 = arith.addf %4, %5 : vector<648x32xf32>
    %c0_8 = arith.constant 0 : index
    %c0_9 = arith.constant 0 : index
    %7 = vector.load %arg4[%c0_8, %c0_9] : memref<648x32xf32, #tpu.memory_space<vmem>>, vector<648x32xf32>
    tpu.vector_store %arg4[%c0_8, %c0_9], %6 {strides = array<i32>} : memref<648x32xf32, #tpu.memory_space<vmem>>, vector<648x32xf32>,
    %c1 = arith.constant 1 : index
    %c0_10 = arith.constant 0 : index
    %8 = vector.load %arg1[%c1, %c0_10] : memref<688x8xbf16, #tpu.memory_space<vmem>>, vector<648x8xbf16>
    %c8 = arith.constant 8 : index
    %c0_11 = arith.constant 0 : index
    %9 = vector.load %arg2[%c8, %c0_11] : memref<72x32xbf16, #tpu.memory_space<vmem>>, vector<8x32xbf16>
    %c0_12 = arith.constant 0 : index
    %c0_13 = arith.constant 0 : index
    %10 = vector.load %arg4[%c0_12, %c0_13] : memref<648x32xf32, #tpu.memory_space<vmem>>, vector<648x32xf32>
    %cst_14 = arith.constant dense<0.000000e+00> : vector<648x32xf32>
    %11 = tpu.matmul %8, %9, %cst_14 {dimension_numbers = #tpu.dot_dimension_numbers<[1], [0], [0], [1], [0, 0, 1, 1], [], []>} : vector<648x8xbf16>, vector<8x32xbf16>, vector<648x32xf32> -> vector<648x32xf32>
    %12 = arith.addf %10, %11 : vector<648x32xf32>
    %c0_15 = arith.constant 0 : index
    %c0_16 = arith.constant 0 : index
    %13 = vector.load %arg4[%c0_15, %c0_16] : memref<648x32xf32, #tpu.memory_space<vmem>>, vector<648x32xf32>
    tpu.vector_store %arg4[%c0_15, %c0_16], %12 {strides = array<i32>} : memref<648x32xf32, #tpu.memory_space<vmem>>, vector<648x32xf32>,
    %c2 = arith.constant 2 : index
    %c0_17 = arith.constant 0 : index
    %14 = vector.load %arg1[%c2, %c0_17] : memref<688x8xbf16, #tpu.memory_space<vmem>>, vector<648x8xbf16>
    %c16 = arith.constant 16 : index
    %c0_18 = arith.constant 0 : index
    %15 = vector.load %arg2[%c16, %c0_18] : memref<72x32xbf16, #tpu.memory_space<vmem>>, vector<8x32xbf16>
    %c0_19 = arith.constant 0 : index
    %c0_20 = arith.constant 0 : index
    %16 = vector.load %arg4[%c0_19, %c0_20] : memref<648x32xf32, #tpu.memory_space<vmem>>, vector<648x32xf32>
    %cst_21 = arith.constant dense<0.000000e+00> : vector<648x32xf32>
    %17 = tpu.matmul %14, %15, %cst_21 {dimension_numbers = #tpu.dot_dimension_numbers<[1], [0], [0], [1], [0, 0, 1, 1], [], []>} : vector<648x8xbf16>, vector<8x32xbf16>, vector<648x32xf32> -> vector<648x32xf32>
    %18 = arith.addf %16, %17 : vector<648x32xf32>
    %c0_22 = arith.constant 0 : index
    %c0_23 = arith.constant 0 : index
    %19 = vector.load %arg4[%c0_22, %c0_23] : memref<648x32xf32, #tpu.memory_space<vmem>>, vector<648x32xf32>
    tpu.vector_store %arg4[%c0_22, %c0_23], %18 {strides = array<i32>} : memref<648x32xf32, #tpu.memory_space<vmem>>, vector<648x32xf32>,
    %c18 = arith.constant 18 : index
    %c0_24 = arith.constant 0 : index
    %20 = vector.load %arg1[%c18, %c0_24] : memref<688x8xbf16, #tpu.memory_space<vmem>>, vector<648x8xbf16>
    %c24 = arith.constant 24 : index
    %c0_25 = arith.constant 0 : index
    %21 = vector.load %arg2[%c24, %c0_25] : memref<72x32xbf16, #tpu.memory_space<vmem>>, vector<8x32xbf16>
    %c0_26 = arith.constant 0 : index
    %c0_27 = arith.constant 0 : index
    %22 = vector.load %arg4[%c0_26, %c0_27] : memref<648x32xf32, #tpu.memory_space<vmem>>, vector<648x32xf32>
    %cst_28 = arith.constant dense<0.000000e+00> : vector<648x32xf32>
    %23 = tpu.matmul %20, %21, %cst_28 {dimension_numbers = #tpu.dot_dimension_numbers<[1], [0], [0], [1], [0, 0, 1, 1], [], []>} : vector<648x8xbf16>, vector<8x32xbf16>, vector<648x32xf32> -> vector<648x32xf32>
    %24 = arith.addf %22, %23 : vector<648x32xf32>
    %c0_29 = arith.constant 0 : index
    %c0_30 = arith.constant 0 : index
    %25 = vector.load %arg4[%c0_29, %c0_30] : memref<648x32xf32, #tpu.memory_space<vmem>>, vector<648x32xf32>
    tpu.vector_store %arg4[%c0_29, %c0_30], %24 {strides = array<i32>} : memref<648x32xf32, #tpu.memory_space<vmem>>, vector<648x32xf32>,
    %c19 = arith.constant 19 : index
    %c0_31 = arith.constant 0 : index
    %26 = vector.load %arg1[%c19, %c0_31] : memref<688x8xbf16, #tpu.memory_space<vmem>>, vector<648x8xbf16>
    %c32 = arith.constant 32 : index
    %c0_32 = arith.constant 0 : index
    %27 = vector.load %arg2[%c32, %c0_32] : memref<72x32xbf16, #tpu.memory_space<vmem>>, vector<8x32xbf16>
    %c0_33 = arith.constant 0 : index
    %c0_34 = arith.constant 0 : index
    %28 = vector.load %arg4[%c0_33, %c0_34] : memref<648x32xf32, #tpu.memory_space<vmem>>, vector<648x32xf32>
    %cst_35 = arith.constant dense<0.000000e+00> : vector<648x32xf32>
    %29 = tpu.matmul %26, %27, %cst_35 {dimension_numbers = #tpu.dot_dimension_numbers<[1], [0], [0], [1], [0, 0, 1, 1], [], []>} : vector<648x8xbf16>, vector<8x32xbf16>, vector<648x32xf32> -> vector<648x32xf32>
    %30 = arith.addf %28, %29 : vector<648x32xf32>
    %c0_36 = arith.constant 0 : index
    %c0_37 = arith.constant 0 : index
    %31 = vector.load %arg4[%c0_36, %c0_37] : memref<648x32xf32, #tpu.memory_space<vmem>>, vector<648x32xf32>
    tpu.vector_store %arg4[%c0_36, %c0_37], %30 {strides = array<i32>} : memref<648x32xf32, #tpu.memory_space<vmem>>, vector<648x32xf32>,
    %c20 = arith.constant 20 : index
    %c0_38 = arith.constant 0 : index
    %32 = vector.load %arg1[%c20, %c0_38] : memref<688x8xbf16, #tpu.memory_space<vmem>>, vector<648x8xbf16>
    %c40 = arith.constant 40 : index
    %c0_39 = arith.constant 0 : index
    %33 = vector.load %arg2[%c40, %c0_39] : memref<72x32xbf16, #tpu.memory_space<vmem>>, vector<8x32xbf16>
    %c0_40 = arith.constant 0 : index
    %c0_41 = arith.constant 0 : index
    %34 = vector.load %arg4[%c0_40, %c0_41] : memref<648x32xf32, #tpu.memory_space<vmem>>, vector<648x32xf32>
    %cst_42 = arith.constant dense<0.000000e+00> : vector<648x32xf32>
    %35 = tpu.matmul %32, %33, %cst_42 {dimension_numbers = #tpu.dot_dimension_numbers<[1], [0], [0], [1], [0, 0, 1, 1], [], []>} : vector<648x8xbf16>, vector<8x32xbf16>, vector<648x32xf32> -> vector<648x32xf32>
    %36 = arith.addf %34, %35 : vector<648x32xf32>
    %c0_43 = arith.constant 0 : index
    %c0_44 = arith.constant 0 : index
    %37 = vector.load %arg4[%c0_43, %c0_44] : memref<648x32xf32, #tpu.memory_space<vmem>>, vector<648x32xf32>
    tpu.vector_store %arg4[%c0_43, %c0_44], %36 {strides = array<i32>} : memref<648x32xf32, #tpu.memory_space<vmem>>, vector<648x32xf32>,
    %c36 = arith.constant 36 : index
    %c0_45 = arith.constant 0 : index
    %38 = vector.load %arg1[%c36, %c0_45] : memref<688x8xbf16, #tpu.memory_space<vmem>>, vector<648x8xbf16>
    %c48 = arith.constant 48 : index
    %c0_46 = arith.constant 0 : index
    %39 = vector.load %arg2[%c48, %c0_46] : memref<72x32xbf16, #tpu.memory_space<vmem>>, vector<8x32xbf16>
    %c0_47 = arith.constant 0 : index
    %c0_48 = arith.constant 0 : index
    %40 = vector.load %arg4[%c0_47, %c0_48] : memref<648x32xf32, #tpu.memory_space<vmem>>, vector<648x32xf32>
    %cst_49 = arith.constant dense<0.000000e+00> : vector<648x32xf32>
    %41 = tpu.matmul %38, %39, %cst_49 {dimension_numbers = #tpu.dot_dimension_numbers<[1], [0], [0], [1], [0, 0, 1, 1], [], []>} : vector<648x8xbf16>, vector<8x32xbf16>, vector<648x32xf32> -> vector<648x32xf32>
    %42 = arith.addf %40, %41 : vector<648x32xf32>
    %c0_50 = arith.constant 0 : index
    %c0_51 = arith.constant 0 : index
    %43 = vector.load %arg4[%c0_50, %c0_51] : memref<648x32xf32, #tpu.memory_space<vmem>>, vector<648x32xf32>
    tpu.vector_store %arg4[%c0_50, %c0_51], %42 {strides = array<i32>} : memref<648x32xf32, #tpu.memory_space<vmem>>, vector<648x32xf32>,
    %c37 = arith.constant 37 : index
    %c0_52 = arith.constant 0 : index
    %44 = vector.load %arg1[%c37, %c0_52] : memref<688x8xbf16, #tpu.memory_space<vmem>>, vector<648x8xbf16>
    %c56 = arith.constant 56 : index
    %c0_53 = arith.constant 0 : index
    %45 = vector.load %arg2[%c56, %c0_53] : memref<72x32xbf16, #tpu.memory_space<vmem>>, vector<8x32xbf16>
    %c0_54 = arith.constant 0 : index
    %c0_55 = arith.constant 0 : index
    %46 = vector.load %arg4[%c0_54, %c0_55] : memref<648x32xf32, #tpu.memory_space<vmem>>, vector<648x32xf32>
    %cst_56 = arith.constant dense<0.000000e+00> : vector<648x32xf32>
    %47 = tpu.matmul %44, %45, %cst_56 {dimension_numbers = #tpu.dot_dimension_numbers<[1], [0], [0], [1], [0, 0, 1, 1], [], []>} : vector<648x8xbf16>, vector<8x32xbf16>, vector<648x32xf32> -> vector<648x32xf32>
    %48 = arith.addf %46, %47 : vector<648x32xf32>
    %c0_57 = arith.constant 0 : index
    %c0_58 = arith.constant 0 : index
    %49 = vector.load %arg4[%c0_57, %c0_58] : memref<648x32xf32, #tpu.memory_space<vmem>>, vector<648x32xf32>
    tpu.vector_store %arg4[%c0_57, %c0_58], %48 {strides = array<i32>} : memref<648x32xf32, #tpu.memory_space<vmem>>, vector<648x32xf32>,
    %c38 = arith.constant 38 : index
    %c0_59 = arith.constant 0 : index
    %50 = vector.load %arg1[%c38, %c0_59] : memref<688x8xbf16, #tpu.memory_space<vmem>>, vector<648x8xbf16>
    %c64 = arith.constant 64 : index
    %c0_60 = arith.constant 0 : index
    %51 = vector.load %arg2[%c64, %c0_60] : memref<72x32xbf16, #tpu.memory_space<vmem>>, vector<8x32xbf16>
    %c0_61 = arith.constant 0 : index
    %c0_62 = arith.constant 0 : index
    %52 = vector.load %arg4[%c0_61, %c0_62] : memref<648x32xf32, #tpu.memory_space<vmem>>, vector<648x32xf32>
    %cst_63 = arith.constant dense<0.000000e+00> : vector<648x32xf32>
    %53 = tpu.matmul %50, %51, %cst_63 {dimension_numbers = #tpu.dot_dimension_numbers<[1], [0], [0], [1], [0, 0, 1, 1], [], []>} : vector<648x8xbf16>, vector<8x32xbf16>, vector<648x32xf32> -> vector<648x32xf32>
    %54 = arith.addf %52, %53 : vector<648x32xf32>
    %c0_64 = arith.constant 0 : index
    %c0_65 = arith.constant 0 : index
    %55 = vector.load %arg4[%c0_64, %c0_65] : memref<648x32xf32, #tpu.memory_space<vmem>>, vector<648x32xf32>
    tpu.vector_store %arg4[%c0_64, %c0_65], %54 {strides = array<i32>} : memref<648x32xf32, #tpu.memory_space<vmem>>, vector<648x32xf32>,
    %c0_66 = arith.constant 0 : index
    %c0_67 = arith.constant 0 : index
    %56 = vector.load %arg4[%c0_66, %c0_67] : memref<648x32xf32, #tpu.memory_space<vmem>>, vector<648x32xf32>
    %c0_68 = arith.constant 0 : index
    %c0_69 = arith.constant 0 : index
    %57 = vector.load %arg3[%c0_68, %c0_69] : memref<1x32xf32, #tpu.memory_space<vmem>>, vector<1x32xf32>
    %58 = vector.broadcast %57 : vector<1x32xf32> to vector<648x32xf32>
    %59 = arith.addf %56, %58 : vector<648x32xf32>
    %cst_70 = arith.constant 0.000000e+00 : f32
    %60 = vector.broadcast %cst_70 : f32 to vector<648x32xf32>
    %61 = arith.cmpf ogt, %59, %60 : vector<648x32xf32>
    %cst_71 = arith.constant 1.000000e-01 : f32
    %62 = vector.broadcast %cst_71 : f32 to vector<648x32xf32>
    %63 = arith.mulf %62, %59 : vector<648x32xf32>
    %64 = arith.select %61, %59, %63 : vector<648x32xi1>, vector<648x32xf32>
    %c0_72 = arith.constant 0 : index
    %c0_73 = arith.constant 0 : index
    %65 = vector.load %arg4[%c0_72, %c0_73] : memref<648x32xf32, #tpu.memory_space<vmem>>, vector<648x32xf32>
    tpu.vector_store %arg4[%c0_72, %c0_73], %64 {strides = array<i32>} : memref<648x32xf32, #tpu.memory_space<vmem>>, vector<648x32xf32>,
    return
  }
  func.func @transform_0(%arg0: i32) -> (i32, i32) {
    %c0_i32 = arith.constant 0 : i32
    %c0_i32_0 = arith.constant 0 : i32
    %c0_i32_1 = arith.constant 0 : i32
    return %c0_i32, %c0_i32_0 : i32, i32
  }
  func.func @transform_1(%arg0: i32) -> (i32, i32) {
    %c0_i32 = arith.constant 0 : i32
    %c0_i32_0 = arith.constant 0 : i32
    %c0_i32_1 = arith.constant 0 : i32
    return %c0_i32, %c0_i32_0 : i32, i32
  }
  func.func @transform_2(%arg0: i32) -> (i32, i32) {
    %c0_i32 = arith.constant 0 : i32
    %c0_i32_0 = arith.constant 0 : i32
    %c0_i32_1 = arith.constant 0 : i32
    return %c0_i32, %c0_i32_0 : i32, i32
  }
  func.func @transform_3(%arg0: i32) -> (i32, i32) {
    %c0_i32 = arith.constant 0 : i32
    %c0_i32_0 = arith.constant 0 : i32
    %c0_i32_1 = arith.constant 0 : i32
    return %c0_i32, %c0_i32_0 : i32, i32
  }
}

</mosaic_0001>

<bundles_post_ra>
// kernel: conv_bn_leaky.1
= control target key start
LH: loop header
LB: loop body
LE: loop exit
PB: predicated region body
PF: predicated region fallthrough
CT: control target
= control target key end

     0   :  { %vm587_vm0 = vcmask 1043456   ;;  %v14206_v0 = vmov 0.0   ;;  %vm14207_vm1 = vmmov 0   ;;  %vm463_vm2 = vcmask 64512   ;;  %s23519_s1 = inlined_call_operand.vmem [shape: bf16[72,32], index: 1, kind: input, shape index: {}]   ;;  %s23520_s0 = inlined_call_operand.vmem [shape: bf16[688,8], index: 0, kind: input, shape index: {}]   ;;  %s23521_s3 = inlined_call_operand.vmem [shape: f32[648,32], index: 3, kind: output, shape index: {}]   ;;  %s23522_s2 = inlined_call_operand.vmem [shape: f32[1,32], index: 2, kind: input, shape index: {}]  }
   0x1   :  { %12337 = vmatprep.subr.bf16.mxu0 %v14206_v0  ;;  %13831 = vmatprep.subr.bf16.mxu1 %v14206_v0  ;;  %v178_v1 = vld [vmem:[%s23519_s1] sm:$0xf]  ;;  %v13836_v4 = vld [vmem:[%s23520_s0 + $0xa8] sm:$0xff]   ;;  %v1195_v5 = vld [vmem:[%s23519_s1 + $0x4] sm:$0xf]  ;;  %vm15_vm3 = vcmask 261120  }
   0x2   :  { %v589_v2 = vsel %vm587_vm0, %v178_v1, 0  ;;  %12339 = vmatprep.mubr.msk.bf16.mxu0 %vm14207_vm1, %v14206_v0  ;;  %12423 = vmatprep.mubr.msk.bf16.mxu1 %vm14207_vm1, %v14206_v0  ;;  %v13835_v3 = vld [vmem:[%s23520_s0] sm:$0xff]   ;;  %v2540_v6 = vld [vmem:[%s23519_s1 + $0x8] sm:$0xf]  ;;  %v1934_v7 = vsel %vm587_vm0, %v1195_v5, 0  ;;  %v13838_v10 = vld [vmem:[%s23520_s0 + $0xb0] sm:$0xff]  }
   0x3   :  { %12338 = vmatpush3.bf16.msra.mxu0 %v589_v2  ;;  %13832 = vmatpush3.bf16.msra.mxu1 %v589_v2  ;;  %v3033_v8 = vsel %vm587_vm0, %v2540_v6, 0  ;;  %v13837_v9 = vld [vmem:[%s23520_s0 + $0x8] sm:$0xff]   ;;  %v13839_v11 = vld [vmem:[%s23520_s0 + $0x10] sm:$0xff]   ;;  %v13840_v12 = vld [vmem:[%s23520_s0 + $0xb8] sm:$0xff]   ;;  %16 = vst.msk [vmem:[%s23521_s3] sm:$0xff] %vm15_vm3, %v14206_v0  ;;  %vm2827_vm5 = vcmask 1046528  }
   0x4   :  { %12503 = vmatprep.subr.bf16.mxu1 %v14206_v0  ;;  %12669 = vmatprep.subr.bf16.mxu0 %v14206_v0  ;;  %v13841_v13 = vld [vmem:[%s23520_s0 + $0x18] sm:$0xff]   ;;  %v13842_v14 = vld [vmem:[%s23520_s0 + $0xc0] sm:$0xff]   ;;  %v13844_v16 = vld [vmem:[%s23520_s0 + $0xc8] sm:$0xff]   ;;  %17 = vst.msk [vmem:[%s23521_s3 + $0x8] sm:$0xff] %vm15_vm3, %v14206_v0  ;;  %vm1482_vm4 = vsmask.f32 7424 }
   0x5   :  { %v13843_v15 = vld [vmem:[%s23520_s0 + $0x20] sm:$0xff]   ;;  %v13845_v17 = vld [vmem:[%s23520_s0 + $0x28] sm:$0xff]   ;;  %v13846_v18 = vld [vmem:[%s23520_s0 + $0xd0] sm:$0xff]   ;;  %18 = vst.msk [vmem:[%s23521_s3 + $0x10] sm:$0xff] %vm15_vm3, %v14206_v0  ;;  %vm5024_vm6 = vsmask.f32 6400 }
   0x6   :  { %12340 = vmatmul.mubr.msk.bf16.vlgmr.msra.gmra.mxu0 %vm463_vm2, %v13835_v3  ;;  %12424 = vmatmul.mubr.msk.bf16.vlgmr.msra.gmra.mxu1 %vm463_vm2, %v13836_v4  ;;  %v13847_v19 = vld [vmem:[%s23520_s0 + $0x30] sm:$0xff]   ;;  %v13848_v20 = vld [vmem:[%s23520_s0 + $0xd8] sm:$0xff]   ;;  %v13850_v22 = vld [vmem:[%s23520_s0 + $0xe0] sm:$0xff]   ;;  %19 = vst.msk [vmem:[%s23521_s3 + $0x18] sm:$0xff] %vm15_vm3, %v14206_v0  ;;  %vm6410_vm7 = vcmask 1045504   ;;  %vm9993_vm9 = vcmask 1044480  }
   0x7   :  { %12504 = vmatpush3.bf16.msra.mxu1 %v1934_v7  ;;  %12670 = vmatpush3.bf16.msra.mxu0 %v3033_v8  ;;  %v13849_v21 = vld [vmem:[%s23520_s0 + $0x38] sm:$0xff]   ;;  %20 = vst.msk [vmem:[%s23521_s3 + $0x20] sm:$0xff] %vm15_vm3, %v14206_v0  ;;  %21 = vst.msk [vmem:[%s23521_s3 + $0x28] sm:$0xff] %vm15_vm3, %v14206_v0  ;;  %v13851_v23 = vld [vmem:[%s23520_s0 + $0x40] sm:$0xff]   ;;  %vm8607_vm8 = vsmask.f32 5376 }
   0x8   :  { %12343 = vmatprep.mubr.msk.bf16.mxu0 %vm14207_vm1, %v14206_v0  ;;  %12427 = vmatprep.mubr.msk.bf16.mxu1 %vm14207_vm1, %v14206_v0  ;;  %22 = vst.msk [vmem:[%s23521_s3 + $0x30] sm:$0xff] %vm15_vm3, %v14206_v0  ;;  %23 = vst.msk [vmem:[%s23521_s3 + $0x38] sm:$0xff] %vm15_vm3, %v14206_v0  ;;  %v13852_v24 = vld [vmem:[%s23520_s0 + $0xe8] sm:$0xff]   ;;  %v13854_v26 = vld [vmem:[%s23520_s0 + $0xf0] sm:$0xff]  }
   0x9   :  { %12835 = vmatprep.subr.bf16.mxu1 %v14206_v0  ;;  %13001 = vmatprep.subr.bf16.mxu0 %v14206_v0  ;;  %24 = vst.msk [vmem:[%s23521_s3 + $0x40] sm:$0xff] %vm15_vm3, %v14206_v0  ;;  %25 = vst.msk [vmem:[%s23521_s3 + $0x48] sm:$0xff] %vm15_vm3, %v14206_v0  ;;  %v13853_v25 = vld [vmem:[%s23520_s0 + $0x48] sm:$0xff]   ;;  %v13855_v27 = vld [vmem:[%s23520_s0 + $0x50] sm:$0xff]  }
   0xa   :  { %26 = vst.msk [vmem:[%s23521_s3 + $0x50] sm:$0xff] %vm15_vm3, %v14206_v0  ;;  %27 = vst.msk [vmem:[%s23521_s3 + $0x58] sm:$0xff] %vm15_vm3, %v14206_v0  ;;  %v13856_v28 = vld [vmem:[%s23520_s0 + $0xf8] sm:$0xff]   ;;  %v13858_v30 = vld [vmem:[%s23520_s0 + $0x100] sm:$0xff]  }
   0xb   :  { %28 = vst.msk [vmem:[%s23521_s3 + $0x60] sm:$0xff] %vm15_vm3, %v14206_v0  ;;  %29 = vst.msk [vmem:[%s23521_s3 + $0x68] sm:$0xff] %vm15_vm3, %v14206_v0  ;;  %v13857_v29 = vld [vmem:[%s23520_s0 + $0x58] sm:$0xff]   ;;  %v13859_v31 = vld [vmem:[%s23520_s0 + $0x60] sm:$0xff]  }
   0xc   :  { %30 = vst.msk [vmem:[%s23521_s3 + $0x70] sm:$0xff] %vm15_vm3, %v14206_v0  ;;  %31 = vst.msk [vmem:[%s23521_s3 + $0x78] sm:$0xff] %vm15_vm3, %v14206_v0  ;;  %v13860_v32 = vld [vmem:[%s23520_s0 + $0x108] sm:$0xff]   ;;  %v13862_v34 = vld [vmem:[%s23520_s0 + $0x110] sm:$0xff]  }
   0xd   :  { %32 = vst.msk [vmem:[%s23521_s3 + $0x80] sm:$0xff] %vm15_vm3, %v14206_v0  ;;  %33 = vst.msk [vmem:[%s23521_s3 + $0x88] sm:$0xff] %vm15_vm3, %v14206_v0  ;;  %v13861_v33 = vld [vmem:[%s23520_s0 + $0x68] sm:$0xff]   ;;  %v13863_v35 = vld [vmem:[%s23520_s0 + $0x70] sm:$0xff]  }
   0xe   :  { %12344 = vmatmul.mubr.msk.bf16.gmra.mxu0 %vm463_vm2, %v13837_v9  ;;  %12428 = vmatmul.mubr.msk.bf16.gmra.mxu1 %vm463_vm2, %v13838_v10  ;;  %34 = vst.msk [vmem:[%s23521_s3 + $0x90] sm:$0xff] %vm15_vm3, %v14206_v0  ;;  %35 = vst.msk [vmem:[%s23521_s3 + $0x98] sm:$0xff] %vm15_vm3, %v14206_v0  ;;  %v13864_v36 = vld [vmem:[%s23520_s0 + $0x118] sm:$0xff]   ;;  %v13866_v38 = vld [vmem:[%s23520_s0 + $0x120] sm:$0xff]  }
   0xf   :  { %12347 = vmatprep.mubr.msk.bf16.mxu0 %vm14207_vm1, %v14206_v0  ;;  %12431 = vmatprep.mubr.msk.bf16.mxu1 %vm14207_vm1, %v14206_v0  ;;  %36 = vst.msk [vmem:[%s23521_s3 + $0xa0] sm:$0xff] %vm15_vm3, %v14206_v0  ;;  %37 = vst.msk [vmem:[%s23521_s3 + $0xa8] sm:$0xff] %vm15_vm3, %v14206_v0  ;;  %v13865_v37 = vld [vmem:[%s23520_s0 + $0x78] sm:$0xff]   ;;  %v13867_v39 = vld [vmem:[%s23520_s0 + $0x80] sm:$0xff]  }
  0x10   :  { %38 = vst.msk [vmem:[%s23521_s3 + $0xb0] sm:$0xff] %vm15_vm3, %v14206_v0  ;;  %39 = vst.msk [vmem:[%s23521_s3 + $0xb8] sm:$0xff] %vm15_vm3, %v14206_v0  ;;  %v13868_v40 = vld [vmem:[%s23520_s0 + $0x128] sm:$0xff]   ;;  %v13870_v42 = vld [vmem:[%s23520_s0 + $0x130] sm:$0xff]  }
  0x11   :  { %40 = vst.msk [vmem:[%s23521_s3 + $0xc0] sm:$0xff] %vm15_vm3, %v14206_v0  ;;  %41 = vst.msk [vmem:[%s23521_s3 + $0xc8] sm:$0xff] %vm15_vm3, %v14206_v0  ;;  %v13869_v41 = vld [vmem:[%s23520_s0 + $0x88] sm:$0xff]   ;;  %v13871_v43 = vld [vmem:[%s23520_s0 + $0x90] sm:$0xff]  }
  0x12   :  { %42 = vst.msk [vmem:[%s23521_s3 + $0xd0] sm:$0xff] %vm15_vm3, %v14206_v0  ;;  %43 = vst.msk [vmem:[%s23521_s3 + $0xd8] sm:$0xff] %vm15_vm3, %v14206_v0  ;;  %v13872_v44 = vld [vmem:[%s23520_s0 + $0x138] sm:$0xff]   ;;  %v13876_v45 = vld [vmem:[%s23520_s0] sm:$0xff]  }
  0x13   :  { %44 = vst.msk [vmem:[%s23521_s3 + $0xe0] sm:$0xff] %vm15_vm3, %v14206_v0  ;;  %45 = vst.msk [vmem:[%s23521_s3 + $0xe8] sm:$0xff] %vm15_vm3, %v14206_v0  ;;  %v13877_v46 = vld [vmem:[%s23520_s0 + $0x8] sm:$0xff]   ;;  %v1486_v47 = vshll.u32 %v13876_v45, 16  ;;  %v13874_v48 = vld [vmem:[%s23520_s0 + $0x140] ss:$0 sps:$4 sm:$0xff]  }
  0x14   :  { %46 = vst.msk [vmem:[%s23521_s3 + $0xf0] sm:$0xff] %vm15_vm3, %v14206_v0  ;;  %47 = vst.msk [vmem:[%s23521_s3 + $0xf8] sm:$0xff] %vm15_vm3, %v14206_v0  ;;  %v13873_v49 = vld [vmem:[%s23520_s0 + $0x98] sm:$0xff]   ;;  %v1484_v50 = vshrl.u32 %v13876_v45, 16  ;;  %v1491_v52 = vshll.u32 %v13877_v46, 16  ;;  %v13878_v54 = vld [vmem:[%s23520_s0 + $0x10] sm:$0xff]  }
  0x15   :  { %48 = vst.msk [vmem:[%s23521_s3 + $0x100] sm:$0xff] %vm15_vm3, %v14206_v0  ;;  %49 = vst.msk [vmem:[%s23521_s3 + $0x108] sm:$0xff] %vm15_vm3, %v14206_v0  ;;  %v1488_v51 = vrot.slane %v1486_v47, 1  ;;  %v3639_v53 = vld [vmem:[%s23519_s1 + $0xc] sm:$0xf]  ;;  %v13875_v57 = vld [vmem:[%s23520_s0 + $0xa0] sm:$0xff]  }
  0x16   :  { %12348 = vmatmul.mubr.msk.bf16.gmra.mxu0 %vm463_vm2, %v13839_v11  ;;  %12432 = vmatmul.mubr.msk.bf16.gmra.mxu1 %vm463_vm2, %v13840_v12  ;;  %50 = vst.msk [vmem:[%s23521_s3 + $0x110] sm:$0xff] %vm15_vm3, %v14206_v0  ;;  %51 = vst.msk [vmem:[%s23521_s3 + $0x118] sm:$0xff] %vm15_vm3, %v14206_v0  ;;  %v1493_v56 = vrot.slane %v1491_v52, 1  ;;  %v4131_v58 = vsel %vm587_vm0, %v3639_v53, 0  ;;  %v1495_v59 = vshrl.u32 %v13877_v46, 16  ;;  %v13880_v60 = vld [vmem:[%s23520_s0 + $0x8] sm:$0xff]  }
  0x17   :  { %12351 = vmatprep.mubr.msk.bf16.mxu0 %vm14207_vm1, %v14206_v0  ;;  %12435 = vmatprep.mubr.msk.bf16.mxu1 %vm14207_vm1, %v14206_v0  ;;  %52 = vst.msk [vmem:[%s23521_s3 + $0x120] sm:$0xff] %vm15_vm3, %v14206_v0  ;;  %53 = vst.msk [vmem:[%s23521_s3 + $0x128] sm:$0xff] %vm15_vm3, %v14206_v0  ;;  %v1489_v55 = vor.u32 %v1488_v51, %v1484_v50  ;;  %v1499_v61 = vshll.u32 %v13878_v54, 16  ;;  %v13879_v63 = vld [vmem:[%s23520_s0] sm:$0xfe]   ;;  %v2829_v3 = vrot.slane %v13880_v60, 1 }
  0x18   :  { %54 = vst.msk [vmem:[%s23521_s3 + $0x130] sm:$0xff] %vm15_vm3, %v14206_v0  ;;  %55 = vst.msk [vmem:[%s23521_s3 + $0x138] sm:$0xff] %vm15_vm3, %v14206_v0  ;;  %v4737_v1 = vld [vmem:[%s23519_s1 + $0x10] sm:$0xf]  ;;  %v1497_v4 = vor.u32 %v1495_v59, %v1493_v56  ;;  %v2828_v5 = vrot.slane %v13879_v63, 1  ;;  %v13881_v6 = vld [vmem:[%s23520_s0 + $0x18] sm:$0xff]  }
  0x19   :  { %56 = vst.msk [vmem:[%s23521_s3 + $0x140] sm:$0xff] %vm15_vm3, %v14206_v0  ;;  %57 = vst.msk [vmem:[%s23521_s3 + $0x148] sm:$0xff] %vm15_vm3, %v14206_v0  ;;  %v1494_v62 = vsel %vm1482_vm4, %v1489_v55, %v1493_v56  ;;  %v1501_v2 = vrot.slane %v1499_v61, 1  ;;  %v5517_v7 = vsel %vm587_vm0, %v4737_v1, 0  ;;  %v1503_v8 = vshrl.u32 %v13878_v54, 16  ;;  %v13882_v12 = vld [vmem:[%s23520_s0 + $0x10] sm:$0xff]  }
  0x1a   :  { %58 = vst.msk [vmem:[%s23521_s3 + $0x150] sm:$0xff] %vm15_vm3, %v14206_v0  ;;  %59 = vst.msk [vmem:[%s23521_s3 + $0x158] sm:$0xff] %vm15_vm3, %v14206_v0  ;;  %v2830_v10 = vsel %vm2827_vm5, %v2828_v5, %v2829_v3  ;;  %v1507_v11 = vshll.u32 %v13881_v6, 16  ;;  %v13889_v51 = vld [vmem:[%s23520_s0 + $0x38] sm:$0xff]   ;;  %v181_v56 = vld [vmem:[%s23521_s3 + $0x10] sm:$0xff] }
  0x1b   :  { %60 = vst.msk [vmem:[%s23521_s3 + $0x160] sm:$0xff] %vm15_vm3, %v14206_v0  ;;  %61 = vst.msk [vmem:[%s23521_s3 + $0x168] sm:$0xff] %vm15_vm3, %v14206_v0  ;;  %v1502_v9 = vsel %vm1482_vm4, %v1497_v4, %v1501_v2  ;;  %v15017_v63 = vld [vmem:[%s23520_s0 + $0x30] sm:$0xff]  }
  0x1c   :  { %62 = vst.msk [vmem:[%s23521_s3 + $0x170] sm:$0xff] %vm15_vm3, %v14206_v0  ;;  %63 = vst.msk [vmem:[%s23521_s3 + $0x178] sm:$0xff] %vm15_vm3, %v14206_v0 }
  0x1d   :  { %64 = vst.msk [vmem:[%s23521_s3 + $0x180] sm:$0xff] %vm15_vm3, %v14206_v0  ;;  %65 = vst.msk [vmem:[%s23521_s3 + $0x188] sm:$0xff] %vm15_vm3, %v14206_v0 }
  0x1e   :  { %12352 = vmatmul.mubr.msk.bf16.gmra.mxu0 %vm463_vm2, %v13841_v13  ;;  %12436 = vmatmul.mubr.msk.bf16.gmra.mxu1 %vm463_vm2, %v13842_v14  ;;  %66 = vst.msk [vmem:[%s23521_s3 + $0x190] sm:$0xff] %vm15_vm3, %v14206_v0  ;;  %67 = vst.msk [vmem:[%s23521_s3 + $0x198] sm:$0xff] %vm15_vm3, %v14206_v0  ;;  %v13883_v13 = vld [vmem:[%s23520_s0 + $0x20] sm:$0xff]   ;;  %v1505_v14 = vor.u32 %v1503_v8, %v1501_v2 }
  0x1f   :  { %12355 = vmatprep.mubr.msk.bf16.mxu0 %vm14207_vm1, %v14206_v0  ;;  %12439 = vmatprep.mubr.msk.bf16.mxu1 %vm14207_vm1, %v14206_v0  ;;  %68 = vst.msk [vmem:[%s23521_s3 + $0x1a0] sm:$0xff] %vm15_vm3, %v14206_v0  ;;  %69 = vst.msk [vmem:[%s23521_s3 + $0x1a8] sm:$0xff] %vm15_vm3, %v14206_v0 }
  0x20   :  { %70 = vst.msk [vmem:[%s23521_s3 + $0x1b0] sm:$0xff] %vm15_vm3, %v14206_v0  ;;  %71 = vst.msk [vmem:[%s23521_s3 + $0x1b8] sm:$0xff] %vm15_vm3, %v14206_v0 }
  0x21   :  { %72 = vst.msk [vmem:[%s23521_s3 + $0x1c0] sm:$0xff] %vm15_vm3, %v14206_v0  ;;  %73 = vst.msk [vmem:[%s23521_s3 + $0x1c8] sm:$0xff] %vm15_vm3, %v14206_v0  ;;  %v222_v45 = vld [vmem:[%s23521_s3 + $0x158] sm:$0xff] }
  0x22   :  { %74 = vst.msk [vmem:[%s23521_s3 + $0x1d0] sm:$0xff] %vm15_vm3, %v14206_v0  ;;  %75 = vst.msk [vmem:[%s23521_s3 + $0x1d8] sm:$0xff] %vm15_vm3, %v14206_v0 }
  0x23   :  { %76 = vst.msk [vmem:[%s23521_s3 + $0x1e0] sm:$0xff] %vm15_vm3, %v14206_v0  ;;  %77 = vst.msk [vmem:[%s23521_s3 + $0x1e8] sm:$0xff] %vm15_vm3, %v14206_v0 }
  0x24   :  { %78 = vst.msk [vmem:[%s23521_s3 + $0x1f0] sm:$0xff] %vm15_vm3, %v14206_v0  ;;  %79 = vst.msk [vmem:[%s23521_s3 + $0x1f8] sm:$0xff] %vm15_vm3, %v14206_v0 }
  0x25   :  { %80 = vst.msk [vmem:[%s23521_s3 + $0x200] sm:$0xff] %vm15_vm3, %v14206_v0  ;;  %81 = vst.msk [vmem:[%s23521_s3 + $0x208] sm:$0xff] %vm15_vm3, %v14206_v0 }
  0x26   :  { %12356 = vmatmul.mubr.msk.bf16.gmra.mxu0 %vm463_vm2, %v13843_v15  ;;  %12440 = vmatmul.mubr.msk.bf16.gmra.mxu1 %vm463_vm2, %v13844_v16  ;;  %82 = vst.msk [vmem:[%s23521_s3 + $0x210] sm:$0xff] %vm15_vm3, %v14206_v0  ;;  %83 = vst.msk [vmem:[%s23521_s3 + $0x218] sm:$0xff] %vm15_vm3, %v14206_v0  ;;  %v1509_v15 = vrot.slane %v1507_v11, 1  ;;  %v2831_v16 = vrot.slane %v13882_v12, 1  ;;  %v2839_v11 = vrot.slane %v15017_v63, 1 }
  0x27   :  { %12359 = vmatprep.mubr.msk.bf16.mxu0 %vm14207_vm1, %v14206_v0  ;;  %12443 = vmatprep.mubr.msk.bf16.mxu1 %vm14207_vm1, %v14206_v0  ;;  %84 = vst.msk [vmem:[%s23521_s3 + $0x220] sm:$0xff] %vm15_vm3, %v14206_v0  ;;  %85 = vst.msk [vmem:[%s23521_s3 + $0x228] sm:$0xff] %vm15_vm3, %v14206_v0 }
  0x28   :  { %86 = vst.msk [vmem:[%s23521_s3 + $0x230] sm:$0xff] %vm15_vm3, %v14206_v0  ;;  %87 = vst.msk [vmem:[%s23521_s3 + $0x238] sm:$0xff] %vm15_vm3, %v14206_v0 }
  0x29   :  { %88 = vst.msk [vmem:[%s23521_s3 + $0x240] sm:$0xff] %vm15_vm3, %v14206_v0  ;;  %89 = vst.msk [vmem:[%s23521_s3 + $0x248] sm:$0xff] %vm15_vm3, %v14206_v0 }
  0x2a   :  { %90 = vst.msk [vmem:[%s23521_s3 + $0x250] sm:$0xff] %vm15_vm3, %v14206_v0  ;;  %91 = vst.msk [vmem:[%s23521_s3 + $0x258] sm:$0xff] %vm15_vm3, %v14206_v0 }
  0x2b   :  { %92 = vst.msk [vmem:[%s23521_s3 + $0x260] sm:$0xff] %vm15_vm3, %v14206_v0  ;;  %93 = vst.msk [vmem:[%s23521_s3 + $0x268] sm:$0xff] %vm15_vm3, %v14206_v0 }
  0x2c   :  { %94 = vst.msk [vmem:[%s23521_s3 + $0x270] sm:$0xff] %vm15_vm3, %v14206_v0  ;;  %95 = vst.msk [vmem:[%s23521_s3 + $0x278] sm:$0xff] %vm15_vm3, %v14206_v0 }
  0x2d   :  { %96 = vst.msk [vmem:[%s23521_s3 + $0x280] sm:$0xff] %vm15_vm3, %v14206_v0 }
  0x2e   :  { %12360 = vmatmul.mubr.msk.bf16.gmra.mxu0 %vm463_vm2, %v13845_v17  ;;  %12444 = vmatmul.mubr.msk.bf16.gmra.mxu1 %vm463_vm2, %v13846_v18  ;;  %v1515_v17 = vshll.u32 %v13883_v13, 16  ;;  %v1510_v18 = vsel %vm1482_vm4, %v1505_v14, %v1509_v15  ;;  %v182_v14 = vld [vmem:[%s23521_s3 + $0x18] sm:$0xff] }
  0x2f   :  { %12363 = vmatprep.mubr.msk.bf16.mxu0 %vm14207_vm1, %v14206_v0  ;;  %12447 = vmatprep.mubr.msk.bf16.mxu1 %vm14207_vm1, %v14206_v0 }
  0x36   :  { %12364 = vmatmul.mubr.msk.bf16.gmra.mxu0 %vm463_vm2, %v13847_v19  ;;  %12448 = vmatmul.mubr.msk.bf16.gmra.mxu1 %vm463_vm2, %v13848_v20  ;;  %v2832_v19 = vsel %vm2827_vm5, %v2829_v3, %v2831_v16  ;;  %v1511_v20 = vshrl.u32 %v13881_v6, 16  ;;  %v223_v3 = vld [vmem:[%s23521_s3 + $0x160] sm:$0xff] }
  0x37   :  { %12367 = vmatprep.mubr.msk.bf16.mxu0 %vm14207_vm1, %v14206_v0  ;;  %12451 = vmatprep.mubr.msk.bf16.mxu1 %vm14207_vm1, %v14206_v0 }
  0x3e   :  { %12368 = vmatmul.mubr.msk.bf16.gmra.mxu0 %vm463_vm2, %v13849_v21  ;;  %12452 = vmatmul.mubr.msk.bf16.gmra.mxu1 %vm463_vm2, %v13850_v22  ;;  %v13884_v21 = vld [vmem:[%s23520_s0 + $0x18] sm:$0xff]   ;;  %v1517_v22 = vrot.slane %v1515_v17, 1 }
  0x3f   :  { %12371 = vmatprep.mubr.msk.bf16.mxu0 %vm14207_vm1, %v14206_v0  ;;  %12455 = vmatprep.mubr.msk.bf16.mxu1 %vm14207_vm1, %v14206_v0 }
  0x46   :  { %12372 = vmatmul.mubr.msk.bf16.gmra.mxu0 %vm463_vm2, %v13851_v23  ;;  %12456 = vmatmul.mubr.msk.bf16.gmra.mxu1 %vm463_vm2, %v13852_v24  ;;  %v1513_v23 = vor.u32 %v1511_v20, %v1509_v15  ;;  %v2833_v24 = vrot.slane %v13884_v21, 1  ;;  %v224_v15 = vld [vmem:[%s23521_s3 + $0x168] sm:$0xff] }
  0x47   :  { %12375 = vmatprep.mubr.msk.bf16.mxu0 %vm14207_vm1, %v14206_v0  ;;  %12459 = vmatprep.mubr.msk.bf16.mxu1 %vm14207_vm1, %v14206_v0 }
  0x4e   :  { %12376 = vmatmul.mubr.msk.bf16.gmra.mxu0 %vm463_vm2, %v13853_v25  ;;  %12460 = vmatmul.mubr.msk.bf16.gmra.mxu1 %vm463_vm2, %v13854_v26  ;;  %v13885_v25 = vld [vmem:[%s23520_s0 + $0x28] sm:$0xff]   ;;  %v1519_v26 = vshrl.u32 %v13883_v13, 16 }
  0x4f   :  { %12379 = vmatprep.mubr.msk.bf16.mxu0 %vm14207_vm1, %v14206_v0  ;;  %12463 = vmatprep.mubr.msk.bf16.mxu1 %vm14207_vm1, %v14206_v0 }
  0x56   :  { %12380 = vmatmul.mubr.msk.bf16.gmra.mxu0 %vm463_vm2, %v13855_v27  ;;  %12464 = vmatmul.mubr.msk.bf16.gmra.mxu1 %vm463_vm2, %v13856_v28  ;;  %v1518_v27 = vsel %vm1482_vm4, %v1513_v23, %v1517_v22  ;;  %v2834_v28 = vsel %vm2827_vm5, %v2831_v16, %v2833_v24 }
  0x57   :  { %12383 = vmatprep.mubr.msk.bf16.mxu0 %vm14207_vm1, %v14206_v0  ;;  %12467 = vmatprep.mubr.msk.bf16.mxu1 %vm14207_vm1, %v14206_v0 }
  0x5e   :  { %12384 = vmatmul.mubr.msk.bf16.gmra.mxu0 %vm463_vm2, %v13857_v29  ;;  %12468 = vmatmul.mubr.msk.bf16.gmra.mxu1 %vm463_vm2, %v13858_v30  ;;  %v1523_v29 = vshll.u32 %v13885_v25, 16  ;;  %v13886_v30 = vld [vmem:[%s23520_s0 + $0x20] sm:$0xff]  }
  0x5f   :  { %12387 = vmatprep.mubr.msk.bf16.mxu0 %vm14207_vm1, %v14206_v0  ;;  %12471 = vmatprep.mubr.msk.bf16.mxu1 %vm14207_vm1, %v14206_v0 }
  0x66   :  { %12388 = vmatmul.mubr.msk.bf16.gmra.mxu0 %vm463_vm2, %v13859_v31  ;;  %12472 = vmatmul.mubr.msk.bf16.gmra.mxu1 %vm463_vm2, %v13860_v32  ;;  %v13887_v31 = vld [vmem:[%s23520_s0 + $0x30] sm:$0xff]   ;;  %v1521_v32 = vor.u32 %v1519_v26, %v1517_v22 }
  0x67   :  { %12391 = vmatprep.mubr.msk.bf16.mxu0 %vm14207_vm1, %v14206_v0  ;;  %12475 = vmatprep.mubr.msk.bf16.mxu1 %vm14207_vm1, %v14206_v0 }
  0x6e   :  { %12392 = vmatmul.mubr.msk.bf16.gmra.mxu0 %vm463_vm2, %v13861_v33  ;;  %12476 = vmatmul.mubr.msk.bf16.gmra.mxu1 %vm463_vm2, %v13862_v34  ;;  %v1525_v33 = vrot.slane %v1523_v29, 1  ;;  %v2835_v34 = vrot.slane %v13886_v30, 1 }
  0x6f   :  { %12395 = vmatprep.mubr.msk.bf16.mxu0 %vm14207_vm1, %v14206_v0  ;;  %12479 = vmatprep.mubr.msk.bf16.mxu1 %vm14207_vm1, %v14206_v0 }
  0x76   :  { %12396 = vmatmul.mubr.msk.bf16.gmra.mxu0 %vm463_vm2, %v13863_v35  ;;  %12480 = vmatmul.mubr.msk.bf16.gmra.mxu1 %vm463_vm2, %v13864_v36  ;;  %v179_v35 = vld [vmem:[%s23521_s3] sm:$0xff]  ;;  %v221_v36 = vld [vmem:[%s23521_s3 + $0x150] sm:$0xff] }
  0x77   :  { %12399 = vmatprep.mubr.msk.bf16.mxu0 %vm14207_vm1, %v14206_v0  ;;  %12483 = vmatprep.mubr.msk.bf16.mxu1 %vm14207_vm1, %v14206_v0 }
  0x7e   :  { %12400 = vmatmul.mubr.msk.bf16.gmra.mxu0 %vm463_vm2, %v13865_v37  ;;  %12484 = vmatmul.mubr.msk.bf16.gmra.mxu1 %vm463_vm2, %v13866_v38  ;;  %v1527_v37 = vshrl.u32 %v13885_v25, 16  ;;  %v1531_v38 = vshll.u32 %v13887_v31, 16 }
  0x7f   :  { %12403 = vmatprep.mubr.msk.bf16.mxu0 %vm14207_vm1, %v14206_v0  ;;  %12487 = vmatprep.mubr.msk.bf16.mxu1 %vm14207_vm1, %v14206_v0 }
  0x80   :  { %v1529_v46 = vor.u32 %v1527_v37, %v1525_v33  ;;  %v1533_v47 = vrot.slane %v1531_v38, 1 }
  0x86   :  { %12404 = vmatmul.mubr.msk.bf16.gmra.mxu0 %vm463_vm2, %v13867_v39  ;;  %12488 = vmatmul.mubr.msk.bf16.gmra.mxu1 %vm463_vm2, %v13868_v40  ;;  %v1526_v39 = vsel %vm1482_vm4, %v1521_v32, %v1525_v33  ;;  %v2836_v40 = vsel %vm2827_vm5, %v2833_v24, %v2835_v34  ;;  %v15062_v24 = vld [vmem:[%s23520_s0 + $0x38] sm:$0xff]  }
  0x87   :  { %12407 = vmatprep.mubr.msk.bf16.mxu0 %vm14207_vm1, %v14206_v0  ;;  %12491 = vmatprep.mubr.msk.bf16.mxu1 %vm14207_vm1, %v14206_v0 }
  0x8e   :  { %12408 = vmatmul.mubr.msk.bf16.gmra.mxu0 %vm463_vm2, %v13869_v41  ;;  %12492 = vmatmul.mubr.msk.bf16.gmra.mxu1 %vm463_vm2, %v13870_v42  ;;  %v13888_v41 = vld [vmem:[%s23520_s0 + $0x28] sm:$0xff]  }
  0x8f   :  { %12411 = vmatprep.mubr.msk.bf16.mxu0 %vm14207_vm1, %v14206_v0  ;;  %12495 = vmatprep.mubr.msk.bf16.mxu1 %vm14207_vm1, %v14206_v0  ;;  %v2837_v50 = vrot.slane %v13888_v41, 1 }
  0x91   :  { %v2838_v61 = vsel %vm2827_vm5, %v2835_v34, %v2837_v50  ;;  %v2840_v23 = vsel %vm2827_vm5, %v2837_v50, %v2839_v11 }
  0x96   :  { %12412 = vmatmul.mubr.msk.bf16.gmra.mxu0 %vm463_vm2, %v13871_v43  ;;  %12496 = vmatmul.mubr.msk.bf16.gmra.mxu1 %vm463_vm2, %v13872_v44  ;;  %v180_v44 = vld [vmem:[%s23521_s3 + $0x8] sm:$0xff] }
  0x97   :  { %12415 = vmatprep.mubr.msk.bf16.mxu0 %vm14207_vm1, %v14206_v0  ;;  %12499 = vmatprep.mubr.msk.bf16.mxu1 %vm14207_vm1, %v14206_v0 }
  0x9e   :  { %12416 = vmatmul.mubr.msk.bf16.gmra.mxu0 %vm463_vm2, %v13873_v49  ;;  %12500 = vmatmul.mubr.msk.bf16.gmra.mxu1 %vm463_vm2, %v13874_v48 }
  0x9f   :  { %12419 = vmatprep.mubr.msk.bf16.mxu0 %vm14207_vm1, %v14206_v0  ;;  %12505 = vmatprep.mubr.msk.bf16.mxu1 %vm14207_vm1, %v14206_v0 }
  0xa6   :  { %12420 = vmatmul.mubr.msk.bf16.gmra.mxu0 %vm463_vm2, %v13875_v57  ;;  %12506 = vmatmul.mubr.msk.bf16.vlgmr.msra.gmra.mxu1 %vm463_vm2, %v1494_v62  ;;  %v1534_v57 = vsel %vm1482_vm4, %v1529_v46, %v1533_v47  ;;  %v1539_v62 = vshll.u32 %v13889_v51, 16 }
  0xa7   :  { %12836 = vmatpush3.bf16.msra.mxu1 %v4131_v58  ;;  %12509 = vmatprep.mubr.msk.bf16.mxu1 %vm14207_vm1, %v14206_v0  ;;  %v1535_v58 = vshrl.u32 %v13887_v31, 16 }
  0xa8   :  { %12671 = vmatprep.mubr.msk.bf16.mxu0 %vm14207_vm1, %v14206_v0  ;;  %13167 = vmatprep.subr.bf16.mxu1 %v14206_v0 }
  0xa9   :  { %v1537_v6 = vor.u32 %v1535_v58, %v1533_v47 }
  0xae   :  { %12510 = vmatmul.mubr.msk.bf16.gmra.mxu1 %vm463_vm2, %v1502_v9  ;;  %12672 = vmatmul.mubr.msk.bf16.vlgmr.msra.gmra.mxu0 %vm463_vm2, %v2830_v10  ;;  %v1541_v10 = vrot.slane %v1539_v62, 1 }
  0xaf   :  { %13002 = vmatpush3.bf16.msra.mxu0 %v5517_v7  ;;  %12513 = vmatprep.mubr.msk.bf16.mxu1 %vm14207_vm1, %v14206_v0  ;;  %v15035_v7 = vld [vmem:[%s23520_s0 + $0x40] sm:$0xff]  }
  0xb0   :  { %12675 = vmatprep.mubr.msk.bf16.mxu0 %vm14207_vm1, %v14206_v0  ;;  %13333 = vmatprep.subr.bf16.mxu0 %v14206_v0  ;;  %v1542_v22 = vsel %vm1482_vm4, %v1537_v6, %v1541_v10 }
  0xb6   :  { %12514 = vmatmul.mubr.msk.bf16.gmra.mxu1 %vm463_vm2, %v1510_v18  ;;  %12676 = vmatmul.mubr.msk.bf16.gmra.mxu0 %vm463_vm2, %v2832_v19  ;;  %v1543_v18 = vshrl.u32 %v13889_v51, 16  ;;  %v1547_v19 = vshll.u32 %v15035_v7, 16 }
  0xb7   :  { %12517 = vmatprep.mubr.msk.bf16.mxu1 %vm14207_vm1, %v14206_v0  ;;  %12679 = vmatprep.mubr.msk.bf16.mxu0 %vm14207_vm1, %v14206_v0 }
  0xb8   :  { %v1545_v31 = vor.u32 %v1543_v18, %v1541_v10  ;;  %v1549_v32 = vrot.slane %v1547_v19, 1 }
  0xbe   :  { %12518 = vmatmul.mubr.msk.bf16.gmra.mxu1 %vm463_vm2, %v1518_v27  ;;  %12680 = vmatmul.mubr.msk.bf16.gmra.mxu0 %vm463_vm2, %v2834_v28  ;;  %v183_v27 = vld [vmem:[%s23521_s3 + $0x20] sm:$0xff]  ;;  %v225_v28 = vld [vmem:[%s23521_s3 + $0x170] sm:$0xff] }
  0xbf   :  { %12521 = vmatprep.mubr.msk.bf16.mxu1 %vm14207_vm1, %v14206_v0  ;;  %12683 = vmatprep.mubr.msk.bf16.mxu0 %vm14207_vm1, %v14206_v0 }
  0xc6   :  { %v625_v42 = vpop.f32.mrf.mxu0  ;;  %v793_v43 = vpop.f32.mrf.mxu1  ;;  %12522 = vmatmul.mubr.msk.bf16.gmra.mxu1 %vm463_vm2, %v1526_v39  ;;  %12684 = vmatmul.mubr.msk.bf16.gmra.mxu0 %vm463_vm2, %v2836_v40  ;;  %v184_v39 = vld [vmem:[%s23521_s3 + $0x28] sm:$0xff]  ;;  %v226_v40 = vld [vmem:[%s23521_s3 + $0x178] sm:$0xff] }
  0xc7   :  { %v951_v48 = vadd.f32 %v625_v42, %v179_v35  ;;  %v993_v49 = vadd.f32 %v793_v43, %v221_v36  ;;  %12525 = vmatprep.mubr.msk.bf16.mxu1 %vm14207_vm1, %v14206_v0  ;;  %12687 = vmatprep.mubr.msk.bf16.mxu0 %vm14207_vm1, %v14206_v0  ;;  %v2841_v35 = vrot.slane %v15062_v24, 1  ;;  %v13893_v36 = vld [vmem:[%s23520_s0 + $0x48] sm:$0xff]   ;;  %v1550_v43 = vsel %vm1482_vm4, %v1545_v31, %v1549_v32  ;;  %v189_v31 = vld [vmem:[%s23521_s3 + $0x50] sm:$0xff] }
  0xc8   :  { %v12341_v52 = vpop.f32.mrf.mxu0  ;;  %v12425_v53 = vpop.f32.mrf.mxu1 }
  0xc9   :  { %1032 = vst.msk [vmem:[%s23521_s3] sm:$0xff] %vm15_vm3, %v951_v48  ;;  %1074 = vst.msk [vmem:[%s23521_s3 + $0x150] sm:$0xff] %vm15_vm3, %v993_v49  ;;  %v2842_v47 = vsel %vm2827_vm5, %v2839_v11, %v2841_v35  ;;  %v1555_v48 = vshll.u32 %v13893_v36, 16  ;;  %v15108_v49 = vld [vmem:[%s23520_s0 + $0x40] sm:$0xff]   ;;  %v185_v52 = vld [vmem:[%s23521_s3 + $0x30] sm:$0xff] }
  0xca   :  { %v628_v54 = vpop.f32.mrf.mxu0  ;;  %v796_v55 = vpop.f32.mrf.mxu1  ;;  %v227_v53 = vld [vmem:[%s23521_s3 + $0x180] sm:$0xff]  ;;  %v15156_v11 = vld [vmem:[%s23520_s0 + $0x48] sm:$0xff]  }
  0xcb   :  { %v952_v59 = vadd.f32 %v628_v54, %v180_v44  ;;  %v994_v60 = vadd.f32 %v796_v55, %v222_v45  ;;  %v1551_v44 = vshrl.u32 %v15035_v7, 16  ;;  %v15127_v54 = vld [vmem:[%s23520_s0 + $0x50] sm:$0xff]  }
  0xcc   :  { %v12342_v1 = vpop.f32.mrf.mxu0  ;;  %v12426_v2 = vpop.f32.mrf.mxu1 }
  0xcd   :  { %1033 = vst.msk [vmem:[%s23521_s3 + $0x8] sm:$0xff] %vm15_vm3, %v952_v59  ;;  %1075 = vst.msk [vmem:[%s23521_s3 + $0x158] sm:$0xff] %vm15_vm3, %v994_v60  ;;  %v1557_v60 = vrot.slane %v1555_v48, 1  ;;  %v186_v1 = vld [vmem:[%s23521_s3 + $0x38] sm:$0xff]  ;;  %v228_v2 = vld [vmem:[%s23521_s3 + $0x188] sm:$0xff] }
  0xce   :  { %v633_v4 = vpop.f32.mrf.mxu0  ;;  %v801_v5 = vpop.f32.mrf.mxu1  ;;  %12526 = vmatmul.mubr.msk.bf16.gmra.mxu1 %vm463_vm2, %v1534_v57  ;;  %12688 = vmatmul.mubr.msk.bf16.gmra.mxu0 %vm463_vm2, %v2838_v61  ;;  %v1553_v57 = vor.u32 %v1551_v44, %v1549_v32  ;;  %v2843_v61 = vrot.slane %v15108_v49, 1 }
  0xcf   :  { %v953_v8 = vadd.f32 %v633_v4, %v181_v56  ;;  %v995_v9 = vadd.f32 %v801_v5, %v223_v3  ;;  %12529 = vmatprep.mubr.msk.bf16.mxu1 %vm14207_vm1, %v14206_v0  ;;  %12691 = vmatprep.mubr.msk.bf16.mxu0 %vm14207_vm1, %v14206_v0  ;;  %v1559_v3 = vshrl.u32 %v13893_v36, 16  ;;  %v1563_v4 = vshll.u32 %v15127_v54, 16 }
  0xd0   :  { %v12345_v12 = vpop.f32.mrf.mxu0  ;;  %v12429_v13 = vpop.f32.mrf.mxu1  ;;  %v2844_v10 = vsel %vm2827_vm5, %v2841_v35, %v2843_v61 }
  0xd1   :  { %1034 = vst.msk [vmem:[%s23521_s3 + $0x10] sm:$0xff] %vm15_vm3, %v953_v8  ;;  %1076 = vst.msk [vmem:[%s23521_s3 + $0x160] sm:$0xff] %vm15_vm3, %v995_v9  ;;  %v1558_v9 = vsel %vm1482_vm4, %v1553_v57, %v1557_v60  ;;  %v1561_v19 = vor.u32 %v1559_v3, %v1557_v60 }
  0xd2   :  { %v636_v16 = vpop.f32.mrf.mxu0  ;;  %v804_v17 = vpop.f32.mrf.mxu1 }
  0xd3   :  { %v954_v20 = vadd.f32 %v636_v16, %v182_v14  ;;  %v996_v21 = vadd.f32 %v804_v17, %v224_v15  ;;  %v187_v14 = vld [vmem:[%s23521_s3 + $0x40] sm:$0xff]  ;;  %v229_v15 = vld [vmem:[%s23521_s3 + $0x190] sm:$0xff]  ;;  %v1565_v16 = vrot.slane %v1563_v4, 1 }
  0xd4   :  { %v12346_v25 = vpop.f32.mrf.mxu0  ;;  %v12430_v26 = vpop.f32.mrf.mxu1 }
  0xd5   :  { %1035 = vst.msk [vmem:[%s23521_s3 + $0x18] sm:$0xff] %vm15_vm3, %v954_v20  ;;  %1077 = vst.msk [vmem:[%s23521_s3 + $0x168] sm:$0xff] %vm15_vm3, %v996_v21  ;;  %v188_v26 = vld [vmem:[%s23521_s3 + $0x48] sm:$0xff]  ;;  %v1566_v32 = vsel %vm1482_vm4, %v1561_v19, %v1565_v16 }
  0xd6   :  { %v641_v29 = vpop.f32.mrf.mxu0  ;;  %v809_v30 = vpop.f32.mrf.mxu1  ;;  %12530 = vmatmul.mubr.msk.bf16.gmra.mxu1 %vm463_vm2, %v1542_v22  ;;  %12692 = vmatmul.mubr.msk.bf16.gmra.mxu0 %vm463_vm2, %v2840_v23  ;;  %v2845_v22 = vrot.slane %v15156_v11, 1  ;;  %v13897_v23 = vld [vmem:[%s23520_s0 + $0x58] sm:$0xff]  }
  0xd7   :  { %v955_v33 = vadd.f32 %v641_v29, %v183_v27  ;;  %v997_v34 = vadd.f32 %v809_v30, %v225_v28  ;;  %12533 = vmatprep.mubr.msk.bf16.mxu1 %vm14207_vm1, %v14206_v0  ;;  %12695 = vmatprep.mubr.msk.bf16.mxu0 %vm14207_vm1, %v14206_v0  ;;  %v230_v27 = vld [vmem:[%s23521_s3 + $0x198] sm:$0xff]  ;;  %v1567_v28 = vshrl.u32 %v15127_v54, 16  ;;  %v1571_v36 = vshll.u32 %v13897_v23, 16 }
  0xd8   :  { %v12349_v37 = vpop.f32.mrf.mxu0  ;;  %v12433_v38 = vpop.f32.mrf.mxu1  ;;  %v2846_v35 = vsel %vm2827_vm5, %v2843_v61, %v2845_v22  ;;  %v1575_v54 = vshrl.u32 %v13897_v23, 16  ;;  %v15250_v61 = vld [vmem:[%s23520_s0 + $0x58] sm:$0xff]  }
  0xd9   :  { %1036 = vst.msk [vmem:[%s23521_s3 + $0x20] sm:$0xff] %vm15_vm3, %v955_v33  ;;  %1078 = vst.msk [vmem:[%s23521_s3 + $0x170] sm:$0xff] %vm15_vm3, %v997_v34  ;;  %v15205_v37 = vld [vmem:[%s23520_s0 + $0x50] sm:$0xff]   ;;  %v1569_v44 = vor.u32 %v1567_v28, %v1565_v16 }
  0xda   :  { %v644_v41 = vpop.f32.mrf.mxu0  ;;  %v812_v42 = vpop.f32.mrf.mxu1  ;;  %v2847_v48 = vrot.slane %v15205_v37, 1  ;;  %v15307_v28 = vld [vmem:[%s23520_s0 + $0x70] sm:$0xff]  }
  0xdb   :  { %v956_v45 = vadd.f32 %v644_v41, %v184_v39  ;;  %v998_v46 = vadd.f32 %v812_v42, %v226_v40  ;;  %v231_v40 = vld [vmem:[%s23521_s3 + $0x1a0] sm:$0xff] }
  0xdc   :  { %v12350_v50 = vpop.f32.mrf.mxu0  ;;  %v12434_v51 = vpop.f32.mrf.mxu1  ;;  %v15213_v41 = vld [vmem:[%s23520_s0 + $0x60] sm:$0xff]   ;;  %v2848_v60 = vsel %vm2827_vm5, %v2845_v22, %v2847_v48 }
  0xdd   :  { %1037 = vst.msk [vmem:[%s23521_s3 + $0x28] sm:$0xff] %vm15_vm3, %v956_v45  ;;  %1079 = vst.msk [vmem:[%s23521_s3 + $0x178] sm:$0xff] %vm15_vm3, %v998_v46  ;;  %v190_v51 = vld [vmem:[%s23521_s3 + $0x58] sm:$0xff] }
  0xde   :  { %v649_v55 = vpop.f32.mrf.mxu0  ;;  %v817_v56 = vpop.f32.mrf.mxu1  ;;  %12534 = vmatmul.mubr.msk.bf16.gmra.mxu1 %vm463_vm2, %v1550_v43  ;;  %12696 = vmatmul.mubr.msk.bf16.gmra.mxu0 %vm463_vm2, %v2842_v47  ;;  %v1573_v47 = vrot.slane %v1571_v36, 1 }
  0xdf   :  { %v957_v58 = vadd.f32 %v649_v55, %v185_v52  ;;  %v999_v59 = vadd.f32 %v817_v56, %v227_v53  ;;  %12537 = vmatprep.mubr.msk.bf16.mxu1 %vm14207_vm1, %v14206_v0  ;;  %12699 = vmatprep.mubr.msk.bf16.mxu0 %vm14207_vm1, %v14206_v0  ;;  %v232_v52 = vld [vmem:[%s23521_s3 + $0x1a8] sm:$0xff]  ;;  %v1579_v53 = vshll.u32 %v15213_v41, 16 }
  0xe0   :  { %v12353_v62 = vpop.f32.mrf.mxu0  ;;  %v12437_v63 = vpop.f32.mrf.mxu1 }
  0xe1   :  { %1038 = vst.msk [vmem:[%s23521_s3 + $0x30] sm:$0xff] %vm15_vm3, %v957_v58  ;;  %1080 = vst.msk [vmem:[%s23521_s3 + $0x180] sm:$0xff] %vm15_vm3, %v999_v59  ;;  %v1574_v59 = vsel %vm1482_vm4, %v1569_v44, %v1573_v47  ;;  %v1581_v3 = vrot.slane %v1579_v53, 1 }
  0xe2   :  { %v652_v5 = vpop.f32.mrf.mxu0  ;;  %v820_v6 = vpop.f32.mrf.mxu1 }
  0xe3   :  { %v958_v7 = vadd.f32 %v652_v5, %v186_v1  ;;  %v1000_v8 = vadd.f32 %v820_v6, %v228_v2  ;;  %v191_v1 = vld [vmem:[%s23521_s3 + $0x60] sm:$0xff]  ;;  %v233_v2 = vld [vmem:[%s23521_s3 + $0x1b0] sm:$0xff]  ;;  %v1577_v6 = vor.u32 %v1575_v54, %v1573_v47 }
  0xe4   :  { %v12354_v12 = vpop.f32.mrf.mxu0  ;;  %v12438_v13 = vpop.f32.mrf.mxu1 }
  0xe5   :  { %1039 = vst.msk [vmem:[%s23521_s3 + $0x38] sm:$0xff] %vm15_vm3, %v958_v7  ;;  %1081 = vst.msk [vmem:[%s23521_s3 + $0x188] sm:$0xff] %vm15_vm3, %v1000_v8  ;;  %v192_v13 = vld [vmem:[%s23521_s3 + $0x68] sm:$0xff]  ;;  %v1582_v19 = vsel %vm1482_vm4, %v1577_v6, %v1581_v3 }
  0xe6   :  { %v657_v17 = vpop.f32.mrf.mxu0  ;;  %v825_v18 = vpop.f32.mrf.mxu1  ;;  %12538 = vmatmul.mubr.msk.bf16.gmra.mxu1 %vm463_vm2, %v1558_v9  ;;  %12700 = vmatmul.mubr.msk.bf16.gmra.mxu0 %vm463_vm2, %v2844_v10  ;;  %v2849_v9 = vrot.slane %v15250_v61, 1  ;;  %v13901_v10 = vld [vmem:[%s23520_s0 + $0x68] sm:$0xff]  }
  0xe7   :  { %v959_v20 = vadd.f32 %v657_v17, %v187_v14  ;;  %v1001_v21 = vadd.f32 %v825_v18, %v229_v15  ;;  %12541 = vmatprep.mubr.msk.bf16.mxu1 %vm14207_vm1, %v14206_v0  ;;  %12703 = vmatprep.mubr.msk.bf16.mxu0 %vm14207_vm1, %v14206_v0  ;;  %v234_v14 = vld [vmem:[%s23521_s3 + $0x1b8] sm:$0xff]  ;;  %v1583_v15 = vshrl.u32 %v15213_v41, 16  ;;  %v193_v18 = vld [vmem:[%s23521_s3 + $0x70] sm:$0xff]  ;;  %v1587_v23 = vshll.u32 %v13901_v10, 16 }
  0xe8   :  { %v12357_v24 = vpop.f32.mrf.mxu0  ;;  %v12441_v25 = vpop.f32.mrf.mxu1  ;;  %v2850_v22 = vsel %vm2827_vm5, %v2847_v48, %v2849_v9  ;;  %v1591_v41 = vshrl.u32 %v13901_v10, 16  ;;  %v15344_v48 = vld [vmem:[%s23520_s0 + $0x68] sm:$0xff]  }
  0xe9   :  { %1040 = vst.msk [vmem:[%s23521_s3 + $0x40] sm:$0xff] %vm15_vm3, %v959_v20  ;;  %1082 = vst.msk [vmem:[%s23521_s3 + $0x190] sm:$0xff] %vm15_vm3, %v1001_v21  ;;  %v15299_v24 = vld [vmem:[%s23520_s0 + $0x60] sm:$0xff]  }
  0xea   :  { %v660_v29 = vpop.f32.mrf.mxu0  ;;  %v828_v30 = vpop.f32.mrf.mxu1 }
  0xeb   :  { %v960_v33 = vadd.f32 %v660_v29, %v188_v26  ;;  %v1002_v34 = vadd.f32 %v828_v30, %v230_v27  ;;  %v235_v27 = vld [vmem:[%s23521_s3 + $0x1c0] sm:$0xff] }
  0xec   :  { %v12358_v38 = vpop.f32.mrf.mxu0  ;;  %v12442_v39 = vpop.f32.mrf.mxu1 }
  0xed   :  { %1041 = vst.msk [vmem:[%s23521_s3 + $0x48] sm:$0xff] %vm15_vm3, %v960_v33  ;;  %1083 = vst.msk [vmem:[%s23521_s3 + $0x198] sm:$0xff] %vm15_vm3, %v1002_v34  ;;  %v1589_v34 = vrot.slane %v1587_v23, 1  ;;  %v194_v38 = vld [vmem:[%s23521_s3 + $0x78] sm:$0xff]  ;;  %v236_v39 = vld [vmem:[%s23521_s3 + $0x1c8] sm:$0xff] }
  0xee   :  { %v665_v42 = vpop.f32.mrf.mxu0  ;;  %v833_v43 = vpop.f32.mrf.mxu1  ;;  %12542 = vmatmul.mubr.msk.bf16.gmra.mxu1 %vm463_vm2, %v1566_v32  ;;  %12704 = vmatmul.mubr.msk.bf16.gmra.mxu0 %vm463_vm2, %v2846_v35  ;;  %v2851_v35 = vrot.slane %v15299_v24, 1 }
  0xef   :  { %v961_v45 = vadd.f32 %v665_v42, %v189_v31  ;;  %v1003_v46 = vadd.f32 %v833_v43, %v231_v40  ;;  %12545 = vmatprep.mubr.msk.bf16.mxu1 %vm14207_vm1, %v14206_v0  ;;  %12707 = vmatprep.mubr.msk.bf16.mxu0 %vm14207_vm1, %v14206_v0  ;;  %v1585_v31 = vor.u32 %v1583_v15, %v1581_v3  ;;  %v1595_v40 = vshll.u32 %v15307_v28, 16  ;;  %v15401_v15 = vld [vmem:[%s23520_s0 + $0x80] sm:$0xff]  }
  0xf0   :  { %v12361_v49 = vpop.f32.mrf.mxu0  ;;  %v12445_v50 = vpop.f32.mrf.mxu1  ;;  %v2852_v47 = vsel %vm2827_vm5, %v2849_v9, %v2851_v35 }
  0xf1   :  { %1042 = vst.msk [vmem:[%s23521_s3 + $0x50] sm:$0xff] %vm15_vm3, %v961_v45  ;;  %1084 = vst.msk [vmem:[%s23521_s3 + $0x1a0] sm:$0xff] %vm15_vm3, %v1003_v46  ;;  %v1590_v46 = vsel %vm1482_vm4, %v1585_v31, %v1589_v34  ;;  %v1597_v53 = vrot.slane %v1595_v40, 1 }
  0xf2   :  { %v668_v55 = vpop.f32.mrf.mxu0  ;;  %v836_v56 = vpop.f32.mrf.mxu1 }
  0xf3   :  { %v962_v57 = vadd.f32 %v668_v55, %v190_v51  ;;  %v1004_v58 = vadd.f32 %v836_v56, %v232_v52  ;;  %v195_v51 = vld [vmem:[%s23521_s3 + $0x80] sm:$0xff]  ;;  %v237_v52 = vld [vmem:[%s23521_s3 + $0x1d0] sm:$0xff]  ;;  %v1593_v56 = vor.u32 %v1591_v41, %v1589_v34 }
  0xf4   :  { %v12362_v62 = vpop.f32.mrf.mxu0  ;;  %v12446_v63 = vpop.f32.mrf.mxu1 }
  0xf5   :  { %1043 = vst.msk [vmem:[%s23521_s3 + $0x58] sm:$0xff] %vm15_vm3, %v962_v57  ;;  %1085 = vst.msk [vmem:[%s23521_s3 + $0x1a8] sm:$0xff] %vm15_vm3, %v1004_v58  ;;  %v196_v63 = vld [vmem:[%s23521_s3 + $0x88] sm:$0xff]  ;;  %v1598_v6 = vsel %vm1482_vm4, %v1593_v56, %v1597_v53 }
  0xf6   :  { %v673_v4 = vpop.f32.mrf.mxu0  ;;  %v841_v5 = vpop.f32.mrf.mxu1  ;;  %12546 = vmatmul.mubr.msk.bf16.gmra.mxu1 %vm463_vm2, %v1574_v59  ;;  %12708 = vmatmul.mubr.msk.bf16.gmra.mxu0 %vm463_vm2, %v2848_v60  ;;  %v2853_v59 = vrot.slane %v15344_v48, 1  ;;  %v13905_v60 = vld [vmem:[%s23520_s0 + $0x78] sm:$0xff]  }
  0xf7   :  { %v963_v7 = vadd.f32 %v673_v4, %v191_v1  ;;  %v1005_v8 = vadd.f32 %v841_v5, %v233_v2  ;;  %12549 = vmatprep.mubr.msk.bf16.mxu1 %vm14207_vm1, %v14206_v0  ;;  %12711 = vmatprep.mubr.msk.bf16.mxu0 %vm14207_vm1, %v14206_v0  ;;  %v238_v1 = vld [vmem:[%s23521_s3 + $0x1d8] sm:$0xff]  ;;  %v1599_v2 = vshrl.u32 %v15307_v28, 16  ;;  %v197_v5 = vld [vmem:[%s23521_s3 + $0x90] sm:$0xff]  ;;  %v1603_v10 = vshll.u32 %v13905_v60, 16 }
  0xf8   :  { %v12365_v11 = vpop.f32.mrf.mxu0  ;;  %v12449_v12 = vpop.f32.mrf.mxu1  ;;  %v2854_v9 = vsel %vm2827_vm5, %v2851_v35, %v2853_v59  ;;  %v1607_v28 = vshrl.u32 %v13905_v60, 16  ;;  %v15438_v35 = vld [vmem:[%s23520_s0 + $0x78] sm:$0xff]  }
  0xf9   :  { %1044 = vst.msk [vmem:[%s23521_s3 + $0x60] sm:$0xff] %vm15_vm3, %v963_v7  ;;  %1086 = vst.msk [vmem:[%s23521_s3 + $0x1b0] sm:$0xff] %vm15_vm3, %v1005_v8  ;;  %v15393_v11 = vld [vmem:[%s23520_s0 + $0x70] sm:$0xff]  }
  0xfa   :  { %v676_v16 = vpop.f32.mrf.mxu0  ;;  %v844_v17 = vpop.f32.mrf.mxu1 }
  0xfb   :  { %v964_v20 = vadd.f32 %v676_v16, %v192_v13  ;;  %v1006_v21 = vadd.f32 %v844_v17, %v234_v14  ;;  %v239_v14 = vld [vmem:[%s23521_s3 + $0x1e0] sm:$0xff] }
  0xfc   :  { %v12366_v25 = vpop.f32.mrf.mxu0  ;;  %v12450_v26 = vpop.f32.mrf.mxu1 }
  0xfd   :  { %1045 = vst.msk [vmem:[%s23521_s3 + $0x68] sm:$0xff] %vm15_vm3, %v964_v20  ;;  %1087 = vst.msk [vmem:[%s23521_s3 + $0x1b8] sm:$0xff] %vm15_vm3, %v1006_v21  ;;  %v1605_v21 = vrot.slane %v1603_v10, 1  ;;  %v198_v25 = vld [vmem:[%s23521_s3 + $0x98] sm:$0xff]  ;;  %v240_v26 = vld [vmem:[%s23521_s3 + $0x1e8] sm:$0xff] }
  0xfe   :  { %v681_v29 = vpop.f32.mrf.mxu0  ;;  %v849_v30 = vpop.f32.mrf.mxu1  ;;  %12550 = vmatmul.mubr.msk.bf16.gmra.mxu1 %vm463_vm2, %v1582_v19  ;;  %12712 = vmatmul.mubr.msk.bf16.gmra.mxu0 %vm463_vm2, %v2850_v22  ;;  %v2855_v22 = vrot.slane %v15393_v11, 1 }
  0xff   :  { %v965_v32 = vadd.f32 %v681_v29, %v193_v18  ;;  %v1007_v33 = vadd.f32 %v849_v30, %v235_v27  ;;  %12553 = vmatprep.mubr.msk.bf16.mxu1 %vm14207_vm1, %v14206_v0  ;;  %12715 = vmatprep.mubr.msk.bf16.mxu0 %vm14207_vm1, %v14206_v0  ;;  %v1601_v18 = vor.u32 %v1599_v2, %v1597_v53  ;;  %v1611_v27 = vshll.u32 %v15401_v15, 16  ;;  %v15495_v2 = vld [vmem:[%s23520_s0 + $0x90] sm:$0xff]  }
 0x100   :  { %v12369_v36 = vpop.f32.mrf.mxu0  ;;  %v12453_v37 = vpop.f32.mrf.mxu1  ;;  %v2856_v34 = vsel %vm2827_vm5, %v2853_v59, %v2855_v22 }
 0x101   :  { %1046 = vst.msk [vmem:[%s23521_s3 + $0x70] sm:$0xff] %vm15_vm3, %v965_v32  ;;  %1088 = vst.msk [vmem:[%s23521_s3 + $0x1c0] sm:$0xff] %vm15_vm3, %v1007_v33  ;;  %v1606_v33 = vsel %vm1482_vm4, %v1601_v18, %v1605_v21  ;;  %v1613_v40 = vrot.slane %v1611_v27, 1 }
 0x102   :  { %v684_v42 = vpop.f32.mrf.mxu0  ;;  %v852_v43 = vpop.f32.mrf.mxu1 }
 0x103   :  { %v966_v44 = vadd.f32 %v684_v42, %v194_v38  ;;  %v1008_v45 = vadd.f32 %v852_v43, %v236_v39  ;;  %v199_v38 = vld [vmem:[%s23521_s3 + $0xa0] sm:$0xff]  ;;  %v241_v39 = vld [vmem:[%s23521_s3 + $0x1f0] sm:$0xff]  ;;  %v1609_v43 = vor.u32 %v1607_v28, %v1605_v21 }
 0x104   :  { %v12370_v49 = vpop.f32.mrf.mxu0  ;;  %v12454_v50 = vpop.f32.mrf.mxu1 }
 0x105   :  { %1047 = vst.msk [vmem:[%s23521_s3 + $0x78] sm:$0xff] %vm15_vm3, %v966_v44  ;;  %1089 = vst.msk [vmem:[%s23521_s3 + $0x1c8] sm:$0xff] %vm15_vm3, %v1008_v45  ;;  %v200_v50 = vld [vmem:[%s23521_s3 + $0xa8] sm:$0xff]  ;;  %v1614_v56 = vsel %vm1482_vm4, %v1609_v43, %v1613_v40 }
 0x106   :  { %v689_v54 = vpop.f32.mrf.mxu0  ;;  %v857_v55 = vpop.f32.mrf.mxu1  ;;  %12554 = vmatmul.mubr.msk.bf16.gmra.mxu1 %vm463_vm2, %v1590_v46  ;;  %12716 = vmatmul.mubr.msk.bf16.gmra.mxu0 %vm463_vm2, %v2852_v47  ;;  %v2857_v46 = vrot.slane %v15438_v35, 1  ;;  %v13909_v47 = vld [vmem:[%s23520_s0 + $0x88] sm:$0xff]  }
 0x107   :  { %v967_v57 = vadd.f32 %v689_v54, %v195_v51  ;;  %v1009_v58 = vadd.f32 %v857_v55, %v237_v52  ;;  %12557 = vmatprep.mubr.msk.bf16.mxu1 %vm14207_vm1, %v14206_v0  ;;  %12719 = vmatprep.mubr.msk.bf16.mxu0 %vm14207_vm1, %v14206_v0  ;;  %v242_v51 = vld [vmem:[%s23521_s3 + $0x1f8] sm:$0xff]  ;;  %v1615_v52 = vshrl.u32 %v15401_v15, 16  ;;  %v201_v55 = vld [vmem:[%s23521_s3 + $0xb0] sm:$0xff]  ;;  %v1619_v60 = vshll.u32 %v13909_v47, 16 }
 0x108   :  { %v12373_v61 = vpop.f32.mrf.mxu0  ;;  %v12457_v62 = vpop.f32.mrf.mxu1  ;;  %v2858_v59 = vsel %vm2827_vm5, %v2855_v22, %v2857_v46  ;;  %v1623_v15 = vshrl.u32 %v13909_v47, 16  ;;  %v15532_v22 = vld [vmem:[%s23520_s0 + $0x88] sm:$0xff]  }
 0x109   :  { %1048 = vst.msk [vmem:[%s23521_s3 + $0x80] sm:$0xff] %vm15_vm3, %v967_v57  ;;  %1090 = vst.msk [vmem:[%s23521_s3 + $0x1d0] sm:$0xff] %vm15_vm3, %v1009_v58  ;;  %v15487_v61 = vld [vmem:[%s23520_s0 + $0x80] sm:$0xff]  }
 0x10a   :  { %v692_v3 = vpop.f32.mrf.mxu0  ;;  %v860_v4 = vpop.f32.mrf.mxu1 }
 0x10b   :  { %v968_v7 = vadd.f32 %v692_v3, %v196_v63  ;;  %v1010_v8 = vadd.f32 %v860_v4, %v238_v1  ;;  %v243_v1 = vld [vmem:[%s23521_s3 + $0x200] sm:$0xff] }
 0x10c   :  { %v12374_v12 = vpop.f32.mrf.mxu0  ;;  %v12458_v13 = vpop.f32.mrf.mxu1 }
 0x10d   :  { %1049 = vst.msk [vmem:[%s23521_s3 + $0x88] sm:$0xff] %vm15_vm3, %v968_v7  ;;  %1091 = vst.msk [vmem:[%s23521_s3 + $0x1d8] sm:$0xff] %vm15_vm3, %v1010_v8  ;;  %v1621_v8 = vrot.slane %v1619_v60, 1  ;;  %v202_v12 = vld [vmem:[%s23521_s3 + $0xb8] sm:$0xff]  ;;  %v244_v13 = vld [vmem:[%s23521_s3 + $0x208] sm:$0xff] }
 0x10e   :  { %v697_v16 = vpop.f32.mrf.mxu0  ;;  %v865_v17 = vpop.f32.mrf.mxu1  ;;  %12558 = vmatmul.mubr.msk.bf16.gmra.mxu1 %vm463_vm2, %v1598_v6  ;;  %12720 = vmatmul.mubr.msk.bf16.gmra.mxu0 %vm463_vm2, %v2854_v9  ;;  %v2859_v9 = vrot.slane %v15487_v61, 1 }
 0x10f   :  { %v969_v19 = vadd.f32 %v697_v16, %v197_v5  ;;  %v1011_v20 = vadd.f32 %v865_v17, %v239_v14  ;;  %12561 = vmatprep.mubr.msk.bf16.mxu1 %vm14207_vm1, %v14206_v0  ;;  %12723 = vmatprep.mubr.msk.bf16.mxu0 %vm14207_vm1, %v14206_v0  ;;  %v1617_v5 = vor.u32 %v1615_v52, %v1613_v40  ;;  %v1627_v14 = vshll.u32 %v15495_v2, 16  ;;  %v15589_v52 = vld [vmem:[%s23520_s0 + $0xa0] sm:$0xff]  }
 0x110   :  { %v12377_v23 = vpop.f32.mrf.mxu0  ;;  %v12461_v24 = vpop.f32.mrf.mxu1  ;;  %v2860_v21 = vsel %vm2827_vm5, %v2857_v46, %v2859_v9 }
 0x111   :  { %1050 = vst.msk [vmem:[%s23521_s3 + $0x90] sm:$0xff] %vm15_vm3, %v969_v19  ;;  %1092 = vst.msk [vmem:[%s23521_s3 + $0x1e0] sm:$0xff] %vm15_vm3, %v1011_v20  ;;  %v1622_v20 = vsel %vm1482_vm4, %v1617_v5, %v1621_v8  ;;  %v1629_v27 = vrot.slane %v1627_v14, 1 }
 0x112   :  { %v700_v29 = vpop.f32.mrf.mxu0  ;;  %v868_v30 = vpop.f32.mrf.mxu1 }
 0x113   :  { %v970_v31 = vadd.f32 %v700_v29, %v198_v25  ;;  %v1012_v32 = vadd.f32 %v868_v30, %v240_v26  ;;  %v203_v25 = vld [vmem:[%s23521_s3 + $0xc0] sm:$0xff]  ;;  %v245_v26 = vld [vmem:[%s23521_s3 + $0x210] sm:$0xff]  ;;  %v1625_v30 = vor.u32 %v1623_v15, %v1621_v8 }
 0x114   :  { %v12378_v36 = vpop.f32.mrf.mxu0  ;;  %v12462_v37 = vpop.f32.mrf.mxu1 }
 0x115   :  { %1051 = vst.msk [vmem:[%s23521_s3 + $0x98] sm:$0xff] %vm15_vm3, %v970_v31  ;;  %1093 = vst.msk [vmem:[%s23521_s3 + $0x1e8] sm:$0xff] %vm15_vm3, %v1012_v32  ;;  %v204_v37 = vld [vmem:[%s23521_s3 + $0xc8] sm:$0xff]  ;;  %v1630_v43 = vsel %vm1482_vm4, %v1625_v30, %v1629_v27 }
 0x116   :  { %v705_v41 = vpop.f32.mrf.mxu0  ;;  %v873_v42 = vpop.f32.mrf.mxu1  ;;  %12562 = vmatmul.mubr.msk.bf16.gmra.mxu1 %vm463_vm2, %v1606_v33  ;;  %12724 = vmatmul.mubr.msk.bf16.gmra.mxu0 %vm463_vm2, %v2856_v34  ;;  %v2861_v33 = vrot.slane %v15532_v22, 1  ;;  %v13913_v34 = vld [vmem:[%s23520_s0 + $0x98] sm:$0xff]  }
 0x117   :  { %v971_v44 = vadd.f32 %v705_v41, %v199_v38  ;;  %v1013_v45 = vadd.f32 %v873_v42, %v241_v39  ;;  %12565 = vmatprep.mubr.msk.bf16.mxu1 %vm14207_vm1, %v14206_v0  ;;  %12727 = vmatprep.mubr.msk.bf16.mxu0 %vm14207_vm1, %v14206_v0  ;;  %v246_v38 = vld [vmem:[%s23521_s3 + $0x218] sm:$0xff]  ;;  %v1631_v39 = vshrl.u32 %v15495_v2, 16  ;;  %v205_v42 = vld [vmem:[%s23521_s3 + $0xd0] sm:$0xff]  ;;  %v1635_v47 = vshll.u32 %v13913_v34, 16 }
 0x118   :  { %v12381_v48 = vpop.f32.mrf.mxu0  ;;  %v12465_v49 = vpop.f32.mrf.mxu1  ;;  %v2862_v46 = vsel %vm2827_vm5, %v2859_v9, %v2861_v33  ;;  %v1639_v2 = vshrl.u32 %v13913_v34, 16  ;;  %v15626_v9 = vld [vmem:[%s23520_s0 + $0x98] sm:$0xff]  }
 0x119   :  { %1052 = vst.msk [vmem:[%s23521_s3 + $0xa0] sm:$0xff] %vm15_vm3, %v971_v44  ;;  %1094 = vst.msk [vmem:[%s23521_s3 + $0x1f0] sm:$0xff] %vm15_vm3, %v1013_v45  ;;  %v15581_v48 = vld [vmem:[%s23520_s0 + $0x90] sm:$0xff]  }
 0x11a   :  { %v708_v53 = vpop.f32.mrf.mxu0  ;;  %v876_v54 = vpop.f32.mrf.mxu1 }
 0x11b   :  { %v972_v57 = vadd.f32 %v708_v53, %v200_v50  ;;  %v1014_v58 = vadd.f32 %v876_v54, %v242_v51  ;;  %v247_v51 = vld [vmem:[%s23521_s3 + $0x220] sm:$0xff] }
 0x11c   :  { %v12382_v62 = vpop.f32.mrf.mxu0  ;;  %v12466_v63 = vpop.f32.mrf.mxu1 }
 0x11d   :  { %1053 = vst.msk [vmem:[%s23521_s3 + $0xa8] sm:$0xff] %vm15_vm3, %v972_v57  ;;  %1095 = vst.msk [vmem:[%s23521_s3 + $0x1f8] sm:$0xff] %vm15_vm3, %v1014_v58  ;;  %v1637_v58 = vrot.slane %v1635_v47, 1  ;;  %v206_v62 = vld [vmem:[%s23521_s3 + $0xd8] sm:$0xff]  ;;  %v248_v63 = vld [vmem:[%s23521_s3 + $0x228] sm:$0xff] }
 0x11e   :  { %v713_v3 = vpop.f32.mrf.mxu0  ;;  %v881_v4 = vpop.f32.mrf.mxu1  ;;  %12566 = vmatmul.mubr.msk.bf16.gmra.mxu1 %vm463_vm2, %v1614_v56  ;;  %12728 = vmatmul.mubr.msk.bf16.gmra.mxu0 %vm463_vm2, %v2858_v59  ;;  %v2863_v59 = vrot.slane %v15581_v48, 1 }
 0x11f   :  { %v973_v6 = vadd.f32 %v713_v3, %v201_v55  ;;  %v1015_v7 = vadd.f32 %v881_v4, %v243_v1  ;;  %12569 = vmatprep.mubr.msk.bf16.mxu1 %vm14207_vm1, %v14206_v0  ;;  %12731 = vmatprep.mubr.msk.bf16.mxu0 %vm14207_vm1, %v14206_v0  ;;  %v1633_v55 = vor.u32 %v1631_v39, %v1629_v27  ;;  %v1643_v1 = vshll.u32 %v15589_v52, 16  ;;  %v15683_v39 = vld [vmem:[%s23520_s0 + $0xb0] sm:$0xff]  }
 0x120   :  { %v12385_v10 = vpop.f32.mrf.mxu0  ;;  %v12469_v11 = vpop.f32.mrf.mxu1  ;;  %v2864_v8 = vsel %vm2827_vm5, %v2861_v33, %v2863_v59 }
 0x121   :  { %1054 = vst.msk [vmem:[%s23521_s3 + $0xb0] sm:$0xff] %vm15_vm3, %v973_v6  ;;  %1096 = vst.msk [vmem:[%s23521_s3 + $0x200] sm:$0xff] %vm15_vm3, %v1015_v7  ;;  %v1638_v7 = vsel %vm1482_vm4, %v1633_v55, %v1637_v58  ;;  %v1645_v14 = vrot.slane %v1643_v1, 1 }
 0x122   :  { %v716_v16 = vpop.f32.mrf.mxu0  ;;  %v884_v17 = vpop.f32.mrf.mxu1 }
 0x123   :  { %v974_v18 = vadd.f32 %v716_v16, %v202_v12  ;;  %v1016_v19 = vadd.f32 %v884_v17, %v244_v13  ;;  %v207_v12 = vld [vmem:[%s23521_s3 + $0xe0] sm:$0xff]  ;;  %v249_v13 = vld [vmem:[%s23521_s3 + $0x230] sm:$0xff]  ;;  %v1641_v17 = vor.u32 %v1639_v2, %v1637_v58 }
 0x124   :  { %v12386_v23 = vpop.f32.mrf.mxu0  ;;  %v12470_v24 = vpop.f32.mrf.mxu1 }
 0x125   :  { %1055 = vst.msk [vmem:[%s23521_s3 + $0xb8] sm:$0xff] %vm15_vm3, %v974_v18  ;;  %1097 = vst.msk [vmem:[%s23521_s3 + $0x208] sm:$0xff] %vm15_vm3, %v1016_v19  ;;  %v208_v24 = vld [vmem:[%s23521_s3 + $0xe8] sm:$0xff]  ;;  %v1646_v30 = vsel %vm1482_vm4, %v1641_v17, %v1645_v14 }
 0x126   :  { %v721_v28 = vpop.f32.mrf.mxu0  ;;  %v889_v29 = vpop.f32.mrf.mxu1  ;;  %12570 = vmatmul.mubr.msk.bf16.gmra.mxu1 %vm463_vm2, %v1622_v20  ;;  %12732 = vmatmul.mubr.msk.bf16.gmra.mxu0 %vm463_vm2, %v2860_v21  ;;  %v2865_v20 = vrot.slane %v15626_v9, 1  ;;  %v13917_v21 = vld [vmem:[%s23520_s0 + $0xa8] sm:$0xff]  }
 0x127   :  { %v975_v31 = vadd.f32 %v721_v28, %v203_v25  ;;  %v1017_v32 = vadd.f32 %v889_v29, %v245_v26  ;;  %12573 = vmatprep.mubr.msk.bf16.mxu1 %vm14207_vm1, %v14206_v0  ;;  %12735 = vmatprep.mubr.msk.bf16.mxu0 %vm14207_vm1, %v14206_v0  ;;  %v250_v25 = vld [vmem:[%s23521_s3 + $0x238] sm:$0xff]  ;;  %v1647_v26 = vshrl.u32 %v15589_v52, 16  ;;  %v209_v29 = vld [vmem:[%s23521_s3 + $0xf0] sm:$0xff]  ;;  %v1651_v34 = vshll.u32 %v13917_v21, 16 }
 0x128   :  { %v12389_v35 = vpop.f32.mrf.mxu0  ;;  %v12473_v36 = vpop.f32.mrf.mxu1  ;;  %v2866_v33 = vsel %vm2827_vm5, %v2863_v59, %v2865_v20  ;;  %v1655_v52 = vshrl.u32 %v13917_v21, 16  ;;  %v15720_v59 = vld [vmem:[%s23520_s0 + $0xa8] sm:$0xff]  }
 0x129   :  { %1056 = vst.msk [vmem:[%s23521_s3 + $0xc0] sm:$0xff] %vm15_vm3, %v975_v31  ;;  %1098 = vst.msk [vmem:[%s23521_s3 + $0x210] sm:$0xff] %vm15_vm3, %v1017_v32  ;;  %v15675_v35 = vld [vmem:[%s23520_s0 + $0xa0] sm:$0xff]  }
 0x12a   :  { %v724_v40 = vpop.f32.mrf.mxu0  ;;  %v892_v41 = vpop.f32.mrf.mxu1 }
 0x12b   :  { %v976_v44 = vadd.f32 %v724_v40, %v204_v37  ;;  %v1018_v45 = vadd.f32 %v892_v41, %v246_v38  ;;  %v251_v38 = vld [vmem:[%s23521_s3 + $0x240] sm:$0xff] }
 0x12c   :  { %v12390_v49 = vpop.f32.mrf.mxu0  ;;  %v12474_v50 = vpop.f32.mrf.mxu1 }
 0x12d   :  { %1057 = vst.msk [vmem:[%s23521_s3 + $0xc8] sm:$0xff] %vm15_vm3, %v976_v44  ;;  %1099 = vst.msk [vmem:[%s23521_s3 + $0x218] sm:$0xff] %vm15_vm3, %v1018_v45  ;;  %v1653_v45 = vrot.slane %v1651_v34, 1  ;;  %v210_v49 = vld [vmem:[%s23521_s3 + $0xf8] sm:$0xff]  ;;  %v252_v50 = vld [vmem:[%s23521_s3 + $0x248] sm:$0xff] }
 0x12e   :  { %v729_v53 = vpop.f32.mrf.mxu0  ;;  %v897_v54 = vpop.f32.mrf.mxu1  ;;  %12574 = vmatmul.mubr.msk.bf16.gmra.mxu1 %vm463_vm2, %v1630_v43  ;;  %12736 = vmatmul.mubr.msk.bf16.gmra.mxu0 %vm463_vm2, %v2862_v46  ;;  %v2867_v46 = vrot.slane %v15675_v35, 1 }
 0x12f   :  { %v977_v56 = vadd.f32 %v729_v53, %v205_v42  ;;  %v1019_v57 = vadd.f32 %v897_v54, %v247_v51  ;;  %12577 = vmatprep.mubr.msk.bf16.mxu1 %vm14207_vm1, %v14206_v0  ;;  %12739 = vmatprep.mubr.msk.bf16.mxu0 %vm14207_vm1, %v14206_v0  ;;  %v1649_v42 = vor.u32 %v1647_v26, %v1645_v14  ;;  %v1659_v51 = vshll.u32 %v15683_v39, 16  ;;  %v15777_v26 = vld [vmem:[%s23520_s0 + $0xc0] sm:$0xff]  }
 0x130   :  { %v12393_v60 = vpop.f32.mrf.mxu0  ;;  %v12477_v61 = vpop.f32.mrf.mxu1  ;;  %v2868_v58 = vsel %vm2827_vm5, %v2865_v20, %v2867_v46 }
 0x131   :  { %1058 = vst.msk [vmem:[%s23521_s3 + $0xd0] sm:$0xff] %vm15_vm3, %v977_v56  ;;  %1100 = vst.msk [vmem:[%s23521_s3 + $0x220] sm:$0xff] %vm15_vm3, %v1019_v57  ;;  %v1654_v57 = vsel %vm1482_vm4, %v1649_v42, %v1653_v45  ;;  %v1661_v1 = vrot.slane %v1659_v51, 1  ;;  %v215_v42 = vld [vmem:[%s23521_s3 + $0x120] sm:$0xff] }
 0x132   :  { %v732_v3 = vpop.f32.mrf.mxu0  ;;  %v900_v4 = vpop.f32.mrf.mxu1 }
 0x133   :  { %v978_v5 = vadd.f32 %v732_v3, %v206_v62  ;;  %v1020_v6 = vadd.f32 %v900_v4, %v248_v63  ;;  %v211_v62 = vld [vmem:[%s23521_s3 + $0x100] sm:$0xff]  ;;  %v253_v63 = vld [vmem:[%s23521_s3 + $0x250] sm:$0xff]  ;;  %v1657_v4 = vor.u32 %v1655_v52, %v1653_v45  ;;  %v15825_v52 = vld [vmem:[%s23520_s0 + $0xc8] sm:$0xff]  }
 0x134   :  { %v12394_v10 = vpop.f32.mrf.mxu0  ;;  %v12478_v11 = vpop.f32.mrf.mxu1 }
 0x135   :  { %1059 = vst.msk [vmem:[%s23521_s3 + $0xd8] sm:$0xff] %vm15_vm3, %v978_v5  ;;  %1101 = vst.msk [vmem:[%s23521_s3 + $0x228] sm:$0xff] %vm15_vm3, %v1020_v6  ;;  %v212_v11 = vld [vmem:[%s23521_s3 + $0x108] sm:$0xff]  ;;  %v1662_v17 = vsel %vm1482_vm4, %v1657_v4, %v1661_v1 }
 0x136   :  { %v737_v15 = vpop.f32.mrf.mxu0  ;;  %v905_v16 = vpop.f32.mrf.mxu1  ;;  %12578 = vmatmul.mubr.msk.bf16.gmra.mxu1 %vm463_vm2, %v1638_v7  ;;  %12740 = vmatmul.mubr.msk.bf16.gmra.mxu0 %vm463_vm2, %v2864_v8  ;;  %v2869_v7 = vrot.slane %v15720_v59, 1  ;;  %v13921_v8 = vld [vmem:[%s23520_s0 + $0xb8] sm:$0xff]  }
 0x137   :  { %v979_v18 = vadd.f32 %v737_v15, %v207_v12  ;;  %v1021_v19 = vadd.f32 %v905_v16, %v249_v13  ;;  %12581 = vmatprep.mubr.msk.bf16.mxu1 %vm14207_vm1, %v14206_v0  ;;  %12743 = vmatprep.mubr.msk.bf16.mxu0 %vm14207_vm1, %v14206_v0  ;;  %v254_v12 = vld [vmem:[%s23521_s3 + $0x258] sm:$0xff]  ;;  %v1663_v13 = vshrl.u32 %v15683_v39, 16  ;;  %v213_v16 = vld [vmem:[%s23521_s3 + $0x110] sm:$0xff]  ;;  %v1667_v21 = vshll.u32 %v13921_v8, 16 }
 0x138   :  { %v12397_v22 = vpop.f32.mrf.mxu0  ;;  %v12481_v23 = vpop.f32.mrf.mxu1  ;;  %v2870_v20 = vsel %vm2827_vm5, %v2867_v46, %v2869_v7  ;;  %v1671_v39 = vshrl.u32 %v13921_v8, 16 }
 0x139   :  { %1060 = vst.msk [vmem:[%s23521_s3 + $0xe0] sm:$0xff] %vm15_vm3, %v979_v18  ;;  %1102 = vst.msk [vmem:[%s23521_s3 + $0x230] sm:$0xff] %vm15_vm3, %v1021_v19  ;;  %v15769_v22 = vld [vmem:[%s23520_s0 + $0xb0] sm:$0xff]  }
 0x13a   :  { %v740_v27 = vpop.f32.mrf.mxu0  ;;  %v908_v28 = vpop.f32.mrf.mxu1 }
 0x13b   :  { %v980_v31 = vadd.f32 %v740_v27, %v208_v24  ;;  %v1022_v32 = vadd.f32 %v908_v28, %v250_v25  ;;  %v255_v25 = vld [vmem:[%s23521_s3 + $0x260] sm:$0xff] }
 0x13c   :  { %v12398_v36 = vpop.f32.mrf.mxu0  ;;  %v12482_v37 = vpop.f32.mrf.mxu1 }
 0x13d   :  { %1061 = vst.msk [vmem:[%s23521_s3 + $0xe8] sm:$0xff] %vm15_vm3, %v980_v31  ;;  %1103 = vst.msk [vmem:[%s23521_s3 + $0x238] sm:$0xff] %vm15_vm3, %v1022_v32  ;;  %v1669_v32 = vrot.slane %v1667_v21, 1  ;;  %v214_v36 = vld [vmem:[%s23521_s3 + $0x118] sm:$0xff]  ;;  %v256_v37 = vld [vmem:[%s23521_s3 + $0x268] sm:$0xff] }
 0x13e   :  { %v745_v40 = vpop.f32.mrf.mxu0  ;;  %v913_v41 = vpop.f32.mrf.mxu1  ;;  %12582 = vmatmul.mubr.msk.bf16.gmra.mxu1 %vm463_vm2, %v1646_v30  ;;  %12744 = vmatmul.mubr.msk.bf16.gmra.mxu0 %vm463_vm2, %v2866_v33  ;;  %v2871_v33 = vrot.slane %v15769_v22, 1 }
 0x13f   :  { %v981_v43 = vadd.f32 %v745_v40, %v209_v29  ;;  %v1023_v44 = vadd.f32 %v913_v41, %v251_v38  ;;  %12585 = vmatprep.mubr.msk.bf16.mxu1 %vm14207_vm1, %v14206_v0  ;;  %12747 = vmatprep.mubr.msk.bf16.mxu0 %vm14207_vm1, %v14206_v0  ;;  %v1665_v29 = vor.u32 %v1663_v13, %v1661_v1  ;;  %v1675_v38 = vshll.u32 %v15777_v26, 16  ;;  %v15852_v1 = vld [vmem:[%s23520_s0 + $0xc0] sm:$0xff]  }
 0x140   :  { %v12401_v47 = vpop.f32.mrf.mxu0  ;;  %v12485_v48 = vpop.f32.mrf.mxu1  ;;  %v2872_v46 = vsel %vm2827_vm5, %v2869_v7, %v2871_v33  ;;  %v217_v7 = vld [vmem:[%s23521_s3 + $0x130] sm:$0xff] }
 0x141   :  { %1062 = vst.msk [vmem:[%s23521_s3 + $0xf0] sm:$0xff] %vm15_vm3, %v981_v43  ;;  %1104 = vst.msk [vmem:[%s23521_s3 + $0x240] sm:$0xff] %vm15_vm3, %v1023_v44  ;;  %v1670_v45 = vsel %vm1482_vm4, %v1665_v29, %v1669_v32  ;;  %v15817_v47 = vld [vmem:[%s23520_s0 + $0xb8] sm:$0xff]   ;;  %v1677_v51 = vrot.slane %v1675_v38, 1 }
 0x142   :  { %v748_v53 = vpop.f32.mrf.mxu0  ;;  %v916_v54 = vpop.f32.mrf.mxu1  ;;  %v2873_v59 = vrot.slane %v15817_v47, 1  ;;  %v15921_v38 = vld [vmem:[%s23520_s0 + $0xd8] sm:$0xff]   ;;  %v1197_v47 = vld [vmem:[%s23521_s3 + $0x8] sm:$0xff] }
 0x143   :  { %v982_v55 = vadd.f32 %v748_v53, %v210_v49  ;;  %v1024_v56 = vadd.f32 %v916_v54, %v252_v50  ;;  %v257_v50 = vld [vmem:[%s23521_s3 + $0x270] sm:$0xff] }
 0x144   :  { %v12402_v60 = vpop.f32.mrf.mxu0  ;;  %v12486_v61 = vpop.f32.mrf.mxu1  ;;  %v2874_v8 = vsel %vm2827_vm5, %v2871_v33, %v2873_v59 }
 0x145   :  { %1063 = vst.msk [vmem:[%s23521_s3 + $0xf8] sm:$0xff] %vm15_vm3, %v982_v55  ;;  %1105 = vst.msk [vmem:[%s23521_s3 + $0x248] sm:$0xff] %vm15_vm3, %v1024_v56  ;;  %v1673_v55 = vor.u32 %v1671_v39, %v1669_v32 }
 0x146   :  { %v753_v2 = vpop.f32.mrf.mxu0  ;;  %v921_v3 = vpop.f32.mrf.mxu1  ;;  %12586 = vmatmul.mubr.msk.bf16.gmra.mxu1 %vm463_vm2, %v1654_v57  ;;  %12748 = vmatmul.mubr.msk.bf16.gmra.mxu0 %vm463_vm2, %v2868_v58  ;;  %v216_v58 = vld [vmem:[%s23521_s3 + $0x128] sm:$0xff] }
 0x147   :  { %v983_v5 = vadd.f32 %v753_v2, %v211_v62  ;;  %v1025_v6 = vadd.f32 %v921_v3, %v253_v63  ;;  %12589 = vmatprep.mubr.msk.bf16.mxu1 %vm14207_vm1, %v14206_v0  ;;  %12751 = vmatprep.mubr.msk.bf16.mxu0 %vm14207_vm1, %v14206_v0  ;;  %v258_v62 = vld [vmem:[%s23521_s3 + $0x278] sm:$0xff]  ;;  %v1683_v63 = vshll.u32 %v15825_v52, 16  ;;  %v1678_v4 = vsel %vm1482_vm4, %v1673_v55, %v1677_v51 }
 0x148   :  { %v12405_v9 = vpop.f32.mrf.mxu0  ;;  %v12489_v10 = vpop.f32.mrf.mxu1 }
 0x149   :  { %1064 = vst.msk [vmem:[%s23521_s3 + $0x100] sm:$0xff] %vm15_vm3, %v983_v5  ;;  %1106 = vst.msk [vmem:[%s23521_s3 + $0x250] sm:$0xff] %vm15_vm3, %v1025_v6  ;;  %v1679_v9 = vshrl.u32 %v15777_v26, 16  ;;  %v1685_v13 = vrot.slane %v1683_v63, 1 }
 0x14a   :  { %v756_v14 = vpop.f32.mrf.mxu0  ;;  %v924_v15 = vpop.f32.mrf.mxu1 }
 0x14b   :  { %v984_v18 = vadd.f32 %v756_v14, %v212_v11  ;;  %v1026_v19 = vadd.f32 %v924_v15, %v254_v12  ;;  %v259_v12 = vld [vmem:[%s23521_s3 + $0x280] sm:$0xff]  ;;  %v2875_v14 = vrot.slane %v15852_v1, 1  ;;  %v15875_v15 = vld [vmem:[%s23520_s0 + $0xd0] sm:$0xff]  }
 0x14c   :  { %v12406_v23 = vpop.f32.mrf.mxu0  ;;  %v12490_v24 = vpop.f32.mrf.mxu1 }
 0x14d   :  { %1065 = vst.msk [vmem:[%s23521_s3 + $0x108] sm:$0xff] %vm15_vm3, %v984_v18  ;;  %1107 = vst.msk [vmem:[%s23521_s3 + $0x258] sm:$0xff] %vm15_vm3, %v1026_v19  ;;  %v218_v23 = vld [vmem:[%s23521_s3 + $0x138] sm:$0xff]  ;;  %v1691_v24 = vshll.u32 %v15875_v15, 16 }
 0x14e   :  { %v761_v27 = vpop.f32.mrf.mxu0  ;;  %v929_v28 = vpop.f32.mrf.mxu1  ;;  %12590 = vmatmul.mubr.msk.bf16.gmra.mxu1 %vm463_vm2, %v1662_v17  ;;  %12752 = vmatmul.mubr.msk.bf16.gmra.mxu0 %vm463_vm2, %v2870_v20  ;;  %v1681_v20 = vor.u32 %v1679_v9, %v1677_v51 }
 0x14f   :  { %v985_v30 = vadd.f32 %v761_v27, %v213_v16  ;;  %v1027_v31 = vadd.f32 %v929_v28, %v255_v25  ;;  %12593 = vmatprep.mubr.msk.bf16.mxu1 %vm14207_vm1, %v14206_v0  ;;  %12755 = vmatprep.mubr.msk.bf16.mxu0 %vm14207_vm1, %v14206_v0  ;;  %v15898_v25 = vld [vmem:[%s23520_s0 + $0xc8] sm:$0xff]  }
 0x150   :  { %v12409_v34 = vpop.f32.mrf.mxu0  ;;  %v12493_v35 = vpop.f32.mrf.mxu1  ;;  %v1686_v29 = vsel %vm1482_vm4, %v1681_v20, %v1685_v13 }
 0x151   :  { %1066 = vst.msk [vmem:[%s23521_s3 + $0x110] sm:$0xff] %vm15_vm3, %v985_v30  ;;  %1108 = vst.msk [vmem:[%s23521_s3 + $0x260] sm:$0xff] %vm15_vm3, %v1027_v31  ;;  %v2876_v30 = vsel %vm2827_vm5, %v2873_v59, %v2875_v14  ;;  %v1687_v31 = vshrl.u32 %v15825_v52, 16  ;;  %v219_v34 = vld [vmem:[%s23521_s3 + $0x140] sm:$0xff]  ;;  %v1198_v59 = vld [vmem:[%s23521_s3 + $0x10] sm:$0xff] }
 0x152   :  { %v764_v40 = vpop.f32.mrf.mxu0  ;;  %v932_v41 = vpop.f32.mrf.mxu1  ;;  %v1196_v35 = vld [vmem:[%s23521_s3] sm:$0xff] }
 0x153   :  { %v986_v43 = vadd.f32 %v764_v40, %v214_v36  ;;  %v1028_v44 = vadd.f32 %v932_v41, %v256_v37  ;;  %v1693_v36 = vrot.slane %v1691_v24, 1  ;;  %v2877_v37 = vrot.slane %v15898_v25, 1  ;;  %v16014_v24 = vld [vmem:[%s23520_s0 + $0xe8] sm:$0xff]  }
 0x154   :  { %v12410_v48 = vpop.f32.mrf.mxu0  ;;  %v12494_v49 = vpop.f32.mrf.mxu1 }
 0x155   :  { %1067 = vst.msk [vmem:[%s23521_s3 + $0x118] sm:$0xff] %vm15_vm3, %v986_v43  ;;  %1109 = vst.msk [vmem:[%s23521_s3 + $0x268] sm:$0xff] %vm15_vm3, %v1028_v44  ;;  %v1689_v43 = vor.u32 %v1687_v31, %v1685_v13  ;;  %v1695_v48 = vshrl.u32 %v15875_v15, 16  ;;  %v1699_v49 = vshll.u32 %v15921_v38, 16  ;;  %v2878_v55 = vsel %vm2827_vm5, %v2875_v14, %v2877_v37 }
 0x156   :  { %v769_v53 = vpop.f32.mrf.mxu0  ;;  %v937_v54 = vpop.f32.mrf.mxu1  ;;  %12594 = vmatmul.mubr.msk.bf16.gmra.mxu1 %vm463_vm2, %v1670_v45  ;;  %12756 = vmatmul.mubr.msk.bf16.gmra.mxu0 %vm463_vm2, %v2872_v46  ;;  %v220_v46 = vld [vmem:[%s23521_s3 + $0x148] sm:$0xff]  ;;  %v1703_v14 = vshrl.u32 %v15921_v38, 16 }
 0x157   :  { %v987_v56 = vadd.f32 %v769_v53, %v215_v42  ;;  %v1029_v57 = vadd.f32 %v937_v54, %v257_v50  ;;  %12597 = vmatprep.mubr.msk.bf16.mxu1 %vm14207_vm1, %v14206_v0  ;;  %12759 = vmatprep.mubr.msk.bf16.mxu0 %vm14207_vm1, %v14206_v0  ;;  %v1694_v54 = vsel %vm1482_vm4, %v1689_v43, %v1693_v36  ;;  %v1701_v63 = vrot.slane %v1699_v49, 1 }
 0x158   :  { %v12413_v60 = vpop.f32.mrf.mxu0  ;;  %v12497_v61 = vpop.f32.mrf.mxu1 }
 0x159   :  { %1068 = vst.msk [vmem:[%s23521_s3 + $0x120] sm:$0xff] %vm15_vm3, %v987_v56  ;;  %1110 = vst.msk [vmem:[%s23521_s3 + $0x270] sm:$0xff] %vm15_vm3, %v1029_v57  ;;  %v15954_v56 = vld [vmem:[%s23520_s0 + $0xd0] sm:$0xff]  }
 0x15a   :  { %v772_v2 = vpop.f32.mrf.mxu0  ;;  %v940_v3 = vpop.f32.mrf.mxu1 }
 0x15b   :  { %v988_v5 = vadd.f32 %v772_v2, %v216_v58  ;;  %v1030_v6 = vadd.f32 %v940_v3, %v258_v62  ;;  %v1697_v62 = vor.u32 %v1695_v48, %v1693_v36  ;;  %v2879_v2 = vrot.slane %v15954_v56, 1  ;;  %v13931_v3 = vld [vmem:[%s23520_s0 + $0xe0] sm:$0xff]  }
 0x15c   :  { %v12414_v10 = vpop.f32.mrf.mxu0  ;;  %v12498_v11 = vpop.f32.mrf.mxu1  ;;  %v1707_v15 = vshll.u32 %v13931_v3, 16  ;;  %v1711_v36 = vshrl.u32 %v13931_v3, 16  ;;  %v16091_v3 = vld [vmem:[%s23520_s0 + $0xe8] sm:$0xff]  }
 0x15d   :  { %1069 = vst.msk [vmem:[%s23521_s3 + $0x128] sm:$0xff] %vm15_vm3, %v988_v5  ;;  %1111 = vst.msk [vmem:[%s23521_s3 + $0x278] sm:$0xff] %vm15_vm3, %v1030_v6  ;;  %v1702_v11 = vsel %vm1482_vm4, %v1697_v62, %v1701_v63  ;;  %v2880_v13 = vsel %vm2827_vm5, %v2877_v37, %v2879_v2  ;;  %v1715_v37 = vshll.u32 %v16014_v24, 16 }
 0x15e   :  { %v777_v16 = vpop.f32.mrf.mxu0  ;;  %v945_v17 = vpop.f32.mrf.mxu1  ;;  %12598 = vmatmul.mubr.msk.bf16.gmra.mxu1 %vm463_vm2, %v1678_v4  ;;  %12760 = vmatmul.mubr.msk.bf16.gmra.mxu0 %vm463_vm2, %v2874_v8  ;;  %v1199_v8 = vld [vmem:[%s23521_s3 + $0x18] sm:$0xff] }
 0x15f   :  { %v989_v18 = vadd.f32 %v777_v16, %v217_v7  ;;  %v1031_v19 = vadd.f32 %v945_v17, %v259_v12  ;;  %12601 = vmatprep.mubr.msk.bf16.mxu1 %vm14207_vm1, %v14206_v0  ;;  %12763 = vmatprep.mubr.msk.bf16.mxu0 %vm14207_vm1, %v14206_v0  ;;  %v15997_v16 = vld [vmem:[%s23520_s0 + $0xd8] sm:$0xff]  }
 0x160   :  { %v12417_v21 = vpop.f32.mrf.mxu0  ;;  %v12501_v22 = vpop.f32.mrf.mxu1 }
 0x161   :  { %1070 = vst.msk [vmem:[%s23521_s3 + $0x130] sm:$0xff] %vm15_vm3, %v989_v18  ;;  %1112 = vst.msk [vmem:[%s23521_s3 + $0x280] sm:$0xff] %vm15_vm3, %v1031_v19  ;;  %v1200_v21 = vld [vmem:[%s23521_s3 + $0x20] sm:$0xff] }
 0x162   :  { %v780_v26 = vpop.f32.mrf.mxu0  ;;  %v948_v27 = vpop.f32.mrf.mxu1 }
 0x163   :  { %v990_v28 = vadd.f32 %v780_v26, %v218_v23  ;;  %v1705_v26 = vor.u32 %v1703_v14, %v1701_v63  ;;  %v1709_v27 = vrot.slane %v1707_v15, 1  ;;  %v2885_v15 = vrot.slane %v16091_v3, 1 }
 0x164   :  { %v12418_v32 = vpop.f32.mrf.mxu0  ;;  %v12502_v33 = vpop.f32.mrf.mxu1 }
 0x165   :  { %1071 = vst.msk [vmem:[%s23521_s3 + $0x138] sm:$0xff] %vm15_vm3, %v990_v28  ;;  %v2881_v28 = vrot.slane %v15997_v16, 1  ;;  %v1201_v33 = vld [vmem:[%s23521_s3 + $0x28] sm:$0xff]  ;;  %v1713_v49 = vor.u32 %v1711_v36, %v1709_v27 }
 0x166   :  { %v785_v39 = vpop.f32.mrf.mxu0  ;;  %v1970_v40 = vpop.f32.mrf.mxu1  ;;  %12602 = vmatmul.mubr.msk.bf16.gmra.mxu1 %vm463_vm2, %v1686_v29  ;;  %12764 = vmatmul.mubr.msk.bf16.gmra.mxu0 %vm463_vm2, %v2876_v30 }
 0x167   :  { %v991_v41 = vadd.f32 %v785_v39, %v219_v34  ;;  %v2296_v42 = vadd.f32 %v1970_v40, %v1196_v35  ;;  %12605 = vmatprep.mubr.msk.bf16.mxu1 %vm14207_vm1, %v14206_v0  ;;  %12767 = vmatprep.mubr.msk.bf16.mxu0 %vm14207_vm1, %v14206_v0  ;;  %v1710_v39 = vsel %vm1482_vm4, %v1705_v26, %v1709_v27 }
 0x168   :  { %v12421_v44 = vpop.f32.mrf.mxu0  ;;  %v12507_v45 = vpop.f32.mrf.mxu1  ;;  %v2882_v40 = vsel %vm2827_vm5, %v2879_v2, %v2881_v28 }
 0x169   :  { %1072 = vst.msk [vmem:[%s23521_s3 + $0x140] sm:$0xff] %vm15_vm3, %v991_v41  ;;  %2377 = vst.msk [vmem:[%s23521_s3] sm:$0xff] %vm15_vm3, %v2296_v42  ;;  %v16045_v41 = vld [vmem:[%s23520_s0 + $0xe0] sm:$0xff]  }
 0x16a   :  { %v788_v50 = vpop.f32.mrf.mxu0  ;;  %v1973_v51 = vpop.f32.mrf.mxu1 }
 0x16b   :  { %v992_v52 = vadd.f32 %v788_v50, %v220_v46  ;;  %v2297_v53 = vadd.f32 %v1973_v51, %v1197_v47  ;;  %v1202_v46 = vld [vmem:[%s23521_s3 + $0x30] sm:$0xff]  ;;  %v1717_v50 = vrot.slane %v1715_v37, 1 }
 0x16c   :  { %v12422_v57 = vpop.f32.mrf.mxu0  ;;  %v12508_v58 = vpop.f32.mrf.mxu1 }
 0x16d   :  { %1073 = vst.msk [vmem:[%s23521_s3 + $0x148] sm:$0xff] %vm15_vm3, %v992_v52  ;;  %2378 = vst.msk [vmem:[%s23521_s3 + $0x8] sm:$0xff] %vm15_vm3, %v2297_v53  ;;  %v2883_v52 = vrot.slane %v16045_v41, 1  ;;  %v13935_v53 = vld [vmem:[%s23520_s0 + $0xf0] sm:$0xff]   ;;  %v1203_v58 = vld [vmem:[%s23521_s3 + $0x38] sm:$0xff] }
 0x16e   :  { %v1978_v60 = vpop.f32.mrf.mxu1  ;;  %12606 = vmatmul.mubr.msk.bf16.gmra.mxu1 %vm463_vm2, %v1694_v54  ;;  %v3069_v61 = vpop.f32.mrf.mxu0  ;;  %12768 = vmatmul.mubr.msk.bf16.gmra.mxu0 %vm463_vm2, %v2878_v55  ;;  %v1723_v2 = vshll.u32 %v13935_v53, 16 }
 0x16f   :  { %v2298_v1 = vadd.f32 %v1978_v60, %v1198_v59  ;;  %12609 = vmatprep.mubr.msk.bf16.mxu1 %vm14207_vm1, %v14206_v0  ;;  %12771 = vmatprep.mubr.msk.bf16.mxu0 %vm14207_vm1, %v14206_v0  ;;  %v2884_v63 = vsel %vm2827_vm5, %v2881_v28, %v2883_v52  ;;  %v2886_v27 = vsel %vm2827_vm5, %v2883_v52, %v2885_v15  ;;  %v16139_v28 = vld [vmem:[%s23520_s0 + $0xf0] sm:$0xff]  }
 0x170   :  { %v2541_v4 = vld [vmem:[%s23521_s3] sm:$0xff]  ;;  %v12511_v5 = vpop.f32.mrf.mxu1  ;;  %v12673_v6 = vpop.f32.mrf.mxu0  ;;  %v1725_v14 = vrot.slane %v1723_v2, 1 }
 0x171   :  { %2379 = vst.msk [vmem:[%s23521_s3 + $0x10] sm:$0xff] %vm15_vm3, %v2298_v1  ;;  %v3395_v7 = vadd.f32 %v3069_v61, %v2541_v4  ;;  %v1718_v61 = vsel %vm1482_vm4, %v1713_v49, %v1717_v50  ;;  %v1719_v1 = vshrl.u32 %v16014_v24, 16 }
 0x172   :  { %v1981_v9 = vpop.f32.mrf.mxu1  ;;  %v3072_v10 = vpop.f32.mrf.mxu0 }
 0x173   :  { %3476 = vst.msk [vmem:[%s23521_s3] sm:$0xff] %vm15_vm3, %v3395_v7  ;;  %v2299_v12 = vadd.f32 %v1981_v9, %v1199_v8  ;;  %v1204_v8 = vld [vmem:[%s23521_s3 + $0x40] sm:$0xff] }
 0x174   :  { %v2542_v17 = vld [vmem:[%s23521_s3 + $0x8] sm:$0xff]  ;;  %v12512_v18 = vpop.f32.mrf.mxu1  ;;  %v12674_v19 = vpop.f32.mrf.mxu0 }
 0x175   :  { %2380 = vst.msk [vmem:[%s23521_s3 + $0x18] sm:$0xff] %vm15_vm3, %v2299_v12  ;;  %v3396_v20 = vadd.f32 %v3072_v10, %v2542_v17 }
 0x176   :  { %v1986_v22 = vpop.f32.mrf.mxu1  ;;  %12610 = vmatmul.mubr.msk.bf16.gmra.mxu1 %vm463_vm2, %v1702_v11  ;;  %v3077_v23 = vpop.f32.mrf.mxu0  ;;  %12772 = vmatmul.mubr.msk.bf16.gmra.mxu0 %vm463_vm2, %v2880_v13  ;;  %v16108_v11 = vld [vmem:[%s23520_s0 + $0xf8] sm:$0xff]   ;;  %v1721_v13 = vor.u32 %v1719_v1, %v1717_v50 }
 0x177   :  { %3477 = vst.msk [vmem:[%s23521_s3 + $0x8] sm:$0xff] %vm15_vm3, %v3396_v20  ;;  %v2300_v25 = vadd.f32 %v1986_v22, %v1200_v21  ;;  %12613 = vmatprep.mubr.msk.bf16.mxu1 %vm14207_vm1, %v14206_v0  ;;  %12775 = vmatprep.mubr.msk.bf16.mxu0 %vm14207_vm1, %v14206_v0  ;;  %v1205_v20 = vld [vmem:[%s23521_s3 + $0x48] sm:$0xff]  ;;  %v1731_v24 = vshll.u32 %v16108_v11, 16 }
 0x178   :  { %v2543_v29 = vld [vmem:[%s23521_s3 + $0x10] sm:$0xff]  ;;  %v12515_v30 = vpop.f32.mrf.mxu1  ;;  %v12677_v31 = vpop.f32.mrf.mxu0  ;;  %v1726_v26 = vsel %vm1482_vm4, %v1721_v13, %v1725_v14 }
 0x179   :  { %2381 = vst.msk [vmem:[%s23521_s3 + $0x20] sm:$0xff] %vm15_vm3, %v2300_v25  ;;  %v3397_v32 = vadd.f32 %v3077_v23, %v2543_v29  ;;  %v1727_v23 = vshrl.u32 %v13935_v53, 16  ;;  %v1733_v37 = vrot.slane %v1731_v24, 1  ;;  %v16185_v53 = vld [vmem:[%s23520_s0 + $0xf8] sm:$0xff]  }
 0x17a   :  { %v1989_v34 = vpop.f32.mrf.mxu1  ;;  %v3080_v35 = vpop.f32.mrf.mxu0  ;;  %v2889_v2 = vrot.slane %v16185_v53, 1 }
 0x17b   :  { %3478 = vst.msk [vmem:[%s23521_s3 + $0x10] sm:$0xff] %vm15_vm3, %v3397_v32  ;;  %v2301_v38 = vadd.f32 %v1989_v34, %v1201_v33  ;;  %v1206_v33 = vld [vmem:[%s23521_s3 + $0x50] sm:$0xff]  ;;  %v1729_v36 = vor.u32 %v1727_v23, %v1725_v14 }
 0x17c   :  { %v2544_v42 = vld [vmem:[%s23521_s3 + $0x18] sm:$0xff]  ;;  %v12516_v43 = vpop.f32.mrf.mxu1  ;;  %v12678_v44 = vpop.f32.mrf.mxu0 }
 0x17d   :  { %2382 = vst.msk [vmem:[%s23521_s3 + $0x28] sm:$0xff] %vm15_vm3, %v2301_v38  ;;  %v3398_v45 = vadd.f32 %v3080_v35, %v2544_v42 }
 0x17e   :  { %v1994_v47 = vpop.f32.mrf.mxu1  ;;  %12614 = vmatmul.mubr.msk.bf16.gmra.mxu1 %vm463_vm2, %v1710_v39  ;;  %v3085_v48 = vpop.f32.mrf.mxu0  ;;  %12776 = vmatmul.mubr.msk.bf16.gmra.mxu0 %vm463_vm2, %v2882_v40  ;;  %v2887_v39 = vrot.slane %v16139_v28, 1  ;;  %v13939_v40 = vld [vmem:[%s23520_s0 + $0x100] sm:$0xff]  }
 0x17f   :  { %3479 = vst.msk [vmem:[%s23521_s3 + $0x18] sm:$0xff] %vm15_vm3, %v3398_v45  ;;  %v2302_v51 = vadd.f32 %v1994_v47, %v1202_v46  ;;  %12617 = vmatprep.mubr.msk.bf16.mxu1 %vm14207_vm1, %v14206_v0  ;;  %12779 = vmatprep.mubr.msk.bf16.mxu0 %vm14207_vm1, %v14206_v0  ;;  %v1207_v45 = vld [vmem:[%s23521_s3 + $0x58] sm:$0xff]  ;;  %v1739_v52 = vshll.u32 %v13939_v40, 16 }
 0x180   :  { %v2545_v54 = vld [vmem:[%s23521_s3 + $0x20] sm:$0xff]  ;;  %v12519_v55 = vpop.f32.mrf.mxu1  ;;  %v12681_v56 = vpop.f32.mrf.mxu0  ;;  %v2888_v50 = vsel %vm2827_vm5, %v2885_v15, %v2887_v39  ;;  %v2890_v14 = vsel %vm2827_vm5, %v2887_v39, %v2889_v2 }
 0x181   :  { %2383 = vst.msk [vmem:[%s23521_s3 + $0x30] sm:$0xff] %vm15_vm3, %v2302_v51  ;;  %v3399_v57 = vadd.f32 %v3085_v48, %v2545_v54  ;;  %v1734_v48 = vsel %vm1482_vm4, %v1729_v36, %v1733_v37  ;;  %v1735_v51 = vshrl.u32 %v16108_v11, 16  ;;  %v1741_v1 = vrot.slane %v1739_v52, 1  ;;  %v16233_v15 = vld [vmem:[%s23520_s0 + $0x100] sm:$0xff]  }
 0x182   :  { %v1997_v59 = vpop.f32.mrf.mxu1  ;;  %v3088_v60 = vpop.f32.mrf.mxu0 }
 0x183   :  { %3480 = vst.msk [vmem:[%s23521_s3 + $0x20] sm:$0xff] %vm15_vm3, %v3399_v57  ;;  %v2303_v62 = vadd.f32 %v1997_v59, %v1203_v58  ;;  %v1208_v58 = vld [vmem:[%s23521_s3 + $0x60] sm:$0xff] }
 0x184   :  { %v2546_v4 = vld [vmem:[%s23521_s3 + $0x28] sm:$0xff]  ;;  %v12520_v5 = vpop.f32.mrf.mxu1  ;;  %v12682_v6 = vpop.f32.mrf.mxu0 }
 0x185   :  { %2384 = vst.msk [vmem:[%s23521_s3 + $0x38] sm:$0xff] %vm15_vm3, %v2303_v62  ;;  %v3400_v7 = vadd.f32 %v3088_v60, %v2546_v4 }
 0x186   :  { %v2002_v9 = vpop.f32.mrf.mxu1  ;;  %12618 = vmatmul.mubr.msk.bf16.gmra.mxu1 %vm463_vm2, %v1718_v61  ;;  %v3093_v10 = vpop.f32.mrf.mxu0  ;;  %12780 = vmatmul.mubr.msk.bf16.gmra.mxu0 %vm463_vm2, %v2884_v63  ;;  %v16202_v61 = vld [vmem:[%s23520_s0 + $0x108] sm:$0xff]   ;;  %v1737_v63 = vor.u32 %v1735_v51, %v1733_v37 }
 0x187   :  { %3481 = vst.msk [vmem:[%s23521_s3 + $0x28] sm:$0xff] %vm15_vm3, %v3400_v7  ;;  %v2304_v12 = vadd.f32 %v2002_v9, %v1204_v8  ;;  %12621 = vmatprep.mubr.msk.bf16.mxu1 %vm14207_vm1, %v14206_v0  ;;  %12783 = vmatprep.mubr.msk.bf16.mxu0 %vm14207_vm1, %v14206_v0  ;;  %v1209_v7 = vld [vmem:[%s23521_s3 + $0x68] sm:$0xff]  ;;  %v1747_v11 = vshll.u32 %v16202_v61, 16 }
 0x188   :  { %v2547_v16 = vld [vmem:[%s23521_s3 + $0x30] sm:$0xff]  ;;  %v12523_v17 = vpop.f32.mrf.mxu1  ;;  %v12685_v18 = vpop.f32.mrf.mxu0  ;;  %v1742_v13 = vsel %vm1482_vm4, %v1737_v63, %v1741_v1 }
 0x189   :  { %2385 = vst.msk [vmem:[%s23521_s3 + $0x40] sm:$0xff] %vm15_vm3, %v2304_v12  ;;  %v3401_v19 = vadd.f32 %v3093_v10, %v2547_v16  ;;  %v1743_v10 = vshrl.u32 %v13939_v40, 16  ;;  %v1749_v24 = vrot.slane %v1747_v11, 1  ;;  %v16279_v40 = vld [vmem:[%s23520_s0 + $0x108] sm:$0xff]  }
 0x18a   :  { %v2005_v21 = vpop.f32.mrf.mxu1  ;;  %v3096_v22 = vpop.f32.mrf.mxu0  ;;  %v2893_v52 = vrot.slane %v16279_v40, 1 }
 0x18b   :  { %3482 = vst.msk [vmem:[%s23521_s3 + $0x30] sm:$0xff] %vm15_vm3, %v3401_v19  ;;  %v2305_v25 = vadd.f32 %v2005_v21, %v1205_v20  ;;  %v1210_v20 = vld [vmem:[%s23521_s3 + $0x70] sm:$0xff]  ;;  %v1745_v23 = vor.u32 %v1743_v10, %v1741_v1 }
 0x18c   :  { %v2548_v29 = vld [vmem:[%s23521_s3 + $0x38] sm:$0xff]  ;;  %v12524_v30 = vpop.f32.mrf.mxu1  ;;  %v12686_v31 = vpop.f32.mrf.mxu0 }
 0x18d   :  { %2386 = vst.msk [vmem:[%s23521_s3 + $0x48] sm:$0xff] %vm15_vm3, %v2305_v25  ;;  %v3402_v32 = vadd.f32 %v3096_v22, %v2548_v29 }
 0x18e   :  { %v2010_v34 = vpop.f32.mrf.mxu1  ;;  %12622 = vmatmul.mubr.msk.bf16.gmra.mxu1 %vm463_vm2, %v1726_v26  ;;  %v3101_v35 = vpop.f32.mrf.mxu0  ;;  %12784 = vmatmul.mubr.msk.bf16.gmra.mxu0 %vm463_vm2, %v2886_v27  ;;  %v2891_v26 = vrot.slane %v16233_v15, 1  ;;  %v13943_v27 = vld [vmem:[%s23520_s0 + $0x110] sm:$0xff]  }
 0x18f   :  { %3483 = vst.msk [vmem:[%s23521_s3 + $0x38] sm:$0xff] %vm15_vm3, %v3402_v32  ;;  %v2306_v38 = vadd.f32 %v2010_v34, %v1206_v33  ;;  %12625 = vmatprep.mubr.msk.bf16.mxu1 %vm14207_vm1, %v14206_v0  ;;  %12787 = vmatprep.mubr.msk.bf16.mxu0 %vm14207_vm1, %v14206_v0  ;;  %v1211_v32 = vld [vmem:[%s23521_s3 + $0x78] sm:$0xff]  ;;  %v1755_v39 = vshll.u32 %v13943_v27, 16 }
 0x190   :  { %v2549_v41 = vld [vmem:[%s23521_s3 + $0x40] sm:$0xff]  ;;  %v12527_v42 = vpop.f32.mrf.mxu1  ;;  %v12689_v43 = vpop.f32.mrf.mxu0  ;;  %v2892_v37 = vsel %vm2827_vm5, %v2889_v2, %v2891_v26  ;;  %v2894_v1 = vsel %vm2827_vm5, %v2891_v26, %v2893_v52  ;;  %v16327_v2 = vld [vmem:[%s23520_s0 + $0x110] sm:$0xff]  }
 0x191   :  { %2387 = vst.msk [vmem:[%s23521_s3 + $0x50] sm:$0xff] %vm15_vm3, %v2306_v38  ;;  %v3403_v44 = vadd.f32 %v3101_v35, %v2549_v41  ;;  %v1750_v35 = vsel %vm1482_vm4, %v1745_v23, %v1749_v24  ;;  %v1751_v38 = vshrl.u32 %v16202_v61, 16  ;;  %v1757_v51 = vrot.slane %v1755_v39, 1 }
 0x192   :  { %v2013_v46 = vpop.f32.mrf.mxu1  ;;  %v3104_v47 = vpop.f32.mrf.mxu0 }
 0x193   :  { %3484 = vst.msk [vmem:[%s23521_s3 + $0x40] sm:$0xff] %vm15_vm3, %v3403_v44  ;;  %v2307_v49 = vadd.f32 %v2013_v46, %v1207_v45  ;;  %v1212_v45 = vld [vmem:[%s23521_s3 + $0x80] sm:$0xff] }
 0x194   :  { %v2550_v54 = vld [vmem:[%s23521_s3 + $0x48] sm:$0xff]  ;;  %v12528_v55 = vpop.f32.mrf.mxu1  ;;  %v12690_v56 = vpop.f32.mrf.mxu0 }
 0x195   :  { %2388 = vst.msk [vmem:[%s23521_s3 + $0x58] sm:$0xff] %vm15_vm3, %v2307_v49  ;;  %v3404_v57 = vadd.f32 %v3104_v47, %v2550_v54 }
 0x196   :  { %v2018_v59 = vpop.f32.mrf.mxu1  ;;  %12626 = vmatmul.mubr.msk.bf16.gmra.mxu1 %vm463_vm2, %v1734_v48  ;;  %v3109_v60 = vpop.f32.mrf.mxu0  ;;  %12788 = vmatmul.mubr.msk.bf16.gmra.mxu0 %vm463_vm2, %v2888_v50  ;;  %v16296_v48 = vld [vmem:[%s23520_s0 + $0x118] sm:$0xff]   ;;  %v1753_v50 = vor.u32 %v1751_v38, %v1749_v24 }
 0x197   :  { %3485 = vst.msk [vmem:[%s23521_s3 + $0x48] sm:$0xff] %vm15_vm3, %v3404_v57  ;;  %v2308_v62 = vadd.f32 %v2018_v59, %v1208_v58  ;;  %12629 = vmatprep.mubr.msk.bf16.mxu1 %vm14207_vm1, %v14206_v0  ;;  %12791 = vmatprep.mubr.msk.bf16.mxu0 %vm14207_vm1, %v14206_v0  ;;  %v1213_v57 = vld [vmem:[%s23521_s3 + $0x88] sm:$0xff]  ;;  %v1763_v61 = vshll.u32 %v16296_v48, 16 }
 0x198   :  { %v2551_v3 = vld [vmem:[%s23521_s3 + $0x50] sm:$0xff]  ;;  %v12531_v4 = vpop.f32.mrf.mxu1  ;;  %v12693_v5 = vpop.f32.mrf.mxu0  ;;  %v1758_v63 = vsel %vm1482_vm4, %v1753_v50, %v1757_v51 }
 0x199   :  { %2389 = vst.msk [vmem:[%s23521_s3 + $0x60] sm:$0xff] %vm15_vm3, %v2308_v62  ;;  %v3405_v6 = vadd.f32 %v3109_v60, %v2551_v3  ;;  %v1759_v60 = vshrl.u32 %v13943_v27, 16  ;;  %v1765_v11 = vrot.slane %v1763_v61, 1  ;;  %v16373_v27 = vld [vmem:[%s23520_s0 + $0x118] sm:$0xff]  }
 0x19a   :  { %v2021_v8 = vpop.f32.mrf.mxu1  ;;  %v3112_v9 = vpop.f32.mrf.mxu0  ;;  %v2897_v39 = vrot.slane %v16373_v27, 1 }
 0x19b   :  { %3486 = vst.msk [vmem:[%s23521_s3 + $0x50] sm:$0xff] %vm15_vm3, %v3405_v6  ;;  %v2309_v12 = vadd.f32 %v2021_v8, %v1209_v7  ;;  %v1214_v7 = vld [vmem:[%s23521_s3 + $0x90] sm:$0xff]  ;;  %v1761_v10 = vor.u32 %v1759_v60, %v1757_v51 }
 0x19c   :  { %v2552_v16 = vld [vmem:[%s23521_s3 + $0x58] sm:$0xff]  ;;  %v12532_v17 = vpop.f32.mrf.mxu1  ;;  %v12694_v18 = vpop.f32.mrf.mxu0 }
 0x19d   :  { %2390 = vst.msk [vmem:[%s23521_s3 + $0x68] sm:$0xff] %vm15_vm3, %v2309_v12  ;;  %v3406_v19 = vadd.f32 %v3112_v9, %v2552_v16 }
 0x19e   :  { %v2026_v21 = vpop.f32.mrf.mxu1  ;;  %12630 = vmatmul.mubr.msk.bf16.gmra.mxu1 %vm463_vm2, %v1742_v13  ;;  %v3117_v22 = vpop.f32.mrf.mxu0  ;;  %12792 = vmatmul.mubr.msk.bf16.gmra.mxu0 %vm463_vm2, %v2890_v14  ;;  %v2895_v13 = vrot.slane %v16327_v2, 1  ;;  %v13947_v14 = vld [vmem:[%s23520_s0 + $0x120] sm:$0xff]  }
 0x19f   :  { %3487 = vst.msk [vmem:[%s23521_s3 + $0x58] sm:$0xff] %vm15_vm3, %v3406_v19  ;;  %v2310_v25 = vadd.f32 %v2026_v21, %v1210_v20  ;;  %12633 = vmatprep.mubr.msk.bf16.mxu1 %vm14207_vm1, %v14206_v0  ;;  %12795 = vmatprep.mubr.msk.bf16.mxu0 %vm14207_vm1, %v14206_v0  ;;  %v1215_v19 = vld [vmem:[%s23521_s3 + $0x98] sm:$0xff]  ;;  %v1771_v26 = vshll.u32 %v13947_v14, 16 }
 0x1a0   :  { %v2553_v28 = vld [vmem:[%s23521_s3 + $0x60] sm:$0xff]  ;;  %v12535_v29 = vpop.f32.mrf.mxu1  ;;  %v12697_v30 = vpop.f32.mrf.mxu0  ;;  %v2896_v24 = vsel %vm2827_vm5, %v2893_v52, %v2895_v13  ;;  %v2898_v51 = vsel %vm2827_vm5, %v2895_v13, %v2897_v39 }
 0x1a1   :  { %2391 = vst.msk [vmem:[%s23521_s3 + $0x70] sm:$0xff] %vm15_vm3, %v2310_v25  ;;  %v3407_v31 = vadd.f32 %v3117_v22, %v2553_v28  ;;  %v1766_v22 = vsel %vm1482_vm4, %v1761_v10, %v1765_v11  ;;  %v1767_v25 = vshrl.u32 %v16296_v48, 16  ;;  %v1773_v38 = vrot.slane %v1771_v26, 1  ;;  %v16421_v52 = vld [vmem:[%s23520_s0 + $0x120] sm:$0xff]  }
 0x1a2   :  { %v2029_v33 = vpop.f32.mrf.mxu1  ;;  %v3120_v34 = vpop.f32.mrf.mxu0 }
 0x1a3   :  { %3488 = vst.msk [vmem:[%s23521_s3 + $0x60] sm:$0xff] %vm15_vm3, %v3407_v31  ;;  %v2311_v36 = vadd.f32 %v2029_v33, %v1211_v32  ;;  %v1216_v32 = vld [vmem:[%s23521_s3 + $0xa0] sm:$0xff] }
 0x1a4   :  { %v2554_v41 = vld [vmem:[%s23521_s3 + $0x68] sm:$0xff]  ;;  %v12536_v42 = vpop.f32.mrf.mxu1  ;;  %v12698_v43 = vpop.f32.mrf.mxu0 }
 0x1a5   :  { %2392 = vst.msk [vmem:[%s23521_s3 + $0x78] sm:$0xff] %vm15_vm3, %v2311_v36  ;;  %v3408_v44 = vadd.f32 %v3120_v34, %v2554_v41 }
 0x1a6   :  { %v2034_v46 = vpop.f32.mrf.mxu1  ;;  %12634 = vmatmul.mubr.msk.bf16.gmra.mxu1 %vm463_vm2, %v1750_v35  ;;  %v3125_v47 = vpop.f32.mrf.mxu0  ;;  %12796 = vmatmul.mubr.msk.bf16.gmra.mxu0 %vm463_vm2, %v2892_v37  ;;  %v16390_v35 = vld [vmem:[%s23520_s0 + $0x128] sm:$0xff]   ;;  %v1769_v37 = vor.u32 %v1767_v25, %v1765_v11 }
 0x1a7   :  { %3489 = vst.msk [vmem:[%s23521_s3 + $0x68] sm:$0xff] %vm15_vm3, %v3408_v44  ;;  %v2312_v49 = vadd.f32 %v2034_v46, %v1212_v45  ;;  %12637 = vmatprep.mubr.msk.bf16.mxu1 %vm14207_vm1, %v14206_v0  ;;  %12799 = vmatprep.mubr.msk.bf16.mxu0 %vm14207_vm1, %v14206_v0  ;;  %v1217_v44 = vld [vmem:[%s23521_s3 + $0xa8] sm:$0xff]  ;;  %v1779_v48 = vshll.u32 %v16390_v35, 16 }
 0x1a8   :  { %v2555_v53 = vld [vmem:[%s23521_s3 + $0x70] sm:$0xff]  ;;  %v12539_v54 = vpop.f32.mrf.mxu1  ;;  %v12701_v55 = vpop.f32.mrf.mxu0  ;;  %v1774_v50 = vsel %vm1482_vm4, %v1769_v37, %v1773_v38 }
 0x1a9   :  { %2393 = vst.msk [vmem:[%s23521_s3 + $0x80] sm:$0xff] %vm15_vm3, %v2312_v49  ;;  %v3409_v56 = vadd.f32 %v3125_v47, %v2555_v53  ;;  %v1775_v47 = vshrl.u32 %v13947_v14, 16  ;;  %v1781_v61 = vrot.slane %v1779_v48, 1  ;;  %v16467_v14 = vld [vmem:[%s23520_s0 + $0x128] sm:$0xff]  }
 0x1aa   :  { %v2037_v58 = vpop.f32.mrf.mxu1  ;;  %v3128_v59 = vpop.f32.mrf.mxu0  ;;  %v2901_v26 = vrot.slane %v16467_v14, 1 }
 0x1ab   :  { %3490 = vst.msk [vmem:[%s23521_s3 + $0x70] sm:$0xff] %vm15_vm3, %v3409_v56  ;;  %v2313_v62 = vadd.f32 %v2037_v58, %v1213_v57  ;;  %v1218_v57 = vld [vmem:[%s23521_s3 + $0xb0] sm:$0xff]  ;;  %v1777_v60 = vor.u32 %v1775_v47, %v1773_v38 }
 0x1ac   :  { %v2556_v3 = vld [vmem:[%s23521_s3 + $0x78] sm:$0xff]  ;;  %v12540_v4 = vpop.f32.mrf.mxu1  ;;  %v12702_v5 = vpop.f32.mrf.mxu0 }
 0x1ad   :  { %2394 = vst.msk [vmem:[%s23521_s3 + $0x88] sm:$0xff] %vm15_vm3, %v2313_v62  ;;  %v3410_v6 = vadd.f32 %v3128_v59, %v2556_v3 }
 0x1ae   :  { %v2042_v8 = vpop.f32.mrf.mxu1  ;;  %12638 = vmatmul.mubr.msk.bf16.gmra.mxu1 %vm463_vm2, %v1758_v63  ;;  %v3133_v9 = vpop.f32.mrf.mxu0  ;;  %12800 = vmatmul.mubr.msk.bf16.gmra.mxu0 %vm463_vm2, %v2894_v1  ;;  %v2899_v63 = vrot.slane %v16421_v52, 1  ;;  %v13951_v1 = vld [vmem:[%s23520_s0 + $0x130] sm:$0xff]  }
 0x1af   :  { %3491 = vst.msk [vmem:[%s23521_s3 + $0x78] sm:$0xff] %vm15_vm3, %v3410_v6  ;;  %v2314_v12 = vadd.f32 %v2042_v8, %v1214_v7  ;;  %12641 = vmatprep.mubr.msk.bf16.mxu1 %vm14207_vm1, %v14206_v0  ;;  %12803 = vmatprep.mubr.msk.bf16.mxu0 %vm14207_vm1, %v14206_v0  ;;  %v1219_v6 = vld [vmem:[%s23521_s3 + $0xb8] sm:$0xff]  ;;  %v1787_v13 = vshll.u32 %v13951_v1, 16 }
 0x1b0   :  { %v2557_v15 = vld [vmem:[%s23521_s3 + $0x80] sm:$0xff]  ;;  %v12543_v16 = vpop.f32.mrf.mxu1  ;;  %v12705_v17 = vpop.f32.mrf.mxu0  ;;  %v2900_v11 = vsel %vm2827_vm5, %v2897_v39, %v2899_v63  ;;  %v2902_v38 = vsel %vm2827_vm5, %v2899_v63, %v2901_v26  ;;  %v16515_v39 = vld [vmem:[%s23520_s0 + $0x130] sm:$0xff]  }
 0x1b1   :  { %2395 = vst.msk [vmem:[%s23521_s3 + $0x90] sm:$0xff] %vm15_vm3, %v2314_v12  ;;  %v3411_v18 = vadd.f32 %v3133_v9, %v2557_v15  ;;  %v1782_v9 = vsel %vm1482_vm4, %v1777_v60, %v1781_v61  ;;  %v1783_v12 = vshrl.u32 %v16390_v35, 16  ;;  %v1789_v25 = vrot.slane %v1787_v13, 1 }
 0x1b2   :  { %v2045_v20 = vpop.f32.mrf.mxu1  ;;  %v3136_v21 = vpop.f32.mrf.mxu0 }
 0x1b3   :  { %3492 = vst.msk [vmem:[%s23521_s3 + $0x80] sm:$0xff] %vm15_vm3, %v3411_v18  ;;  %v2315_v23 = vadd.f32 %v2045_v20, %v1215_v19  ;;  %v1220_v19 = vld [vmem:[%s23521_s3 + $0xc0] sm:$0xff] }
 0x1b4   :  { %v2558_v28 = vld [vmem:[%s23521_s3 + $0x88] sm:$0xff]  ;;  %v12544_v29 = vpop.f32.mrf.mxu1  ;;  %v12706_v30 = vpop.f32.mrf.mxu0 }
 0x1b5   :  { %2396 = vst.msk [vmem:[%s23521_s3 + $0x98] sm:$0xff] %vm15_vm3, %v2315_v23  ;;  %v3412_v31 = vadd.f32 %v3136_v21, %v2558_v28 }
 0x1b6   :  { %v2050_v33 = vpop.f32.mrf.mxu1  ;;  %12642 = vmatmul.mubr.msk.bf16.gmra.mxu1 %vm463_vm2, %v1766_v22  ;;  %v3141_v34 = vpop.f32.mrf.mxu0  ;;  %12804 = vmatmul.mubr.msk.bf16.gmra.mxu0 %vm463_vm2, %v2896_v24  ;;  %v16484_v22 = vld [vmem:[%s23520_s0 + $0x138] sm:$0xff]   ;;  %v1785_v24 = vor.u32 %v1783_v12, %v1781_v61 }
 0x1b7   :  { %3493 = vst.msk [vmem:[%s23521_s3 + $0x88] sm:$0xff] %vm15_vm3, %v3412_v31  ;;  %v2316_v36 = vadd.f32 %v2050_v33, %v1216_v32  ;;  %12645 = vmatprep.mubr.msk.bf16.mxu1 %vm14207_vm1, %v14206_v0  ;;  %12807 = vmatprep.mubr.msk.bf16.mxu0 %vm14207_vm1, %v14206_v0  ;;  %v1221_v31 = vld [vmem:[%s23521_s3 + $0xc8] sm:$0xff]  ;;  %v1795_v35 = vshll.u32 %v16484_v22, 16 }
 0x1b8   :  { %v2559_v40 = vld [vmem:[%s23521_s3 + $0x90] sm:$0xff]  ;;  %v12547_v41 = vpop.f32.mrf.mxu1  ;;  %v12709_v42 = vpop.f32.mrf.mxu0  ;;  %v1790_v37 = vsel %vm1482_vm4, %v1785_v24, %v1789_v25 }
 0x1b9   :  { %2397 = vst.msk [vmem:[%s23521_s3 + $0xa0] sm:$0xff] %vm15_vm3, %v2316_v36  ;;  %v3413_v43 = vadd.f32 %v3141_v34, %v2559_v40  ;;  %v1791_v34 = vshrl.u32 %v13951_v1, 16  ;;  %v1797_v48 = vrot.slane %v1795_v35, 1  ;;  %v13956_v1 = vld [vmem:[%s23520_s0 + $0x138] sm:$0xff]  }
 0x1ba   :  { %v2053_v45 = vpop.f32.mrf.mxu1  ;;  %v3144_v46 = vpop.f32.mrf.mxu0  ;;  %v2905_v12 = vrot.slane %v13956_v1, 1 }
 0x1bb   :  { %3494 = vst.msk [vmem:[%s23521_s3 + $0x90] sm:$0xff] %vm15_vm3, %v3413_v43  ;;  %v2317_v49 = vadd.f32 %v2053_v45, %v1217_v44  ;;  %v1222_v44 = vld [vmem:[%s23521_s3 + $0xd0] sm:$0xff]  ;;  %v1793_v47 = vor.u32 %v1791_v34, %v1789_v25 }
 0x1bc   :  { %v2560_v53 = vld [vmem:[%s23521_s3 + $0x98] sm:$0xff]  ;;  %v12548_v54 = vpop.f32.mrf.mxu1  ;;  %v12710_v55 = vpop.f32.mrf.mxu0 }
 0x1bd   :  { %2398 = vst.msk [vmem:[%s23521_s3 + $0xa8] sm:$0xff] %vm15_vm3, %v2317_v49  ;;  %v3414_v56 = vadd.f32 %v3144_v46, %v2560_v53 }
 0x1be   :  { %v2058_v58 = vpop.f32.mrf.mxu1  ;;  %12646 = vmatmul.mubr.msk.bf16.gmra.mxu1 %vm463_vm2, %v1774_v50  ;;  %v3149_v59 = vpop.f32.mrf.mxu0  ;;  %12808 = vmatmul.mubr.msk.bf16.gmra.mxu0 %vm463_vm2, %v2898_v51  ;;  %v2903_v50 = vrot.slane %v16515_v39, 1  ;;  %v16541_v51 = vld [vmem:[%s23520_s0 + $0x140] sm:$0x1f]  }
 0x1bf   :  { %3495 = vst.msk [vmem:[%s23521_s3 + $0x98] sm:$0xff] %vm15_vm3, %v3414_v56  ;;  %v2318_v62 = vadd.f32 %v2058_v58, %v1218_v57  ;;  %12649 = vmatprep.mubr.msk.bf16.mxu1 %vm14207_vm1, %v14206_v0  ;;  %12811 = vmatprep.mubr.msk.bf16.mxu0 %vm14207_vm1, %v14206_v0  ;;  %v1223_v56 = vld [vmem:[%s23521_s3 + $0xd8] sm:$0xff]  ;;  %v1803_v63 = vshll.u32 %v16541_v51, 16 }
 0x1c0   :  { %v2561_v2 = vld [vmem:[%s23521_s3 + $0xa0] sm:$0xff]  ;;  %v12551_v3 = vpop.f32.mrf.mxu1  ;;  %v12713_v4 = vpop.f32.mrf.mxu0  ;;  %v2904_v61 = vsel %vm2827_vm5, %v2901_v26, %v2903_v50 }
 0x1c1   :  { %2399 = vst.msk [vmem:[%s23521_s3 + $0xb0] sm:$0xff] %vm15_vm3, %v2318_v62  ;;  %v3415_v5 = vadd.f32 %v3149_v59, %v2561_v2  ;;  %v1798_v59 = vsel %vm1482_vm4, %v1793_v47, %v1797_v48  ;;  %v1799_v62 = vshrl.u32 %v16484_v22, 16  ;;  %v2906_v22 = vsel %vm2827_vm5, %v2903_v50, %v2905_v12  ;;  %v13962_v47 = vld [vmem:[%s23520_s0 + $0x10] sm:$0xff]  }
 0x1c2   :  { %v2061_v7 = vpop.f32.mrf.mxu1  ;;  %v3152_v8 = vpop.f32.mrf.mxu0 }
 0x1c3   :  { %3496 = vst.msk [vmem:[%s23521_s3 + $0xa0] sm:$0xff] %vm15_vm3, %v3415_v5  ;;  %v2319_v10 = vadd.f32 %v2061_v7, %v1219_v6  ;;  %v1224_v6 = vld [vmem:[%s23521_s3 + $0xe0] sm:$0xff] }
 0x1c4   :  { %v2562_v15 = vld [vmem:[%s23521_s3 + $0xa8] sm:$0xff]  ;;  %v12552_v16 = vpop.f32.mrf.mxu1  ;;  %v12714_v17 = vpop.f32.mrf.mxu0 }
 0x1c5   :  { %2400 = vst.msk [vmem:[%s23521_s3 + $0xb8] sm:$0xff] %vm15_vm3, %v2319_v10  ;;  %v3416_v18 = vadd.f32 %v3152_v8, %v2562_v15  ;;  %v1801_v10 = vor.u32 %v1799_v62, %v1797_v48  ;;  %v1225_v17 = vld [vmem:[%s23521_s3 + $0xe8] sm:$0xff] }
 0x1c6   :  { %v2066_v20 = vpop.f32.mrf.mxu1  ;;  %12650 = vmatmul.mubr.msk.bf16.gmra.mxu1 %vm463_vm2, %v1782_v9  ;;  %v3157_v21 = vpop.f32.mrf.mxu0  ;;  %12812 = vmatmul.mubr.msk.bf16.gmra.mxu0 %vm463_vm2, %v2900_v11  ;;  %v1805_v11 = vrot.slane %v1803_v63, 1 }
 0x1c7   :  { %3497 = vst.msk [vmem:[%s23521_s3 + $0xa8] sm:$0xff] %vm15_vm3, %v3416_v18  ;;  %v2320_v23 = vadd.f32 %v2066_v20, %v1220_v19  ;;  %12653 = vmatprep.mubr.msk.bf16.mxu1 %vm14207_vm1, %v14206_v0  ;;  %12815 = vmatprep.mubr.msk.bf16.mxu0 %vm14207_vm1, %v14206_v0 }
 0x1c8   :  { %v2563_v27 = vld [vmem:[%s23521_s3 + $0xb0] sm:$0xff]  ;;  %v12555_v28 = vpop.f32.mrf.mxu1  ;;  %v12717_v29 = vpop.f32.mrf.mxu0 }
 0x1c9   :  { %2401 = vst.msk [vmem:[%s23521_s3 + $0xc0] sm:$0xff] %vm15_vm3, %v2320_v23  ;;  %v3417_v30 = vadd.f32 %v3157_v21, %v2563_v27  ;;  %v1806_v21 = vsel %vm1482_vm4, %v1801_v10, %v1805_v11  ;;  %v16603_v23 = vld [vmem:[%s23520_s0 + $0x140] sm:$0x1f]   ;;  %v1226_v28 = vld [vmem:[%s23521_s3 + $0xf0] sm:$0xff] }
 0x1ca   :  { %v2069_v32 = vpop.f32.mrf.mxu1  ;;  %v3160_v33 = vpop.f32.mrf.mxu0 }
 0x1cb   :  { %3498 = vst.msk [vmem:[%s23521_s3 + $0xb0] sm:$0xff] %vm15_vm3, %v3417_v30  ;;  %v2321_v36 = vadd.f32 %v2069_v32, %v1221_v31  ;;  %v1807_v31 = vshrl.u32 %v16541_v51, 16 }
 0x1cc   :  { %v2564_v40 = vld [vmem:[%s23521_s3 + $0xb8] sm:$0xff]  ;;  %v12556_v41 = vpop.f32.mrf.mxu1  ;;  %v12718_v42 = vpop.f32.mrf.mxu0 }
 0x1cd   :  { %2402 = vst.msk [vmem:[%s23521_s3 + $0xc8] sm:$0xff] %vm15_vm3, %v2321_v36  ;;  %v3418_v43 = vadd.f32 %v3160_v33, %v2564_v40  ;;  %v2907_v33 = vrot.slane %v16603_v23, 1  ;;  %v1809_v41 = vor.u32 %v1807_v31, %v1805_v11  ;;  %v13958_v42 = vld [vmem:[%s23520_s0 + $0x8] sm:$0xfe]  }
 0x1ce   :  { %v2074_v45 = vpop.f32.mrf.mxu1  ;;  %12654 = vmatmul.mubr.msk.bf16.gmra.mxu1 %vm463_vm2, %v1790_v37  ;;  %v3165_v46 = vpop.f32.mrf.mxu0  ;;  %12816 = vmatmul.mubr.msk.bf16.gmra.mxu0 %vm463_vm2, %v2902_v38  ;;  %v1227_v38 = vld [vmem:[%s23521_s3 + $0xf8] sm:$0xff] }
 0x1cf   :  { %3499 = vst.msk [vmem:[%s23521_s3 + $0xb8] sm:$0xff] %vm15_vm3, %v3418_v43  ;;  %v2322_v49 = vadd.f32 %v2074_v45, %v1222_v44  ;;  %12657 = vmatprep.mubr.msk.bf16.mxu1 %vm14207_vm1, %v14206_v0  ;;  %12819 = vmatprep.mubr.msk.bf16.mxu0 %vm14207_vm1, %v14206_v0  ;;  %v13961_v43 = vld [vmem:[%s23520_s0 + $0x8] sm:$0xfe]   ;;  %v2908_v45 = vsel %vm2827_vm5, %v2905_v12, %v2907_v33 }
 0x1d0   :  { %v2565_v52 = vld [vmem:[%s23521_s3 + $0xc0] sm:$0xff]  ;;  %v12559_v53 = vpop.f32.mrf.mxu1  ;;  %v12721_v54 = vpop.f32.mrf.mxu0 }
 0x1d1   :  { %2403 = vst.msk [vmem:[%s23521_s3 + $0xd0] sm:$0xff] %vm15_vm3, %v2322_v49  ;;  %v3419_v55 = vadd.f32 %v3165_v46, %v2565_v52  ;;  %v16653_v46 = vld [vmem:[%s23520_s0 + $0x10] sm:$0xff]   ;;  %v1228_v52 = vld [vmem:[%s23521_s3 + $0x100] sm:$0xff] }
 0x1d2   :  { %v2077_v57 = vpop.f32.mrf.mxu1  ;;  %v3168_v58 = vpop.f32.mrf.mxu0 }
 0x1d3   :  { %3500 = vst.msk [vmem:[%s23521_s3 + $0xc0] sm:$0xff] %vm15_vm3, %v3419_v55  ;;  %v2323_v60 = vadd.f32 %v2077_v57, %v1223_v56  ;;  %v3926_v55 = vrot.slane %v13958_v42, 1  ;;  %v5026_v56 = vshrl.u32 %v13961_v43, 16  ;;  %v5029_v57 = vshll.u32 %v13961_v43, 16  ;;  %v13966_v43 = vld [vmem:[%s23520_s0 + $0x20] sm:$0xff]  }
 0x1d4   :  { %v2566_v2 = vld [vmem:[%s23521_s3 + $0xc8] sm:$0xff]  ;;  %v12560_v3 = vpop.f32.mrf.mxu1  ;;  %v12722_v4 = vpop.f32.mrf.mxu0 }
 0x1d5   :  { %2404 = vst.msk [vmem:[%s23521_s3 + $0xd8] sm:$0xff] %vm15_vm3, %v2323_v60  ;;  %v3420_v5 = vadd.f32 %v3168_v58, %v2566_v2  ;;  %v5034_v60 = vshrl.u32 %v13962_v47, 16  ;;  %v6123_v3 = vld [vmem:[%s23519_s1 + $0x14] sm:$0xf]  ;;  %v1229_v4 = vld [vmem:[%s23521_s3 + $0x108] sm:$0xff] }
 0x1d6   :  { %v2082_v7 = vpop.f32.mrf.mxu1  ;;  %12658 = vmatmul.mubr.msk.bf16.gmra.mxu1 %vm463_vm2, %v1798_v59  ;;  %v3173_v8 = vpop.f32.mrf.mxu0  ;;  %12820 = vmatmul.mubr.msk.bf16.gmra.mxu0 %vm463_vm2, %v2904_v61  ;;  %v3927_v59 = vrot.slane %v16653_v46, 1  ;;  %v5037_v61 = vshll.u32 %v13962_v47, 16 }
 0x1d7   :  { %3501 = vst.msk [vmem:[%s23521_s3 + $0xc8] sm:$0xff] %vm15_vm3, %v3420_v5  ;;  %v2324_v9 = vadd.f32 %v2082_v7, %v1224_v6  ;;  %12661 = vmatprep.mubr.msk.bf16.mxu1 %vm14207_vm1, %v14206_v0  ;;  %12823 = vmatprep.mubr.msk.bf16.mxu0 %vm14207_vm1, %v14206_v0  ;;  %v16695_v7 = vld [vmem:[%s23520_s0 + $0x18] sm:$0xff]   ;;  %v5036_v12 = vrot.slane %v5034_v60, 1 }
 0x1d8   :  { %v2567_v13 = vld [vmem:[%s23521_s3 + $0xd0] sm:$0xff]  ;;  %v12563_v14 = vpop.f32.mrf.mxu1  ;;  %v12725_v15 = vpop.f32.mrf.mxu0  ;;  %v3928_v11 = vsel %vm2827_vm5, %v3926_v55, %v3927_v59  ;;  %v5052_v55 = vshrl.u32 %v13966_v43, 16 }
 0x1d9   :  { %2405 = vst.msk [vmem:[%s23521_s3 + $0xe0] sm:$0xff] %vm15_vm3, %v2324_v9  ;;  %v3421_v16 = vadd.f32 %v3173_v8, %v2567_v13  ;;  %v5028_v8 = vrot.slane %v5026_v56, 1  ;;  %v5031_v9 = vrot.slane %v5029_v57, 2  ;;  %v5039_v13 = vrot.slane %v5037_v61, 2  ;;  %v13964_v14 = vld [vmem:[%s23520_s0 + $0x18] sm:$0xff]   ;;  %v1233_v61 = vld [vmem:[%s23521_s3 + $0x128] sm:$0xff] }
 0x1da   :  { %v2085_v18 = vpop.f32.mrf.mxu1  ;;  %v3176_v19 = vpop.f32.mrf.mxu0  ;;  %v5046_v23 = vshll.u32 %v13964_v14, 16  ;;  %v5055_v56 = vshll.u32 %v13966_v43, 16 }
 0x1db   :  { %3502 = vst.msk [vmem:[%s23521_s3 + $0xd0] sm:$0xff] %vm15_vm3, %v3421_v16  ;;  %v2325_v20 = vadd.f32 %v2085_v18, %v1225_v17  ;;  %v6616_v18 = vsel %vm587_vm0, %v6123_v3, 0 }
 0x1dc   :  { %v2568_v24 = vld [vmem:[%s23521_s3 + $0xd8] sm:$0xff]  ;;  %v12564_v25 = vpop.f32.mrf.mxu1  ;;  %v12726_v26 = vpop.f32.mrf.mxu0  ;;  %v5048_v42 = vrot.slane %v5046_v23, 2  ;;  %v16839_v23 = vld [vmem:[%s23520_s0 + $0x30] sm:$0xff]  }
 0x1dd   :  { %2406 = vst.msk [vmem:[%s23521_s3 + $0xe8] sm:$0xff] %vm15_vm3, %v2325_v20  ;;  %v3422_v27 = vadd.f32 %v3176_v19, %v2568_v24  ;;  %v1230_v20 = vld [vmem:[%s23521_s3 + $0x110] sm:$0xff]  ;;  %v3929_v24 = vrot.slane %v16695_v7, 1  ;;  %v5032_v25 = vor.u32 %v5031_v9, %v5028_v8  ;;  %v13968_v7 = vld [vmem:[%s23520_s0 + $0x28] sm:$0xff]  }
 0x1de   :  { %v2090_v29 = vpop.f32.mrf.mxu1  ;;  %12662 = vmatmul.mubr.msk.bf16.gmra.mxu1 %vm463_vm2, %v1806_v21  ;;  %v3181_v30 = vpop.f32.mrf.mxu0  ;;  %12824 = vmatmul.mubr.msk.bf16.gmra.mxu0 %vm463_vm2, %v2906_v22 }
 0x1df   :  { %3503 = vst.msk [vmem:[%s23521_s3 + $0xd8] sm:$0xff] %vm15_vm3, %v3422_v27  ;;  %v2326_v32 = vadd.f32 %v2090_v29, %v1226_v28  ;;  %12665 = vmatprep.mubr.msk.bf16.mxu1 %vm14207_vm1, %v14206_v0  ;;  %12827 = vmatprep.mubr.msk.bf16.mxu0 %vm14207_vm1, %v14206_v0  ;;  %v5040_v27 = vor.u32 %v5039_v13, %v5036_v12  ;;  %v5043_v28 = vshrl.u32 %v13964_v14, 16  ;;  %v1234_v12 = vld [vmem:[%s23521_s3 + $0x130] sm:$0xff] }
 0x1e0   :  { %v2569_v34 = vld [vmem:[%s23521_s3 + $0xe0] sm:$0xff]  ;;  %v12567_v35 = vpop.f32.mrf.mxu1  ;;  %v12729_v36 = vpop.f32.mrf.mxu0 }
 0x1e1   :  { %2407 = vst.msk [vmem:[%s23521_s3 + $0xf0] sm:$0xff] %vm15_vm3, %v2326_v32  ;;  %v3423_v37 = vadd.f32 %v3181_v30, %v2569_v34  ;;  %v1231_v34 = vld [vmem:[%s23521_s3 + $0x118] sm:$0xff] }
 0x1e2   :  { %v2093_v39 = vpop.f32.mrf.mxu1  ;;  %v3184_v40 = vpop.f32.mrf.mxu0 }
 0x1e3   :  { %3504 = vst.msk [vmem:[%s23521_s3 + $0xe0] sm:$0xff] %vm15_vm3, %v3423_v37  ;;  %v2327_v44 = vadd.f32 %v2093_v39, %v1227_v38  ;;  %v3930_v37 = vsel %vm2827_vm5, %v3927_v59, %v3929_v24  ;;  %v16747_v38 = vld [vmem:[%s23520_s0 + $0x20] sm:$0xff]  }
 0x1e4   :  { %v2570_v48 = vld [vmem:[%s23521_s3 + $0xe8] sm:$0xff]  ;;  %v12568_v49 = vpop.f32.mrf.mxu1  ;;  %v12730_v50 = vpop.f32.mrf.mxu0 }
 0x1e5   :  { %2408 = vst.msk [vmem:[%s23521_s3 + $0xf8] sm:$0xff] %vm15_vm3, %v2327_v44  ;;  %v3424_v51 = vadd.f32 %v3184_v40, %v2570_v48  ;;  %v5041_v40 = vsel %vm5024_vm6, %v5032_v25, %v5040_v27  ;;  %v1232_v49 = vld [vmem:[%s23521_s3 + $0x120] sm:$0xff]  ;;  %v1235_v25 = vld [vmem:[%s23521_s3 + $0x138] sm:$0xff] }
 0x1e6   :  { %v2098_v53 = vpop.f32.mrf.mxu1  ;;  %12666 = vmatmul.mubr.msk.bf16.gmra.mxu1 %vm463_vm2, %v1809_v41  ;;  %v3189_v54 = vpop.f32.mrf.mxu0  ;;  %12828 = vmatmul.mubr.msk.bf16.gmra.mxu0 %vm463_vm2, %v2908_v45  ;;  %v5045_v41 = vrot.slane %v5043_v28, 1 }
 0x1e7   :  { %3505 = vst.msk [vmem:[%s23521_s3 + $0xe8] sm:$0xff] %vm15_vm3, %v3424_v51  ;;  %v2328_v58 = vadd.f32 %v2098_v53, %v1228_v52  ;;  %12831 = vmatprep.mubr.msk.bf16.mxu0 %vm14207_vm1, %v14206_v0  ;;  %12837 = vmatprep.mubr.msk.bf16.mxu1 %vm14207_vm1, %v14206_v0  ;;  %v3931_v52 = vrot.slane %v16747_v38, 1  ;;  %v1236_v38 = vld [vmem:[%s23521_s3 + $0x140] sm:$0xff] }
 0x1e8   :  { %v2571_v62 = vld [vmem:[%s23521_s3 + $0xf0] sm:$0xff]  ;;  %v12571_v63 = vpop.f32.mrf.mxu1  ;;  %v12733_v1 = vpop.f32.mrf.mxu0 }
 0x1e9   :  { %2409 = vst.msk [vmem:[%s23521_s3 + $0x100] sm:$0xff] %vm15_vm3, %v2328_v58  ;;  %v3425_v2 = vadd.f32 %v3189_v54, %v2571_v62  ;;  %v5049_v54 = vor.u32 %v5048_v42, %v5045_v41  ;;  %v3932_v1 = vsel %vm2827_vm5, %v3929_v24, %v3931_v52  ;;  %v3935_v41 = vrot.slane %v16839_v23, 1 }
 0x1ea   :  { %v2101_v5 = vpop.f32.mrf.mxu1  ;;  %v3192_v6 = vpop.f32.mrf.mxu0 }
 0x1eb   :  { %3506 = vst.msk [vmem:[%s23521_s3 + $0xf0] sm:$0xff] %vm15_vm3, %v3425_v2  ;;  %v2329_v10 = vadd.f32 %v2101_v5, %v1229_v4  ;;  %v16794_v2 = vld [vmem:[%s23520_s0 + $0x28] sm:$0xff]   ;;  %v5050_v4 = vsel %vm5024_vm6, %v5040_v27, %v5049_v54  ;;  %v5054_v5 = vrot.slane %v5052_v55, 1 }
 0x1ec   :  { %v2572_v15 = vld [vmem:[%s23521_s3 + $0xf8] sm:$0xff]  ;;  %v12572_v16 = vpop.f32.mrf.mxu1  ;;  %v12734_v17 = vpop.f32.mrf.mxu0 }
 0x1ed   :  { %2410 = vst.msk [vmem:[%s23521_s3 + $0x108] sm:$0xff] %vm15_vm3, %v2329_v10  ;;  %v3426_v19 = vadd.f32 %v3192_v6, %v2572_v15  ;;  %v5057_v6 = vrot.slane %v5055_v56, 2  ;;  %v3933_v15 = vrot.slane %v16794_v2, 1 }
 0x1ee   :  { %v2106_v21 = vpop.f32.mrf.mxu1  ;;  %v3197_v22 = vpop.f32.mrf.mxu0  ;;  %12832 = vmatmul.mubr.msk.bf16.gmra.mxu0 %vm463_vm2, %v2907_v33  ;;  %12838 = vmatmul.mubr.msk.bf16.vlgmr.msra.gmra.mxu1 %vm463_vm2, %v3928_v11  ;;  %v7222_v33 = vld [vmem:[%s23519_s1 + $0x18] sm:$0xf] }
 0x1ef   :  { %3507 = vst.msk [vmem:[%s23521_s3 + $0xf8] sm:$0xff] %vm15_vm3, %v3426_v19  ;;  %v2330_v26 = vadd.f32 %v2106_v21, %v1230_v20  ;;  %13168 = vmatpush3.bf16.msra.mxu1 %v6616_v18  ;;  %12841 = vmatprep.mubr.msk.bf16.mxu1 %vm14207_vm1, %v14206_v0  ;;  %v7714_v47 = vsel %vm587_vm0, %v7222_v33, 0  ;;  %v5058_v17 = vor.u32 %v5057_v6, %v5054_v5  ;;  %v5061_v18 = vshrl.u32 %v13968_v7, 16  ;;  %v13970_v33 = vld [vmem:[%s23520_s0 + $0x30] sm:$0xff]  }
 0x1f0   :  { %v2573_v29 = vld [vmem:[%s23521_s3 + $0x100] sm:$0xff]  ;;  %v12575_v30 = vpop.f32.mrf.mxu1  ;;  %v12737_v31 = vpop.f32.mrf.mxu0  ;;  %13003 = vmatprep.mubr.msk.bf16.mxu0 %vm14207_vm1, %v14206_v0  ;;  %13499 = vmatprep.subr.bf16.mxu1 %v14206_v0  ;;  %v5064_v19 = vshll.u32 %v13968_v7, 16  ;;  %v3934_v28 = vsel %vm2827_vm5, %v3931_v52, %v3933_v15 }
 0x1f1   :  { %2411 = vst.msk [vmem:[%s23521_s3 + $0x110] sm:$0xff] %vm15_vm3, %v2330_v26  ;;  %v3427_v32 = vadd.f32 %v3197_v22, %v2573_v29  ;;  %v5059_v30 = vsel %vm5024_vm6, %v5049_v54, %v5058_v17  ;;  %v5063_v31 = vrot.slane %v5061_v18, 1  ;;  %v16884_v54 = vld [vmem:[%s23520_s0 + $0x38] sm:$0xff]  }
 0x1f2   :  { %v2109_v35 = vpop.f32.mrf.mxu1  ;;  %v3200_v36 = vpop.f32.mrf.mxu0 }
 0x1f3   :  { %3508 = vst.msk [vmem:[%s23521_s3 + $0x100] sm:$0xff] %vm15_vm3, %v3427_v32  ;;  %v2331_v39 = vadd.f32 %v2109_v35, %v1231_v34  ;;  %v5066_v32 = vrot.slane %v5064_v19, 2 }
 0x1f4   :  { %v2574_v44 = vld [vmem:[%s23521_s3 + $0x108] sm:$0xff]  ;;  %v12576_v45 = vpop.f32.mrf.mxu1  ;;  %v12738_v46 = vpop.f32.mrf.mxu0 }
 0x1f5   :  { %2412 = vst.msk [vmem:[%s23521_s3 + $0x118] sm:$0xff] %vm15_vm3, %v2331_v39  ;;  %v3428_v48 = vadd.f32 %v3200_v36, %v2574_v44  ;;  %v5067_v43 = vor.u32 %v5066_v32, %v5063_v31  ;;  %v5070_v44 = vshrl.u32 %v13970_v33, 16  ;;  %v5073_v45 = vshll.u32 %v13970_v33, 16 }
 0x1f6   :  { %v2114_v50 = vpop.f32.mrf.mxu1  ;;  %v3205_v51 = vpop.f32.mrf.mxu0  ;;  %12842 = vmatmul.mubr.msk.bf16.gmra.mxu1 %vm463_vm2, %v3930_v37  ;;  %13004 = vmatmul.mubr.msk.bf16.vlgmr.msra.gmra.mxu0 %vm463_vm2, %v5041_v40 }
 0x1f7   :  { %3509 = vst.msk [vmem:[%s23521_s3 + $0x108] sm:$0xff] %vm15_vm3, %v3428_v48  ;;  %v2332_v53 = vadd.f32 %v2114_v50, %v1232_v49  ;;  %13334 = vmatpush3.bf16.msra.mxu0 %v7714_v47  ;;  %12845 = vmatprep.mubr.msk.bf16.mxu1 %vm14207_vm1, %v14206_v0  ;;  %v1237_v50 = vld [vmem:[%s23521_s3 + $0x148] sm:$0xff]  ;;  %v5068_v56 = vsel %vm5024_vm6, %v5058_v17, %v5067_v43  ;;  %v16929_v17 = vld [vmem:[%s23520_s0 + $0x40] sm:$0xff]  }
 0x1f8   :  { %v2575_v57 = vld [vmem:[%s23521_s3 + $0x110] sm:$0xff]  ;;  %v12579_v58 = vpop.f32.mrf.mxu1  ;;  %v12741_v59 = vpop.f32.mrf.mxu0  ;;  %13007 = vmatprep.mubr.msk.bf16.mxu0 %vm14207_vm1, %v14206_v0  ;;  %13665 = vmatprep.subr.bf16.mxu0 %v14206_v0 }
 0x1f9   :  { %2413 = vst.msk [vmem:[%s23521_s3 + $0x120] sm:$0xff] %vm15_vm3, %v2332_v53  ;;  %v3429_v60 = vadd.f32 %v3205_v51, %v2575_v57  ;;  %v3936_v53 = vsel %vm2827_vm5, %v3933_v15, %v3935_v41  ;;  %v5072_v57 = vrot.slane %v5070_v44, 1  ;;  %v5075_v58 = vrot.slane %v5073_v45, 2  ;;  %v13972_v59 = vld [vmem:[%s23520_s0 + $0x38] sm:$0xff]  }
 0x1fa   :  { %v2117_v62 = vpop.f32.mrf.mxu1  ;;  %v3208_v63 = vpop.f32.mrf.mxu0  ;;  %v5079_v7 = vshrl.u32 %v13972_v59, 16 }
 0x1fb   :  { %3510 = vst.msk [vmem:[%s23521_s3 + $0x110] sm:$0xff] %vm15_vm3, %v3429_v60  ;;  %v2333_v3 = vadd.f32 %v2117_v62, %v1233_v61  ;;  %v5076_v6 = vor.u32 %v5075_v58, %v5072_v57 }
 0x1fc   :  { %v2576_v8 = vld [vmem:[%s23521_s3 + $0x118] sm:$0xff]  ;;  %v12580_v9 = vpop.f32.mrf.mxu1  ;;  %v12742_v10 = vpop.f32.mrf.mxu0 }
 0x1fd   :  { %2414 = vst.msk [vmem:[%s23521_s3 + $0x128] sm:$0xff] %vm15_vm3, %v2333_v3  ;;  %v3430_v11 = vadd.f32 %v3208_v63, %v2576_v8  ;;  %v5082_v8 = vshll.u32 %v13972_v59, 16  ;;  %v5077_v19 = vsel %vm5024_vm6, %v5067_v43, %v5076_v6  ;;  %v16974_v43 = vld [vmem:[%s23520_s0 + $0x48] sm:$0xff]  }
 0x1fe   :  { %v2122_v13 = vpop.f32.mrf.mxu1  ;;  %v3213_v14 = vpop.f32.mrf.mxu0  ;;  %12846 = vmatmul.mubr.msk.bf16.gmra.mxu1 %vm463_vm2, %v3932_v1  ;;  %13008 = vmatmul.mubr.msk.bf16.gmra.mxu0 %vm463_vm2, %v5050_v4  ;;  %v1238_v1 = vld [vmem:[%s23521_s3 + $0x150] sm:$0xff]  ;;  %v3937_v4 = vrot.slane %v16884_v54, 1 }
 0x1ff   :  { %3511 = vst.msk [vmem:[%s23521_s3 + $0x118] sm:$0xff] %vm15_vm3, %v3430_v11  ;;  %v2334_v16 = vadd.f32 %v2122_v13, %v1234_v12  ;;  %12849 = vmatprep.mubr.msk.bf16.mxu1 %vm14207_vm1, %v14206_v0  ;;  %13011 = vmatprep.mubr.msk.bf16.mxu0 %vm14207_vm1, %v14206_v0  ;;  %v1239_v13 = vld [vmem:[%s23521_s3 + $0x158] sm:$0xff] }
 0x200   :  { %v2577_v20 = vld [vmem:[%s23521_s3 + $0x120] sm:$0xff]  ;;  %v12583_v21 = vpop.f32.mrf.mxu1  ;;  %v12745_v22 = vpop.f32.mrf.mxu0 }
 0x201   :  { %2415 = vst.msk [vmem:[%s23521_s3 + $0x130] sm:$0xff] %vm15_vm3, %v2334_v16  ;;  %v3431_v24 = vadd.f32 %v3213_v14, %v2577_v20  ;;  %v3938_v16 = vsel %vm2827_vm5, %v3935_v41, %v3937_v4  ;;  %v5081_v20 = vrot.slane %v5079_v7, 1  ;;  %v5084_v21 = vrot.slane %v5082_v8, 2  ;;  %v13974_v22 = vld [vmem:[%s23520_s0 + $0x40] sm:$0xff]  }
 0x202   :  { %v2125_v26 = vpop.f32.mrf.mxu1  ;;  %v3216_v27 = vpop.f32.mrf.mxu0  ;;  %v5088_v33 = vshrl.u32 %v13974_v22, 16 }
 0x203   :  { %3512 = vst.msk [vmem:[%s23521_s3 + $0x120] sm:$0xff] %vm15_vm3, %v3431_v24  ;;  %v2335_v29 = vadd.f32 %v2125_v26, %v1235_v25  ;;  %v5085_v32 = vor.u32 %v5084_v21, %v5081_v20 }
 0x204   :  { %v2578_v34 = vld [vmem:[%s23521_s3 + $0x128] sm:$0xff]  ;;  %v12584_v35 = vpop.f32.mrf.mxu1  ;;  %v12746_v36 = vpop.f32.mrf.mxu0 }
 0x205   :  { %2416 = vst.msk [vmem:[%s23521_s3 + $0x138] sm:$0xff] %vm15_vm3, %v2335_v29  ;;  %v3432_v37 = vadd.f32 %v3216_v27, %v2578_v34  ;;  %v5091_v34 = vshll.u32 %v13974_v22, 16  ;;  %v5086_v45 = vsel %vm5024_vm6, %v5076_v6, %v5085_v32  ;;  %v17019_v6 = vld [vmem:[%s23520_s0 + $0x50] sm:$0xff]  }
 0x206   :  { %v2130_v39 = vpop.f32.mrf.mxu1  ;;  %v3221_v40 = vpop.f32.mrf.mxu0  ;;  %12850 = vmatmul.mubr.msk.bf16.gmra.mxu1 %vm463_vm2, %v3934_v28  ;;  %13012 = vmatmul.mubr.msk.bf16.gmra.mxu0 %vm463_vm2, %v5059_v30  ;;  %v1240_v28 = vld [vmem:[%s23521_s3 + $0x160] sm:$0xff]  ;;  %v3939_v30 = vrot.slane %v16929_v17, 1 }
 0x207   :  { %3513 = vst.msk [vmem:[%s23521_s3 + $0x128] sm:$0xff] %vm15_vm3, %v3432_v37  ;;  %v2336_v42 = vadd.f32 %v2130_v39, %v1236_v38  ;;  %12853 = vmatprep.mubr.msk.bf16.mxu1 %vm14207_vm1, %v14206_v0  ;;  %13015 = vmatprep.mubr.msk.bf16.mxu0 %vm14207_vm1, %v14206_v0  ;;  %v1241_v39 = vld [vmem:[%s23521_s3 + $0x168] sm:$0xff] }
 0x208   :  { %v2579_v46 = vld [vmem:[%s23521_s3 + $0x130] sm:$0xff]  ;;  %v12587_v47 = vpop.f32.mrf.mxu1  ;;  %v12749_v48 = vpop.f32.mrf.mxu0 }
 0x209   :  { %2417 = vst.msk [vmem:[%s23521_s3 + $0x140] sm:$0xff] %vm15_vm3, %v2336_v42  ;;  %v3433_v49 = vadd.f32 %v3221_v40, %v2579_v46  ;;  %v3940_v42 = vsel %vm2827_vm5, %v3937_v4, %v3939_v30  ;;  %v5090_v46 = vrot.slane %v5088_v33, 1  ;;  %v5093_v47 = vrot.slane %v5091_v34, 2  ;;  %v13976_v48 = vld [vmem:[%s23520_s0 + $0x48] sm:$0xff]  }
 0x20a   :  { %v2133_v51 = vpop.f32.mrf.mxu1  ;;  %v3224_v52 = vpop.f32.mrf.mxu0  ;;  %v5097_v59 = vshrl.u32 %v13976_v48, 16 }
 0x20b   :  { %3514 = vst.msk [vmem:[%s23521_s3 + $0x130] sm:$0xff] %vm15_vm3, %v3433_v49  ;;  %v2337_v55 = vadd.f32 %v2133_v51, %v1237_v50  ;;  %v5094_v58 = vor.u32 %v5093_v47, %v5090_v46 }
 0x20c   :  { %v2580_v60 = vld [vmem:[%s23521_s3 + $0x138] sm:$0xff]  ;;  %v12588_v61 = vpop.f32.mrf.mxu1  ;;  %v12750_v62 = vpop.f32.mrf.mxu0 }
 0x20d   :  { %2418 = vst.msk [vmem:[%s23521_s3 + $0x148] sm:$0xff] %vm15_vm3, %v2337_v55  ;;  %v3434_v63 = vadd.f32 %v3224_v52, %v2580_v60  ;;  %v5100_v60 = vshll.u32 %v13976_v48, 16  ;;  %v5095_v8 = vsel %vm5024_vm6, %v5085_v32, %v5094_v58  ;;  %v17064_v32 = vld [vmem:[%s23520_s0 + $0x58] sm:$0xff]  }
 0x20e   :  { %v2138_v2 = vpop.f32.mrf.mxu1  ;;  %v3229_v3 = vpop.f32.mrf.mxu0  ;;  %12854 = vmatmul.mubr.msk.bf16.gmra.mxu1 %vm463_vm2, %v3936_v53  ;;  %13016 = vmatmul.mubr.msk.bf16.gmra.mxu0 %vm463_vm2, %v5068_v56  ;;  %v1242_v53 = vld [vmem:[%s23521_s3 + $0x170] sm:$0xff]  ;;  %v3941_v56 = vrot.slane %v16974_v43, 1 }
 0x20f   :  { %3515 = vst.msk [vmem:[%s23521_s3 + $0x138] sm:$0xff] %vm15_vm3, %v3434_v63  ;;  %v2338_v5 = vadd.f32 %v2138_v2, %v1238_v1  ;;  %12857 = vmatprep.mubr.msk.bf16.mxu1 %vm14207_vm1, %v14206_v0  ;;  %13019 = vmatprep.mubr.msk.bf16.mxu0 %vm14207_vm1, %v14206_v0  ;;  %v1243_v2 = vld [vmem:[%s23521_s3 + $0x178] sm:$0xff] }
 0x210   :  { %v2581_v9 = vld [vmem:[%s23521_s3 + $0x140] sm:$0xff]  ;;  %v12591_v10 = vpop.f32.mrf.mxu1  ;;  %v12753_v11 = vpop.f32.mrf.mxu0 }
 0x211   :  { %2419 = vst.msk [vmem:[%s23521_s3 + $0x150] sm:$0xff] %vm15_vm3, %v2338_v5  ;;  %v3435_v12 = vadd.f32 %v3229_v3, %v2581_v9  ;;  %v3942_v5 = vsel %vm2827_vm5, %v3939_v30, %v3941_v56  ;;  %v5099_v9 = vrot.slane %v5097_v59, 1  ;;  %v5102_v10 = vrot.slane %v5100_v60, 2  ;;  %v13978_v11 = vld [vmem:[%s23520_s0 + $0x50] sm:$0xff]  }
 0x212   :  { %v2141_v14 = vpop.f32.mrf.mxu1  ;;  %v3232_v15 = vpop.f32.mrf.mxu0  ;;  %v5106_v22 = vshrl.u32 %v13978_v11, 16 }
 0x213   :  { %3516 = vst.msk [vmem:[%s23521_s3 + $0x140] sm:$0xff] %vm15_vm3, %v3435_v12  ;;  %v2339_v18 = vadd.f32 %v2141_v14, %v1239_v13  ;;  %v5103_v21 = vor.u32 %v5102_v10, %v5099_v9 }
 0x214   :  { %v2582_v24 = vld [vmem:[%s23521_s3 + $0x148] sm:$0xff]  ;;  %v12592_v25 = vpop.f32.mrf.mxu1  ;;  %v12754_v26 = vpop.f32.mrf.mxu0 }
 0x215   :  { %2420 = vst.msk [vmem:[%s23521_s3 + $0x158] sm:$0xff] %vm15_vm3, %v2339_v18  ;;  %v3436_v27 = vadd.f32 %v3232_v15, %v2582_v24  ;;  %v5109_v24 = vshll.u32 %v13978_v11, 16  ;;  %v5104_v34 = vsel %vm5024_vm6, %v5094_v58, %v5103_v21  ;;  %v17109_v58 = vld [vmem:[%s23520_s0 + $0x60] sm:$0xff]  }
 0x216   :  { %v2146_v23 = vpop.f32.mrf.mxu1  ;;  %v3237_v29 = vpop.f32.mrf.mxu0  ;;  %12858 = vmatmul.mubr.msk.bf16.gmra.mxu1 %vm463_vm2, %v3938_v16  ;;  %13020 = vmatmul.mubr.msk.bf16.gmra.mxu0 %vm463_vm2, %v5077_v19  ;;  %v1244_v16 = vld [vmem:[%s23521_s3 + $0x180] sm:$0xff]  ;;  %v3943_v19 = vrot.slane %v17019_v6, 1 }
 0x217   :  { %3517 = vst.msk [vmem:[%s23521_s3 + $0x148] sm:$0xff] %vm15_vm3, %v3436_v27  ;;  %v2340_v31 = vadd.f32 %v2146_v23, %v1240_v28  ;;  %12861 = vmatprep.mubr.msk.bf16.mxu1 %vm14207_vm1, %v14206_v0  ;;  %13023 = vmatprep.mubr.msk.bf16.mxu0 %vm14207_vm1, %v14206_v0  ;;  %v1245_v23 = vld [vmem:[%s23521_s3 + $0x188] sm:$0xff] }
 0x218   :  { %v2583_v35 = vld [vmem:[%s23521_s3 + $0x150] sm:$0xff]  ;;  %v12595_v36 = vpop.f32.mrf.mxu1  ;;  %v12757_v37 = vpop.f32.mrf.mxu0 }
 0x219   :  { %2421 = vst.msk [vmem:[%s23521_s3 + $0x160] sm:$0xff] %vm15_vm3, %v2340_v31  ;;  %v3437_v38 = vadd.f32 %v3237_v29, %v2583_v35  ;;  %v3944_v31 = vsel %vm2827_vm5, %v3941_v56, %v3943_v19  ;;  %v5108_v35 = vrot.slane %v5106_v22, 1  ;;  %v5111_v36 = vrot.slane %v5109_v24, 2  ;;  %v13980_v37 = vld [vmem:[%s23520_s0 + $0x58] sm:$0xff]  }
 0x21a   :  { %v2149_v40 = vpop.f32.mrf.mxu1  ;;  %v3240_v41 = vpop.f32.mrf.mxu0  ;;  %v5115_v48 = vshrl.u32 %v13980_v37, 16 }
 0x21b   :  { %3518 = vst.msk [vmem:[%s23521_s3 + $0x150] sm:$0xff] %vm15_vm3, %v3437_v38  ;;  %v2341_v44 = vadd.f32 %v2149_v40, %v1241_v39  ;;  %v5112_v47 = vor.u32 %v5111_v36, %v5108_v35 }
 0x21c   :  { %v2584_v49 = vld [vmem:[%s23521_s3 + $0x158] sm:$0xff]  ;;  %v12596_v50 = vpop.f32.mrf.mxu1  ;;  %v12758_v51 = vpop.f32.mrf.mxu0 }
 0x21d   :  { %2422 = vst.msk [vmem:[%s23521_s3 + $0x168] sm:$0xff] %vm15_vm3, %v2341_v44  ;;  %v3438_v52 = vadd.f32 %v3240_v41, %v2584_v49  ;;  %v5118_v49 = vshll.u32 %v13980_v37, 16  ;;  %v5113_v60 = vsel %vm5024_vm6, %v5103_v21, %v5112_v47  ;;  %v17154_v21 = vld [vmem:[%s23520_s0 + $0x68] sm:$0xff]  }
 0x21e   :  { %v2154_v54 = vpop.f32.mrf.mxu1  ;;  %v3245_v55 = vpop.f32.mrf.mxu0  ;;  %12862 = vmatmul.mubr.msk.bf16.gmra.mxu1 %vm463_vm2, %v3940_v42  ;;  %13024 = vmatmul.mubr.msk.bf16.gmra.mxu0 %vm463_vm2, %v5086_v45  ;;  %v1246_v42 = vld [vmem:[%s23521_s3 + $0x190] sm:$0xff]  ;;  %v3945_v45 = vrot.slane %v17064_v32, 1 }
 0x21f   :  { %3519 = vst.msk [vmem:[%s23521_s3 + $0x158] sm:$0xff] %vm15_vm3, %v3438_v52  ;;  %v2342_v57 = vadd.f32 %v2154_v54, %v1242_v53  ;;  %12865 = vmatprep.mubr.msk.bf16.mxu1 %vm14207_vm1, %v14206_v0  ;;  %13027 = vmatprep.mubr.msk.bf16.mxu0 %vm14207_vm1, %v14206_v0  ;;  %v1247_v54 = vld [vmem:[%s23521_s3 + $0x198] sm:$0xff] }
 0x220   :  { %v2585_v61 = vld [vmem:[%s23521_s3 + $0x160] sm:$0xff]  ;;  %v12599_v62 = vpop.f32.mrf.mxu1  ;;  %v12761_v63 = vpop.f32.mrf.mxu0 }
 0x221   :  { %2423 = vst.msk [vmem:[%s23521_s3 + $0x170] sm:$0xff] %vm15_vm3, %v2342_v57  ;;  %v3439_v1 = vadd.f32 %v3245_v55, %v2585_v61  ;;  %v3946_v57 = vsel %vm2827_vm5, %v3943_v19, %v3945_v45  ;;  %v5117_v61 = vrot.slane %v5115_v48, 1  ;;  %v5120_v62 = vrot.slane %v5118_v49, 2  ;;  %v13982_v63 = vld [vmem:[%s23520_s0 + $0x60] sm:$0xff]  }
 0x222   :  { %v2157_v3 = vpop.f32.mrf.mxu1  ;;  %v3248_v4 = vpop.f32.mrf.mxu0  ;;  %v5124_v11 = vshrl.u32 %v13982_v63, 16 }
 0x223   :  { %3520 = vst.msk [vmem:[%s23521_s3 + $0x160] sm:$0xff] %vm15_vm3, %v3439_v1  ;;  %v2343_v7 = vadd.f32 %v2157_v3, %v1243_v2  ;;  %v5121_v10 = vor.u32 %v5120_v62, %v5117_v61 }
 0x224   :  { %v2586_v12 = vld [vmem:[%s23521_s3 + $0x168] sm:$0xff]  ;;  %v12600_v13 = vpop.f32.mrf.mxu1  ;;  %v12762_v14 = vpop.f32.mrf.mxu0 }
 0x225   :  { %2424 = vst.msk [vmem:[%s23521_s3 + $0x178] sm:$0xff] %vm15_vm3, %v2343_v7  ;;  %v3440_v15 = vadd.f32 %v3248_v4, %v2586_v12  ;;  %v5127_v12 = vshll.u32 %v13982_v63, 16  ;;  %v5122_v24 = vsel %vm5024_vm6, %v5112_v47, %v5121_v10  ;;  %v17199_v47 = vld [vmem:[%s23520_s0 + $0x70] sm:$0xff]  }
 0x226   :  { %v2162_v17 = vpop.f32.mrf.mxu1  ;;  %v3253_v18 = vpop.f32.mrf.mxu0  ;;  %12866 = vmatmul.mubr.msk.bf16.gmra.mxu1 %vm463_vm2, %v3942_v5  ;;  %13028 = vmatmul.mubr.msk.bf16.gmra.mxu0 %vm463_vm2, %v5095_v8  ;;  %v1248_v5 = vld [vmem:[%s23521_s3 + $0x1a0] sm:$0xff]  ;;  %v3947_v8 = vrot.slane %v17109_v58, 1 }
 0x227   :  { %3521 = vst.msk [vmem:[%s23521_s3 + $0x168] sm:$0xff] %vm15_vm3, %v3440_v15  ;;  %v2344_v20 = vadd.f32 %v2162_v17, %v1244_v16  ;;  %12869 = vmatprep.mubr.msk.bf16.mxu1 %vm14207_vm1, %v14206_v0  ;;  %13031 = vmatprep.mubr.msk.bf16.mxu0 %vm14207_vm1, %v14206_v0  ;;  %v1249_v17 = vld [vmem:[%s23521_s3 + $0x1a8] sm:$0xff] }
 0x228   :  { %v2587_v25 = vld [vmem:[%s23521_s3 + $0x170] sm:$0xff]  ;;  %v12603_v26 = vpop.f32.mrf.mxu1  ;;  %v12765_v27 = vpop.f32.mrf.mxu0 }
 0x229   :  { %2425 = vst.msk [vmem:[%s23521_s3 + $0x180] sm:$0xff] %vm15_vm3, %v2344_v20  ;;  %v3441_v28 = vadd.f32 %v3253_v18, %v2587_v25  ;;  %v3948_v20 = vsel %vm2827_vm5, %v3945_v45, %v3947_v8  ;;  %v5126_v25 = vrot.slane %v5124_v11, 1  ;;  %v5129_v26 = vrot.slane %v5127_v12, 2  ;;  %v13984_v27 = vld [vmem:[%s23520_s0 + $0x68] sm:$0xff]  }
 0x22a   :  { %v2165_v29 = vpop.f32.mrf.mxu1  ;;  %v3256_v30 = vpop.f32.mrf.mxu0  ;;  %v5133_v37 = vshrl.u32 %v13984_v27, 16 }
 0x22b   :  { %3522 = vst.msk [vmem:[%s23521_s3 + $0x170] sm:$0xff] %vm15_vm3, %v3441_v28  ;;  %v2345_v33 = vadd.f32 %v2165_v29, %v1245_v23  ;;  %v5130_v36 = vor.u32 %v5129_v26, %v5126_v25 }
 0x22c   :  { %v2588_v38 = vld [vmem:[%s23521_s3 + $0x178] sm:$0xff]  ;;  %v12604_v39 = vpop.f32.mrf.mxu1  ;;  %v12766_v40 = vpop.f32.mrf.mxu0 }
 0x22d   :  { %2426 = vst.msk [vmem:[%s23521_s3 + $0x188] sm:$0xff] %vm15_vm3, %v2345_v33  ;;  %v3442_v41 = vadd.f32 %v3256_v30, %v2588_v38  ;;  %v5136_v38 = vshll.u32 %v13984_v27, 16  ;;  %v5131_v49 = vsel %vm5024_vm6, %v5121_v10, %v5130_v36  ;;  %v17244_v10 = vld [vmem:[%s23520_s0 + $0x78] sm:$0xff]  }
 0x22e   :  { %v2170_v43 = vpop.f32.mrf.mxu1  ;;  %v3261_v44 = vpop.f32.mrf.mxu0  ;;  %12870 = vmatmul.mubr.msk.bf16.gmra.mxu1 %vm463_vm2, %v3944_v31  ;;  %13032 = vmatmul.mubr.msk.bf16.gmra.mxu0 %vm463_vm2, %v5104_v34  ;;  %v1250_v31 = vld [vmem:[%s23521_s3 + $0x1b0] sm:$0xff]  ;;  %v3949_v34 = vrot.slane %v17154_v21, 1 }
 0x22f   :  { %3523 = vst.msk [vmem:[%s23521_s3 + $0x178] sm:$0xff] %vm15_vm3, %v3442_v41  ;;  %v2346_v46 = vadd.f32 %v2170_v43, %v1246_v42  ;;  %12873 = vmatprep.mubr.msk.bf16.mxu1 %vm14207_vm1, %v14206_v0  ;;  %13035 = vmatprep.mubr.msk.bf16.mxu0 %vm14207_vm1, %v14206_v0  ;;  %v1251_v43 = vld [vmem:[%s23521_s3 + $0x1b8] sm:$0xff] }
 0x230   :  { %v2589_v50 = vld [vmem:[%s23521_s3 + $0x180] sm:$0xff]  ;;  %v12607_v51 = vpop.f32.mrf.mxu1  ;;  %v12769_v52 = vpop.f32.mrf.mxu0 }
 0x231   :  { %2427 = vst.msk [vmem:[%s23521_s3 + $0x190] sm:$0xff] %vm15_vm3, %v2346_v46  ;;  %v3443_v53 = vadd.f32 %v3261_v44, %v2589_v50  ;;  %v3950_v46 = vsel %vm2827_vm5, %v3947_v8, %v3949_v34  ;;  %v5135_v50 = vrot.slane %v5133_v37, 1  ;;  %v5138_v51 = vrot.slane %v5136_v38, 2  ;;  %v13986_v52 = vld [vmem:[%s23520_s0 + $0x70] sm:$0xff]  }
 0x232   :  { %v2173_v55 = vpop.f32.mrf.mxu1  ;;  %v3264_v56 = vpop.f32.mrf.mxu0  ;;  %v5142_v63 = vshrl.u32 %v13986_v52, 16 }
 0x233   :  { %3524 = vst.msk [vmem:[%s23521_s3 + $0x180] sm:$0xff] %vm15_vm3, %v3443_v53  ;;  %v2347_v59 = vadd.f32 %v2173_v55, %v1247_v54  ;;  %v5139_v62 = vor.u32 %v5138_v51, %v5135_v50 }
 0x234   :  { %v2590_v1 = vld [vmem:[%s23521_s3 + $0x188] sm:$0xff]  ;;  %v12608_v2 = vpop.f32.mrf.mxu1  ;;  %v12770_v3 = vpop.f32.mrf.mxu0 }
 0x235   :  { %2428 = vst.msk [vmem:[%s23521_s3 + $0x198] sm:$0xff] %vm15_vm3, %v2347_v59  ;;  %v3444_v4 = vadd.f32 %v3264_v56, %v2590_v1  ;;  %v5145_v1 = vshll.u32 %v13986_v52, 16  ;;  %v5140_v12 = vsel %vm5024_vm6, %v5130_v36, %v5139_v62  ;;  %v17289_v36 = vld [vmem:[%s23520_s0 + $0x80] sm:$0xff]  }
 0x236   :  { %v2178_v6 = vpop.f32.mrf.mxu1  ;;  %v3269_v7 = vpop.f32.mrf.mxu0  ;;  %12874 = vmatmul.mubr.msk.bf16.gmra.mxu1 %vm463_vm2, %v3946_v57  ;;  %13036 = vmatmul.mubr.msk.bf16.gmra.mxu0 %vm463_vm2, %v5113_v60  ;;  %v1252_v57 = vld [vmem:[%s23521_s3 + $0x1c0] sm:$0xff]  ;;  %v3951_v60 = vrot.slane %v17199_v47, 1 }
 0x237   :  { %3525 = vst.msk [vmem:[%s23521_s3 + $0x188] sm:$0xff] %vm15_vm3, %v3444_v4  ;;  %v2348_v9 = vadd.f32 %v2178_v6, %v1248_v5  ;;  %12877 = vmatprep.mubr.msk.bf16.mxu1 %vm14207_vm1, %v14206_v0  ;;  %13039 = vmatprep.mubr.msk.bf16.mxu0 %vm14207_vm1, %v14206_v0  ;;  %v1253_v6 = vld [vmem:[%s23521_s3 + $0x1c8] sm:$0xff] }
 0x238   :  { %v2591_v13 = vld [vmem:[%s23521_s3 + $0x190] sm:$0xff]  ;;  %v12611_v14 = vpop.f32.mrf.mxu1  ;;  %v12773_v15 = vpop.f32.mrf.mxu0 }
 0x239   :  { %2429 = vst.msk [vmem:[%s23521_s3 + $0x1a0] sm:$0xff] %vm15_vm3, %v2348_v9  ;;  %v3445_v16 = vadd.f32 %v3269_v7, %v2591_v13  ;;  %v3952_v9 = vsel %vm2827_vm5, %v3949_v34, %v3951_v60  ;;  %v5144_v13 = vrot.slane %v5142_v63, 1  ;;  %v5147_v14 = vrot.slane %v5145_v1, 2  ;;  %v13988_v15 = vld [vmem:[%s23520_s0 + $0x78] sm:$0xff]  }
 0x23a   :  { %v2181_v18 = vpop.f32.mrf.mxu1  ;;  %v3272_v19 = vpop.f32.mrf.mxu0  ;;  %v5151_v27 = vshrl.u32 %v13988_v15, 16 }
 0x23b   :  { %3526 = vst.msk [vmem:[%s23521_s3 + $0x190] sm:$0xff] %vm15_vm3, %v3445_v16  ;;  %v2349_v22 = vadd.f32 %v2181_v18, %v1249_v17  ;;  %v5148_v26 = vor.u32 %v5147_v14, %v5144_v13 }
 0x23c   :  { %v2592_v28 = vld [vmem:[%s23521_s3 + $0x198] sm:$0xff]  ;;  %v12612_v23 = vpop.f32.mrf.mxu1  ;;  %v12774_v29 = vpop.f32.mrf.mxu0 }
 0x23d   :  { %2430 = vst.msk [vmem:[%s23521_s3 + $0x1a8] sm:$0xff] %vm15_vm3, %v2349_v22  ;;  %v3446_v30 = vadd.f32 %v3272_v19, %v2592_v28  ;;  %v5154_v28 = vshll.u32 %v13988_v15, 16  ;;  %v5149_v38 = vsel %vm5024_vm6, %v5139_v62, %v5148_v26  ;;  %v17334_v62 = vld [vmem:[%s23520_s0 + $0x88] sm:$0xff]  }
 0x23e   :  { %v2186_v32 = vpop.f32.mrf.mxu1  ;;  %v3277_v33 = vpop.f32.mrf.mxu0  ;;  %12878 = vmatmul.mubr.msk.bf16.gmra.mxu1 %vm463_vm2, %v3948_v20  ;;  %13040 = vmatmul.mubr.msk.bf16.gmra.mxu0 %vm463_vm2, %v5122_v24  ;;  %v1254_v20 = vld [vmem:[%s23521_s3 + $0x1d0] sm:$0xff]  ;;  %v3953_v24 = vrot.slane %v17244_v10, 1 }
 0x23f   :  { %3527 = vst.msk [vmem:[%s23521_s3 + $0x198] sm:$0xff] %vm15_vm3, %v3446_v30  ;;  %v2350_v35 = vadd.f32 %v2186_v32, %v1250_v31  ;;  %12881 = vmatprep.mubr.msk.bf16.mxu1 %vm14207_vm1, %v14206_v0  ;;  %13043 = vmatprep.mubr.msk.bf16.mxu0 %vm14207_vm1, %v14206_v0  ;;  %v1255_v32 = vld [vmem:[%s23521_s3 + $0x1d8] sm:$0xff] }
 0x240   :  { %v2593_v39 = vld [vmem:[%s23521_s3 + $0x1a0] sm:$0xff]  ;;  %v12615_v40 = vpop.f32.mrf.mxu1  ;;  %v12777_v41 = vpop.f32.mrf.mxu0 }
 0x241   :  { %2431 = vst.msk [vmem:[%s23521_s3 + $0x1b0] sm:$0xff] %vm15_vm3, %v2350_v35  ;;  %v3447_v42 = vadd.f32 %v3277_v33, %v2593_v39  ;;  %v3954_v35 = vsel %vm2827_vm5, %v3951_v60, %v3953_v24  ;;  %v5153_v39 = vrot.slane %v5151_v27, 1  ;;  %v5156_v40 = vrot.slane %v5154_v28, 2  ;;  %v13990_v41 = vld [vmem:[%s23520_s0 + $0x80] sm:$0xff]  }
 0x242   :  { %v2189_v44 = vpop.f32.mrf.mxu1  ;;  %v3280_v45 = vpop.f32.mrf.mxu0  ;;  %v5160_v52 = vshrl.u32 %v13990_v41, 16 }
 0x243   :  { %3528 = vst.msk [vmem:[%s23521_s3 + $0x1a0] sm:$0xff] %vm15_vm3, %v3447_v42  ;;  %v2351_v48 = vadd.f32 %v2189_v44, %v1251_v43  ;;  %v5157_v51 = vor.u32 %v5156_v40, %v5153_v39 }
 0x244   :  { %v2594_v53 = vld [vmem:[%s23521_s3 + $0x1a8] sm:$0xff]  ;;  %v12616_v54 = vpop.f32.mrf.mxu1  ;;  %v12778_v55 = vpop.f32.mrf.mxu0 }
 0x245   :  { %2432 = vst.msk [vmem:[%s23521_s3 + $0x1b8] sm:$0xff] %vm15_vm3, %v2351_v48  ;;  %v3448_v56 = vadd.f32 %v3280_v45, %v2594_v53  ;;  %v5163_v53 = vshll.u32 %v13990_v41, 16  ;;  %v5158_v1 = vsel %vm5024_vm6, %v5148_v26, %v5157_v51  ;;  %v17379_v26 = vld [vmem:[%s23520_s0 + $0x90] sm:$0xff]  }
 0x246   :  { %v2194_v58 = vpop.f32.mrf.mxu1  ;;  %v3285_v59 = vpop.f32.mrf.mxu0  ;;  %12882 = vmatmul.mubr.msk.bf16.gmra.mxu1 %vm463_vm2, %v3950_v46  ;;  %13044 = vmatmul.mubr.msk.bf16.gmra.mxu0 %vm463_vm2, %v5131_v49  ;;  %v1256_v46 = vld [vmem:[%s23521_s3 + $0x1e0] sm:$0xff]  ;;  %v3955_v49 = vrot.slane %v17289_v36, 1 }
 0x247   :  { %3529 = vst.msk [vmem:[%s23521_s3 + $0x1a8] sm:$0xff] %vm15_vm3, %v3448_v56  ;;  %v2352_v61 = vadd.f32 %v2194_v58, %v1252_v57  ;;  %12885 = vmatprep.mubr.msk.bf16.mxu1 %vm14207_vm1, %v14206_v0  ;;  %13047 = vmatprep.mubr.msk.bf16.mxu0 %vm14207_vm1, %v14206_v0  ;;  %v1257_v58 = vld [vmem:[%s23521_s3 + $0x1e8] sm:$0xff] }
 0x248   :  { %v2595_v2 = vld [vmem:[%s23521_s3 + $0x1b0] sm:$0xff]  ;;  %v12619_v3 = vpop.f32.mrf.mxu1  ;;  %v12781_v4 = vpop.f32.mrf.mxu0 }
 0x249   :  { %2433 = vst.msk [vmem:[%s23521_s3 + $0x1c0] sm:$0xff] %vm15_vm3, %v2352_v61  ;;  %v3449_v5 = vadd.f32 %v3285_v59, %v2595_v2  ;;  %v3956_v61 = vsel %vm2827_vm5, %v3953_v24, %v3955_v49  ;;  %v5162_v2 = vrot.slane %v5160_v52, 1  ;;  %v5165_v3 = vrot.slane %v5163_v53, 2  ;;  %v13992_v4 = vld [vmem:[%s23520_s0 + $0x88] sm:$0xff]  }
 0x24a   :  { %v2197_v7 = vpop.f32.mrf.mxu1  ;;  %v3288_v8 = vpop.f32.mrf.mxu0  ;;  %v5169_v15 = vshrl.u32 %v13992_v4, 16 }
 0x24b   :  { %3530 = vst.msk [vmem:[%s23521_s3 + $0x1b0] sm:$0xff] %vm15_vm3, %v3449_v5  ;;  %v2353_v11 = vadd.f32 %v2197_v7, %v1253_v6  ;;  %v5166_v14 = vor.u32 %v5165_v3, %v5162_v2 }
 0x24c   :  { %v2596_v16 = vld [vmem:[%s23521_s3 + $0x1b8] sm:$0xff]  ;;  %v12620_v17 = vpop.f32.mrf.mxu1  ;;  %v12782_v18 = vpop.f32.mrf.mxu0 }
 0x24d   :  { %2434 = vst.msk [vmem:[%s23521_s3 + $0x1c8] sm:$0xff] %vm15_vm3, %v2353_v11  ;;  %v3450_v19 = vadd.f32 %v3288_v8, %v2596_v16  ;;  %v5172_v16 = vshll.u32 %v13992_v4, 16  ;;  %v5167_v28 = vsel %vm5024_vm6, %v5157_v51, %v5166_v14  ;;  %v17424_v51 = vld [vmem:[%s23520_s0 + $0x98] sm:$0xff]  }
 0x24e   :  { %v2202_v21 = vpop.f32.mrf.mxu1  ;;  %v3293_v22 = vpop.f32.mrf.mxu0  ;;  %12886 = vmatmul.mubr.msk.bf16.gmra.mxu1 %vm463_vm2, %v3952_v9  ;;  %13048 = vmatmul.mubr.msk.bf16.gmra.mxu0 %vm463_vm2, %v5140_v12  ;;  %v1258_v9 = vld [vmem:[%s23521_s3 + $0x1f0] sm:$0xff]  ;;  %v3957_v12 = vrot.slane %v17334_v62, 1 }
 0x24f   :  { %3531 = vst.msk [vmem:[%s23521_s3 + $0x1b8] sm:$0xff] %vm15_vm3, %v3450_v19  ;;  %v2354_v25 = vadd.f32 %v2202_v21, %v1254_v20  ;;  %12889 = vmatprep.mubr.msk.bf16.mxu1 %vm14207_vm1, %v14206_v0  ;;  %13051 = vmatprep.mubr.msk.bf16.mxu0 %vm14207_vm1, %v14206_v0  ;;  %v1259_v21 = vld [vmem:[%s23521_s3 + $0x1f8] sm:$0xff] }
 0x250   :  { %v2597_v23 = vld [vmem:[%s23521_s3 + $0x1c0] sm:$0xff]  ;;  %v12623_v29 = vpop.f32.mrf.mxu1  ;;  %v12785_v30 = vpop.f32.mrf.mxu0 }
 0x251   :  { %2435 = vst.msk [vmem:[%s23521_s3 + $0x1d0] sm:$0xff] %vm15_vm3, %v2354_v25  ;;  %v3451_v31 = vadd.f32 %v3293_v22, %v2597_v23  ;;  %v3958_v25 = vsel %vm2827_vm5, %v3955_v49, %v3957_v12  ;;  %v5171_v23 = vrot.slane %v5169_v15, 1  ;;  %v5174_v29 = vrot.slane %v5172_v16, 2  ;;  %v13994_v30 = vld [vmem:[%s23520_s0 + $0x90] sm:$0xff]  }
 0x252   :  { %v2205_v33 = vpop.f32.mrf.mxu1  ;;  %v3296_v34 = vpop.f32.mrf.mxu0  ;;  %v5178_v41 = vshrl.u32 %v13994_v30, 16 }
 0x253   :  { %3532 = vst.msk [vmem:[%s23521_s3 + $0x1c0] sm:$0xff] %vm15_vm3, %v3451_v31  ;;  %v2355_v37 = vadd.f32 %v2205_v33, %v1255_v32  ;;  %v5175_v40 = vor.u32 %v5174_v29, %v5171_v23 }
 0x254   :  { %v2598_v42 = vld [vmem:[%s23521_s3 + $0x1c8] sm:$0xff]  ;;  %v12624_v43 = vpop.f32.mrf.mxu1  ;;  %v12786_v44 = vpop.f32.mrf.mxu0 }
 0x255   :  { %2436 = vst.msk [vmem:[%s23521_s3 + $0x1d8] sm:$0xff] %vm15_vm3, %v2355_v37  ;;  %v3452_v45 = vadd.f32 %v3296_v34, %v2598_v42  ;;  %v5181_v42 = vshll.u32 %v13994_v30, 16  ;;  %v5176_v53 = vsel %vm5024_vm6, %v5166_v14, %v5175_v40  ;;  %v17469_v14 = vld [vmem:[%s23520_s0 + $0xa0] sm:$0xff]  }
 0x256   :  { %v2210_v47 = vpop.f32.mrf.mxu1  ;;  %v3301_v48 = vpop.f32.mrf.mxu0  ;;  %12890 = vmatmul.mubr.msk.bf16.gmra.mxu1 %vm463_vm2, %v3954_v35  ;;  %13052 = vmatmul.mubr.msk.bf16.gmra.mxu0 %vm463_vm2, %v5149_v38  ;;  %v1260_v35 = vld [vmem:[%s23521_s3 + $0x200] sm:$0xff]  ;;  %v3959_v38 = vrot.slane %v17379_v26, 1 }
 0x257   :  { %3533 = vst.msk [vmem:[%s23521_s3 + $0x1c8] sm:$0xff] %vm15_vm3, %v3452_v45  ;;  %v2356_v50 = vadd.f32 %v2210_v47, %v1256_v46  ;;  %12893 = vmatprep.mubr.msk.bf16.mxu1 %vm14207_vm1, %v14206_v0  ;;  %13055 = vmatprep.mubr.msk.bf16.mxu0 %vm14207_vm1, %v14206_v0  ;;  %v1261_v47 = vld [vmem:[%s23521_s3 + $0x208] sm:$0xff] }
 0x258   :  { %v2599_v54 = vld [vmem:[%s23521_s3 + $0x1d0] sm:$0xff]  ;;  %v12627_v55 = vpop.f32.mrf.mxu1  ;;  %v12789_v56 = vpop.f32.mrf.mxu0 }
 0x259   :  { %2437 = vst.msk [vmem:[%s23521_s3 + $0x1e0] sm:$0xff] %vm15_vm3, %v2356_v50  ;;  %v3453_v57 = vadd.f32 %v3301_v48, %v2599_v54  ;;  %v3960_v50 = vsel %vm2827_vm5, %v3957_v12, %v3959_v38  ;;  %v5180_v54 = vrot.slane %v5178_v41, 1  ;;  %v5183_v55 = vrot.slane %v5181_v42, 2  ;;  %v13996_v56 = vld [vmem:[%s23520_s0 + $0x98] sm:$0xff]  }
 0x25a   :  { %v2213_v59 = vpop.f32.mrf.mxu1  ;;  %v3304_v60 = vpop.f32.mrf.mxu0  ;;  %v5187_v4 = vshrl.u32 %v13996_v56, 16 }
 0x25b   :  { %3534 = vst.msk [vmem:[%s23521_s3 + $0x1d0] sm:$0xff] %vm15_vm3, %v3453_v57  ;;  %v2357_v63 = vadd.f32 %v2213_v59, %v1257_v58  ;;  %v5184_v3 = vor.u32 %v5183_v55, %v5180_v54 }
 0x25c   :  { %v2600_v5 = vld [vmem:[%s23521_s3 + $0x1d8] sm:$0xff]  ;;  %v12628_v6 = vpop.f32.mrf.mxu1  ;;  %v12790_v7 = vpop.f32.mrf.mxu0 }
 0x25d   :  { %2438 = vst.msk [vmem:[%s23521_s3 + $0x1e8] sm:$0xff] %vm15_vm3, %v2357_v63  ;;  %v3454_v8 = vadd.f32 %v3304_v60, %v2600_v5  ;;  %v5190_v5 = vshll.u32 %v13996_v56, 16  ;;  %v5185_v16 = vsel %vm5024_vm6, %v5175_v40, %v5184_v3  ;;  %v17514_v40 = vld [vmem:[%s23520_s0 + $0xa8] sm:$0xff]  }
 0x25e   :  { %v2218_v10 = vpop.f32.mrf.mxu1  ;;  %v3309_v11 = vpop.f32.mrf.mxu0  ;;  %12894 = vmatmul.mubr.msk.bf16.gmra.mxu1 %vm463_vm2, %v3956_v61  ;;  %13056 = vmatmul.mubr.msk.bf16.gmra.mxu0 %vm463_vm2, %v5158_v1  ;;  %v1262_v61 = vld [vmem:[%s23521_s3 + $0x210] sm:$0xff]  ;;  %v3961_v1 = vrot.slane %v17424_v51, 1 }
 0x25f   :  { %3535 = vst.msk [vmem:[%s23521_s3 + $0x1d8] sm:$0xff] %vm15_vm3, %v3454_v8  ;;  %v2358_v13 = vadd.f32 %v2218_v10, %v1258_v9  ;;  %12897 = vmatprep.mubr.msk.bf16.mxu1 %vm14207_vm1, %v14206_v0  ;;  %13059 = vmatprep.mubr.msk.bf16.mxu0 %vm14207_vm1, %v14206_v0  ;;  %v1263_v10 = vld [vmem:[%s23521_s3 + $0x218] sm:$0xff] }
 0x260   :  { %v2601_v17 = vld [vmem:[%s23521_s3 + $0x1e0] sm:$0xff]  ;;  %v12631_v18 = vpop.f32.mrf.mxu1  ;;  %v12793_v19 = vpop.f32.mrf.mxu0 }
 0x261   :  { %2439 = vst.msk [vmem:[%s23521_s3 + $0x1f0] sm:$0xff] %vm15_vm3, %v2358_v13  ;;  %v3455_v20 = vadd.f32 %v3309_v11, %v2601_v17  ;;  %v3962_v13 = vsel %vm2827_vm5, %v3959_v38, %v3961_v1  ;;  %v5189_v17 = vrot.slane %v5187_v4, 1  ;;  %v5192_v18 = vrot.slane %v5190_v5, 2  ;;  %v13998_v19 = vld [vmem:[%s23520_s0 + $0xa0] sm:$0xff]  }
 0x262   :  { %v2221_v22 = vpop.f32.mrf.mxu1  ;;  %v3312_v24 = vpop.f32.mrf.mxu0  ;;  %v5196_v30 = vshrl.u32 %v13998_v19, 16 }
 0x263   :  { %3536 = vst.msk [vmem:[%s23521_s3 + $0x1e0] sm:$0xff] %vm15_vm3, %v3455_v20  ;;  %v2359_v27 = vadd.f32 %v2221_v22, %v1259_v21  ;;  %v5193_v29 = vor.u32 %v5192_v18, %v5189_v17 }
 0x264   :  { %v2602_v31 = vld [vmem:[%s23521_s3 + $0x1e8] sm:$0xff]  ;;  %v12632_v32 = vpop.f32.mrf.mxu1  ;;  %v12794_v33 = vpop.f32.mrf.mxu0 }
 0x265   :  { %2440 = vst.msk [vmem:[%s23521_s3 + $0x1f8] sm:$0xff] %vm15_vm3, %v2359_v27  ;;  %v3456_v34 = vadd.f32 %v3312_v24, %v2602_v31  ;;  %v5199_v31 = vshll.u32 %v13998_v19, 16  ;;  %v5194_v42 = vsel %vm5024_vm6, %v5184_v3, %v5193_v29  ;;  %v17559_v3 = vld [vmem:[%s23520_s0 + $0xb0] sm:$0xff]  }
 0x266   :  { %v2226_v36 = vpop.f32.mrf.mxu1  ;;  %v3317_v37 = vpop.f32.mrf.mxu0  ;;  %12898 = vmatmul.mubr.msk.bf16.gmra.mxu1 %vm463_vm2, %v3958_v25  ;;  %13060 = vmatmul.mubr.msk.bf16.gmra.mxu0 %vm463_vm2, %v5167_v28  ;;  %v1264_v25 = vld [vmem:[%s23521_s3 + $0x220] sm:$0xff]  ;;  %v3963_v28 = vrot.slane %v17469_v14, 1 }
 0x267   :  { %3537 = vst.msk [vmem:[%s23521_s3 + $0x1e8] sm:$0xff] %vm15_vm3, %v3456_v34  ;;  %v2360_v39 = vadd.f32 %v2226_v36, %v1260_v35  ;;  %12901 = vmatprep.mubr.msk.bf16.mxu1 %vm14207_vm1, %v14206_v0  ;;  %13063 = vmatprep.mubr.msk.bf16.mxu0 %vm14207_vm1, %v14206_v0  ;;  %v1265_v36 = vld [vmem:[%s23521_s3 + $0x228] sm:$0xff] }
 0x268   :  { %v2603_v43 = vld [vmem:[%s23521_s3 + $0x1f0] sm:$0xff]  ;;  %v12635_v44 = vpop.f32.mrf.mxu1  ;;  %v12797_v45 = vpop.f32.mrf.mxu0 }
 0x269   :  { %2441 = vst.msk [vmem:[%s23521_s3 + $0x200] sm:$0xff] %vm15_vm3, %v2360_v39  ;;  %v3457_v46 = vadd.f32 %v3317_v37, %v2603_v43  ;;  %v3964_v39 = vsel %vm2827_vm5, %v3961_v1, %v3963_v28  ;;  %v5198_v43 = vrot.slane %v5196_v30, 1  ;;  %v5201_v44 = vrot.slane %v5199_v31, 2  ;;  %v14000_v45 = vld [vmem:[%s23520_s0 + $0xa8] sm:$0xff]  }
 0x26a   :  { %v2229_v48 = vpop.f32.mrf.mxu1  ;;  %v3320_v49 = vpop.f32.mrf.mxu0  ;;  %v5205_v56 = vshrl.u32 %v14000_v45, 16 }
 0x26b   :  { %3538 = vst.msk [vmem:[%s23521_s3 + $0x1f0] sm:$0xff] %vm15_vm3, %v3457_v46  ;;  %v2361_v52 = vadd.f32 %v2229_v48, %v1261_v47  ;;  %v5202_v55 = vor.u32 %v5201_v44, %v5198_v43 }
 0x26c   :  { %v2604_v57 = vld [vmem:[%s23521_s3 + $0x1f8] sm:$0xff]  ;;  %v12636_v58 = vpop.f32.mrf.mxu1  ;;  %v12798_v59 = vpop.f32.mrf.mxu0 }
 0x26d   :  { %2442 = vst.msk [vmem:[%s23521_s3 + $0x208] sm:$0xff] %vm15_vm3, %v2361_v52  ;;  %v3458_v60 = vadd.f32 %v3320_v49, %v2604_v57  ;;  %v5208_v57 = vshll.u32 %v14000_v45, 16  ;;  %v5203_v5 = vsel %vm5024_vm6, %v5193_v29, %v5202_v55  ;;  %v17604_v29 = vld [vmem:[%s23520_s0 + $0xb8] sm:$0xff]  }
 0x26e   :  { %v2234_v62 = vpop.f32.mrf.mxu1  ;;  %v3325_v63 = vpop.f32.mrf.mxu0  ;;  %12902 = vmatmul.mubr.msk.bf16.gmra.mxu1 %vm463_vm2, %v3960_v50  ;;  %13064 = vmatmul.mubr.msk.bf16.gmra.mxu0 %vm463_vm2, %v5176_v53  ;;  %v1266_v50 = vld [vmem:[%s23521_s3 + $0x230] sm:$0xff]  ;;  %v3965_v53 = vrot.slane %v17514_v40, 1 }
 0x26f   :  { %3539 = vst.msk [vmem:[%s23521_s3 + $0x1f8] sm:$0xff] %vm15_vm3, %v3458_v60  ;;  %v2362_v2 = vadd.f32 %v2234_v62, %v1262_v61  ;;  %12905 = vmatprep.mubr.msk.bf16.mxu1 %vm14207_vm1, %v14206_v0  ;;  %13067 = vmatprep.mubr.msk.bf16.mxu0 %vm14207_vm1, %v14206_v0  ;;  %v1267_v62 = vld [vmem:[%s23521_s3 + $0x238] sm:$0xff] }
 0x270   :  { %v2605_v6 = vld [vmem:[%s23521_s3 + $0x200] sm:$0xff]  ;;  %v12639_v7 = vpop.f32.mrf.mxu1  ;;  %v12801_v8 = vpop.f32.mrf.mxu0 }
 0x271   :  { %2443 = vst.msk [vmem:[%s23521_s3 + $0x210] sm:$0xff] %vm15_vm3, %v2362_v2  ;;  %v3459_v9 = vadd.f32 %v3325_v63, %v2605_v6  ;;  %v3966_v2 = vsel %vm2827_vm5, %v3963_v28, %v3965_v53  ;;  %v5207_v6 = vrot.slane %v5205_v56, 1  ;;  %v5210_v7 = vrot.slane %v5208_v57, 2  ;;  %v14002_v8 = vld [vmem:[%s23520_s0 + $0xb0] sm:$0xff]  }
 0x272   :  { %v2237_v11 = vpop.f32.mrf.mxu1  ;;  %v3328_v12 = vpop.f32.mrf.mxu0  ;;  %v5214_v19 = vshrl.u32 %v14002_v8, 16 }
 0x273   :  { %3540 = vst.msk [vmem:[%s23521_s3 + $0x200] sm:$0xff] %vm15_vm3, %v3459_v9  ;;  %v2363_v15 = vadd.f32 %v2237_v11, %v1263_v10  ;;  %v5211_v18 = vor.u32 %v5210_v7, %v5207_v6 }
 0x274   :  { %v2606_v20 = vld [vmem:[%s23521_s3 + $0x208] sm:$0xff]  ;;  %v12640_v21 = vpop.f32.mrf.mxu1  ;;  %v12802_v22 = vpop.f32.mrf.mxu0 }
 0x275   :  { %2444 = vst.msk [vmem:[%s23521_s3 + $0x218] sm:$0xff] %vm15_vm3, %v2363_v15  ;;  %v3460_v24 = vadd.f32 %v3328_v12, %v2606_v20  ;;  %v5217_v20 = vshll.u32 %v14002_v8, 16  ;;  %v5212_v31 = vsel %vm5024_vm6, %v5202_v55, %v5211_v18  ;;  %v17649_v55 = vld [vmem:[%s23520_s0 + $0xc0] sm:$0xff]  }
 0x276   :  { %v2242_v26 = vpop.f32.mrf.mxu1  ;;  %v3333_v27 = vpop.f32.mrf.mxu0  ;;  %12906 = vmatmul.mubr.msk.bf16.gmra.mxu1 %vm463_vm2, %v3962_v13  ;;  %13068 = vmatmul.mubr.msk.bf16.gmra.mxu0 %vm463_vm2, %v5185_v16  ;;  %v1268_v13 = vld [vmem:[%s23521_s3 + $0x240] sm:$0xff]  ;;  %v3967_v16 = vrot.slane %v17559_v3, 1 }
 0x277   :  { %3541 = vst.msk [vmem:[%s23521_s3 + $0x208] sm:$0xff] %vm15_vm3, %v3460_v24  ;;  %v2364_v23 = vadd.f32 %v2242_v26, %v1264_v25  ;;  %12909 = vmatprep.mubr.msk.bf16.mxu1 %vm14207_vm1, %v14206_v0  ;;  %13071 = vmatprep.mubr.msk.bf16.mxu0 %vm14207_vm1, %v14206_v0  ;;  %v1269_v26 = vld [vmem:[%s23521_s3 + $0x248] sm:$0xff] }
 0x278   :  { %v2607_v32 = vld [vmem:[%s23521_s3 + $0x210] sm:$0xff]  ;;  %v12643_v33 = vpop.f32.mrf.mxu1  ;;  %v12805_v34 = vpop.f32.mrf.mxu0 }
 0x279   :  { %2445 = vst.msk [vmem:[%s23521_s3 + $0x220] sm:$0xff] %vm15_vm3, %v2364_v23  ;;  %v3461_v35 = vadd.f32 %v3333_v27, %v2607_v32  ;;  %v3968_v23 = vsel %vm2827_vm5, %v3965_v53, %v3967_v16  ;;  %v5216_v32 = vrot.slane %v5214_v19, 1  ;;  %v5219_v33 = vrot.slane %v5217_v20, 2  ;;  %v14004_v34 = vld [vmem:[%s23520_s0 + $0xb8] sm:$0xff]  }
 0x27a   :  { %v2245_v37 = vpop.f32.mrf.mxu1  ;;  %v3336_v38 = vpop.f32.mrf.mxu0  ;;  %v5223_v45 = vshrl.u32 %v14004_v34, 16 }
 0x27b   :  { %3542 = vst.msk [vmem:[%s23521_s3 + $0x210] sm:$0xff] %vm15_vm3, %v3461_v35  ;;  %v2365_v41 = vadd.f32 %v2245_v37, %v1265_v36  ;;  %v5220_v44 = vor.u32 %v5219_v33, %v5216_v32 }
 0x27c   :  { %v2608_v46 = vld [vmem:[%s23521_s3 + $0x218] sm:$0xff]  ;;  %v12644_v47 = vpop.f32.mrf.mxu1  ;;  %v12806_v48 = vpop.f32.mrf.mxu0 }
 0x27d   :  { %2446 = vst.msk [vmem:[%s23521_s3 + $0x228] sm:$0xff] %vm15_vm3, %v2365_v41  ;;  %v3462_v49 = vadd.f32 %v3336_v38, %v2608_v46  ;;  %v5226_v46 = vshll.u32 %v14004_v34, 16  ;;  %v5221_v57 = vsel %vm5024_vm6, %v5211_v18, %v5220_v44  ;;  %v17694_v18 = vld [vmem:[%s23520_s0 + $0xc8] sm:$0xff]  }
 0x27e   :  { %v2250_v51 = vpop.f32.mrf.mxu1  ;;  %v3341_v52 = vpop.f32.mrf.mxu0  ;;  %12910 = vmatmul.mubr.msk.bf16.gmra.mxu1 %vm463_vm2, %v3964_v39  ;;  %13072 = vmatmul.mubr.msk.bf16.gmra.mxu0 %vm463_vm2, %v5194_v42  ;;  %v1270_v39 = vld [vmem:[%s23521_s3 + $0x250] sm:$0xff]  ;;  %v3969_v42 = vrot.slane %v17604_v29, 1 }
 0x27f   :  { %3543 = vst.msk [vmem:[%s23521_s3 + $0x218] sm:$0xff] %vm15_vm3, %v3462_v49  ;;  %v2366_v54 = vadd.f32 %v2250_v51, %v1266_v50  ;;  %12913 = vmatprep.mubr.msk.bf16.mxu1 %vm14207_vm1, %v14206_v0  ;;  %13075 = vmatprep.mubr.msk.bf16.mxu0 %vm14207_vm1, %v14206_v0  ;;  %v1271_v51 = vld [vmem:[%s23521_s3 + $0x258] sm:$0xff] }
 0x280   :  { %v2609_v58 = vld [vmem:[%s23521_s3 + $0x220] sm:$0xff]  ;;  %v12647_v59 = vpop.f32.mrf.mxu1  ;;  %v12809_v60 = vpop.f32.mrf.mxu0 }
 0x281   :  { %2447 = vst.msk [vmem:[%s23521_s3 + $0x230] sm:$0xff] %vm15_vm3, %v2366_v54  ;;  %v3463_v61 = vadd.f32 %v3341_v52, %v2609_v58  ;;  %v3970_v54 = vsel %vm2827_vm5, %v3967_v16, %v3969_v42  ;;  %v5225_v58 = vrot.slane %v5223_v45, 1  ;;  %v5228_v59 = vrot.slane %v5226_v46, 2  ;;  %v14006_v60 = vld [vmem:[%s23520_s0 + $0xc0] sm:$0xff]  }
 0x282   :  { %v2253_v63 = vpop.f32.mrf.mxu1  ;;  %v3344_v1 = vpop.f32.mrf.mxu0  ;;  %v5232_v8 = vshrl.u32 %v14006_v60, 16 }
 0x283   :  { %3544 = vst.msk [vmem:[%s23521_s3 + $0x220] sm:$0xff] %vm15_vm3, %v3463_v61  ;;  %v2367_v4 = vadd.f32 %v2253_v63, %v1267_v62  ;;  %v5229_v7 = vor.u32 %v5228_v59, %v5225_v58 }
 0x284   :  { %v2610_v9 = vld [vmem:[%s23521_s3 + $0x228] sm:$0xff]  ;;  %v12648_v10 = vpop.f32.mrf.mxu1  ;;  %v12810_v11 = vpop.f32.mrf.mxu0 }
 0x285   :  { %2448 = vst.msk [vmem:[%s23521_s3 + $0x238] sm:$0xff] %vm15_vm3, %v2367_v4  ;;  %v3464_v12 = vadd.f32 %v3344_v1, %v2610_v9  ;;  %v5235_v9 = vshll.u32 %v14006_v60, 16  ;;  %v5230_v20 = vsel %vm5024_vm6, %v5220_v44, %v5229_v7  ;;  %v17739_v44 = vld [vmem:[%s23520_s0 + $0xd0] sm:$0xff]  }
 0x286   :  { %v2258_v14 = vpop.f32.mrf.mxu1  ;;  %v3349_v15 = vpop.f32.mrf.mxu0  ;;  %12914 = vmatmul.mubr.msk.bf16.gmra.mxu1 %vm463_vm2, %v3966_v2  ;;  %13076 = vmatmul.mubr.msk.bf16.gmra.mxu0 %vm463_vm2, %v5203_v5  ;;  %v1272_v2 = vld [vmem:[%s23521_s3 + $0x260] sm:$0xff]  ;;  %v3971_v5 = vrot.slane %v17649_v55, 1 }
 0x287   :  { %3545 = vst.msk [vmem:[%s23521_s3 + $0x228] sm:$0xff] %vm15_vm3, %v3464_v12  ;;  %v2368_v17 = vadd.f32 %v2258_v14, %v1268_v13  ;;  %12917 = vmatprep.mubr.msk.bf16.mxu1 %vm14207_vm1, %v14206_v0  ;;  %13079 = vmatprep.mubr.msk.bf16.mxu0 %vm14207_vm1, %v14206_v0  ;;  %v1273_v14 = vld [vmem:[%s23521_s3 + $0x268] sm:$0xff] }
 0x288   :  { %v2611_v21 = vld [vmem:[%s23521_s3 + $0x230] sm:$0xff]  ;;  %v12651_v22 = vpop.f32.mrf.mxu1  ;;  %v12813_v24 = vpop.f32.mrf.mxu0 }
 0x289   :  { %2449 = vst.msk [vmem:[%s23521_s3 + $0x240] sm:$0xff] %vm15_vm3, %v2368_v17  ;;  %v3465_v25 = vadd.f32 %v3349_v15, %v2611_v21  ;;  %v3972_v17 = vsel %vm2827_vm5, %v3969_v42, %v3971_v5  ;;  %v5234_v21 = vrot.slane %v5232_v8, 1  ;;  %v5237_v22 = vrot.slane %v5235_v9, 2  ;;  %v14008_v24 = vld [vmem:[%s23520_s0 + $0xc8] sm:$0xff]  }
 0x28a   :  { %v2261_v27 = vpop.f32.mrf.mxu1  ;;  %v3352_v28 = vpop.f32.mrf.mxu0  ;;  %v5241_v34 = vshrl.u32 %v14008_v24, 16 }
 0x28b   :  { %3546 = vst.msk [vmem:[%s23521_s3 + $0x230] sm:$0xff] %vm15_vm3, %v3465_v25  ;;  %v2369_v30 = vadd.f32 %v2261_v27, %v1269_v26  ;;  %v5238_v33 = vor.u32 %v5237_v22, %v5234_v21 }
 0x28c   :  { %v2612_v35 = vld [vmem:[%s23521_s3 + $0x238] sm:$0xff]  ;;  %v12652_v36 = vpop.f32.mrf.mxu1  ;;  %v12814_v37 = vpop.f32.mrf.mxu0 }
 0x28d   :  { %2450 = vst.msk [vmem:[%s23521_s3 + $0x248] sm:$0xff] %vm15_vm3, %v2369_v30  ;;  %v3466_v38 = vadd.f32 %v3352_v28, %v2612_v35  ;;  %v5244_v35 = vshll.u32 %v14008_v24, 16  ;;  %v5239_v46 = vsel %vm5024_vm6, %v5229_v7, %v5238_v33 }
 0x28e   :  { %v2266_v40 = vpop.f32.mrf.mxu1  ;;  %v3357_v41 = vpop.f32.mrf.mxu0  ;;  %12918 = vmatmul.mubr.msk.bf16.gmra.mxu1 %vm463_vm2, %v3968_v23  ;;  %13080 = vmatmul.mubr.msk.bf16.gmra.mxu0 %vm463_vm2, %v5212_v31  ;;  %v1274_v23 = vld [vmem:[%s23521_s3 + $0x270] sm:$0xff]  ;;  %v3973_v31 = vrot.slane %v17694_v18, 1 }
 0x28f   :  { %3547 = vst.msk [vmem:[%s23521_s3 + $0x238] sm:$0xff] %vm15_vm3, %v3466_v38  ;;  %v2370_v43 = vadd.f32 %v2266_v40, %v1270_v39  ;;  %12921 = vmatprep.mubr.msk.bf16.mxu1 %vm14207_vm1, %v14206_v0  ;;  %13083 = vmatprep.mubr.msk.bf16.mxu0 %vm14207_vm1, %v14206_v0  ;;  %v1275_v40 = vld [vmem:[%s23521_s3 + $0x278] sm:$0xff] }
 0x290   :  { %v2613_v47 = vld [vmem:[%s23521_s3 + $0x240] sm:$0xff]  ;;  %v12655_v48 = vpop.f32.mrf.mxu1  ;;  %v12817_v49 = vpop.f32.mrf.mxu0 }
 0x291   :  { %2451 = vst.msk [vmem:[%s23521_s3 + $0x250] sm:$0xff] %vm15_vm3, %v2370_v43  ;;  %v3467_v50 = vadd.f32 %v3357_v41, %v2613_v47  ;;  %v3974_v43 = vsel %vm2827_vm5, %v3971_v5, %v3973_v31  ;;  %v5243_v47 = vrot.slane %v5241_v34, 1  ;;  %v5246_v48 = vrot.slane %v5244_v35, 2  ;;  %v14010_v49 = vld [vmem:[%s23520_s0 + $0xd0] sm:$0xff]   ;;  %v17780_v5 = vld [vmem:[%s23520_s0 + $0xd8] sm:$0xff]  }
 0x292   :  { %v2269_v52 = vpop.f32.mrf.mxu1  ;;  %v3360_v53 = vpop.f32.mrf.mxu0  ;;  %v5250_v60 = vshrl.u32 %v14010_v49, 16  ;;  %v3977_v18 = vrot.slane %v17780_v5, 1 }
 0x293   :  { %3548 = vst.msk [vmem:[%s23521_s3 + $0x240] sm:$0xff] %vm15_vm3, %v3467_v50  ;;  %v2371_v56 = vadd.f32 %v2269_v52, %v1271_v51  ;;  %v5247_v59 = vor.u32 %v5246_v48, %v5243_v47 }
 0x294   :  { %v2614_v61 = vld [vmem:[%s23521_s3 + $0x248] sm:$0xff]  ;;  %v12656_v62 = vpop.f32.mrf.mxu1  ;;  %v12818_v63 = vpop.f32.mrf.mxu0  ;;  %v5252_v8 = vrot.slane %v5250_v60, 1 }
 0x295   :  { %2452 = vst.msk [vmem:[%s23521_s3 + $0x258] sm:$0xff] %vm15_vm3, %v2371_v56  ;;  %v3468_v1 = vadd.f32 %v3360_v53, %v2614_v61  ;;  %v5253_v61 = vshll.u32 %v14010_v49, 16  ;;  %v5248_v7 = vsel %vm5024_vm6, %v5238_v33, %v5247_v59  ;;  %v14016_v60 = vld [vmem:[%s23520_s0 + $0xe8] sm:$0xff]  }
 0x296   :  { %v2274_v3 = vpop.f32.mrf.mxu1  ;;  %v3365_v4 = vpop.f32.mrf.mxu0  ;;  %12922 = vmatmul.mubr.msk.bf16.gmra.mxu1 %vm463_vm2, %v3970_v54  ;;  %13084 = vmatmul.mubr.msk.bf16.gmra.mxu0 %vm463_vm2, %v5221_v57  ;;  %v1276_v54 = vld [vmem:[%s23521_s3 + $0x280] sm:$0xff]  ;;  %v3975_v57 = vrot.slane %v17739_v44, 1 }
 0x297   :  { %3549 = vst.msk [vmem:[%s23521_s3 + $0x248] sm:$0xff] %vm15_vm3, %v3468_v1  ;;  %v2372_v6 = vadd.f32 %v2274_v3, %v1272_v2  ;;  %12925 = vmatprep.mubr.msk.bf16.mxu1 %vm14207_vm1, %v14206_v0  ;;  %13087 = vmatprep.mubr.msk.bf16.mxu0 %vm14207_vm1, %v14206_v0  ;;  %v5255_v9 = vrot.slane %v5253_v61, 2 }
 0x298   :  { %v2615_v10 = vld [vmem:[%s23521_s3 + $0x250] sm:$0xff]  ;;  %v12659_v11 = vpop.f32.mrf.mxu1  ;;  %v12821_v12 = vpop.f32.mrf.mxu0 }
 0x299   :  { %2453 = vst.msk [vmem:[%s23521_s3 + $0x260] sm:$0xff] %vm15_vm3, %v2372_v6  ;;  %v3469_v13 = vadd.f32 %v3365_v4, %v2615_v10  ;;  %v3976_v6 = vsel %vm2827_vm5, %v3973_v31, %v3975_v57  ;;  %v14012_v10 = vld [vmem:[%s23520_s0 + $0xd8] sm:$0xff]   ;;  %v17822_v31 = vld [vmem:[%s23520_s0 + $0xe0] sm:$0xff]  }
 0x29a   :  { %v2277_v15 = vpop.f32.mrf.mxu1  ;;  %v3368_v16 = vpop.f32.mrf.mxu0  ;;  %v5259_v21 = vshrl.u32 %v14012_v10, 16  ;;  %v5262_v22 = vshll.u32 %v14012_v10, 16 }
 0x29b   :  { %3550 = vst.msk [vmem:[%s23521_s3 + $0x250] sm:$0xff] %vm15_vm3, %v3469_v13  ;;  %v2373_v19 = vadd.f32 %v2277_v15, %v1273_v14 }
 0x29c   :  { %v2616_v25 = vld [vmem:[%s23521_s3 + $0x258] sm:$0xff]  ;;  %v12660_v26 = vpop.f32.mrf.mxu1  ;;  %v12822_v27 = vpop.f32.mrf.mxu0  ;;  %v5261_v34 = vrot.slane %v5259_v21, 1  ;;  %v5264_v35 = vrot.slane %v5262_v22, 2 }
 0x29d   :  { %2454 = vst.msk [vmem:[%s23521_s3 + $0x268] sm:$0xff] %vm15_vm3, %v2373_v19  ;;  %v3470_v28 = vadd.f32 %v3368_v16, %v2616_v25  ;;  %v3640_v16 = vld [vmem:[%s23521_s3] sm:$0xff] }
 0x29e   :  { %v2282_v29 = vpop.f32.mrf.mxu1  ;;  %v3373_v30 = vpop.f32.mrf.mxu0  ;;  %12926 = vmatmul.mubr.msk.bf16.gmra.mxu1 %vm463_vm2, %v3972_v17  ;;  %13088 = vmatmul.mubr.msk.bf16.gmra.mxu0 %vm463_vm2, %v5230_v20  ;;  %v5256_v20 = vor.u32 %v5255_v9, %v5252_v8  ;;  %v5265_v44 = vor.u32 %v5264_v35, %v5261_v34  ;;  %v5277_v8 = vshrl.u32 %v14016_v60, 16  ;;  %v5280_v9 = vshll.u32 %v14016_v60, 16 }
 0x29f   :  { %3551 = vst.msk [vmem:[%s23521_s3 + $0x258] sm:$0xff] %vm15_vm3, %v3470_v28  ;;  %v2374_v32 = vadd.f32 %v2282_v29, %v1274_v23  ;;  %12929 = vmatprep.mubr.msk.bf16.mxu1 %vm14207_vm1, %v14206_v0  ;;  %13091 = vmatprep.mubr.msk.bf16.mxu0 %vm14207_vm1, %v14206_v0  ;;  %v3641_v23 = vld [vmem:[%s23521_s3 + $0x8] sm:$0xff] }
 0x2a0   :  { %v2617_v36 = vld [vmem:[%s23521_s3 + $0x260] sm:$0xff]  ;;  %v12663_v37 = vpop.f32.mrf.mxu1  ;;  %v12825_v38 = vpop.f32.mrf.mxu0  ;;  %v5257_v33 = vsel %vm5024_vm6, %v5247_v59, %v5256_v20  ;;  %v5279_v21 = vrot.slane %v5277_v8, 1  ;;  %v5282_v22 = vrot.slane %v5280_v9, 2 }
 0x2a1   :  { %2455 = vst.msk [vmem:[%s23521_s3 + $0x270] sm:$0xff] %vm15_vm3, %v2374_v32  ;;  %v3471_v39 = vadd.f32 %v3373_v30, %v2617_v36  ;;  %v3978_v30 = vsel %vm2827_vm5, %v3975_v57, %v3977_v18  ;;  %v14014_v36 = vld [vmem:[%s23520_s0 + $0xe0] sm:$0xff]   ;;  %v5266_v57 = vsel %vm5024_vm6, %v5256_v20, %v5265_v44 }
 0x2a2   :  { %v2285_v41 = vpop.f32.mrf.mxu1  ;;  %v3376_v42 = vpop.f32.mrf.mxu0 }
 0x2a3   :  { %3552 = vst.msk [vmem:[%s23521_s3 + $0x260] sm:$0xff] %vm15_vm3, %v3471_v39  ;;  %v2375_v45 = vadd.f32 %v2285_v41, %v1275_v40  ;;  %v3642_v39 = vld [vmem:[%s23521_s3 + $0x10] sm:$0xff] }
 0x2a4   :  { %v2618_v50 = vld [vmem:[%s23521_s3 + $0x268] sm:$0xff]  ;;  %v12664_v51 = vpop.f32.mrf.mxu1  ;;  %v12826_v52 = vpop.f32.mrf.mxu0 }
 0x2a5   :  { %2456 = vst.msk [vmem:[%s23521_s3 + $0x278] sm:$0xff] %vm15_vm3, %v2375_v45  ;;  %v3472_v53 = vadd.f32 %v3376_v42, %v2618_v50  ;;  %v3979_v42 = vrot.slane %v17822_v31, 1  ;;  %v5268_v45 = vshrl.u32 %v14014_v36, 16  ;;  %v3643_v51 = vld [vmem:[%s23521_s3 + $0x18] sm:$0xff] }
 0x2a6   :  { %v2290_v55 = vpop.f32.mrf.mxu1  ;;  %v3381_v56 = vpop.f32.mrf.mxu0  ;;  %12930 = vmatmul.mubr.msk.bf16.gmra.mxu1 %vm463_vm2, %v3974_v43  ;;  %13092 = vmatmul.mubr.msk.bf16.gmra.mxu0 %vm463_vm2, %v5239_v46  ;;  %v5271_v46 = vshll.u32 %v14014_v36, 16 }
 0x2a7   :  { %3553 = vst.msk [vmem:[%s23521_s3 + $0x268] sm:$0xff] %vm15_vm3, %v3472_v53  ;;  %v2376_v58 = vadd.f32 %v2290_v55, %v1276_v54  ;;  %12933 = vmatprep.mubr.msk.bf16.mxu1 %vm14207_vm1, %v14206_v0  ;;  %13095 = vmatprep.mubr.msk.bf16.mxu0 %vm14207_vm1, %v14206_v0  ;;  %v3980_v54 = vsel %vm2827_vm5, %v3977_v18, %v3979_v42  ;;  %v17860_v55 = vld [vmem:[%s23520_s0 + $0xe8] sm:$0xff]   ;;  %v17905_v18 = vld [vmem:[%s23520_s0 + $0xf0] sm:$0xff]  }
 0x2a8   :  { %v2619_v62 = vld [vmem:[%s23521_s3 + $0x270] sm:$0xff]  ;;  %v12667_v63 = vpop.f32.mrf.mxu1  ;;  %v12829_v1 = vpop.f32.mrf.mxu0  ;;  %v5273_v59 = vrot.slane %v5271_v46, 2  ;;  %v3981_v5 = vrot.slane %v17860_v55, 1  ;;  %v3983_v31 = vrot.slane %v17905_v18, 1 }
 0x2a9   :  { %2457 = vst.msk [vmem:[%s23521_s3 + $0x280] sm:$0xff] %vm15_vm3, %v2376_v58  ;;  %v3473_v2 = vadd.f32 %v3381_v56, %v2619_v62  ;;  %v5270_v58 = vrot.slane %v5268_v45, 1 }
 0x2aa   :  { %v2293_v3 = vpop.f32.mrf.mxu1  ;;  %v3384_v4 = vpop.f32.mrf.mxu0 }
 0x2ab   :  { %3554 = vst.msk [vmem:[%s23521_s3 + $0x270] sm:$0xff] %vm15_vm3, %v3473_v2  ;;  %v3644_v2 = vld [vmem:[%s23521_s3 + $0x20] sm:$0xff] }
 0x2ac   :  { %v2620_v11 = vld [vmem:[%s23521_s3 + $0x278] sm:$0xff]  ;;  %v12668_v12 = vpop.f32.mrf.mxu1  ;;  %v12830_v13 = vpop.f32.mrf.mxu0 }
 0x2ad   :  { %v3474_v14 = vadd.f32 %v3384_v4, %v2620_v11 }
 0x2ae   :  { %v3389_v15 = vpop.f32.mrf.mxu0  ;;  %v4167_v17 = vpop.f32.mrf.mxu1  ;;  %12934 = vmatmul.mubr.msk.bf16.gmra.mxu1 %vm463_vm2, %v3976_v6  ;;  %13096 = vmatmul.mubr.msk.bf16.gmra.mxu0 %vm463_vm2, %v5248_v7  ;;  %v5274_v7 = vor.u32 %v5273_v59, %v5270_v58 }
 0x2af   :  { %3555 = vst.msk [vmem:[%s23521_s3 + $0x278] sm:$0xff] %vm15_vm3, %v3474_v14  ;;  %v4493_v19 = vadd.f32 %v4167_v17, %v3640_v16  ;;  %12937 = vmatprep.mubr.msk.bf16.mxu1 %vm14207_vm1, %v14206_v0  ;;  %13099 = vmatprep.mubr.msk.bf16.mxu0 %vm14207_vm1, %v14206_v0  ;;  %v3645_v14 = vld [vmem:[%s23521_s3 + $0x28] sm:$0xff]  ;;  %v3982_v17 = vsel %vm2827_vm5, %v3979_v42, %v3981_v5 }
 0x2b0   :  { %v2621_v24 = vld [vmem:[%s23521_s3 + $0x280] sm:$0xff]  ;;  %v12833_v25 = vpop.f32.mrf.mxu0  ;;  %v12839_v26 = vpop.f32.mrf.mxu1  ;;  %v5275_v20 = vsel %vm5024_vm6, %v5265_v44, %v5274_v7  ;;  %v17950_v44 = vld [vmem:[%s23520_s0 + $0xf8] sm:$0xff]  }
 0x2b1   :  { %v3475_v27 = vadd.f32 %v3389_v15, %v2621_v24  ;;  %4574 = vst.msk [vmem:[%s23521_s3] sm:$0xff] %vm15_vm3, %v4493_v19  ;;  %v14018_v24 = vld [vmem:[%s23520_s0 + $0xf0] sm:$0xff]  }
 0x2b2   :  { %v3392_v28 = vpop.f32.mrf.mxu0  ;;  %v4170_v29 = vpop.f32.mrf.mxu1  ;;  %v5286_v34 = vshrl.u32 %v14018_v24, 16  ;;  %v5289_v35 = vshll.u32 %v14018_v24, 16 }
 0x2b3   :  { %3556 = vst.msk [vmem:[%s23521_s3 + $0x280] sm:$0xff] %vm15_vm3, %v3475_v27  ;;  %v4494_v32 = vadd.f32 %v4170_v29, %v3641_v23  ;;  %v3646_v23 = vld [vmem:[%s23521_s3 + $0x30] sm:$0xff] }
 0x2b4   :  { %v12834_v37 = vpop.f32.mrf.mxu0  ;;  %v12840_v38 = vpop.f32.mrf.mxu1 }
 0x2b5   :  { %4575 = vst.msk [vmem:[%s23521_s3 + $0x8] sm:$0xff] %vm15_vm3, %v4494_v32 }
 0x2b6   :  { %v4175_v40 = vpop.f32.mrf.mxu1  ;;  %12938 = vmatmul.mubr.msk.bf16.gmra.mxu1 %vm463_vm2, %v3978_v30  ;;  %v5553_v41 = vpop.f32.mrf.mxu0  ;;  %13100 = vmatmul.mubr.msk.bf16.gmra.mxu0 %vm463_vm2, %v5257_v33  ;;  %v5283_v33 = vor.u32 %v5282_v22, %v5279_v21 }
 0x2b7   :  { %v4495_v43 = vadd.f32 %v4175_v40, %v3642_v39  ;;  %12941 = vmatprep.mubr.msk.bf16.mxu1 %vm14207_vm1, %v14206_v0  ;;  %13103 = vmatprep.mubr.msk.bf16.mxu0 %vm14207_vm1, %v14206_v0  ;;  %v3647_v40 = vld [vmem:[%s23521_s3 + $0x38] sm:$0xff] }
 0x2b8   :  { %v4738_v47 = vld [vmem:[%s23521_s3] sm:$0xff]  ;;  %v12843_v48 = vpop.f32.mrf.mxu1  ;;  %v13005_v49 = vpop.f32.mrf.mxu0  ;;  %v5284_v46 = vsel %vm5024_vm6, %v5274_v7, %v5283_v33 }
 0x2b9   :  { %4576 = vst.msk [vmem:[%s23521_s3 + $0x10] sm:$0xff] %vm15_vm3, %v4495_v43  ;;  %v5879_v50 = vadd.f32 %v5553_v41, %v4738_v47  ;;  %v3984_v43 = vsel %vm2827_vm5, %v3981_v5, %v3983_v31  ;;  %v5288_v47 = vrot.slane %v5286_v34, 1  ;;  %v5291_v48 = vrot.slane %v5289_v35, 2  ;;  %v14020_v49 = vld [vmem:[%s23520_s0 + $0xf8] sm:$0xff]   ;;  %v17995_v7 = vld [vmem:[%s23520_s0 + $0x100] sm:$0xff]  }
 0x2ba   :  { %v4178_v52 = vpop.f32.mrf.mxu1  ;;  %v5556_v53 = vpop.f32.mrf.mxu0  ;;  %v5295_v60 = vshrl.u32 %v14020_v49, 16 }
 0x2bb   :  { %5960 = vst.msk [vmem:[%s23521_s3] sm:$0xff] %vm15_vm3, %v5879_v50  ;;  %v4496_v56 = vadd.f32 %v4178_v52, %v3643_v51  ;;  %v5292_v59 = vor.u32 %v5291_v48, %v5288_v47 }
 0x2bc   :  { %v4739_v61 = vld [vmem:[%s23521_s3 + $0x8] sm:$0xff]  ;;  %v12844_v62 = vpop.f32.mrf.mxu1  ;;  %v13006_v63 = vpop.f32.mrf.mxu0 }
 0x2bd   :  { %4577 = vst.msk [vmem:[%s23521_s3 + $0x18] sm:$0xff] %vm15_vm3, %v4496_v56  ;;  %v5880_v1 = vadd.f32 %v5556_v53, %v4739_v61  ;;  %v5298_v61 = vshll.u32 %v14020_v49, 16  ;;  %v5293_v9 = vsel %vm5024_vm6, %v5283_v33, %v5292_v59  ;;  %v18040_v33 = vld [vmem:[%s23520_s0 + $0x108] sm:$0xff]  }
 0x2be   :  { %v4183_v3 = vpop.f32.mrf.mxu1  ;;  %12942 = vmatmul.mubr.msk.bf16.gmra.mxu1 %vm463_vm2, %v3980_v54  ;;  %v5561_v4 = vpop.f32.mrf.mxu0  ;;  %13104 = vmatmul.mubr.msk.bf16.gmra.mxu0 %vm463_vm2, %v5266_v57  ;;  %v3648_v54 = vld [vmem:[%s23521_s3 + $0x40] sm:$0xff]  ;;  %v3985_v57 = vrot.slane %v17950_v44, 1 }
 0x2bf   :  { %5961 = vst.msk [vmem:[%s23521_s3 + $0x8] sm:$0xff] %vm15_vm3, %v5880_v1  ;;  %v4497_v6 = vadd.f32 %v4183_v3, %v3644_v2  ;;  %12945 = vmatprep.mubr.msk.bf16.mxu1 %vm14207_vm1, %v14206_v0  ;;  %13107 = vmatprep.mubr.msk.bf16.mxu0 %vm14207_vm1, %v14206_v0  ;;  %v3649_v3 = vld [vmem:[%s23521_s3 + $0x48] sm:$0xff] }
 0x2c0   :  { %v4740_v10 = vld [vmem:[%s23521_s3 + $0x10] sm:$0xff]  ;;  %v12847_v11 = vpop.f32.mrf.mxu1  ;;  %v13009_v12 = vpop.f32.mrf.mxu0 }
 0x2c1   :  { %4578 = vst.msk [vmem:[%s23521_s3 + $0x20] sm:$0xff] %vm15_vm3, %v4497_v6  ;;  %v5881_v13 = vadd.f32 %v5561_v4, %v4740_v10  ;;  %v3986_v6 = vsel %vm2827_vm5, %v3983_v31, %v3985_v57  ;;  %v5297_v10 = vrot.slane %v5295_v60, 1  ;;  %v5300_v11 = vrot.slane %v5298_v61, 2  ;;  %v14022_v12 = vld [vmem:[%s23520_s0 + $0x100] sm:$0xff]  }
 0x2c2   :  { %v4186_v15 = vpop.f32.mrf.mxu1  ;;  %v5564_v16 = vpop.f32.mrf.mxu0  ;;  %v5304_v24 = vshrl.u32 %v14022_v12, 16 }
 0x2c3   :  { %5962 = vst.msk [vmem:[%s23521_s3 + $0x10] sm:$0xff] %vm15_vm3, %v5881_v13  ;;  %v4498_v19 = vadd.f32 %v4186_v15, %v3645_v14  ;;  %v5301_v22 = vor.u32 %v5300_v11, %v5297_v10 }
 0x2c4   :  { %v4741_v25 = vld [vmem:[%s23521_s3 + $0x18] sm:$0xff]  ;;  %v12848_v26 = vpop.f32.mrf.mxu1  ;;  %v13010_v27 = vpop.f32.mrf.mxu0 }
 0x2c5   :  { %4579 = vst.msk [vmem:[%s23521_s3 + $0x28] sm:$0xff] %vm15_vm3, %v4498_v19  ;;  %v5882_v28 = vadd.f32 %v5564_v16, %v4741_v25  ;;  %v5307_v25 = vshll.u32 %v14022_v12, 16  ;;  %v5302_v35 = vsel %vm5024_vm6, %v5292_v59, %v5301_v22  ;;  %v18085_v59 = vld [vmem:[%s23520_s0 + $0x110] sm:$0xff]  }
 0x2c6   :  { %v4191_v29 = vpop.f32.mrf.mxu1  ;;  %12946 = vmatmul.mubr.msk.bf16.gmra.mxu1 %vm463_vm2, %v3982_v17  ;;  %v5569_v30 = vpop.f32.mrf.mxu0  ;;  %13108 = vmatmul.mubr.msk.bf16.gmra.mxu0 %vm463_vm2, %v5275_v20  ;;  %v3650_v17 = vld [vmem:[%s23521_s3 + $0x50] sm:$0xff]  ;;  %v3987_v20 = vrot.slane %v17995_v7, 1 }
 0x2c7   :  { %5963 = vst.msk [vmem:[%s23521_s3 + $0x18] sm:$0xff] %vm15_vm3, %v5882_v28  ;;  %v4499_v32 = vadd.f32 %v4191_v29, %v3646_v23  ;;  %12949 = vmatprep.mubr.msk.bf16.mxu1 %vm14207_vm1, %v14206_v0  ;;  %13111 = vmatprep.mubr.msk.bf16.mxu0 %vm14207_vm1, %v14206_v0  ;;  %v3651_v29 = vld [vmem:[%s23521_s3 + $0x58] sm:$0xff] }
 0x2c8   :  { %v4742_v36 = vld [vmem:[%s23521_s3 + $0x20] sm:$0xff]  ;;  %v12851_v37 = vpop.f32.mrf.mxu1  ;;  %v13013_v38 = vpop.f32.mrf.mxu0 }
 0x2c9   :  { %4580 = vst.msk [vmem:[%s23521_s3 + $0x30] sm:$0xff] %vm15_vm3, %v4499_v32  ;;  %v5883_v39 = vadd.f32 %v5569_v30, %v4742_v36  ;;  %v3988_v32 = vsel %vm2827_vm5, %v3985_v57, %v3987_v20  ;;  %v5306_v36 = vrot.slane %v5304_v24, 1  ;;  %v5309_v37 = vrot.slane %v5307_v25, 2  ;;  %v14024_v38 = vld [vmem:[%s23520_s0 + $0x108] sm:$0xff]  }
 0x2ca   :  { %v4194_v41 = vpop.f32.mrf.mxu1  ;;  %v5572_v42 = vpop.f32.mrf.mxu0  ;;  %v5313_v49 = vshrl.u32 %v14024_v38, 16 }
 0x2cb   :  { %5964 = vst.msk [vmem:[%s23521_s3 + $0x20] sm:$0xff] %vm15_vm3, %v5883_v39  ;;  %v4500_v45 = vadd.f32 %v4194_v41, %v3647_v40  ;;  %v5310_v48 = vor.u32 %v5309_v37, %v5306_v36 }
 0x2cc   :  { %v4743_v50 = vld [vmem:[%s23521_s3 + $0x28] sm:$0xff]  ;;  %v12852_v51 = vpop.f32.mrf.mxu1  ;;  %v13014_v52 = vpop.f32.mrf.mxu0 }
 0x2cd   :  { %4581 = vst.msk [vmem:[%s23521_s3 + $0x38] sm:$0xff] %vm15_vm3, %v4500_v45  ;;  %v5884_v53 = vadd.f32 %v5572_v42, %v4743_v50  ;;  %v5316_v50 = vshll.u32 %v14024_v38, 16  ;;  %v5311_v61 = vsel %vm5024_vm6, %v5301_v22, %v5310_v48  ;;  %v18130_v22 = vld [vmem:[%s23520_s0 + $0x118] sm:$0xff]  }
 0x2ce   :  { %v4199_v55 = vpop.f32.mrf.mxu1  ;;  %12950 = vmatmul.mubr.msk.bf16.gmra.mxu1 %vm463_vm2, %v3984_v43  ;;  %v5577_v56 = vpop.f32.mrf.mxu0  ;;  %13112 = vmatmul.mubr.msk.bf16.gmra.mxu0 %vm463_vm2, %v5284_v46  ;;  %v3652_v43 = vld [vmem:[%s23521_s3 + $0x60] sm:$0xff]  ;;  %v3989_v46 = vrot.slane %v18040_v33, 1 }
 0x2cf   :  { %5965 = vst.msk [vmem:[%s23521_s3 + $0x28] sm:$0xff] %vm15_vm3, %v5884_v53  ;;  %v4501_v58 = vadd.f32 %v4199_v55, %v3648_v54  ;;  %12953 = vmatprep.mubr.msk.bf16.mxu1 %vm14207_vm1, %v14206_v0  ;;  %13115 = vmatprep.mubr.msk.bf16.mxu0 %vm14207_vm1, %v14206_v0  ;;  %v3653_v55 = vld [vmem:[%s23521_s3 + $0x68] sm:$0xff] }
 0x2d0   :  { %v4744_v62 = vld [vmem:[%s23521_s3 + $0x30] sm:$0xff]  ;;  %v12855_v63 = vpop.f32.mrf.mxu1  ;;  %v13017_v1 = vpop.f32.mrf.mxu0 }
 0x2d1   :  { %4582 = vst.msk [vmem:[%s23521_s3 + $0x40] sm:$0xff] %vm15_vm3, %v4501_v58  ;;  %v5885_v2 = vadd.f32 %v5577_v56, %v4744_v62  ;;  %v3990_v58 = vsel %vm2827_vm5, %v3987_v20, %v3989_v46  ;;  %v5315_v62 = vrot.slane %v5313_v49, 1  ;;  %v5318_v63 = vrot.slane %v5316_v50, 2  ;;  %v14026_v1 = vld [vmem:[%s23520_s0 + $0x110] sm:$0xff]  }
 0x2d2   :  { %v4202_v4 = vpop.f32.mrf.mxu1  ;;  %v5580_v5 = vpop.f32.mrf.mxu0  ;;  %v5322_v12 = vshrl.u32 %v14026_v1, 16 }
 0x2d3   :  { %5966 = vst.msk [vmem:[%s23521_s3 + $0x30] sm:$0xff] %vm15_vm3, %v5885_v2  ;;  %v4502_v8 = vadd.f32 %v4202_v4, %v3649_v3  ;;  %v5319_v11 = vor.u32 %v5318_v63, %v5315_v62 }
 0x2d4   :  { %v4745_v13 = vld [vmem:[%s23521_s3 + $0x38] sm:$0xff]  ;;  %v12856_v14 = vpop.f32.mrf.mxu1  ;;  %v13018_v15 = vpop.f32.mrf.mxu0 }
 0x2d5   :  { %4583 = vst.msk [vmem:[%s23521_s3 + $0x48] sm:$0xff] %vm15_vm3, %v4502_v8  ;;  %v5886_v16 = vadd.f32 %v5580_v5, %v4745_v13  ;;  %v5325_v13 = vshll.u32 %v14026_v1, 16  ;;  %v5320_v25 = vsel %vm5024_vm6, %v5310_v48, %v5319_v11  ;;  %v18175_v48 = vld [vmem:[%s23520_s0 + $0x120] sm:$0xff]  }
 0x2d6   :  { %v4207_v18 = vpop.f32.mrf.mxu1  ;;  %12954 = vmatmul.mubr.msk.bf16.gmra.mxu1 %vm463_vm2, %v3986_v6  ;;  %v5585_v19 = vpop.f32.mrf.mxu0  ;;  %13116 = vmatmul.mubr.msk.bf16.gmra.mxu0 %vm463_vm2, %v5293_v9  ;;  %v3654_v6 = vld [vmem:[%s23521_s3 + $0x70] sm:$0xff]  ;;  %v3991_v9 = vrot.slane %v18085_v59, 1 }
 0x2d7   :  { %5967 = vst.msk [vmem:[%s23521_s3 + $0x38] sm:$0xff] %vm15_vm3, %v5886_v16  ;;  %v4503_v21 = vadd.f32 %v4207_v18, %v3650_v17  ;;  %12957 = vmatprep.mubr.msk.bf16.mxu1 %vm14207_vm1, %v14206_v0  ;;  %13119 = vmatprep.mubr.msk.bf16.mxu0 %vm14207_vm1, %v14206_v0  ;;  %v3655_v18 = vld [vmem:[%s23521_s3 + $0x78] sm:$0xff] }
 0x2d8   :  { %v4746_v26 = vld [vmem:[%s23521_s3 + $0x40] sm:$0xff]  ;;  %v12859_v27 = vpop.f32.mrf.mxu1  ;;  %v13021_v28 = vpop.f32.mrf.mxu0 }
 0x2d9   :  { %4584 = vst.msk [vmem:[%s23521_s3 + $0x50] sm:$0xff] %vm15_vm3, %v4503_v21  ;;  %v5887_v23 = vadd.f32 %v5585_v19, %v4746_v26  ;;  %v3992_v21 = vsel %vm2827_vm5, %v3989_v46, %v3991_v9  ;;  %v5324_v26 = vrot.slane %v5322_v12, 1  ;;  %v5327_v27 = vrot.slane %v5325_v13, 2  ;;  %v14028_v28 = vld [vmem:[%s23520_s0 + $0x118] sm:$0xff]  }
 0x2da   :  { %v4210_v30 = vpop.f32.mrf.mxu1  ;;  %v5588_v31 = vpop.f32.mrf.mxu0  ;;  %v5331_v38 = vshrl.u32 %v14028_v28, 16 }
 0x2db   :  { %5968 = vst.msk [vmem:[%s23521_s3 + $0x40] sm:$0xff] %vm15_vm3, %v5887_v23  ;;  %v4504_v34 = vadd.f32 %v4210_v30, %v3651_v29  ;;  %v5328_v37 = vor.u32 %v5327_v27, %v5324_v26 }
 0x2dc   :  { %v4747_v39 = vld [vmem:[%s23521_s3 + $0x48] sm:$0xff]  ;;  %v12860_v40 = vpop.f32.mrf.mxu1  ;;  %v13022_v41 = vpop.f32.mrf.mxu0 }
 0x2dd   :  { %4585 = vst.msk [vmem:[%s23521_s3 + $0x58] sm:$0xff] %vm15_vm3, %v4504_v34  ;;  %v5888_v42 = vadd.f32 %v5588_v31, %v4747_v39  ;;  %v5334_v39 = vshll.u32 %v14028_v28, 16  ;;  %v5329_v50 = vsel %vm5024_vm6, %v5319_v11, %v5328_v37  ;;  %v18220_v11 = vld [vmem:[%s23520_s0 + $0x128] sm:$0xff]  }
 0x2de   :  { %v4215_v44 = vpop.f32.mrf.mxu1  ;;  %12958 = vmatmul.mubr.msk.bf16.gmra.mxu1 %vm463_vm2, %v3988_v32  ;;  %v5593_v45 = vpop.f32.mrf.mxu0  ;;  %13120 = vmatmul.mubr.msk.bf16.gmra.mxu0 %vm463_vm2, %v5302_v35  ;;  %v3656_v32 = vld [vmem:[%s23521_s3 + $0x80] sm:$0xff]  ;;  %v3993_v35 = vrot.slane %v18130_v22, 1 }
 0x2df   :  { %5969 = vst.msk [vmem:[%s23521_s3 + $0x48] sm:$0xff] %vm15_vm3, %v5888_v42  ;;  %v4505_v47 = vadd.f32 %v4215_v44, %v3652_v43  ;;  %12961 = vmatprep.mubr.msk.bf16.mxu1 %vm14207_vm1, %v14206_v0  ;;  %13123 = vmatprep.mubr.msk.bf16.mxu0 %vm14207_vm1, %v14206_v0  ;;  %v3657_v44 = vld [vmem:[%s23521_s3 + $0x88] sm:$0xff] }
 0x2e0   :  { %v4748_v51 = vld [vmem:[%s23521_s3 + $0x50] sm:$0xff]  ;;  %v12863_v52 = vpop.f32.mrf.mxu1  ;;  %v13025_v53 = vpop.f32.mrf.mxu0 }
 0x2e1   :  { %4586 = vst.msk [vmem:[%s23521_s3 + $0x60] sm:$0xff] %vm15_vm3, %v4505_v47  ;;  %v5889_v54 = vadd.f32 %v5593_v45, %v4748_v51  ;;  %v3994_v47 = vsel %vm2827_vm5, %v3991_v9, %v3993_v35  ;;  %v5333_v51 = vrot.slane %v5331_v38, 1  ;;  %v5336_v52 = vrot.slane %v5334_v39, 2  ;;  %v14030_v53 = vld [vmem:[%s23520_s0 + $0x120] sm:$0xff]  }
 0x2e2   :  { %v4218_v56 = vpop.f32.mrf.mxu1  ;;  %v5596_v57 = vpop.f32.mrf.mxu0  ;;  %v5340_v1 = vshrl.u32 %v14030_v53, 16 }
 0x2e3   :  { %5970 = vst.msk [vmem:[%s23521_s3 + $0x50] sm:$0xff] %vm15_vm3, %v5889_v54  ;;  %v4506_v60 = vadd.f32 %v4218_v56, %v3653_v55  ;;  %v5337_v63 = vor.u32 %v5336_v52, %v5333_v51 }
 0x2e4   :  { %v4749_v2 = vld [vmem:[%s23521_s3 + $0x58] sm:$0xff]  ;;  %v12864_v3 = vpop.f32.mrf.mxu1  ;;  %v13026_v4 = vpop.f32.mrf.mxu0 }
 0x2e5   :  { %4587 = vst.msk [vmem:[%s23521_s3 + $0x68] sm:$0xff] %vm15_vm3, %v4506_v60  ;;  %v5890_v5 = vadd.f32 %v5596_v57, %v4749_v2  ;;  %v5343_v2 = vshll.u32 %v14030_v53, 16  ;;  %v5338_v13 = vsel %vm5024_vm6, %v5328_v37, %v5337_v63  ;;  %v18265_v37 = vld [vmem:[%s23520_s0 + $0x130] sm:$0xff]  }
 0x2e6   :  { %v4223_v7 = vpop.f32.mrf.mxu1  ;;  %12962 = vmatmul.mubr.msk.bf16.gmra.mxu1 %vm463_vm2, %v3990_v58  ;;  %v5601_v8 = vpop.f32.mrf.mxu0  ;;  %13124 = vmatmul.mubr.msk.bf16.gmra.mxu0 %vm463_vm2, %v5311_v61  ;;  %v3658_v58 = vld [vmem:[%s23521_s3 + $0x90] sm:$0xff]  ;;  %v3995_v61 = vrot.slane %v18175_v48, 1 }
 0x2e7   :  { %5971 = vst.msk [vmem:[%s23521_s3 + $0x58] sm:$0xff] %vm15_vm3, %v5890_v5  ;;  %v4507_v10 = vadd.f32 %v4223_v7, %v3654_v6  ;;  %12965 = vmatprep.mubr.msk.bf16.mxu1 %vm14207_vm1, %v14206_v0  ;;  %13127 = vmatprep.mubr.msk.bf16.mxu0 %vm14207_vm1, %v14206_v0  ;;  %v3659_v7 = vld [vmem:[%s23521_s3 + $0x98] sm:$0xff] }
 0x2e8   :  { %v4750_v14 = vld [vmem:[%s23521_s3 + $0x60] sm:$0xff]  ;;  %v12867_v15 = vpop.f32.mrf.mxu1  ;;  %v13029_v16 = vpop.f32.mrf.mxu0 }
 0x2e9   :  { %4588 = vst.msk [vmem:[%s23521_s3 + $0x70] sm:$0xff] %vm15_vm3, %v4507_v10  ;;  %v5891_v17 = vadd.f32 %v5601_v8, %v4750_v14  ;;  %v3996_v10 = vsel %vm2827_vm5, %v3993_v35, %v3995_v61  ;;  %v5342_v14 = vrot.slane %v5340_v1, 1  ;;  %v5345_v15 = vrot.slane %v5343_v2, 2  ;;  %v14032_v16 = vld [vmem:[%s23520_s0 + $0x128] sm:$0xff]  }
 0x2ea   :  { %v4226_v19 = vpop.f32.mrf.mxu1  ;;  %v5604_v20 = vpop.f32.mrf.mxu0  ;;  %v5349_v28 = vshrl.u32 %v14032_v16, 16 }
 0x2eb   :  { %5972 = vst.msk [vmem:[%s23521_s3 + $0x60] sm:$0xff] %vm15_vm3, %v5891_v17  ;;  %v4508_v24 = vadd.f32 %v4226_v19, %v3655_v18  ;;  %v5346_v27 = vor.u32 %v5345_v15, %v5342_v14 }
 0x2ec   :  { %v4751_v23 = vld [vmem:[%s23521_s3 + $0x68] sm:$0xff]  ;;  %v12868_v29 = vpop.f32.mrf.mxu1  ;;  %v13030_v30 = vpop.f32.mrf.mxu0 }
 0x2ed   :  { %4589 = vst.msk [vmem:[%s23521_s3 + $0x78] sm:$0xff] %vm15_vm3, %v4508_v24  ;;  %v5892_v31 = vadd.f32 %v5604_v20, %v4751_v23  ;;  %v5352_v23 = vshll.u32 %v14032_v16, 16  ;;  %v5347_v39 = vsel %vm5024_vm6, %v5337_v63, %v5346_v27  ;;  %v18310_v63 = vld [vmem:[%s23520_s0 + $0x138] sm:$0xff]  }
 0x2ee   :  { %v4231_v33 = vpop.f32.mrf.mxu1  ;;  %12966 = vmatmul.mubr.msk.bf16.gmra.mxu1 %vm463_vm2, %v3992_v21  ;;  %v5609_v34 = vpop.f32.mrf.mxu0  ;;  %13128 = vmatmul.mubr.msk.bf16.gmra.mxu0 %vm463_vm2, %v5320_v25  ;;  %v3660_v21 = vld [vmem:[%s23521_s3 + $0xa0] sm:$0xff]  ;;  %v3997_v25 = vrot.slane %v18220_v11, 1 }
 0x2ef   :  { %5973 = vst.msk [vmem:[%s23521_s3 + $0x68] sm:$0xff] %vm15_vm3, %v5892_v31  ;;  %v4509_v36 = vadd.f32 %v4231_v33, %v3656_v32  ;;  %12969 = vmatprep.mubr.msk.bf16.mxu1 %vm14207_vm1, %v14206_v0  ;;  %13131 = vmatprep.mubr.msk.bf16.mxu0 %vm14207_vm1, %v14206_v0  ;;  %v3661_v33 = vld [vmem:[%s23521_s3 + $0xa8] sm:$0xff] }
 0x2f0   :  { %v4752_v40 = vld [vmem:[%s23521_s3 + $0x70] sm:$0xff]  ;;  %v12871_v41 = vpop.f32.mrf.mxu1  ;;  %v13033_v42 = vpop.f32.mrf.mxu0 }
 0x2f1   :  { %4590 = vst.msk [vmem:[%s23521_s3 + $0x80] sm:$0xff] %vm15_vm3, %v4509_v36  ;;  %v5893_v43 = vadd.f32 %v5609_v34, %v4752_v40  ;;  %v3998_v36 = vsel %vm2827_vm5, %v3995_v61, %v3997_v25  ;;  %v5351_v40 = vrot.slane %v5349_v28, 1  ;;  %v5354_v41 = vrot.slane %v5352_v23, 2  ;;  %v14034_v42 = vld [vmem:[%s23520_s0 + $0x130] sm:$0xff]  }
 0x2f2   :  { %v4234_v45 = vpop.f32.mrf.mxu1  ;;  %v5612_v46 = vpop.f32.mrf.mxu0  ;;  %v5358_v53 = vshrl.u32 %v14034_v42, 16 }
 0x2f3   :  { %5974 = vst.msk [vmem:[%s23521_s3 + $0x70] sm:$0xff] %vm15_vm3, %v5893_v43  ;;  %v4510_v49 = vadd.f32 %v4234_v45, %v3657_v44  ;;  %v5355_v52 = vor.u32 %v5354_v41, %v5351_v40 }
 0x2f4   :  { %v4753_v54 = vld [vmem:[%s23521_s3 + $0x78] sm:$0xff]  ;;  %v12872_v55 = vpop.f32.mrf.mxu1  ;;  %v13034_v56 = vpop.f32.mrf.mxu0 }
 0x2f5   :  { %4591 = vst.msk [vmem:[%s23521_s3 + $0x88] sm:$0xff] %vm15_vm3, %v4510_v49  ;;  %v5894_v57 = vadd.f32 %v5612_v46, %v4753_v54  ;;  %v5361_v54 = vshll.u32 %v14034_v42, 16  ;;  %v5356_v2 = vsel %vm5024_vm6, %v5346_v27, %v5355_v52  ;;  %v18355_v27 = vld [vmem:[%s23520_s0 + $0x140] sm:$0xff]  }
 0x2f6   :  { %v4239_v59 = vpop.f32.mrf.mxu1  ;;  %12970 = vmatmul.mubr.msk.bf16.gmra.mxu1 %vm463_vm2, %v3994_v47  ;;  %v5617_v60 = vpop.f32.mrf.mxu0  ;;  %13132 = vmatmul.mubr.msk.bf16.gmra.mxu0 %vm463_vm2, %v5329_v50  ;;  %v3662_v47 = vld [vmem:[%s23521_s3 + $0xb0] sm:$0xff]  ;;  %v3999_v50 = vrot.slane %v18265_v37, 1 }
 0x2f7   :  { %5975 = vst.msk [vmem:[%s23521_s3 + $0x78] sm:$0xff] %vm15_vm3, %v5894_v57  ;;  %v4511_v62 = vadd.f32 %v4239_v59, %v3658_v58  ;;  %12973 = vmatprep.mubr.msk.bf16.mxu1 %vm14207_vm1, %v14206_v0  ;;  %13135 = vmatprep.mubr.msk.bf16.mxu0 %vm14207_vm1, %v14206_v0  ;;  %v3663_v59 = vld [vmem:[%s23521_s3 + $0xb8] sm:$0xff] }
 0x2f8   :  { %v4754_v3 = vld [vmem:[%s23521_s3 + $0x80] sm:$0xff]  ;;  %v12875_v4 = vpop.f32.mrf.mxu1  ;;  %v13037_v5 = vpop.f32.mrf.mxu0 }
 0x2f9   :  { %4592 = vst.msk [vmem:[%s23521_s3 + $0x90] sm:$0xff] %vm15_vm3, %v4511_v62  ;;  %v5895_v6 = vadd.f32 %v5617_v60, %v4754_v3  ;;  %v4000_v62 = vsel %vm2827_vm5, %v3997_v25, %v3999_v50  ;;  %v5360_v3 = vrot.slane %v5358_v53, 1  ;;  %v5363_v4 = vrot.slane %v5361_v54, 2  ;;  %v14036_v5 = vld [vmem:[%s23520_s0 + $0x138] sm:$0xff]  }
 0x2fa   :  { %v4242_v8 = vpop.f32.mrf.mxu1  ;;  %v5620_v9 = vpop.f32.mrf.mxu0  ;;  %v5367_v16 = vshrl.u32 %v14036_v5, 16 }
 0x2fb   :  { %5976 = vst.msk [vmem:[%s23521_s3 + $0x80] sm:$0xff] %vm15_vm3, %v5895_v6  ;;  %v4512_v12 = vadd.f32 %v4242_v8, %v3659_v7  ;;  %v5364_v15 = vor.u32 %v5363_v4, %v5360_v3 }
 0x2fc   :  { %v4755_v17 = vld [vmem:[%s23521_s3 + $0x88] sm:$0xff]  ;;  %v12876_v18 = vpop.f32.mrf.mxu1  ;;  %v13038_v19 = vpop.f32.mrf.mxu0 }
 0x2fd   :  { %4593 = vst.msk [vmem:[%s23521_s3 + $0x98] sm:$0xff] %vm15_vm3, %v4512_v12  ;;  %v5896_v20 = vadd.f32 %v5620_v9, %v4755_v17  ;;  %v5370_v17 = vshll.u32 %v14036_v5, 16  ;;  %v5365_v23 = vsel %vm5024_vm6, %v5355_v52, %v5364_v15  ;;  %v18400_v52 = vld [vmem:[%s23520_s0 + $0x148] sm:$0x1f]  }
 0x2fe   :  { %v4247_v22 = vpop.f32.mrf.mxu1  ;;  %12974 = vmatmul.mubr.msk.bf16.gmra.mxu1 %vm463_vm2, %v3996_v10  ;;  %v5625_v24 = vpop.f32.mrf.mxu0  ;;  %13136 = vmatmul.mubr.msk.bf16.gmra.mxu0 %vm463_vm2, %v5338_v13  ;;  %v3664_v10 = vld [vmem:[%s23521_s3 + $0xc0] sm:$0xff]  ;;  %v4001_v13 = vrot.slane %v18310_v63, 1 }
 0x2ff   :  { %5977 = vst.msk [vmem:[%s23521_s3 + $0x88] sm:$0xff] %vm15_vm3, %v5896_v20  ;;  %v4513_v26 = vadd.f32 %v4247_v22, %v3660_v21  ;;  %12977 = vmatprep.mubr.msk.bf16.mxu1 %vm14207_vm1, %v14206_v0  ;;  %13139 = vmatprep.mubr.msk.bf16.mxu0 %vm14207_vm1, %v14206_v0  ;;  %v3665_v22 = vld [vmem:[%s23521_s3 + $0xc8] sm:$0xff] }
 0x300   :  { %v4756_v29 = vld [vmem:[%s23521_s3 + $0x90] sm:$0xff]  ;;  %v12879_v30 = vpop.f32.mrf.mxu1  ;;  %v13041_v31 = vpop.f32.mrf.mxu0 }
 0x301   :  { %4594 = vst.msk [vmem:[%s23521_s3 + $0xa0] sm:$0xff] %vm15_vm3, %v4513_v26  ;;  %v5897_v32 = vadd.f32 %v5625_v24, %v4756_v29  ;;  %v4002_v26 = vsel %vm2827_vm5, %v3999_v50, %v4001_v13  ;;  %v5369_v29 = vrot.slane %v5367_v16, 1  ;;  %v5372_v30 = vrot.slane %v5370_v17, 2  ;;  %v14038_v31 = vld [vmem:[%s23520_s0 + $0x140] sm:$0xff]  }
 0x302   :  { %v4250_v34 = vpop.f32.mrf.mxu1  ;;  %v5628_v35 = vpop.f32.mrf.mxu0  ;;  %v5376_v42 = vshrl.u32 %v14038_v31, 16 }
 0x303   :  { %5978 = vst.msk [vmem:[%s23521_s3 + $0x90] sm:$0xff] %vm15_vm3, %v5897_v32  ;;  %v4514_v38 = vadd.f32 %v4250_v34, %v3661_v33  ;;  %v5373_v41 = vor.u32 %v5372_v30, %v5369_v29 }
 0x304   :  { %v4757_v43 = vld [vmem:[%s23521_s3 + $0x98] sm:$0xff]  ;;  %v12880_v44 = vpop.f32.mrf.mxu1  ;;  %v13042_v45 = vpop.f32.mrf.mxu0 }
 0x305   :  { %4595 = vst.msk [vmem:[%s23521_s3 + $0xa8] sm:$0xff] %vm15_vm3, %v4514_v38  ;;  %v5898_v46 = vadd.f32 %v5628_v35, %v4757_v43  ;;  %v5379_v43 = vshll.u32 %v14038_v31, 16  ;;  %v5374_v54 = vsel %vm5024_vm6, %v5364_v15, %v5373_v41 }
 0x306   :  { %v4255_v48 = vpop.f32.mrf.mxu1  ;;  %12978 = vmatmul.mubr.msk.bf16.gmra.mxu1 %vm463_vm2, %v3998_v36  ;;  %v5633_v49 = vpop.f32.mrf.mxu0  ;;  %13140 = vmatmul.mubr.msk.bf16.gmra.mxu0 %vm463_vm2, %v5347_v39  ;;  %v3666_v36 = vld [vmem:[%s23521_s3 + $0xd0] sm:$0xff]  ;;  %v4003_v39 = vrot.slane %v18355_v27, 1 }
 0x307   :  { %5979 = vst.msk [vmem:[%s23521_s3 + $0x98] sm:$0xff] %vm15_vm3, %v5898_v46  ;;  %v4515_v51 = vadd.f32 %v4255_v48, %v3662_v47  ;;  %12981 = vmatprep.mubr.msk.bf16.mxu1 %vm14207_vm1, %v14206_v0  ;;  %13143 = vmatprep.mubr.msk.bf16.mxu0 %vm14207_vm1, %v14206_v0  ;;  %v3667_v48 = vld [vmem:[%s23521_s3 + $0xd8] sm:$0xff] }
 0x308   :  { %v4758_v55 = vld [vmem:[%s23521_s3 + $0xa0] sm:$0xff]  ;;  %v12883_v56 = vpop.f32.mrf.mxu1  ;;  %v13045_v57 = vpop.f32.mrf.mxu0 }
 0x309   :  { %4596 = vst.msk [vmem:[%s23521_s3 + $0xb0] sm:$0xff] %vm15_vm3, %v4515_v51  ;;  %v5899_v58 = vadd.f32 %v5633_v49, %v4758_v55  ;;  %v4004_v51 = vsel %vm2827_vm5, %v4001_v13, %v4003_v39  ;;  %v5378_v55 = vrot.slane %v5376_v42, 1  ;;  %v5381_v56 = vrot.slane %v5379_v43, 2  ;;  %v14039_v57 = vld [vmem:[%s23520_s0 + $0x148] sm:$0x3f]   ;;  %v3672_v43 = vld [vmem:[%s23521_s3 + $0x100] sm:$0xff] }
 0x30a   :  { %v4258_v60 = vpop.f32.mrf.mxu1  ;;  %v5636_v61 = vpop.f32.mrf.mxu0  ;;  %v5385_v5 = vshrl.u32 %v14039_v57, 16 }
 0x30b   :  { %5980 = vst.msk [vmem:[%s23521_s3 + $0xa0] sm:$0xff] %vm15_vm3, %v5899_v58  ;;  %v4516_v1 = vadd.f32 %v4258_v60, %v3663_v59  ;;  %v5382_v4 = vor.u32 %v5381_v56, %v5378_v55 }
 0x30c   :  { %v4759_v6 = vld [vmem:[%s23521_s3 + $0xa8] sm:$0xff]  ;;  %v12884_v7 = vpop.f32.mrf.mxu1  ;;  %v13046_v8 = vpop.f32.mrf.mxu0  ;;  %v5387_v17 = vrot.slane %v5385_v5, 1 }
 0x30d   :  { %4597 = vst.msk [vmem:[%s23521_s3 + $0xb8] sm:$0xff] %vm15_vm3, %v4516_v1  ;;  %v5900_v9 = vadd.f32 %v5636_v61, %v4759_v6  ;;  %v5388_v6 = vshll.u32 %v14039_v57, 16  ;;  %v5383_v16 = vsel %vm5024_vm6, %v5373_v41, %v5382_v4 }
 0x30e   :  { %v4263_v11 = vpop.f32.mrf.mxu1  ;;  %12982 = vmatmul.mubr.msk.bf16.gmra.mxu1 %vm463_vm2, %v4000_v62  ;;  %v5641_v12 = vpop.f32.mrf.mxu0  ;;  %13144 = vmatmul.mubr.msk.bf16.gmra.mxu0 %vm463_vm2, %v5356_v2  ;;  %v3668_v62 = vld [vmem:[%s23521_s3 + $0xe0] sm:$0xff]  ;;  %v4005_v2 = vrot.slane %v18400_v52, 1 }
 0x30f   :  { %5981 = vst.msk [vmem:[%s23521_s3 + $0xa8] sm:$0xff] %vm15_vm3, %v5900_v9  ;;  %v4517_v14 = vadd.f32 %v4263_v11, %v3664_v10  ;;  %12985 = vmatprep.mubr.msk.bf16.mxu1 %vm14207_vm1, %v14206_v0  ;;  %13147 = vmatprep.mubr.msk.bf16.mxu0 %vm14207_vm1, %v14206_v0  ;;  %v3669_v11 = vld [vmem:[%s23521_s3 + $0xe8] sm:$0xff] }
 0x310   :  { %v4760_v18 = vld [vmem:[%s23521_s3 + $0xb0] sm:$0xff]  ;;  %v12887_v19 = vpop.f32.mrf.mxu1  ;;  %v13049_v20 = vpop.f32.mrf.mxu0 }
 0x311   :  { %4598 = vst.msk [vmem:[%s23521_s3 + $0xc0] sm:$0xff] %vm15_vm3, %v4517_v14  ;;  %v5901_v21 = vadd.f32 %v5641_v12, %v4760_v18  ;;  %v4006_v14 = vsel %vm2827_vm5, %v4003_v39, %v4005_v2  ;;  %v5390_v18 = vrot.slane %v5388_v6, 2 }
 0x312   :  { %v4266_v24 = vpop.f32.mrf.mxu1  ;;  %v5644_v25 = vpop.f32.mrf.mxu0 }
 0x313   :  { %5982 = vst.msk [vmem:[%s23521_s3 + $0xb0] sm:$0xff] %vm15_vm3, %v5901_v21  ;;  %v4518_v28 = vadd.f32 %v4266_v24, %v3665_v22  ;;  %v3670_v24 = vld [vmem:[%s23521_s3 + $0xf0] sm:$0xff] }
 0x314   :  { %v4761_v32 = vld [vmem:[%s23521_s3 + $0xb8] sm:$0xff]  ;;  %v12888_v33 = vpop.f32.mrf.mxu1  ;;  %v13050_v34 = vpop.f32.mrf.mxu0 }
 0x315   :  { %4599 = vst.msk [vmem:[%s23521_s3 + $0xc8] sm:$0xff] %vm15_vm3, %v4518_v28  ;;  %v5902_v35 = vadd.f32 %v5644_v25, %v4761_v32  ;;  %v5391_v28 = vor.u32 %v5390_v18, %v5387_v17  ;;  %v3671_v32 = vld [vmem:[%s23521_s3 + $0xf8] sm:$0xff] }
 0x316   :  { %v4271_v37 = vpop.f32.mrf.mxu1  ;;  %12986 = vmatmul.mubr.msk.bf16.gmra.mxu1 %vm463_vm2, %v4002_v26  ;;  %v5649_v38 = vpop.f32.mrf.mxu0  ;;  %13148 = vmatmul.mubr.msk.bf16.gmra.mxu0 %vm463_vm2, %v5365_v23 }
 0x317   :  { %5983 = vst.msk [vmem:[%s23521_s3 + $0xb8] sm:$0xff] %vm15_vm3, %v5902_v35  ;;  %v4519_v40 = vadd.f32 %v4271_v37, %v3666_v36  ;;  %12989 = vmatprep.mubr.msk.bf16.mxu1 %vm14207_vm1, %v14206_v0  ;;  %13151 = vmatprep.mubr.msk.bf16.mxu0 %vm14207_vm1, %v14206_v0  ;;  %v5392_v36 = vsel %vm5024_vm6, %v5382_v4, %v5391_v28  ;;  %v14040_v37 = vld [vmem:[%s23520_s0 + $0x8] sm:$0xfc]   ;;  %v3674_v4 = vld [vmem:[%s23521_s3 + $0x110] sm:$0xff] }
 0x318   :  { %v4762_v44 = vld [vmem:[%s23521_s3 + $0xc0] sm:$0xff]  ;;  %v12891_v45 = vpop.f32.mrf.mxu1  ;;  %v13053_v46 = vpop.f32.mrf.mxu0 }
 0x319   :  { %4600 = vst.msk [vmem:[%s23521_s3 + $0xd0] sm:$0xff] %vm15_vm3, %v4519_v40  ;;  %v5903_v47 = vadd.f32 %v5649_v38, %v4762_v44  ;;  %v18488_v38 = vld [vmem:[%s23520_s0 + $0x10] sm:$0xff]  }
 0x31a   :  { %v4274_v49 = vpop.f32.mrf.mxu1  ;;  %v5652_v50 = vpop.f32.mrf.mxu0 }
 0x31b   :  { %5984 = vst.msk [vmem:[%s23521_s3 + $0xc0] sm:$0xff] %vm15_vm3, %v5903_v47  ;;  %v4520_v53 = vadd.f32 %v4274_v49, %v3667_v48  ;;  %v6411_v47 = vrot.slane %v14040_v37, 2  ;;  %v6412_v48 = vrot.slane %v18488_v38, 2 }
 0x31c   :  { %v4763_v58 = vld [vmem:[%s23521_s3 + $0xc8] sm:$0xff]  ;;  %v12892_v59 = vpop.f32.mrf.mxu1  ;;  %v13054_v60 = vpop.f32.mrf.mxu0 }
 0x31d   :  { %4601 = vst.msk [vmem:[%s23521_s3 + $0xd8] sm:$0xff] %vm15_vm3, %v4520_v53  ;;  %v5904_v61 = vadd.f32 %v5652_v50, %v4763_v58  ;;  %v8320_v53 = vld [vmem:[%s23519_s1 + $0x1c] sm:$0xf]  ;;  %v6413_v58 = vsel %vm6410_vm7, %v6411_v47, %v6412_v48  ;;  %v14043_v60 = vld [vmem:[%s23520_s0 + $0x10] sm:$0xfc]  }
 0x31e   :  { %v4279_v63 = vpop.f32.mrf.mxu1  ;;  %12990 = vmatmul.mubr.msk.bf16.gmra.mxu1 %vm463_vm2, %v4004_v51  ;;  %v5657_v1 = vpop.f32.mrf.mxu0  ;;  %13152 = vmatmul.mubr.msk.bf16.gmra.mxu0 %vm463_vm2, %v5374_v54  ;;  %v3673_v54 = vld [vmem:[%s23521_s3 + $0x108] sm:$0xff]  ;;  %v18532_v59 = vld [vmem:[%s23520_s0 + $0x18] sm:$0xff]  }
 0x31f   :  { %5985 = vst.msk [vmem:[%s23521_s3 + $0xc8] sm:$0xff] %vm15_vm3, %v5904_v61  ;;  %v4521_v3 = vadd.f32 %v4279_v63, %v3668_v62  ;;  %12993 = vmatprep.mubr.msk.bf16.mxu1 %vm14207_vm1, %v14206_v0  ;;  %13155 = vmatprep.mubr.msk.bf16.mxu0 %vm14207_vm1, %v14206_v0  ;;  %v18540_v61 = vld [vmem:[%s23520_s0 + $0x18] sm:$0xff]  }
 0x320   :  { %v4764_v7 = vld [vmem:[%s23521_s3 + $0xd0] sm:$0xff]  ;;  %v12895_v8 = vpop.f32.mrf.mxu1  ;;  %v13057_v9 = vpop.f32.mrf.mxu0 }
 0x321   :  { %4602 = vst.msk [vmem:[%s23521_s3 + $0xe0] sm:$0xff] %vm15_vm3, %v4521_v3  ;;  %v5905_v10 = vadd.f32 %v5657_v1, %v4764_v7  ;;  %v6414_v8 = vrot.slane %v18532_v59, 2  ;;  %v7509_v9 = vrot.slane %v14043_v60, 2 }
 0x322   :  { %v4282_v12 = vpop.f32.mrf.mxu1  ;;  %v5660_v13 = vpop.f32.mrf.mxu0 }
 0x323   :  { %5986 = vst.msk [vmem:[%s23521_s3 + $0xd0] sm:$0xff] %vm15_vm3, %v5905_v10  ;;  %v4522_v15 = vadd.f32 %v4282_v12, %v3669_v11  ;;  %v7510_v10 = vrot.slane %v18540_v61, 2  ;;  %v3679_v61 = vld [vmem:[%s23521_s3 + $0x138] sm:$0xff] }
 0x324   :  { %v4765_v19 = vld [vmem:[%s23521_s3 + $0xd8] sm:$0xff]  ;;  %v12896_v20 = vpop.f32.mrf.mxu1  ;;  %v13058_v21 = vpop.f32.mrf.mxu0 }
 0x325   :  { %4603 = vst.msk [vmem:[%s23521_s3 + $0xe8] sm:$0xff] %vm15_vm3, %v4522_v15  ;;  %v5906_v22 = vadd.f32 %v5660_v13, %v4765_v19  ;;  %v9706_v15 = vld [vmem:[%s23519_s1 + $0x20] sm:$0xf]  ;;  %v6415_v20 = vsel %vm6410_vm7, %v6412_v48, %v6414_v8  ;;  %v7511_v21 = vsel %vm6410_vm7, %v7509_v9, %v7510_v10 }
 0x326   :  { %v4287_v25 = vpop.f32.mrf.mxu1  ;;  %12994 = vmatmul.mubr.msk.bf16.gmra.mxu1 %vm463_vm2, %v4006_v14  ;;  %v5665_v26 = vpop.f32.mrf.mxu0  ;;  %13156 = vmatmul.mubr.msk.bf16.gmra.mxu0 %vm463_vm2, %v5383_v16  ;;  %v3675_v16 = vld [vmem:[%s23521_s3 + $0x118] sm:$0xff] }
 0x327   :  { %5987 = vst.msk [vmem:[%s23521_s3 + $0xd8] sm:$0xff] %vm15_vm3, %v5906_v22  ;;  %v4523_v27 = vadd.f32 %v4287_v25, %v3670_v24  ;;  %12997 = vmatprep.mubr.msk.bf16.mxu1 %vm14207_vm1, %v14206_v0  ;;  %13159 = vmatprep.mubr.msk.bf16.mxu0 %vm14207_vm1, %v14206_v0  ;;  %v14045_v22 = vld [vmem:[%s23520_s0 + $0x20] sm:$0xff]  }
 0x328   :  { %v4766_v23 = vld [vmem:[%s23521_s3 + $0xe0] sm:$0xff]  ;;  %v12899_v29 = vpop.f32.mrf.mxu1  ;;  %v13061_v30 = vpop.f32.mrf.mxu0 }
 0x329   :  { %4604 = vst.msk [vmem:[%s23521_s3 + $0xf0] sm:$0xff] %vm15_vm3, %v4523_v27  ;;  %v5907_v31 = vadd.f32 %v5665_v26, %v4766_v23  ;;  %v14046_v24 = vld [vmem:[%s23520_s0 + $0x20] sm:$0xff]  }
 0x32a   :  { %v4290_v33 = vpop.f32.mrf.mxu1  ;;  %v5668_v34 = vpop.f32.mrf.mxu0  ;;  %v3676_v29 = vld [vmem:[%s23521_s3 + $0x120] sm:$0xff] }
 0x32b   :  { %5988 = vst.msk [vmem:[%s23521_s3 + $0xe0] sm:$0xff] %vm15_vm3, %v5907_v31  ;;  %v4524_v35 = vadd.f32 %v4290_v33, %v3671_v32  ;;  %v6416_v33 = vrot.slane %v14045_v22, 2 }
 0x32c   :  { %v4767_v39 = vld [vmem:[%s23521_s3 + $0xe8] sm:$0xff]  ;;  %v12900_v40 = vpop.f32.mrf.mxu1  ;;  %v13062_v41 = vpop.f32.mrf.mxu0 }
 0x32d   :  { %4605 = vst.msk [vmem:[%s23521_s3 + $0xf8] sm:$0xff] %vm15_vm3, %v4524_v35  ;;  %v5908_v42 = vadd.f32 %v5668_v34, %v4767_v39  ;;  %v7512_v34 = vrot.slane %v14046_v24, 2  ;;  %v3677_v39 = vld [vmem:[%s23521_s3 + $0x128] sm:$0xff] }
 0x32e   :  { %v4295_v44 = vpop.f32.mrf.mxu1  ;;  %12998 = vmatmul.mubr.msk.bf16.gmra.mxu1 %vm463_vm2, %v4005_v2  ;;  %v5673_v45 = vpop.f32.mrf.mxu0  ;;  %13160 = vmatmul.mubr.msk.bf16.gmra.mxu0 %vm463_vm2, %v5392_v36  ;;  %v9100_v2 = vsel %vm587_vm0, %v8320_v53, 0 }
 0x32f   :  { %5989 = vst.msk [vmem:[%s23521_s3 + $0xe8] sm:$0xff] %vm15_vm3, %v5908_v42  ;;  %v4525_v46 = vadd.f32 %v4295_v44, %v3672_v43  ;;  %13163 = vmatprep.mubr.msk.bf16.mxu0 %vm14207_vm1, %v14206_v0  ;;  %13169 = vmatprep.mubr.msk.bf16.mxu1 %vm14207_vm1, %v14206_v0  ;;  %v6417_v43 = vsel %vm6410_vm7, %v6414_v8, %v6416_v33 }
 0x330   :  { %v4768_v49 = vld [vmem:[%s23521_s3 + $0xf0] sm:$0xff]  ;;  %v12903_v50 = vpop.f32.mrf.mxu1  ;;  %v13065_v51 = vpop.f32.mrf.mxu0  ;;  %v7513_v44 = vsel %vm6410_vm7, %v7510_v10, %v7512_v34  ;;  %v3680_v10 = vld [vmem:[%s23521_s3 + $0x140] sm:$0xff] }
 0x331   :  { %4606 = vst.msk [vmem:[%s23521_s3 + $0x100] sm:$0xff] %vm15_vm3, %v4525_v46  ;;  %v5909_v52 = vadd.f32 %v5673_v45, %v4768_v49  ;;  %v14047_v45 = vld [vmem:[%s23520_s0 + $0x28] sm:$0xff]   ;;  %v3678_v51 = vld [vmem:[%s23521_s3 + $0x130] sm:$0xff] }
 0x332   :  { %v4298_v55 = vpop.f32.mrf.mxu1  ;;  %v5676_v56 = vpop.f32.mrf.mxu0  ;;  %v14048_v46 = vld [vmem:[%s23520_s0 + $0x28] sm:$0xff]  }
 0x333   :  { %5990 = vst.msk [vmem:[%s23521_s3 + $0xf0] sm:$0xff] %vm15_vm3, %v5909_v52  ;;  %v4526_v57 = vadd.f32 %v4298_v55, %v3673_v54  ;;  %v6418_v55 = vrot.slane %v14047_v45, 2 }
 0x334   :  { %v4769_v62 = vld [vmem:[%s23521_s3 + $0xf8] sm:$0xff]  ;;  %v12904_v63 = vpop.f32.mrf.mxu1  ;;  %v13066_v1 = vpop.f32.mrf.mxu0 }
 0x335   :  { %4607 = vst.msk [vmem:[%s23521_s3 + $0x108] sm:$0xff] %vm15_vm3, %v4526_v57  ;;  %v5910_v3 = vadd.f32 %v5676_v56, %v4769_v62  ;;  %v7514_v56 = vrot.slane %v14048_v46, 2 }
 0x336   :  { %v4303_v5 = vpop.f32.mrf.mxu1  ;;  %v5681_v6 = vpop.f32.mrf.mxu0  ;;  %13164 = vmatmul.mubr.msk.bf16.gmra.mxu0 %vm463_vm2, %v5391_v28  ;;  %13170 = vmatmul.mubr.msk.bf16.vlgmr.msra.gmra.mxu1 %vm463_vm2, %v6413_v58  ;;  %v10199_v28 = vsel %vm587_vm0, %v9706_v15, 0 }
 0x337   :  { %5991 = vst.msk [vmem:[%s23521_s3 + $0xf8] sm:$0xff] %vm15_vm3, %v5910_v3  ;;  %v4527_v7 = vadd.f32 %v4303_v5, %v3674_v4  ;;  %13500 = vmatpush3.bf16.msra.mxu1 %v9100_v2  ;;  %13173 = vmatprep.mubr.msk.bf16.mxu1 %vm14207_vm1, %v14206_v0  ;;  %v6419_v2 = vsel %vm6410_vm7, %v6416_v33, %v6418_v55  ;;  %v14049_v4 = vld [vmem:[%s23520_s0 + $0x30] sm:$0xff]  }
 0x338   :  { %v4770_v11 = vld [vmem:[%s23521_s3 + $0x100] sm:$0xff]  ;;  %v12907_v12 = vpop.f32.mrf.mxu1  ;;  %v13069_v13 = vpop.f32.mrf.mxu0  ;;  %13335 = vmatprep.mubr.msk.bf16.mxu0 %vm14207_vm1, %v14206_v0  ;;  %v7515_v3 = vsel %vm6410_vm7, %v7512_v34, %v7514_v56  ;;  %v14050_v5 = vld [vmem:[%s23520_s0 + $0x30] sm:$0xff]  }
 0x339   :  { %4608 = vst.msk [vmem:[%s23521_s3 + $0x110] sm:$0xff] %vm15_vm3, %v4527_v7  ;;  %v5911_v14 = vadd.f32 %v5681_v6, %v4770_v11  ;;  %v7516_v15 = vrot.slane %v14050_v5, 2 }
 0x33a   :  { %v4306_v17 = vpop.f32.mrf.mxu1  ;;  %v5684_v18 = vpop.f32.mrf.mxu0 }
 0x33b   :  { %5992 = vst.msk [vmem:[%s23521_s3 + $0x100] sm:$0xff] %vm15_vm3, %v5911_v14  ;;  %v4528_v19 = vadd.f32 %v4306_v17, %v3675_v16  ;;  %v6420_v14 = vrot.slane %v14049_v4, 2 }
 0x33c   :  { %v4771_v25 = vld [vmem:[%s23521_s3 + $0x108] sm:$0xff]  ;;  %v12908_v26 = vpop.f32.mrf.mxu1  ;;  %v13070_v27 = vpop.f32.mrf.mxu0 }
 0x33d   :  { %4609 = vst.msk [vmem:[%s23521_s3 + $0x118] sm:$0xff] %vm15_vm3, %v4528_v19  ;;  %v5912_v23 = vadd.f32 %v5684_v18, %v4771_v25  ;;  %v6421_v25 = vsel %vm6410_vm7, %v6418_v55, %v6420_v14  ;;  %v7517_v26 = vsel %vm6410_vm7, %v7514_v56, %v7516_v15  ;;  %v14051_v27 = vld [vmem:[%s23520_s0 + $0x38] sm:$0xff]  }
 0x33e   :  { %v4311_v30 = vpop.f32.mrf.mxu1  ;;  %v5689_v31 = vpop.f32.mrf.mxu0  ;;  %13174 = vmatmul.mubr.msk.bf16.gmra.mxu1 %vm463_vm2, %v6415_v20  ;;  %13336 = vmatmul.mubr.msk.bf16.vlgmr.msra.gmra.mxu0 %vm463_vm2, %v7511_v21  ;;  %v3681_v20 = vld [vmem:[%s23521_s3 + $0x148] sm:$0xff] }
 0x33f   :  { %5993 = vst.msk [vmem:[%s23521_s3 + $0x108] sm:$0xff] %vm15_vm3, %v5912_v23  ;;  %v4529_v32 = vadd.f32 %v4311_v30, %v3676_v29  ;;  %13666 = vmatpush3.bf16.msra.mxu0 %v10199_v28  ;;  %13177 = vmatprep.mubr.msk.bf16.mxu1 %vm14207_vm1, %v14206_v0  ;;  %v14052_v28 = vld [vmem:[%s23520_s0 + $0x38] sm:$0xff]  }
 0x340   :  { %v4772_v35 = vld [vmem:[%s23521_s3 + $0x110] sm:$0xff]  ;;  %v12911_v36 = vpop.f32.mrf.mxu1  ;;  %v13073_v37 = vpop.f32.mrf.mxu0  ;;  %13339 = vmatprep.mubr.msk.bf16.mxu0 %vm14207_vm1, %v14206_v0 }
 0x341   :  { %4610 = vst.msk [vmem:[%s23521_s3 + $0x120] sm:$0xff] %vm15_vm3, %v4529_v32  ;;  %v5913_v38 = vadd.f32 %v5689_v31, %v4772_v35  ;;  %v3682_v32 = vld [vmem:[%s23521_s3 + $0x150] sm:$0xff]  ;;  %v6422_v36 = vrot.slane %v14051_v27, 2  ;;  %v7518_v37 = vrot.slane %v14052_v28, 2 }
 0x342   :  { %v4314_v40 = vpop.f32.mrf.mxu1  ;;  %v5692_v41 = vpop.f32.mrf.mxu0 }
 0x343   :  { %5994 = vst.msk [vmem:[%s23521_s3 + $0x110] sm:$0xff] %vm15_vm3, %v5913_v38  ;;  %v4530_v42 = vadd.f32 %v4314_v40, %v3677_v39  ;;  %v6423_v46 = vsel %vm6410_vm7, %v6420_v14, %v6422_v36 }
 0x344   :  { %v4773_v47 = vld [vmem:[%s23521_s3 + $0x118] sm:$0xff]  ;;  %v12912_v48 = vpop.f32.mrf.mxu1  ;;  %v13074_v49 = vpop.f32.mrf.mxu0 }
 0x345   :  { %4611 = vst.msk [vmem:[%s23521_s3 + $0x128] sm:$0xff] %vm15_vm3, %v4530_v42  ;;  %v5914_v50 = vadd.f32 %v5692_v41, %v4773_v47  ;;  %v3683_v42 = vld [vmem:[%s23521_s3 + $0x158] sm:$0xff]  ;;  %v7519_v47 = vsel %vm6410_vm7, %v7516_v15, %v7518_v37  ;;  %v14053_v48 = vld [vmem:[%s23520_s0 + $0x40] sm:$0xff]  }
 0x346   :  { %v4319_v52 = vpop.f32.mrf.mxu1  ;;  %v5697_v53 = vpop.f32.mrf.mxu0  ;;  %13178 = vmatmul.mubr.msk.bf16.gmra.mxu1 %vm463_vm2, %v6417_v43  ;;  %13340 = vmatmul.mubr.msk.bf16.gmra.mxu0 %vm463_vm2, %v7513_v44  ;;  %v14054_v49 = vld [vmem:[%s23520_s0 + $0x40] sm:$0xff]  }
 0x347   :  { %5995 = vst.msk [vmem:[%s23521_s3 + $0x118] sm:$0xff] %vm15_vm3, %v5914_v50  ;;  %v4531_v54 = vadd.f32 %v4319_v52, %v3678_v51  ;;  %13181 = vmatprep.mubr.msk.bf16.mxu1 %vm14207_vm1, %v14206_v0  ;;  %13343 = vmatprep.mubr.msk.bf16.mxu0 %vm14207_vm1, %v14206_v0 }
 0x348   :  { %v4774_v57 = vld [vmem:[%s23521_s3 + $0x120] sm:$0xff]  ;;  %v12915_v58 = vpop.f32.mrf.mxu1  ;;  %v13077_v59 = vpop.f32.mrf.mxu0 }
 0x349   :  { %4612 = vst.msk [vmem:[%s23521_s3 + $0x130] sm:$0xff] %vm15_vm3, %v4531_v54  ;;  %v5915_v60 = vadd.f32 %v5697_v53, %v4774_v57  ;;  %v3684_v54 = vld [vmem:[%s23521_s3 + $0x160] sm:$0xff]  ;;  %v6424_v58 = vrot.slane %v14053_v48, 2  ;;  %v7520_v59 = vrot.slane %v14054_v49, 2 }
 0x34a   :  { %v4322_v62 = vpop.f32.mrf.mxu1  ;;  %v5700_v63 = vpop.f32.mrf.mxu0 }
 0x34b   :  { %5996 = vst.msk [vmem:[%s23521_s3 + $0x120] sm:$0xff] %vm15_vm3, %v5915_v60  ;;  %v4532_v1 = vadd.f32 %v4322_v62, %v3679_v61  ;;  %v6425_v5 = vsel %vm6410_vm7, %v6422_v36, %v6424_v58 }
 0x34c   :  { %v4775_v6 = vld [vmem:[%s23521_s3 + $0x128] sm:$0xff]  ;;  %v12916_v7 = vpop.f32.mrf.mxu1  ;;  %v13078_v8 = vpop.f32.mrf.mxu0 }
 0x34d   :  { %4613 = vst.msk [vmem:[%s23521_s3 + $0x138] sm:$0xff] %vm15_vm3, %v4532_v1  ;;  %v5916_v9 = vadd.f32 %v5700_v63, %v4775_v6  ;;  %v3685_v1 = vld [vmem:[%s23521_s3 + $0x168] sm:$0xff]  ;;  %v7521_v6 = vsel %vm6410_vm7, %v7518_v37, %v7520_v59 }
 0x34e   :  { %v4327_v11 = vpop.f32.mrf.mxu1  ;;  %v5705_v12 = vpop.f32.mrf.mxu0  ;;  %13182 = vmatmul.mubr.msk.bf16.gmra.mxu1 %vm463_vm2, %v6419_v2  ;;  %13344 = vmatmul.mubr.msk.bf16.gmra.mxu0 %vm463_vm2, %v7515_v3  ;;  %v14055_v7 = vld [vmem:[%s23520_s0 + $0x48] sm:$0xff]  }
 0x34f   :  { %5997 = vst.msk [vmem:[%s23521_s3 + $0x128] sm:$0xff] %vm15_vm3, %v5916_v9  ;;  %v4533_v13 = vadd.f32 %v4327_v11, %v3680_v10  ;;  %13185 = vmatprep.mubr.msk.bf16.mxu1 %vm14207_vm1, %v14206_v0  ;;  %13347 = vmatprep.mubr.msk.bf16.mxu0 %vm14207_vm1, %v14206_v0  ;;  %v14056_v8 = vld [vmem:[%s23520_s0 + $0x48] sm:$0xff]  }
 0x350   :  { %v4776_v16 = vld [vmem:[%s23521_s3 + $0x130] sm:$0xff]  ;;  %v12919_v17 = vpop.f32.mrf.mxu1  ;;  %v13081_v18 = vpop.f32.mrf.mxu0 }
 0x351   :  { %4614 = vst.msk [vmem:[%s23521_s3 + $0x140] sm:$0xff] %vm15_vm3, %v4533_v13  ;;  %v5917_v19 = vadd.f32 %v5705_v12, %v4776_v16  ;;  %v3686_v13 = vld [vmem:[%s23521_s3 + $0x170] sm:$0xff]  ;;  %v6426_v17 = vrot.slane %v14055_v7, 2  ;;  %v7522_v18 = vrot.slane %v14056_v8, 2 }
 0x352   :  { %v4330_v21 = vpop.f32.mrf.mxu1  ;;  %v5708_v22 = vpop.f32.mrf.mxu0 }
 0x353   :  { %5998 = vst.msk [vmem:[%s23521_s3 + $0x130] sm:$0xff] %vm15_vm3, %v5917_v19  ;;  %v4534_v24 = vadd.f32 %v4330_v21, %v3681_v20  ;;  %v6427_v28 = vsel %vm6410_vm7, %v6424_v58, %v6426_v17 }
 0x354   :  { %v4777_v23 = vld [vmem:[%s23521_s3 + $0x138] sm:$0xff]  ;;  %v12920_v29 = vpop.f32.mrf.mxu1  ;;  %v13082_v30 = vpop.f32.mrf.mxu0 }
 0x355   :  { %4615 = vst.msk [vmem:[%s23521_s3 + $0x148] sm:$0xff] %vm15_vm3, %v4534_v24  ;;  %v5918_v31 = vadd.f32 %v5708_v22, %v4777_v23  ;;  %v3687_v24 = vld [vmem:[%s23521_s3 + $0x178] sm:$0xff]  ;;  %v7523_v23 = vsel %vm6410_vm7, %v7520_v59, %v7522_v18  ;;  %v14057_v29 = vld [vmem:[%s23520_s0 + $0x50] sm:$0xff]  }
 0x356   :  { %v4335_v33 = vpop.f32.mrf.mxu1  ;;  %v5713_v34 = vpop.f32.mrf.mxu0  ;;  %13186 = vmatmul.mubr.msk.bf16.gmra.mxu1 %vm463_vm2, %v6421_v25  ;;  %13348 = vmatmul.mubr.msk.bf16.gmra.mxu0 %vm463_vm2, %v7517_v26  ;;  %v14058_v30 = vld [vmem:[%s23520_s0 + $0x50] sm:$0xff]  }
 0x357   :  { %5999 = vst.msk [vmem:[%s23521_s3 + $0x138] sm:$0xff] %vm15_vm3, %v5918_v31  ;;  %v4535_v35 = vadd.f32 %v4335_v33, %v3682_v32  ;;  %13189 = vmatprep.mubr.msk.bf16.mxu1 %vm14207_vm1, %v14206_v0  ;;  %13351 = vmatprep.mubr.msk.bf16.mxu0 %vm14207_vm1, %v14206_v0 }
 0x358   :  { %v4778_v38 = vld [vmem:[%s23521_s3 + $0x140] sm:$0xff]  ;;  %v12923_v39 = vpop.f32.mrf.mxu1  ;;  %v13085_v40 = vpop.f32.mrf.mxu0 }
 0x359   :  { %4616 = vst.msk [vmem:[%s23521_s3 + $0x150] sm:$0xff] %vm15_vm3, %v4535_v35  ;;  %v5919_v41 = vadd.f32 %v5713_v34, %v4778_v38  ;;  %v3688_v35 = vld [vmem:[%s23521_s3 + $0x180] sm:$0xff]  ;;  %v6428_v39 = vrot.slane %v14057_v29, 2  ;;  %v7524_v40 = vrot.slane %v14058_v30, 2 }
 0x35a   :  { %v4338_v43 = vpop.f32.mrf.mxu1  ;;  %v5716_v44 = vpop.f32.mrf.mxu0 }
 0x35b   :  { %6000 = vst.msk [vmem:[%s23521_s3 + $0x140] sm:$0xff] %vm15_vm3, %v5919_v41  ;;  %v4536_v45 = vadd.f32 %v4338_v43, %v3683_v42  ;;  %v6429_v49 = vsel %vm6410_vm7, %v6426_v17, %v6428_v39 }
 0x35c   :  { %v4779_v50 = vld [vmem:[%s23521_s3 + $0x148] sm:$0xff]  ;;  %v12924_v51 = vpop.f32.mrf.mxu1  ;;  %v13086_v52 = vpop.f32.mrf.mxu0 }
 0x35d   :  { %4617 = vst.msk [vmem:[%s23521_s3 + $0x158] sm:$0xff] %vm15_vm3, %v4536_v45  ;;  %v5920_v53 = vadd.f32 %v5716_v44, %v4779_v50  ;;  %v3689_v45 = vld [vmem:[%s23521_s3 + $0x188] sm:$0xff]  ;;  %v7525_v50 = vsel %vm6410_vm7, %v7522_v18, %v7524_v40  ;;  %v14059_v51 = vld [vmem:[%s23520_s0 + $0x58] sm:$0xff]  }
 0x35e   :  { %v4343_v55 = vpop.f32.mrf.mxu1  ;;  %v5721_v56 = vpop.f32.mrf.mxu0  ;;  %13190 = vmatmul.mubr.msk.bf16.gmra.mxu1 %vm463_vm2, %v6423_v46  ;;  %13352 = vmatmul.mubr.msk.bf16.gmra.mxu0 %vm463_vm2, %v7519_v47  ;;  %v14060_v52 = vld [vmem:[%s23520_s0 + $0x58] sm:$0xff]  }
 0x35f   :  { %6001 = vst.msk [vmem:[%s23521_s3 + $0x148] sm:$0xff] %vm15_vm3, %v5920_v53  ;;  %v4537_v57 = vadd.f32 %v4343_v55, %v3684_v54  ;;  %13193 = vmatprep.mubr.msk.bf16.mxu1 %vm14207_vm1, %v14206_v0  ;;  %13355 = vmatprep.mubr.msk.bf16.mxu0 %vm14207_vm1, %v14206_v0 }
 0x360   :  { %v4780_v60 = vld [vmem:[%s23521_s3 + $0x150] sm:$0xff]  ;;  %v12927_v61 = vpop.f32.mrf.mxu1  ;;  %v13089_v62 = vpop.f32.mrf.mxu0 }
 0x361   :  { %4618 = vst.msk [vmem:[%s23521_s3 + $0x160] sm:$0xff] %vm15_vm3, %v4537_v57  ;;  %v5921_v63 = vadd.f32 %v5721_v56, %v4780_v60  ;;  %v3690_v57 = vld [vmem:[%s23521_s3 + $0x190] sm:$0xff]  ;;  %v6430_v61 = vrot.slane %v14059_v51, 2  ;;  %v7526_v62 = vrot.slane %v14060_v52, 2 }
 0x362   :  { %v4346_v2 = vpop.f32.mrf.mxu1  ;;  %v5724_v3 = vpop.f32.mrf.mxu0 }
 0x363   :  { %6002 = vst.msk [vmem:[%s23521_s3 + $0x150] sm:$0xff] %vm15_vm3, %v5921_v63  ;;  %v4538_v4 = vadd.f32 %v4346_v2, %v3685_v1  ;;  %v6431_v8 = vsel %vm6410_vm7, %v6428_v39, %v6430_v61 }
 0x364   :  { %v4781_v9 = vld [vmem:[%s23521_s3 + $0x158] sm:$0xff]  ;;  %v12928_v10 = vpop.f32.mrf.mxu1  ;;  %v13090_v11 = vpop.f32.mrf.mxu0 }
 0x365   :  { %4619 = vst.msk [vmem:[%s23521_s3 + $0x168] sm:$0xff] %vm15_vm3, %v4538_v4  ;;  %v5922_v12 = vadd.f32 %v5724_v3, %v4781_v9  ;;  %v3691_v4 = vld [vmem:[%s23521_s3 + $0x198] sm:$0xff]  ;;  %v7527_v9 = vsel %vm6410_vm7, %v7524_v40, %v7526_v62  ;;  %v14061_v10 = vld [vmem:[%s23520_s0 + $0x60] sm:$0xff]  }
 0x366   :  { %v4351_v14 = vpop.f32.mrf.mxu1  ;;  %v5729_v15 = vpop.f32.mrf.mxu0  ;;  %13194 = vmatmul.mubr.msk.bf16.gmra.mxu1 %vm463_vm2, %v6425_v5  ;;  %13356 = vmatmul.mubr.msk.bf16.gmra.mxu0 %vm463_vm2, %v7521_v6  ;;  %v14062_v11 = vld [vmem:[%s23520_s0 + $0x60] sm:$0xff]  }
 0x367   :  { %6003 = vst.msk [vmem:[%s23521_s3 + $0x158] sm:$0xff] %vm15_vm3, %v5922_v12  ;;  %v4539_v16 = vadd.f32 %v4351_v14, %v3686_v13  ;;  %13197 = vmatprep.mubr.msk.bf16.mxu1 %vm14207_vm1, %v14206_v0  ;;  %13359 = vmatprep.mubr.msk.bf16.mxu0 %vm14207_vm1, %v14206_v0 }
 0x368   :  { %v4782_v19 = vld [vmem:[%s23521_s3 + $0x160] sm:$0xff]  ;;  %v12931_v20 = vpop.f32.mrf.mxu1  ;;  %v13093_v21 = vpop.f32.mrf.mxu0 }
 0x369   :  { %4620 = vst.msk [vmem:[%s23521_s3 + $0x170] sm:$0xff] %vm15_vm3, %v4539_v16  ;;  %v5923_v22 = vadd.f32 %v5729_v15, %v4782_v19  ;;  %v3692_v16 = vld [vmem:[%s23521_s3 + $0x1a0] sm:$0xff]  ;;  %v6432_v20 = vrot.slane %v14061_v10, 2  ;;  %v7528_v21 = vrot.slane %v14062_v11, 2 }
 0x36a   :  { %v4354_v25 = vpop.f32.mrf.mxu1  ;;  %v5732_v26 = vpop.f32.mrf.mxu0 }
 0x36b   :  { %6004 = vst.msk [vmem:[%s23521_s3 + $0x160] sm:$0xff] %vm15_vm3, %v5923_v22  ;;  %v4540_v27 = vadd.f32 %v4354_v25, %v3687_v24  ;;  %v6433_v30 = vsel %vm6410_vm7, %v6430_v61, %v6432_v20 }
 0x36c   :  { %v4783_v31 = vld [vmem:[%s23521_s3 + $0x168] sm:$0xff]  ;;  %v12932_v32 = vpop.f32.mrf.mxu1  ;;  %v13094_v33 = vpop.f32.mrf.mxu0 }
 0x36d   :  { %4621 = vst.msk [vmem:[%s23521_s3 + $0x178] sm:$0xff] %vm15_vm3, %v4540_v27  ;;  %v5924_v34 = vadd.f32 %v5732_v26, %v4783_v31  ;;  %v3693_v27 = vld [vmem:[%s23521_s3 + $0x1a8] sm:$0xff]  ;;  %v7529_v31 = vsel %vm6410_vm7, %v7526_v62, %v7528_v21 }
 0x36e   :  { %v4359_v36 = vpop.f32.mrf.mxu1  ;;  %v5737_v37 = vpop.f32.mrf.mxu0  ;;  %13198 = vmatmul.mubr.msk.bf16.gmra.mxu1 %vm463_vm2, %v6427_v28  ;;  %13360 = vmatmul.mubr.msk.bf16.gmra.mxu0 %vm463_vm2, %v7523_v23  ;;  %v14063_v32 = vld [vmem:[%s23520_s0 + $0x68] sm:$0xff]  }
 0x36f   :  { %6005 = vst.msk [vmem:[%s23521_s3 + $0x168] sm:$0xff] %vm15_vm3, %v5924_v34  ;;  %v4541_v38 = vadd.f32 %v4359_v36, %v3688_v35  ;;  %13201 = vmatprep.mubr.msk.bf16.mxu1 %vm14207_vm1, %v14206_v0  ;;  %13363 = vmatprep.mubr.msk.bf16.mxu0 %vm14207_vm1, %v14206_v0  ;;  %v14064_v33 = vld [vmem:[%s23520_s0 + $0x68] sm:$0xff]  }
 0x370   :  { %v4784_v41 = vld [vmem:[%s23521_s3 + $0x170] sm:$0xff]  ;;  %v12935_v42 = vpop.f32.mrf.mxu1  ;;  %v13097_v43 = vpop.f32.mrf.mxu0 }
 0x371   :  { %4622 = vst.msk [vmem:[%s23521_s3 + $0x180] sm:$0xff] %vm15_vm3, %v4541_v38  ;;  %v5925_v44 = vadd.f32 %v5737_v37, %v4784_v41  ;;  %v3694_v38 = vld [vmem:[%s23521_s3 + $0x1b0] sm:$0xff]  ;;  %v6434_v42 = vrot.slane %v14063_v32, 2  ;;  %v7530_v43 = vrot.slane %v14064_v33, 2 }
 0x372   :  { %v4362_v46 = vpop.f32.mrf.mxu1  ;;  %v5740_v47 = vpop.f32.mrf.mxu0 }
 0x373   :  { %6006 = vst.msk [vmem:[%s23521_s3 + $0x170] sm:$0xff] %vm15_vm3, %v5925_v44  ;;  %v4542_v48 = vadd.f32 %v4362_v46, %v3689_v45  ;;  %v6435_v52 = vsel %vm6410_vm7, %v6432_v20, %v6434_v42 }
 0x374   :  { %v4785_v53 = vld [vmem:[%s23521_s3 + $0x178] sm:$0xff]  ;;  %v12936_v54 = vpop.f32.mrf.mxu1  ;;  %v13098_v55 = vpop.f32.mrf.mxu0 }
 0x375   :  { %4623 = vst.msk [vmem:[%s23521_s3 + $0x188] sm:$0xff] %vm15_vm3, %v4542_v48  ;;  %v5926_v56 = vadd.f32 %v5740_v47, %v4785_v53  ;;  %v3695_v48 = vld [vmem:[%s23521_s3 + $0x1b8] sm:$0xff]  ;;  %v7531_v53 = vsel %vm6410_vm7, %v7528_v21, %v7530_v43  ;;  %v14065_v54 = vld [vmem:[%s23520_s0 + $0x70] sm:$0xff]  }
 0x376   :  { %v4367_v58 = vpop.f32.mrf.mxu1  ;;  %v5745_v59 = vpop.f32.mrf.mxu0  ;;  %13202 = vmatmul.mubr.msk.bf16.gmra.mxu1 %vm463_vm2, %v6429_v49  ;;  %13364 = vmatmul.mubr.msk.bf16.gmra.mxu0 %vm463_vm2, %v7525_v50  ;;  %v14066_v55 = vld [vmem:[%s23520_s0 + $0x70] sm:$0xff]  }
 0x377   :  { %6007 = vst.msk [vmem:[%s23521_s3 + $0x178] sm:$0xff] %vm15_vm3, %v5926_v56  ;;  %v4543_v60 = vadd.f32 %v4367_v58, %v3690_v57  ;;  %13205 = vmatprep.mubr.msk.bf16.mxu1 %vm14207_vm1, %v14206_v0  ;;  %13367 = vmatprep.mubr.msk.bf16.mxu0 %vm14207_vm1, %v14206_v0 }
 0x378   :  { %v4786_v63 = vld [vmem:[%s23521_s3 + $0x180] sm:$0xff]  ;;  %v12939_v1 = vpop.f32.mrf.mxu1  ;;  %v13101_v2 = vpop.f32.mrf.mxu0 }
 0x379   :  { %4624 = vst.msk [vmem:[%s23521_s3 + $0x190] sm:$0xff] %vm15_vm3, %v4543_v60  ;;  %v5927_v3 = vadd.f32 %v5745_v59, %v4786_v63  ;;  %v3696_v60 = vld [vmem:[%s23521_s3 + $0x1c0] sm:$0xff]  ;;  %v6436_v1 = vrot.slane %v14065_v54, 2  ;;  %v7532_v2 = vrot.slane %v14066_v55, 2 }
 0x37a   :  { %v4370_v5 = vpop.f32.mrf.mxu1  ;;  %v5748_v6 = vpop.f32.mrf.mxu0 }
 0x37b   :  { %6008 = vst.msk [vmem:[%s23521_s3 + $0x180] sm:$0xff] %vm15_vm3, %v5927_v3  ;;  %v4544_v7 = vadd.f32 %v4370_v5, %v3691_v4  ;;  %v6437_v11 = vsel %vm6410_vm7, %v6434_v42, %v6436_v1 }
 0x37c   :  { %v4787_v12 = vld [vmem:[%s23521_s3 + $0x188] sm:$0xff]  ;;  %v12940_v13 = vpop.f32.mrf.mxu1  ;;  %v13102_v14 = vpop.f32.mrf.mxu0 }
 0x37d   :  { %4625 = vst.msk [vmem:[%s23521_s3 + $0x198] sm:$0xff] %vm15_vm3, %v4544_v7  ;;  %v5928_v15 = vadd.f32 %v5748_v6, %v4787_v12  ;;  %v3697_v7 = vld [vmem:[%s23521_s3 + $0x1c8] sm:$0xff]  ;;  %v7533_v12 = vsel %vm6410_vm7, %v7530_v43, %v7532_v2  ;;  %v14067_v13 = vld [vmem:[%s23520_s0 + $0x78] sm:$0xff]  }
 0x37e   :  { %v4375_v17 = vpop.f32.mrf.mxu1  ;;  %v5753_v18 = vpop.f32.mrf.mxu0  ;;  %13206 = vmatmul.mubr.msk.bf16.gmra.mxu1 %vm463_vm2, %v6431_v8  ;;  %13368 = vmatmul.mubr.msk.bf16.gmra.mxu0 %vm463_vm2, %v7527_v9  ;;  %v14068_v14 = vld [vmem:[%s23520_s0 + $0x78] sm:$0xff]  }
 0x37f   :  { %6009 = vst.msk [vmem:[%s23521_s3 + $0x188] sm:$0xff] %vm15_vm3, %v5928_v15  ;;  %v4545_v19 = vadd.f32 %v4375_v17, %v3692_v16  ;;  %13209 = vmatprep.mubr.msk.bf16.mxu1 %vm14207_vm1, %v14206_v0  ;;  %13371 = vmatprep.mubr.msk.bf16.mxu0 %vm14207_vm1, %v14206_v0 }
 0x380   :  { %v4788_v22 = vld [vmem:[%s23521_s3 + $0x190] sm:$0xff]  ;;  %v12943_v24 = vpop.f32.mrf.mxu1  ;;  %v13105_v25 = vpop.f32.mrf.mxu0 }
 0x381   :  { %4626 = vst.msk [vmem:[%s23521_s3 + $0x1a0] sm:$0xff] %vm15_vm3, %v4545_v19  ;;  %v5929_v26 = vadd.f32 %v5753_v18, %v4788_v22  ;;  %v3698_v19 = vld [vmem:[%s23521_s3 + $0x1d0] sm:$0xff]  ;;  %v6438_v24 = vrot.slane %v14067_v13, 2  ;;  %v7534_v25 = vrot.slane %v14068_v14, 2 }
 0x382   :  { %v4378_v28 = vpop.f32.mrf.mxu1  ;;  %v5756_v23 = vpop.f32.mrf.mxu0 }
 0x383   :  { %6010 = vst.msk [vmem:[%s23521_s3 + $0x190] sm:$0xff] %vm15_vm3, %v5929_v26  ;;  %v4546_v29 = vadd.f32 %v4378_v28, %v3693_v27  ;;  %v6439_v33 = vsel %vm6410_vm7, %v6436_v1, %v6438_v24 }
 0x384   :  { %v4789_v34 = vld [vmem:[%s23521_s3 + $0x198] sm:$0xff]  ;;  %v12944_v35 = vpop.f32.mrf.mxu1  ;;  %v13106_v36 = vpop.f32.mrf.mxu0 }
 0x385   :  { %4627 = vst.msk [vmem:[%s23521_s3 + $0x1a8] sm:$0xff] %vm15_vm3, %v4546_v29  ;;  %v5930_v37 = vadd.f32 %v5756_v23, %v4789_v34  ;;  %v3699_v29 = vld [vmem:[%s23521_s3 + $0x1d8] sm:$0xff]  ;;  %v7535_v34 = vsel %vm6410_vm7, %v7532_v2, %v7534_v25  ;;  %v14069_v35 = vld [vmem:[%s23520_s0 + $0x80] sm:$0xff]  }
 0x386   :  { %v4383_v39 = vpop.f32.mrf.mxu1  ;;  %v5761_v40 = vpop.f32.mrf.mxu0  ;;  %13210 = vmatmul.mubr.msk.bf16.gmra.mxu1 %vm463_vm2, %v6433_v30  ;;  %13372 = vmatmul.mubr.msk.bf16.gmra.mxu0 %vm463_vm2, %v7529_v31  ;;  %v14070_v36 = vld [vmem:[%s23520_s0 + $0x80] sm:$0xff]  }
 0x387   :  { %6011 = vst.msk [vmem:[%s23521_s3 + $0x198] sm:$0xff] %vm15_vm3, %v5930_v37  ;;  %v4547_v41 = vadd.f32 %v4383_v39, %v3694_v38  ;;  %13213 = vmatprep.mubr.msk.bf16.mxu1 %vm14207_vm1, %v14206_v0  ;;  %13375 = vmatprep.mubr.msk.bf16.mxu0 %vm14207_vm1, %v14206_v0 }
 0x388   :  { %v4790_v44 = vld [vmem:[%s23521_s3 + $0x1a0] sm:$0xff]  ;;  %v12947_v45 = vpop.f32.mrf.mxu1  ;;  %v13109_v46 = vpop.f32.mrf.mxu0 }
 0x389   :  { %4628 = vst.msk [vmem:[%s23521_s3 + $0x1b0] sm:$0xff] %vm15_vm3, %v4547_v41  ;;  %v5931_v47 = vadd.f32 %v5761_v40, %v4790_v44  ;;  %v3700_v41 = vld [vmem:[%s23521_s3 + $0x1e0] sm:$0xff]  ;;  %v6440_v45 = vrot.slane %v14069_v35, 2  ;;  %v7536_v46 = vrot.slane %v14070_v36, 2 }
 0x38a   :  { %v4386_v49 = vpop.f32.mrf.mxu1  ;;  %v5764_v50 = vpop.f32.mrf.mxu0 }
 0x38b   :  { %6012 = vst.msk [vmem:[%s23521_s3 + $0x1a0] sm:$0xff] %vm15_vm3, %v5931_v47  ;;  %v4548_v51 = vadd.f32 %v4386_v49, %v3695_v48  ;;  %v6441_v55 = vsel %vm6410_vm7, %v6438_v24, %v6440_v45 }
 0x38c   :  { %v4791_v56 = vld [vmem:[%s23521_s3 + $0x1a8] sm:$0xff]  ;;  %v12948_v57 = vpop.f32.mrf.mxu1  ;;  %v13110_v58 = vpop.f32.mrf.mxu0 }
 0x38d   :  { %4629 = vst.msk [vmem:[%s23521_s3 + $0x1b8] sm:$0xff] %vm15_vm3, %v4548_v51  ;;  %v5932_v59 = vadd.f32 %v5764_v50, %v4791_v56  ;;  %v3701_v51 = vld [vmem:[%s23521_s3 + $0x1e8] sm:$0xff]  ;;  %v7537_v56 = vsel %vm6410_vm7, %v7534_v25, %v7536_v46 }
 0x38e   :  { %v4391_v61 = vpop.f32.mrf.mxu1  ;;  %v5769_v62 = vpop.f32.mrf.mxu0  ;;  %13214 = vmatmul.mubr.msk.bf16.gmra.mxu1 %vm463_vm2, %v6435_v52  ;;  %13376 = vmatmul.mubr.msk.bf16.gmra.mxu0 %vm463_vm2, %v7531_v53  ;;  %v14071_v57 = vld [vmem:[%s23520_s0 + $0x88] sm:$0xff]  }
 0x38f   :  { %6013 = vst.msk [vmem:[%s23521_s3 + $0x1a8] sm:$0xff] %vm15_vm3, %v5932_v59  ;;  %v4549_v63 = vadd.f32 %v4391_v61, %v3696_v60  ;;  %13217 = vmatprep.mubr.msk.bf16.mxu1 %vm14207_vm1, %v14206_v0  ;;  %13379 = vmatprep.mubr.msk.bf16.mxu0 %vm14207_vm1, %v14206_v0  ;;  %v14072_v58 = vld [vmem:[%s23520_s0 + $0x88] sm:$0xff]  }
 0x390   :  { %v4792_v3 = vld [vmem:[%s23521_s3 + $0x1b0] sm:$0xff]  ;;  %v12951_v4 = vpop.f32.mrf.mxu1  ;;  %v13113_v5 = vpop.f32.mrf.mxu0 }
 0x391   :  { %4630 = vst.msk [vmem:[%s23521_s3 + $0x1c0] sm:$0xff] %vm15_vm3, %v4549_v63  ;;  %v5933_v6 = vadd.f32 %v5769_v62, %v4792_v3  ;;  %v3702_v63 = vld [vmem:[%s23521_s3 + $0x1f0] sm:$0xff]  ;;  %v6442_v4 = vrot.slane %v14071_v57, 2  ;;  %v7538_v5 = vrot.slane %v14072_v58, 2 }
 0x392   :  { %v4394_v8 = vpop.f32.mrf.mxu1  ;;  %v5772_v9 = vpop.f32.mrf.mxu0 }
 0x393   :  { %6014 = vst.msk [vmem:[%s23521_s3 + $0x1b0] sm:$0xff] %vm15_vm3, %v5933_v6  ;;  %v4550_v10 = vadd.f32 %v4394_v8, %v3697_v7  ;;  %v6443_v14 = vsel %vm6410_vm7, %v6440_v45, %v6442_v4 }
 0x394   :  { %v4793_v15 = vld [vmem:[%s23521_s3 + $0x1b8] sm:$0xff]  ;;  %v12952_v16 = vpop.f32.mrf.mxu1  ;;  %v13114_v17 = vpop.f32.mrf.mxu0 }
 0x395   :  { %4631 = vst.msk [vmem:[%s23521_s3 + $0x1c8] sm:$0xff] %vm15_vm3, %v4550_v10  ;;  %v5934_v18 = vadd.f32 %v5772_v9, %v4793_v15  ;;  %v3703_v10 = vld [vmem:[%s23521_s3 + $0x1f8] sm:$0xff]  ;;  %v7539_v15 = vsel %vm6410_vm7, %v7536_v46, %v7538_v5  ;;  %v14073_v16 = vld [vmem:[%s23520_s0 + $0x90] sm:$0xff]  }
 0x396   :  { %v4399_v20 = vpop.f32.mrf.mxu1  ;;  %v5777_v21 = vpop.f32.mrf.mxu0  ;;  %13218 = vmatmul.mubr.msk.bf16.gmra.mxu1 %vm463_vm2, %v6437_v11  ;;  %13380 = vmatmul.mubr.msk.bf16.gmra.mxu0 %vm463_vm2, %v7533_v12  ;;  %v14074_v17 = vld [vmem:[%s23520_s0 + $0x90] sm:$0xff]  }
 0x397   :  { %6015 = vst.msk [vmem:[%s23521_s3 + $0x1b8] sm:$0xff] %vm15_vm3, %v5934_v18  ;;  %v4551_v22 = vadd.f32 %v4399_v20, %v3698_v19  ;;  %13221 = vmatprep.mubr.msk.bf16.mxu1 %vm14207_vm1, %v14206_v0  ;;  %13383 = vmatprep.mubr.msk.bf16.mxu0 %vm14207_vm1, %v14206_v0 }
 0x398   :  { %v4794_v26 = vld [vmem:[%s23521_s3 + $0x1c0] sm:$0xff]  ;;  %v12955_v27 = vpop.f32.mrf.mxu1  ;;  %v13117_v28 = vpop.f32.mrf.mxu0 }
 0x399   :  { %4632 = vst.msk [vmem:[%s23521_s3 + $0x1d0] sm:$0xff] %vm15_vm3, %v4551_v22  ;;  %v5935_v23 = vadd.f32 %v5777_v21, %v4794_v26  ;;  %v3704_v22 = vld [vmem:[%s23521_s3 + $0x200] sm:$0xff]  ;;  %v6444_v27 = vrot.slane %v14073_v16, 2  ;;  %v7540_v28 = vrot.slane %v14074_v17, 2 }
 0x39a   :  { %v4402_v30 = vpop.f32.mrf.mxu1  ;;  %v5780_v31 = vpop.f32.mrf.mxu0 }
 0x39b   :  { %6016 = vst.msk [vmem:[%s23521_s3 + $0x1c0] sm:$0xff] %vm15_vm3, %v5935_v23  ;;  %v4552_v32 = vadd.f32 %v4402_v30, %v3699_v29  ;;  %v6445_v36 = vsel %vm6410_vm7, %v6442_v4, %v6444_v27 }
 0x39c   :  { %v4795_v37 = vld [vmem:[%s23521_s3 + $0x1c8] sm:$0xff]  ;;  %v12956_v38 = vpop.f32.mrf.mxu1  ;;  %v13118_v39 = vpop.f32.mrf.mxu0 }
 0x39d   :  { %4633 = vst.msk [vmem:[%s23521_s3 + $0x1d8] sm:$0xff] %vm15_vm3, %v4552_v32  ;;  %v5936_v40 = vadd.f32 %v5780_v31, %v4795_v37  ;;  %v3705_v32 = vld [vmem:[%s23521_s3 + $0x208] sm:$0xff]  ;;  %v7541_v37 = vsel %vm6410_vm7, %v7538_v5, %v7540_v28  ;;  %v14075_v38 = vld [vmem:[%s23520_s0 + $0x98] sm:$0xff]  }
 0x39e   :  { %v4407_v42 = vpop.f32.mrf.mxu1  ;;  %v5785_v43 = vpop.f32.mrf.mxu0  ;;  %13222 = vmatmul.mubr.msk.bf16.gmra.mxu1 %vm463_vm2, %v6439_v33  ;;  %13384 = vmatmul.mubr.msk.bf16.gmra.mxu0 %vm463_vm2, %v7535_v34  ;;  %v14076_v39 = vld [vmem:[%s23520_s0 + $0x98] sm:$0xff]  }
 0x39f   :  { %6017 = vst.msk [vmem:[%s23521_s3 + $0x1c8] sm:$0xff] %vm15_vm3, %v5936_v40  ;;  %v4553_v44 = vadd.f32 %v4407_v42, %v3700_v41  ;;  %13225 = vmatprep.mubr.msk.bf16.mxu1 %vm14207_vm1, %v14206_v0  ;;  %13387 = vmatprep.mubr.msk.bf16.mxu0 %vm14207_vm1, %v14206_v0 }
 0x3a0   :  { %v4796_v47 = vld [vmem:[%s23521_s3 + $0x1d0] sm:$0xff]  ;;  %v12959_v48 = vpop.f32.mrf.mxu1  ;;  %v13121_v49 = vpop.f32.mrf.mxu0 }
 0x3a1   :  { %4634 = vst.msk [vmem:[%s23521_s3 + $0x1e0] sm:$0xff] %vm15_vm3, %v4553_v44  ;;  %v5937_v50 = vadd.f32 %v5785_v43, %v4796_v47  ;;  %v3706_v44 = vld [vmem:[%s23521_s3 + $0x210] sm:$0xff]  ;;  %v6446_v48 = vrot.slane %v14075_v38, 2  ;;  %v7542_v49 = vrot.slane %v14076_v39, 2 }
 0x3a2   :  { %v4410_v52 = vpop.f32.mrf.mxu1  ;;  %v5788_v53 = vpop.f32.mrf.mxu0 }
 0x3a3   :  { %6018 = vst.msk [vmem:[%s23521_s3 + $0x1d0] sm:$0xff] %vm15_vm3, %v5937_v50  ;;  %v4554_v54 = vadd.f32 %v4410_v52, %v3701_v51  ;;  %v6447_v58 = vsel %vm6410_vm7, %v6444_v27, %v6446_v48 }
 0x3a4   :  { %v4797_v59 = vld [vmem:[%s23521_s3 + $0x1d8] sm:$0xff]  ;;  %v12960_v60 = vpop.f32.mrf.mxu1  ;;  %v13122_v61 = vpop.f32.mrf.mxu0 }
 0x3a5   :  { %4635 = vst.msk [vmem:[%s23521_s3 + $0x1e8] sm:$0xff] %vm15_vm3, %v4554_v54  ;;  %v5938_v62 = vadd.f32 %v5788_v53, %v4797_v59  ;;  %v3707_v54 = vld [vmem:[%s23521_s3 + $0x218] sm:$0xff]  ;;  %v7543_v59 = vsel %vm6410_vm7, %v7540_v28, %v7542_v49  ;;  %v14077_v60 = vld [vmem:[%s23520_s0 + $0xa0] sm:$0xff]  }
 0x3a6   :  { %v4415_v1 = vpop.f32.mrf.mxu1  ;;  %v5793_v2 = vpop.f32.mrf.mxu0  ;;  %13226 = vmatmul.mubr.msk.bf16.gmra.mxu1 %vm463_vm2, %v6441_v55  ;;  %13388 = vmatmul.mubr.msk.bf16.gmra.mxu0 %vm463_vm2, %v7537_v56  ;;  %v14078_v61 = vld [vmem:[%s23520_s0 + $0xa0] sm:$0xff]  }
 0x3a7   :  { %6019 = vst.msk [vmem:[%s23521_s3 + $0x1d8] sm:$0xff] %vm15_vm3, %v5938_v62  ;;  %v4555_v3 = vadd.f32 %v4415_v1, %v3702_v63  ;;  %13229 = vmatprep.mubr.msk.bf16.mxu1 %vm14207_vm1, %v14206_v0  ;;  %13391 = vmatprep.mubr.msk.bf16.mxu0 %vm14207_vm1, %v14206_v0 }
 0x3a8   :  { %v4798_v6 = vld [vmem:[%s23521_s3 + $0x1e0] sm:$0xff]  ;;  %v12963_v7 = vpop.f32.mrf.mxu1  ;;  %v13125_v8 = vpop.f32.mrf.mxu0 }
 0x3a9   :  { %4636 = vst.msk [vmem:[%s23521_s3 + $0x1f0] sm:$0xff] %vm15_vm3, %v4555_v3  ;;  %v5939_v9 = vadd.f32 %v5793_v2, %v4798_v6  ;;  %v3708_v3 = vld [vmem:[%s23521_s3 + $0x220] sm:$0xff]  ;;  %v6448_v7 = vrot.slane %v14077_v60, 2  ;;  %v7544_v8 = vrot.slane %v14078_v61, 2 }
 0x3aa   :  { %v4418_v11 = vpop.f32.mrf.mxu1  ;;  %v5796_v12 = vpop.f32.mrf.mxu0 }
 0x3ab   :  { %6020 = vst.msk [vmem:[%s23521_s3 + $0x1e0] sm:$0xff] %vm15_vm3, %v5939_v9  ;;  %v4556_v13 = vadd.f32 %v4418_v11, %v3703_v10  ;;  %v6449_v17 = vsel %vm6410_vm7, %v6446_v48, %v6448_v7 }
 0x3ac   :  { %v4799_v18 = vld [vmem:[%s23521_s3 + $0x1e8] sm:$0xff]  ;;  %v12964_v19 = vpop.f32.mrf.mxu1  ;;  %v13126_v20 = vpop.f32.mrf.mxu0 }
 0x3ad   :  { %4637 = vst.msk [vmem:[%s23521_s3 + $0x1f8] sm:$0xff] %vm15_vm3, %v4556_v13  ;;  %v5940_v21 = vadd.f32 %v5796_v12, %v4799_v18  ;;  %v3709_v13 = vld [vmem:[%s23521_s3 + $0x228] sm:$0xff]  ;;  %v7545_v18 = vsel %vm6410_vm7, %v7542_v49, %v7544_v8 }
 0x3ae   :  { %v4423_v24 = vpop.f32.mrf.mxu1  ;;  %v5801_v25 = vpop.f32.mrf.mxu0  ;;  %13230 = vmatmul.mubr.msk.bf16.gmra.mxu1 %vm463_vm2, %v6443_v14  ;;  %13392 = vmatmul.mubr.msk.bf16.gmra.mxu0 %vm463_vm2, %v7539_v15  ;;  %v14079_v19 = vld [vmem:[%s23520_s0 + $0xa8] sm:$0xff]  }
 0x3af   :  { %6021 = vst.msk [vmem:[%s23521_s3 + $0x1e8] sm:$0xff] %vm15_vm3, %v5940_v21  ;;  %v4557_v26 = vadd.f32 %v4423_v24, %v3704_v22  ;;  %13233 = vmatprep.mubr.msk.bf16.mxu1 %vm14207_vm1, %v14206_v0  ;;  %13395 = vmatprep.mubr.msk.bf16.mxu0 %vm14207_vm1, %v14206_v0  ;;  %v14080_v20 = vld [vmem:[%s23520_s0 + $0xa8] sm:$0xff]  }
 0x3b0   :  { %v4800_v23 = vld [vmem:[%s23521_s3 + $0x1f0] sm:$0xff]  ;;  %v12967_v29 = vpop.f32.mrf.mxu1  ;;  %v13129_v30 = vpop.f32.mrf.mxu0 }
 0x3b1   :  { %4638 = vst.msk [vmem:[%s23521_s3 + $0x200] sm:$0xff] %vm15_vm3, %v4557_v26  ;;  %v5941_v31 = vadd.f32 %v5801_v25, %v4800_v23  ;;  %v3710_v26 = vld [vmem:[%s23521_s3 + $0x230] sm:$0xff]  ;;  %v6450_v29 = vrot.slane %v14079_v19, 2  ;;  %v7546_v30 = vrot.slane %v14080_v20, 2 }
 0x3b2   :  { %v4426_v33 = vpop.f32.mrf.mxu1  ;;  %v5804_v34 = vpop.f32.mrf.mxu0 }
 0x3b3   :  { %6022 = vst.msk [vmem:[%s23521_s3 + $0x1f0] sm:$0xff] %vm15_vm3, %v5941_v31  ;;  %v4558_v35 = vadd.f32 %v4426_v33, %v3705_v32  ;;  %v6451_v39 = vsel %vm6410_vm7, %v6448_v7, %v6450_v29 }
 0x3b4   :  { %v4801_v40 = vld [vmem:[%s23521_s3 + $0x1f8] sm:$0xff]  ;;  %v12968_v41 = vpop.f32.mrf.mxu1  ;;  %v13130_v42 = vpop.f32.mrf.mxu0 }
 0x3b5   :  { %4639 = vst.msk [vmem:[%s23521_s3 + $0x208] sm:$0xff] %vm15_vm3, %v4558_v35  ;;  %v5942_v43 = vadd.f32 %v5804_v34, %v4801_v40  ;;  %v3711_v35 = vld [vmem:[%s23521_s3 + $0x238] sm:$0xff]  ;;  %v7547_v40 = vsel %vm6410_vm7, %v7544_v8, %v7546_v30  ;;  %v14081_v41 = vld [vmem:[%s23520_s0 + $0xb0] sm:$0xff]  }
 0x3b6   :  { %v4431_v45 = vpop.f32.mrf.mxu1  ;;  %v5809_v46 = vpop.f32.mrf.mxu0  ;;  %13234 = vmatmul.mubr.msk.bf16.gmra.mxu1 %vm463_vm2, %v6445_v36  ;;  %13396 = vmatmul.mubr.msk.bf16.gmra.mxu0 %vm463_vm2, %v7541_v37  ;;  %v14082_v42 = vld [vmem:[%s23520_s0 + $0xb0] sm:$0xff]  }
 0x3b7   :  { %6023 = vst.msk [vmem:[%s23521_s3 + $0x1f8] sm:$0xff] %vm15_vm3, %v5942_v43  ;;  %v4559_v47 = vadd.f32 %v4431_v45, %v3706_v44  ;;  %13237 = vmatprep.mubr.msk.bf16.mxu1 %vm14207_vm1, %v14206_v0  ;;  %13399 = vmatprep.mubr.msk.bf16.mxu0 %vm14207_vm1, %v14206_v0 }
 0x3b8   :  { %v4802_v50 = vld [vmem:[%s23521_s3 + $0x200] sm:$0xff]  ;;  %v12971_v51 = vpop.f32.mrf.mxu1  ;;  %v13133_v52 = vpop.f32.mrf.mxu0 }
 0x3b9   :  { %4640 = vst.msk [vmem:[%s23521_s3 + $0x210] sm:$0xff] %vm15_vm3, %v4559_v47  ;;  %v5943_v53 = vadd.f32 %v5809_v46, %v4802_v50  ;;  %v3712_v47 = vld [vmem:[%s23521_s3 + $0x240] sm:$0xff]  ;;  %v6452_v51 = vrot.slane %v14081_v41, 2  ;;  %v7548_v52 = vrot.slane %v14082_v42, 2 }
 0x3ba   :  { %v4434_v55 = vpop.f32.mrf.mxu1  ;;  %v5812_v56 = vpop.f32.mrf.mxu0 }
 0x3bb   :  { %6024 = vst.msk [vmem:[%s23521_s3 + $0x200] sm:$0xff] %vm15_vm3, %v5943_v53  ;;  %v4560_v57 = vadd.f32 %v4434_v55, %v3707_v54  ;;  %v6453_v61 = vsel %vm6410_vm7, %v6450_v29, %v6452_v51 }
 0x3bc   :  { %v4803_v62 = vld [vmem:[%s23521_s3 + $0x208] sm:$0xff]  ;;  %v12972_v63 = vpop.f32.mrf.mxu1  ;;  %v13134_v1 = vpop.f32.mrf.mxu0 }
 0x3bd   :  { %4641 = vst.msk [vmem:[%s23521_s3 + $0x218] sm:$0xff] %vm15_vm3, %v4560_v57  ;;  %v5944_v2 = vadd.f32 %v5812_v56, %v4803_v62  ;;  %v3713_v57 = vld [vmem:[%s23521_s3 + $0x248] sm:$0xff]  ;;  %v7549_v62 = vsel %vm6410_vm7, %v7546_v30, %v7548_v52  ;;  %v14083_v63 = vld [vmem:[%s23520_s0 + $0xb8] sm:$0xff]  }
 0x3be   :  { %v4439_v4 = vpop.f32.mrf.mxu1  ;;  %v5817_v5 = vpop.f32.mrf.mxu0  ;;  %13238 = vmatmul.mubr.msk.bf16.gmra.mxu1 %vm463_vm2, %v6447_v58  ;;  %13400 = vmatmul.mubr.msk.bf16.gmra.mxu0 %vm463_vm2, %v7543_v59  ;;  %v14084_v1 = vld [vmem:[%s23520_s0 + $0xb8] sm:$0xff]  }
 0x3bf   :  { %6025 = vst.msk [vmem:[%s23521_s3 + $0x208] sm:$0xff] %vm15_vm3, %v5944_v2  ;;  %v4561_v6 = vadd.f32 %v4439_v4, %v3708_v3  ;;  %13241 = vmatprep.mubr.msk.bf16.mxu1 %vm14207_vm1, %v14206_v0  ;;  %13403 = vmatprep.mubr.msk.bf16.mxu0 %vm14207_vm1, %v14206_v0 }
 0x3c0   :  { %v4804_v9 = vld [vmem:[%s23521_s3 + $0x210] sm:$0xff]  ;;  %v12975_v10 = vpop.f32.mrf.mxu1  ;;  %v13137_v11 = vpop.f32.mrf.mxu0 }
 0x3c1   :  { %4642 = vst.msk [vmem:[%s23521_s3 + $0x220] sm:$0xff] %vm15_vm3, %v4561_v6  ;;  %v5945_v12 = vadd.f32 %v5817_v5, %v4804_v9  ;;  %v3714_v6 = vld [vmem:[%s23521_s3 + $0x250] sm:$0xff]  ;;  %v6454_v10 = vrot.slane %v14083_v63, 2  ;;  %v7550_v11 = vrot.slane %v14084_v1, 2 }
 0x3c2   :  { %v4442_v14 = vpop.f32.mrf.mxu1  ;;  %v5820_v15 = vpop.f32.mrf.mxu0 }
 0x3c3   :  { %6026 = vst.msk [vmem:[%s23521_s3 + $0x210] sm:$0xff] %vm15_vm3, %v5945_v12  ;;  %v4562_v16 = vadd.f32 %v4442_v14, %v3709_v13  ;;  %v6455_v20 = vsel %vm6410_vm7, %v6452_v51, %v6454_v10 }
 0x3c4   :  { %v4805_v21 = vld [vmem:[%s23521_s3 + $0x218] sm:$0xff]  ;;  %v12976_v22 = vpop.f32.mrf.mxu1  ;;  %v13138_v24 = vpop.f32.mrf.mxu0 }
 0x3c5   :  { %4643 = vst.msk [vmem:[%s23521_s3 + $0x228] sm:$0xff] %vm15_vm3, %v4562_v16  ;;  %v5946_v25 = vadd.f32 %v5820_v15, %v4805_v21  ;;  %v3715_v16 = vld [vmem:[%s23521_s3 + $0x258] sm:$0xff]  ;;  %v7551_v21 = vsel %vm6410_vm7, %v7548_v52, %v7550_v11  ;;  %v14085_v22 = vld [vmem:[%s23520_s0 + $0xc0] sm:$0xff]  }
 0x3c6   :  { %v4447_v27 = vpop.f32.mrf.mxu1  ;;  %v5825_v28 = vpop.f32.mrf.mxu0  ;;  %13242 = vmatmul.mubr.msk.bf16.gmra.mxu1 %vm463_vm2, %v6449_v17  ;;  %13404 = vmatmul.mubr.msk.bf16.gmra.mxu0 %vm463_vm2, %v7545_v18  ;;  %v14086_v24 = vld [vmem:[%s23520_s0 + $0xc0] sm:$0xff]  }
 0x3c7   :  { %6027 = vst.msk [vmem:[%s23521_s3 + $0x218] sm:$0xff] %vm15_vm3, %v5946_v25  ;;  %v4563_v23 = vadd.f32 %v4447_v27, %v3710_v26  ;;  %13245 = vmatprep.mubr.msk.bf16.mxu1 %vm14207_vm1, %v14206_v0  ;;  %13407 = vmatprep.mubr.msk.bf16.mxu0 %vm14207_vm1, %v14206_v0 }
 0x3c8   :  { %v4806_v31 = vld [vmem:[%s23521_s3 + $0x220] sm:$0xff]  ;;  %v12979_v32 = vpop.f32.mrf.mxu1  ;;  %v13141_v33 = vpop.f32.mrf.mxu0 }
 0x3c9   :  { %4644 = vst.msk [vmem:[%s23521_s3 + $0x230] sm:$0xff] %vm15_vm3, %v4563_v23  ;;  %v5947_v34 = vadd.f32 %v5825_v28, %v4806_v31  ;;  %v3716_v23 = vld [vmem:[%s23521_s3 + $0x260] sm:$0xff]  ;;  %v6456_v32 = vrot.slane %v14085_v22, 2  ;;  %v7552_v33 = vrot.slane %v14086_v24, 2  ;;  %v14091_v24 = vld [vmem:[%s23520_s0 + $0xd8] sm:$0xff]  }
 0x3ca   :  { %v4450_v36 = vpop.f32.mrf.mxu1  ;;  %v5828_v37 = vpop.f32.mrf.mxu0 }
 0x3cb   :  { %6028 = vst.msk [vmem:[%s23521_s3 + $0x220] sm:$0xff] %vm15_vm3, %v5947_v34  ;;  %v4564_v38 = vadd.f32 %v4450_v36, %v3711_v35  ;;  %v6457_v42 = vsel %vm6410_vm7, %v6454_v10, %v6456_v32 }
 0x3cc   :  { %v4807_v43 = vld [vmem:[%s23521_s3 + $0x228] sm:$0xff]  ;;  %v12980_v44 = vpop.f32.mrf.mxu1  ;;  %v13142_v45 = vpop.f32.mrf.mxu0 }
 0x3cd   :  { %4645 = vst.msk [vmem:[%s23521_s3 + $0x238] sm:$0xff] %vm15_vm3, %v4564_v38  ;;  %v5948_v46 = vadd.f32 %v5828_v37, %v4807_v43  ;;  %v3717_v38 = vld [vmem:[%s23521_s3 + $0x268] sm:$0xff]  ;;  %v7553_v43 = vsel %vm6410_vm7, %v7550_v11, %v7552_v33 }
 0x3ce   :  { %v4455_v48 = vpop.f32.mrf.mxu1  ;;  %v5833_v49 = vpop.f32.mrf.mxu0  ;;  %13246 = vmatmul.mubr.msk.bf16.gmra.mxu1 %vm463_vm2, %v6451_v39  ;;  %13408 = vmatmul.mubr.msk.bf16.gmra.mxu0 %vm463_vm2, %v7547_v40  ;;  %v14087_v44 = vld [vmem:[%s23520_s0 + $0xc8] sm:$0xff]  }
 0x3cf   :  { %6029 = vst.msk [vmem:[%s23521_s3 + $0x228] sm:$0xff] %vm15_vm3, %v5948_v46  ;;  %v4565_v50 = vadd.f32 %v4455_v48, %v3712_v47  ;;  %13249 = vmatprep.mubr.msk.bf16.mxu1 %vm14207_vm1, %v14206_v0  ;;  %13411 = vmatprep.mubr.msk.bf16.mxu0 %vm14207_vm1, %v14206_v0  ;;  %v14088_v45 = vld [vmem:[%s23520_s0 + $0xc8] sm:$0xff]  }
 0x3d0   :  { %v4808_v53 = vld [vmem:[%s23521_s3 + $0x230] sm:$0xff]  ;;  %v12983_v54 = vpop.f32.mrf.mxu1  ;;  %v13145_v55 = vpop.f32.mrf.mxu0 }
 0x3d1   :  { %4646 = vst.msk [vmem:[%s23521_s3 + $0x240] sm:$0xff] %vm15_vm3, %v4565_v50  ;;  %v5949_v56 = vadd.f32 %v5833_v49, %v4808_v53  ;;  %v3718_v50 = vld [vmem:[%s23521_s3 + $0x270] sm:$0xff]  ;;  %v6458_v54 = vrot.slane %v14087_v44, 2  ;;  %v7554_v55 = vrot.slane %v14088_v45, 2  ;;  %v14093_v45 = vld [vmem:[%s23520_s0 + $0xe0] sm:$0xff]  }
 0x3d2   :  { %v4458_v58 = vpop.f32.mrf.mxu1  ;;  %v5836_v59 = vpop.f32.mrf.mxu0 }
 0x3d3   :  { %6030 = vst.msk [vmem:[%s23521_s3 + $0x230] sm:$0xff] %vm15_vm3, %v5949_v56  ;;  %v4566_v60 = vadd.f32 %v4458_v58, %v3713_v57  ;;  %v6459_v1 = vsel %vm6410_vm7, %v6456_v32, %v6458_v54 }
 0x3d4   :  { %v4809_v2 = vld [vmem:[%s23521_s3 + $0x238] sm:$0xff]  ;;  %v12984_v3 = vpop.f32.mrf.mxu1  ;;  %v13146_v4 = vpop.f32.mrf.mxu0 }
 0x3d5   :  { %4647 = vst.msk [vmem:[%s23521_s3 + $0x248] sm:$0xff] %vm15_vm3, %v4566_v60  ;;  %v5950_v5 = vadd.f32 %v5836_v59, %v4809_v2  ;;  %v3719_v60 = vld [vmem:[%s23521_s3 + $0x278] sm:$0xff]  ;;  %v7555_v2 = vsel %vm6410_vm7, %v7552_v33, %v7554_v55  ;;  %v14089_v3 = vld [vmem:[%s23520_s0 + $0xd0] sm:$0xff]   ;;  %v6462_v33 = vrot.slane %v14091_v24, 2 }
 0x3d6   :  { %v4463_v7 = vpop.f32.mrf.mxu1  ;;  %v5841_v8 = vpop.f32.mrf.mxu0  ;;  %13250 = vmatmul.mubr.msk.bf16.gmra.mxu1 %vm463_vm2, %v6453_v61  ;;  %13412 = vmatmul.mubr.msk.bf16.gmra.mxu0 %vm463_vm2, %v7549_v62  ;;  %v14090_v4 = vld [vmem:[%s23520_s0 + $0xd0] sm:$0xff]  }
 0x3d7   :  { %6031 = vst.msk [vmem:[%s23521_s3 + $0x238] sm:$0xff] %vm15_vm3, %v5950_v5  ;;  %v4567_v9 = vadd.f32 %v4463_v7, %v3714_v6  ;;  %13253 = vmatprep.mubr.msk.bf16.mxu1 %vm14207_vm1, %v14206_v0  ;;  %13415 = vmatprep.mubr.msk.bf16.mxu0 %vm14207_vm1, %v14206_v0 }
 0x3d8   :  { %v4810_v12 = vld [vmem:[%s23521_s3 + $0x240] sm:$0xff]  ;;  %v12987_v13 = vpop.f32.mrf.mxu1  ;;  %v13149_v14 = vpop.f32.mrf.mxu0 }
 0x3d9   :  { %4648 = vst.msk [vmem:[%s23521_s3 + $0x250] sm:$0xff] %vm15_vm3, %v4567_v9  ;;  %v5951_v15 = vadd.f32 %v5841_v8, %v4810_v12  ;;  %v3720_v9 = vld [vmem:[%s23521_s3 + $0x280] sm:$0xff]  ;;  %v6460_v13 = vrot.slane %v14089_v3, 2  ;;  %v7556_v14 = vrot.slane %v14090_v4, 2  ;;  %v14096_v3 = vld [vmem:[%s23520_s0 + $0xe8] sm:$0xff]  }
 0x3da   :  { %v4466_v17 = vpop.f32.mrf.mxu1  ;;  %v5844_v18 = vpop.f32.mrf.mxu0 }
 0x3db   :  { %6032 = vst.msk [vmem:[%s23521_s3 + $0x240] sm:$0xff] %vm15_vm3, %v5951_v15  ;;  %v4568_v19 = vadd.f32 %v4466_v17, %v3715_v16  ;;  %v7557_v22 = vsel %vm6410_vm7, %v7554_v55, %v7556_v14 }
 0x3dc   :  { %v4811_v25 = vld [vmem:[%s23521_s3 + $0x248] sm:$0xff]  ;;  %v12988_v26 = vpop.f32.mrf.mxu1  ;;  %v13150_v27 = vpop.f32.mrf.mxu0 }
 0x3dd   :  { %4649 = vst.msk [vmem:[%s23521_s3 + $0x258] sm:$0xff] %vm15_vm3, %v4568_v19  ;;  %v5952_v28 = vadd.f32 %v5844_v18, %v4811_v25  ;;  %v14092_v25 = vld [vmem:[%s23520_s0 + $0xd8] sm:$0xff]  }
 0x3de   :  { %v4471_v29 = vpop.f32.mrf.mxu1  ;;  %v5849_v30 = vpop.f32.mrf.mxu0  ;;  %13254 = vmatmul.mubr.msk.bf16.gmra.mxu1 %vm463_vm2, %v6455_v20  ;;  %13416 = vmatmul.mubr.msk.bf16.gmra.mxu0 %vm463_vm2, %v7551_v21  ;;  %v6461_v21 = vsel %vm6410_vm7, %v6458_v54, %v6460_v13 }
 0x3df   :  { %6033 = vst.msk [vmem:[%s23521_s3 + $0x248] sm:$0xff] %vm15_vm3, %v5952_v28  ;;  %v4569_v31 = vadd.f32 %v4471_v29, %v3716_v23  ;;  %13257 = vmatprep.mubr.msk.bf16.mxu1 %vm14207_vm1, %v14206_v0  ;;  %13419 = vmatprep.mubr.msk.bf16.mxu0 %vm14207_vm1, %v14206_v0 }
 0x3e0   :  { %v4812_v34 = vld [vmem:[%s23521_s3 + $0x250] sm:$0xff]  ;;  %v12991_v35 = vpop.f32.mrf.mxu1  ;;  %v13153_v36 = vpop.f32.mrf.mxu0 }
 0x3e1   :  { %4650 = vst.msk [vmem:[%s23521_s3 + $0x260] sm:$0xff] %vm15_vm3, %v4569_v31  ;;  %v5953_v37 = vadd.f32 %v5849_v30, %v4812_v34  ;;  %v6124_v30 = vld [vmem:[%s23521_s3] sm:$0xff]  ;;  %v7558_v34 = vrot.slane %v14092_v25, 2  ;;  %v14097_v25 = vld [vmem:[%s23520_s0 + $0xf0] sm:$0xff]  }
 0x3e2   :  { %v4474_v39 = vpop.f32.mrf.mxu1  ;;  %v5852_v40 = vpop.f32.mrf.mxu0 }
 0x3e3   :  { %6034 = vst.msk [vmem:[%s23521_s3 + $0x250] sm:$0xff] %vm15_vm3, %v5953_v37  ;;  %v4570_v41 = vadd.f32 %v4474_v39, %v3717_v38  ;;  %v7559_v44 = vsel %vm6410_vm7, %v7556_v14, %v7558_v34 }
 0x3e4   :  { %v4813_v46 = vld [vmem:[%s23521_s3 + $0x258] sm:$0xff]  ;;  %v12992_v47 = vpop.f32.mrf.mxu1  ;;  %v13154_v48 = vpop.f32.mrf.mxu0 }
 0x3e5   :  { %4651 = vst.msk [vmem:[%s23521_s3 + $0x268] sm:$0xff] %vm15_vm3, %v4570_v41  ;;  %v5954_v49 = vadd.f32 %v5852_v40, %v4813_v46  ;;  %v6125_v40 = vld [vmem:[%s23521_s3 + $0x8] sm:$0xff]  ;;  %v14094_v46 = vld [vmem:[%s23520_s0 + $0xe0] sm:$0xff]  }
 0x3e6   :  { %v4479_v51 = vpop.f32.mrf.mxu1  ;;  %v5857_v52 = vpop.f32.mrf.mxu0  ;;  %13258 = vmatmul.mubr.msk.bf16.gmra.mxu1 %vm463_vm2, %v6457_v42  ;;  %13420 = vmatmul.mubr.msk.bf16.gmra.mxu0 %vm463_vm2, %v7553_v43  ;;  %v6463_v43 = vsel %vm6410_vm7, %v6460_v13, %v6462_v33  ;;  %v7560_v54 = vrot.slane %v14094_v46, 2  ;;  %v7562_v13 = vrot.slane %v14096_v3, 2  ;;  %v14099_v46 = vld [vmem:[%s23520_s0 + $0xf8] sm:$0xff]  }
 0x3e7   :  { %6035 = vst.msk [vmem:[%s23521_s3 + $0x258] sm:$0xff] %vm15_vm3, %v5954_v49  ;;  %v4571_v53 = vadd.f32 %v4479_v51, %v3718_v50  ;;  %13261 = vmatprep.mubr.msk.bf16.mxu1 %vm14207_vm1, %v14206_v0  ;;  %13423 = vmatprep.mubr.msk.bf16.mxu0 %vm14207_vm1, %v14206_v0  ;;  %v6126_v49 = vld [vmem:[%s23521_s3 + $0x10] sm:$0xff] }
 0x3e8   :  { %v4814_v56 = vld [vmem:[%s23521_s3 + $0x260] sm:$0xff]  ;;  %v12995_v57 = vpop.f32.mrf.mxu1  ;;  %v13157_v58 = vpop.f32.mrf.mxu0  ;;  %v7563_v24 = vsel %vm6410_vm7, %v7560_v54, %v7562_v13 }
 0x3e9   :  { %4652 = vst.msk [vmem:[%s23521_s3 + $0x270] sm:$0xff] %vm15_vm3, %v4571_v53  ;;  %v5955_v59 = vadd.f32 %v5857_v52, %v4814_v56  ;;  %v6464_v53 = vrot.slane %v14093_v45, 2 }
 0x3ea   :  { %v4482_v61 = vpop.f32.mrf.mxu1  ;;  %v5860_v62 = vpop.f32.mrf.mxu0 }
 0x3eb   :  { %6036 = vst.msk [vmem:[%s23521_s3 + $0x260] sm:$0xff] %vm15_vm3, %v5955_v59  ;;  %v4572_v63 = vadd.f32 %v4482_v61, %v3719_v60  ;;  %v6127_v59 = vld [vmem:[%s23521_s3 + $0x18] sm:$0xff] }
 0x3ec   :  { %v4815_v5 = vld [vmem:[%s23521_s3 + $0x268] sm:$0xff]  ;;  %v12996_v6 = vpop.f32.mrf.mxu1  ;;  %v13158_v7 = vpop.f32.mrf.mxu0 }
 0x3ed   :  { %4653 = vst.msk [vmem:[%s23521_s3 + $0x278] sm:$0xff] %vm15_vm3, %v4572_v63  ;;  %v5956_v8 = vadd.f32 %v5860_v62, %v4815_v5  ;;  %v6465_v63 = vsel %vm6410_vm7, %v6462_v33, %v6464_v53 }
 0x3ee   :  { %v4487_v10 = vpop.f32.mrf.mxu1  ;;  %v5865_v11 = vpop.f32.mrf.mxu0  ;;  %13262 = vmatmul.mubr.msk.bf16.gmra.mxu1 %vm463_vm2, %v6459_v1  ;;  %13424 = vmatmul.mubr.msk.bf16.gmra.mxu0 %vm463_vm2, %v7555_v2  ;;  %v7561_v1 = vsel %vm6410_vm7, %v7558_v34, %v7560_v54  ;;  %v14095_v2 = vld [vmem:[%s23520_s0 + $0xe8] sm:$0xff]   ;;  %v6468_v34 = vrot.slane %v14097_v25, 2 }
 0x3ef   :  { %6037 = vst.msk [vmem:[%s23521_s3 + $0x268] sm:$0xff] %vm15_vm3, %v5956_v8  ;;  %v4573_v12 = vadd.f32 %v4487_v10, %v3720_v9  ;;  %13265 = vmatprep.mubr.msk.bf16.mxu1 %vm14207_vm1, %v14206_v0  ;;  %13427 = vmatprep.mubr.msk.bf16.mxu0 %vm14207_vm1, %v14206_v0  ;;  %v6128_v8 = vld [vmem:[%s23521_s3 + $0x20] sm:$0xff] }
 0x3f0   :  { %v4816_v15 = vld [vmem:[%s23521_s3 + $0x270] sm:$0xff]  ;;  %v12999_v16 = vpop.f32.mrf.mxu1  ;;  %v13161_v17 = vpop.f32.mrf.mxu0 }
 0x3f1   :  { %4654 = vst.msk [vmem:[%s23521_s3 + $0x280] sm:$0xff] %vm15_vm3, %v4573_v12  ;;  %v5957_v18 = vadd.f32 %v5865_v11, %v4816_v15  ;;  %v6466_v12 = vrot.slane %v14095_v2, 2 }
 0x3f2   :  { %v4490_v19 = vpop.f32.mrf.mxu1  ;;  %v5868_v20 = vpop.f32.mrf.mxu0 }
 0x3f3   :  { %6038 = vst.msk [vmem:[%s23521_s3 + $0x270] sm:$0xff] %vm15_vm3, %v5957_v18  ;;  %v6129_v18 = vld [vmem:[%s23521_s3 + $0x28] sm:$0xff] }
 0x3f4   :  { %v4817_v26 = vld [vmem:[%s23521_s3 + $0x278] sm:$0xff]  ;;  %v13000_v27 = vpop.f32.mrf.mxu1  ;;  %v13162_v28 = vpop.f32.mrf.mxu0 }
 0x3f5   :  { %v5958_v23 = vadd.f32 %v5868_v20, %v4817_v26  ;;  %v14098_v26 = vld [vmem:[%s23520_s0 + $0xf0] sm:$0xff]  }
 0x3f6   :  { %v5873_v29 = vpop.f32.mrf.mxu0  ;;  %v6652_v31 = vpop.f32.mrf.mxu1  ;;  %13266 = vmatmul.mubr.msk.bf16.gmra.mxu1 %vm463_vm2, %v6461_v21  ;;  %13428 = vmatmul.mubr.msk.bf16.gmra.mxu0 %vm463_vm2, %v7557_v22  ;;  %v6467_v22 = vsel %vm6410_vm7, %v6464_v53, %v6466_v12 }
 0x3f7   :  { %6039 = vst.msk [vmem:[%s23521_s3 + $0x278] sm:$0xff] %vm15_vm3, %v5958_v23  ;;  %v6978_v32 = vadd.f32 %v6652_v31, %v6124_v30  ;;  %13269 = vmatprep.mubr.msk.bf16.mxu1 %vm14207_vm1, %v14206_v0  ;;  %13431 = vmatprep.mubr.msk.bf16.mxu0 %vm14207_vm1, %v14206_v0  ;;  %v6130_v30 = vld [vmem:[%s23521_s3 + $0x30] sm:$0xff] }
 0x3f8   :  { %v4818_v35 = vld [vmem:[%s23521_s3 + $0x280] sm:$0xff]  ;;  %v13165_v36 = vpop.f32.mrf.mxu0  ;;  %v13171_v37 = vpop.f32.mrf.mxu1 }
 0x3f9   :  { %v5959_v38 = vadd.f32 %v5873_v29, %v4818_v35  ;;  %7059 = vst.msk [vmem:[%s23521_s3] sm:$0xff] %vm15_vm3, %v6978_v32  ;;  %v7564_v35 = vrot.slane %v14098_v26, 2 }
 0x3fa   :  { %v5876_v39 = vpop.f32.mrf.mxu0  ;;  %v6655_v41 = vpop.f32.mrf.mxu1 }
 0x3fb   :  { %6040 = vst.msk [vmem:[%s23521_s3 + $0x280] sm:$0xff] %vm15_vm3, %v5959_v38  ;;  %v6979_v42 = vadd.f32 %v6655_v41, %v6125_v40  ;;  %v6131_v40 = vld [vmem:[%s23521_s3 + $0x38] sm:$0xff]  ;;  %v7565_v45 = vsel %vm6410_vm7, %v7562_v13, %v7564_v35 }
 0x3fc   :  { %v13166_v47 = vpop.f32.mrf.mxu0  ;;  %v13172_v48 = vpop.f32.mrf.mxu1 }
 0x3fd   :  { %7060 = vst.msk [vmem:[%s23521_s3 + $0x8] sm:$0xff] %vm15_vm3, %v6979_v42  ;;  %v14100_v47 = vld [vmem:[%s23520_s0 + $0xf8] sm:$0xff]  }
 0x3fe   :  { %v6660_v50 = vpop.f32.mrf.mxu1  ;;  %13270 = vmatmul.mubr.msk.bf16.gmra.mxu1 %vm463_vm2, %v6463_v43  ;;  %v7750_v51 = vpop.f32.mrf.mxu0  ;;  %13432 = vmatmul.mubr.msk.bf16.gmra.mxu0 %vm463_vm2, %v7559_v44  ;;  %v6469_v44 = vsel %vm6410_vm7, %v6466_v12, %v6468_v34 }
 0x3ff   :  { %v6980_v52 = vadd.f32 %v6660_v50, %v6126_v49  ;;  %13273 = vmatprep.mubr.msk.bf16.mxu1 %vm14207_vm1, %v14206_v0  ;;  %13435 = vmatprep.mubr.msk.bf16.mxu0 %vm14207_vm1, %v14206_v0 }
 0x400   :  { %v7223_v55 = vld [vmem:[%s23521_s3] sm:$0xff]  ;;  %v13175_v56 = vpop.f32.mrf.mxu1  ;;  %v13337_v57 = vpop.f32.mrf.mxu0 }
 0x401   :  { %7061 = vst.msk [vmem:[%s23521_s3 + $0x10] sm:$0xff] %vm15_vm3, %v6980_v52  ;;  %v8076_v58 = vadd.f32 %v7750_v51, %v7223_v55  ;;  %v6132_v52 = vld [vmem:[%s23521_s3 + $0x40] sm:$0xff]  ;;  %v6470_v56 = vrot.slane %v14099_v46, 2  ;;  %v7566_v57 = vrot.slane %v14100_v47, 2 }
 0x402   :  { %v6663_v60 = vpop.f32.mrf.mxu1  ;;  %v7753_v61 = vpop.f32.mrf.mxu0 }
 0x403   :  { %8157 = vst.msk [vmem:[%s23521_s3] sm:$0xff] %vm15_vm3, %v8076_v58  ;;  %v6981_v62 = vadd.f32 %v6663_v60, %v6127_v59  ;;  %v6471_v3 = vsel %vm6410_vm7, %v6468_v34, %v6470_v56 }
 0x404   :  { %v7224_v4 = vld [vmem:[%s23521_s3 + $0x8] sm:$0xff]  ;;  %v13176_v5 = vpop.f32.mrf.mxu1  ;;  %v13338_v6 = vpop.f32.mrf.mxu0 }
 0x405   :  { %7062 = vst.msk [vmem:[%s23521_s3 + $0x18] sm:$0xff] %vm15_vm3, %v6981_v62  ;;  %v8077_v7 = vadd.f32 %v7753_v61, %v7224_v4  ;;  %v6133_v62 = vld [vmem:[%s23521_s3 + $0x48] sm:$0xff]  ;;  %v7567_v4 = vsel %vm6410_vm7, %v7564_v35, %v7566_v57  ;;  %v14101_v5 = vld [vmem:[%s23520_s0 + $0x100] sm:$0xff]  }
 0x406   :  { %v6668_v9 = vpop.f32.mrf.mxu1  ;;  %13274 = vmatmul.mubr.msk.bf16.gmra.mxu1 %vm463_vm2, %v6465_v63  ;;  %v7758_v10 = vpop.f32.mrf.mxu0  ;;  %13436 = vmatmul.mubr.msk.bf16.gmra.mxu0 %vm463_vm2, %v7561_v1  ;;  %v14102_v6 = vld [vmem:[%s23520_s0 + $0x100] sm:$0xff]  }
 0x407   :  { %8158 = vst.msk [vmem:[%s23521_s3 + $0x8] sm:$0xff] %vm15_vm3, %v8077_v7  ;;  %v6982_v11 = vadd.f32 %v6668_v9, %v6128_v8  ;;  %13277 = vmatprep.mubr.msk.bf16.mxu1 %vm14207_vm1, %v14206_v0  ;;  %13439 = vmatprep.mubr.msk.bf16.mxu0 %vm14207_vm1, %v14206_v0 }
 0x408   :  { %v7225_v14 = vld [vmem:[%s23521_s3 + $0x10] sm:$0xff]  ;;  %v13179_v15 = vpop.f32.mrf.mxu1  ;;  %v13341_v16 = vpop.f32.mrf.mxu0 }
 0x409   :  { %7063 = vst.msk [vmem:[%s23521_s3 + $0x20] sm:$0xff] %vm15_vm3, %v6982_v11  ;;  %v8078_v17 = vadd.f32 %v7758_v10, %v7225_v14  ;;  %v6134_v11 = vld [vmem:[%s23521_s3 + $0x50] sm:$0xff]  ;;  %v6472_v15 = vrot.slane %v14101_v5, 2  ;;  %v7568_v16 = vrot.slane %v14102_v6, 2 }
 0x40a   :  { %v6671_v19 = vpop.f32.mrf.mxu1  ;;  %v7761_v20 = vpop.f32.mrf.mxu0 }
 0x40b   :  { %8159 = vst.msk [vmem:[%s23521_s3 + $0x10] sm:$0xff] %vm15_vm3, %v8078_v17  ;;  %v6983_v21 = vadd.f32 %v6671_v19, %v6129_v18  ;;  %v6473_v26 = vsel %vm6410_vm7, %v6470_v56, %v6472_v15 }
 0x40c   :  { %v7226_v27 = vld [vmem:[%s23521_s3 + $0x18] sm:$0xff]  ;;  %v13180_v28 = vpop.f32.mrf.mxu1  ;;  %v13342_v23 = vpop.f32.mrf.mxu0 }
 0x40d   :  { %7064 = vst.msk [vmem:[%s23521_s3 + $0x28] sm:$0xff] %vm15_vm3, %v6983_v21  ;;  %v8079_v29 = vadd.f32 %v7761_v20, %v7226_v27  ;;  %v6135_v21 = vld [vmem:[%s23521_s3 + $0x58] sm:$0xff]  ;;  %v7569_v27 = vsel %vm6410_vm7, %v7566_v57, %v7568_v16  ;;  %v14103_v28 = vld [vmem:[%s23520_s0 + $0x108] sm:$0xff]  }
 0x40e   :  { %v6676_v31 = vpop.f32.mrf.mxu1  ;;  %13278 = vmatmul.mubr.msk.bf16.gmra.mxu1 %vm463_vm2, %v6467_v22  ;;  %v7766_v32 = vpop.f32.mrf.mxu0  ;;  %13440 = vmatmul.mubr.msk.bf16.gmra.mxu0 %vm463_vm2, %v7563_v24  ;;  %v14104_v23 = vld [vmem:[%s23520_s0 + $0x108] sm:$0xff]  }
 0x40f   :  { %8160 = vst.msk [vmem:[%s23521_s3 + $0x18] sm:$0xff] %vm15_vm3, %v8079_v29  ;;  %v6984_v33 = vadd.f32 %v6676_v31, %v6130_v30  ;;  %13281 = vmatprep.mubr.msk.bf16.mxu1 %vm14207_vm1, %v14206_v0  ;;  %13443 = vmatprep.mubr.msk.bf16.mxu0 %vm14207_vm1, %v14206_v0 }
 0x410   :  { %v7227_v36 = vld [vmem:[%s23521_s3 + $0x20] sm:$0xff]  ;;  %v13183_v37 = vpop.f32.mrf.mxu1  ;;  %v13345_v38 = vpop.f32.mrf.mxu0 }
 0x411   :  { %7065 = vst.msk [vmem:[%s23521_s3 + $0x30] sm:$0xff] %vm15_vm3, %v6984_v33  ;;  %v8080_v39 = vadd.f32 %v7766_v32, %v7227_v36  ;;  %v6136_v33 = vld [vmem:[%s23521_s3 + $0x60] sm:$0xff]  ;;  %v6474_v37 = vrot.slane %v14103_v28, 2  ;;  %v7570_v38 = vrot.slane %v14104_v23, 2 }
 0x412   :  { %v6679_v41 = vpop.f32.mrf.mxu1  ;;  %v7769_v42 = vpop.f32.mrf.mxu0 }
 0x413   :  { %8161 = vst.msk [vmem:[%s23521_s3 + $0x20] sm:$0xff] %vm15_vm3, %v8080_v39  ;;  %v6985_v43 = vadd.f32 %v6679_v41, %v6131_v40  ;;  %v6475_v47 = vsel %vm6410_vm7, %v6472_v15, %v6474_v37 }
 0x414   :  { %v7228_v48 = vld [vmem:[%s23521_s3 + $0x28] sm:$0xff]  ;;  %v13184_v49 = vpop.f32.mrf.mxu1  ;;  %v13346_v50 = vpop.f32.mrf.mxu0 }
 0x415   :  { %7066 = vst.msk [vmem:[%s23521_s3 + $0x38] sm:$0xff] %vm15_vm3, %v6985_v43  ;;  %v8081_v51 = vadd.f32 %v7769_v42, %v7228_v48  ;;  %v6137_v43 = vld [vmem:[%s23521_s3 + $0x68] sm:$0xff]  ;;  %v7571_v48 = vsel %vm6410_vm7, %v7568_v16, %v7570_v38  ;;  %v14105_v49 = vld [vmem:[%s23520_s0 + $0x110] sm:$0xff]  }
 0x416   :  { %v6684_v53 = vpop.f32.mrf.mxu1  ;;  %13282 = vmatmul.mubr.msk.bf16.gmra.mxu1 %vm463_vm2, %v6469_v44  ;;  %v7774_v54 = vpop.f32.mrf.mxu0  ;;  %13444 = vmatmul.mubr.msk.bf16.gmra.mxu0 %vm463_vm2, %v7565_v45  ;;  %v14106_v50 = vld [vmem:[%s23520_s0 + $0x110] sm:$0xff]  }
 0x417   :  { %8162 = vst.msk [vmem:[%s23521_s3 + $0x28] sm:$0xff] %vm15_vm3, %v8081_v51  ;;  %v6986_v55 = vadd.f32 %v6684_v53, %v6132_v52  ;;  %13285 = vmatprep.mubr.msk.bf16.mxu1 %vm14207_vm1, %v14206_v0  ;;  %13447 = vmatprep.mubr.msk.bf16.mxu0 %vm14207_vm1, %v14206_v0 }
 0x418   :  { %v7229_v58 = vld [vmem:[%s23521_s3 + $0x30] sm:$0xff]  ;;  %v13187_v59 = vpop.f32.mrf.mxu1  ;;  %v13349_v60 = vpop.f32.mrf.mxu0 }
 0x419   :  { %7067 = vst.msk [vmem:[%s23521_s3 + $0x40] sm:$0xff] %vm15_vm3, %v6986_v55  ;;  %v8082_v61 = vadd.f32 %v7774_v54, %v7229_v58  ;;  %v6138_v55 = vld [vmem:[%s23521_s3 + $0x70] sm:$0xff]  ;;  %v6476_v59 = vrot.slane %v14105_v49, 2  ;;  %v7572_v60 = vrot.slane %v14106_v50, 2 }
 0x41a   :  { %v6687_v63 = vpop.f32.mrf.mxu1  ;;  %v7777_v1 = vpop.f32.mrf.mxu0 }
 0x41b   :  { %8163 = vst.msk [vmem:[%s23521_s3 + $0x30] sm:$0xff] %vm15_vm3, %v8082_v61  ;;  %v6987_v2 = vadd.f32 %v6687_v63, %v6133_v62  ;;  %v6477_v6 = vsel %vm6410_vm7, %v6474_v37, %v6476_v59 }
 0x41c   :  { %v7230_v7 = vld [vmem:[%s23521_s3 + $0x38] sm:$0xff]  ;;  %v13188_v8 = vpop.f32.mrf.mxu1  ;;  %v13350_v9 = vpop.f32.mrf.mxu0 }
 0x41d   :  { %7068 = vst.msk [vmem:[%s23521_s3 + $0x48] sm:$0xff] %vm15_vm3, %v6987_v2  ;;  %v8083_v10 = vadd.f32 %v7777_v1, %v7230_v7  ;;  %v6139_v2 = vld [vmem:[%s23521_s3 + $0x78] sm:$0xff]  ;;  %v7573_v7 = vsel %vm6410_vm7, %v7570_v38, %v7572_v60 }
 0x41e   :  { %v6692_v12 = vpop.f32.mrf.mxu1  ;;  %13286 = vmatmul.mubr.msk.bf16.gmra.mxu1 %vm463_vm2, %v6471_v3  ;;  %v7782_v13 = vpop.f32.mrf.mxu0  ;;  %13448 = vmatmul.mubr.msk.bf16.gmra.mxu0 %vm463_vm2, %v7567_v4  ;;  %v14107_v8 = vld [vmem:[%s23520_s0 + $0x118] sm:$0xff]  }
 0x41f   :  { %8164 = vst.msk [vmem:[%s23521_s3 + $0x38] sm:$0xff] %vm15_vm3, %v8083_v10  ;;  %v6988_v14 = vadd.f32 %v6692_v12, %v6134_v11  ;;  %13289 = vmatprep.mubr.msk.bf16.mxu1 %vm14207_vm1, %v14206_v0  ;;  %13451 = vmatprep.mubr.msk.bf16.mxu0 %vm14207_vm1, %v14206_v0  ;;  %v14108_v9 = vld [vmem:[%s23520_s0 + $0x118] sm:$0xff]  }
 0x420   :  { %v7231_v17 = vld [vmem:[%s23521_s3 + $0x40] sm:$0xff]  ;;  %v13191_v18 = vpop.f32.mrf.mxu1  ;;  %v13353_v19 = vpop.f32.mrf.mxu0 }
 0x421   :  { %7069 = vst.msk [vmem:[%s23521_s3 + $0x50] sm:$0xff] %vm15_vm3, %v6988_v14  ;;  %v8084_v20 = vadd.f32 %v7782_v13, %v7231_v17  ;;  %v6140_v14 = vld [vmem:[%s23521_s3 + $0x80] sm:$0xff]  ;;  %v6478_v18 = vrot.slane %v14107_v8, 2  ;;  %v7574_v19 = vrot.slane %v14108_v9, 2 }
 0x422   :  { %v6695_v22 = vpop.f32.mrf.mxu1  ;;  %v7785_v24 = vpop.f32.mrf.mxu0 }
 0x423   :  { %8165 = vst.msk [vmem:[%s23521_s3 + $0x40] sm:$0xff] %vm15_vm3, %v8084_v20  ;;  %v6989_v25 = vadd.f32 %v6695_v22, %v6135_v21  ;;  %v6479_v23 = vsel %vm6410_vm7, %v6476_v59, %v6478_v18 }
 0x424   :  { %v7232_v29 = vld [vmem:[%s23521_s3 + $0x48] sm:$0xff]  ;;  %v13192_v30 = vpop.f32.mrf.mxu1  ;;  %v13354_v31 = vpop.f32.mrf.mxu0 }
 0x425   :  { %7070 = vst.msk [vmem:[%s23521_s3 + $0x58] sm:$0xff] %vm15_vm3, %v6989_v25  ;;  %v8085_v32 = vadd.f32 %v7785_v24, %v7232_v29  ;;  %v6141_v25 = vld [vmem:[%s23521_s3 + $0x88] sm:$0xff]  ;;  %v7575_v29 = vsel %vm6410_vm7, %v7572_v60, %v7574_v19  ;;  %v14109_v30 = vld [vmem:[%s23520_s0 + $0x120] sm:$0xff]  }
 0x426   :  { %v6700_v34 = vpop.f32.mrf.mxu1  ;;  %13290 = vmatmul.mubr.msk.bf16.gmra.mxu1 %vm463_vm2, %v6473_v26  ;;  %v7790_v35 = vpop.f32.mrf.mxu0  ;;  %13452 = vmatmul.mubr.msk.bf16.gmra.mxu0 %vm463_vm2, %v7569_v27  ;;  %v14110_v31 = vld [vmem:[%s23520_s0 + $0x120] sm:$0xff]  }
 0x427   :  { %8166 = vst.msk [vmem:[%s23521_s3 + $0x48] sm:$0xff] %vm15_vm3, %v8085_v32  ;;  %v6990_v36 = vadd.f32 %v6700_v34, %v6136_v33  ;;  %13293 = vmatprep.mubr.msk.bf16.mxu1 %vm14207_vm1, %v14206_v0  ;;  %13455 = vmatprep.mubr.msk.bf16.mxu0 %vm14207_vm1, %v14206_v0 }
 0x428   :  { %v7233_v39 = vld [vmem:[%s23521_s3 + $0x50] sm:$0xff]  ;;  %v13195_v40 = vpop.f32.mrf.mxu1  ;;  %v13357_v41 = vpop.f32.mrf.mxu0 }
 0x429   :  { %7071 = vst.msk [vmem:[%s23521_s3 + $0x60] sm:$0xff] %vm15_vm3, %v6990_v36  ;;  %v8086_v42 = vadd.f32 %v7790_v35, %v7233_v39  ;;  %v6142_v36 = vld [vmem:[%s23521_s3 + $0x90] sm:$0xff]  ;;  %v6480_v40 = vrot.slane %v14109_v30, 2  ;;  %v7576_v41 = vrot.slane %v14110_v31, 2 }
 0x42a   :  { %v6703_v44 = vpop.f32.mrf.mxu1  ;;  %v7793_v45 = vpop.f32.mrf.mxu0 }
 0x42b   :  { %8167 = vst.msk [vmem:[%s23521_s3 + $0x50] sm:$0xff] %vm15_vm3, %v8086_v42  ;;  %v6991_v46 = vadd.f32 %v6703_v44, %v6137_v43  ;;  %v6481_v50 = vsel %vm6410_vm7, %v6478_v18, %v6480_v40 }
 0x42c   :  { %v7234_v51 = vld [vmem:[%s23521_s3 + $0x58] sm:$0xff]  ;;  %v13196_v52 = vpop.f32.mrf.mxu1  ;;  %v13358_v53 = vpop.f32.mrf.mxu0 }
 0x42d   :  { %7072 = vst.msk [vmem:[%s23521_s3 + $0x68] sm:$0xff] %vm15_vm3, %v6991_v46  ;;  %v8087_v54 = vadd.f32 %v7793_v45, %v7234_v51  ;;  %v6143_v46 = vld [vmem:[%s23521_s3 + $0x98] sm:$0xff]  ;;  %v7577_v51 = vsel %vm6410_vm7, %v7574_v19, %v7576_v41  ;;  %v14111_v52 = vld [vmem:[%s23520_s0 + $0x128] sm:$0xff]  }
 0x42e   :  { %v6708_v56 = vpop.f32.mrf.mxu1  ;;  %13294 = vmatmul.mubr.msk.bf16.gmra.mxu1 %vm463_vm2, %v6475_v47  ;;  %v7798_v57 = vpop.f32.mrf.mxu0  ;;  %13456 = vmatmul.mubr.msk.bf16.gmra.mxu0 %vm463_vm2, %v7571_v48  ;;  %v14112_v53 = vld [vmem:[%s23520_s0 + $0x128] sm:$0xff]  }
 0x42f   :  { %8168 = vst.msk [vmem:[%s23521_s3 + $0x58] sm:$0xff] %vm15_vm3, %v8087_v54  ;;  %v6992_v58 = vadd.f32 %v6708_v56, %v6138_v55  ;;  %13297 = vmatprep.mubr.msk.bf16.mxu1 %vm14207_vm1, %v14206_v0  ;;  %13459 = vmatprep.mubr.msk.bf16.mxu0 %vm14207_vm1, %v14206_v0 }
 0x430   :  { %v7235_v61 = vld [vmem:[%s23521_s3 + $0x60] sm:$0xff]  ;;  %v13199_v62 = vpop.f32.mrf.mxu1  ;;  %v13361_v63 = vpop.f32.mrf.mxu0 }
 0x431   :  { %7073 = vst.msk [vmem:[%s23521_s3 + $0x70] sm:$0xff] %vm15_vm3, %v6992_v58  ;;  %v8088_v1 = vadd.f32 %v7798_v57, %v7235_v61  ;;  %v6144_v58 = vld [vmem:[%s23521_s3 + $0xa0] sm:$0xff]  ;;  %v6482_v62 = vrot.slane %v14111_v52, 2  ;;  %v7578_v63 = vrot.slane %v14112_v53, 2 }
 0x432   :  { %v6711_v3 = vpop.f32.mrf.mxu1  ;;  %v7801_v4 = vpop.f32.mrf.mxu0 }
 0x433   :  { %8169 = vst.msk [vmem:[%s23521_s3 + $0x60] sm:$0xff] %vm15_vm3, %v8088_v1  ;;  %v6993_v5 = vadd.f32 %v6711_v3, %v6139_v2  ;;  %v6483_v9 = vsel %vm6410_vm7, %v6480_v40, %v6482_v62 }
 0x434   :  { %v7236_v10 = vld [vmem:[%s23521_s3 + $0x68] sm:$0xff]  ;;  %v13200_v11 = vpop.f32.mrf.mxu1  ;;  %v13362_v12 = vpop.f32.mrf.mxu0 }
 0x435   :  { %7074 = vst.msk [vmem:[%s23521_s3 + $0x78] sm:$0xff] %vm15_vm3, %v6993_v5  ;;  %v8089_v13 = vadd.f32 %v7801_v4, %v7236_v10  ;;  %v6145_v5 = vld [vmem:[%s23521_s3 + $0xa8] sm:$0xff]  ;;  %v7579_v10 = vsel %vm6410_vm7, %v7576_v41, %v7578_v63  ;;  %v14113_v11 = vld [vmem:[%s23520_s0 + $0x130] sm:$0xff]  }
 0x436   :  { %v6716_v15 = vpop.f32.mrf.mxu1  ;;  %13298 = vmatmul.mubr.msk.bf16.gmra.mxu1 %vm463_vm2, %v6477_v6  ;;  %v7806_v16 = vpop.f32.mrf.mxu0  ;;  %13460 = vmatmul.mubr.msk.bf16.gmra.mxu0 %vm463_vm2, %v7573_v7  ;;  %v14114_v12 = vld [vmem:[%s23520_s0 + $0x130] sm:$0xff]  }
 0x437   :  { %8170 = vst.msk [vmem:[%s23521_s3 + $0x68] sm:$0xff] %vm15_vm3, %v8089_v13  ;;  %v6994_v17 = vadd.f32 %v6716_v15, %v6140_v14  ;;  %13301 = vmatprep.mubr.msk.bf16.mxu1 %vm14207_vm1, %v14206_v0  ;;  %13463 = vmatprep.mubr.msk.bf16.mxu0 %vm14207_vm1, %v14206_v0 }
 0x438   :  { %v7237_v20 = vld [vmem:[%s23521_s3 + $0x70] sm:$0xff]  ;;  %v13203_v21 = vpop.f32.mrf.mxu1  ;;  %v13365_v22 = vpop.f32.mrf.mxu0 }
 0x439   :  { %7075 = vst.msk [vmem:[%s23521_s3 + $0x80] sm:$0xff] %vm15_vm3, %v6994_v17  ;;  %v8090_v24 = vadd.f32 %v7806_v16, %v7237_v20  ;;  %v6146_v17 = vld [vmem:[%s23521_s3 + $0xb0] sm:$0xff]  ;;  %v6484_v21 = vrot.slane %v14113_v11, 2  ;;  %v7580_v22 = vrot.slane %v14114_v12, 2 }
 0x43a   :  { %v6719_v26 = vpop.f32.mrf.mxu1  ;;  %v7809_v27 = vpop.f32.mrf.mxu0 }
 0x43b   :  { %8171 = vst.msk [vmem:[%s23521_s3 + $0x70] sm:$0xff] %vm15_vm3, %v8090_v24  ;;  %v6995_v28 = vadd.f32 %v6719_v26, %v6141_v25  ;;  %v6485_v31 = vsel %vm6410_vm7, %v6482_v62, %v6484_v21 }
 0x43c   :  { %v7238_v32 = vld [vmem:[%s23521_s3 + $0x78] sm:$0xff]  ;;  %v13204_v33 = vpop.f32.mrf.mxu1  ;;  %v13366_v34 = vpop.f32.mrf.mxu0 }
 0x43d   :  { %7076 = vst.msk [vmem:[%s23521_s3 + $0x88] sm:$0xff] %vm15_vm3, %v6995_v28  ;;  %v8091_v35 = vadd.f32 %v7809_v27, %v7238_v32  ;;  %v6147_v28 = vld [vmem:[%s23521_s3 + $0xb8] sm:$0xff]  ;;  %v7581_v32 = vsel %vm6410_vm7, %v7578_v63, %v7580_v22 }
 0x43e   :  { %v6724_v37 = vpop.f32.mrf.mxu1  ;;  %13302 = vmatmul.mubr.msk.bf16.gmra.mxu1 %vm463_vm2, %v6479_v23  ;;  %v7814_v38 = vpop.f32.mrf.mxu0  ;;  %13464 = vmatmul.mubr.msk.bf16.gmra.mxu0 %vm463_vm2, %v7575_v29  ;;  %v14115_v33 = vld [vmem:[%s23520_s0 + $0x138] sm:$0xff]  }
 0x43f   :  { %8172 = vst.msk [vmem:[%s23521_s3 + $0x78] sm:$0xff] %vm15_vm3, %v8091_v35  ;;  %v6996_v39 = vadd.f32 %v6724_v37, %v6142_v36  ;;  %13305 = vmatprep.mubr.msk.bf16.mxu1 %vm14207_vm1, %v14206_v0  ;;  %13467 = vmatprep.mubr.msk.bf16.mxu0 %vm14207_vm1, %v14206_v0  ;;  %v14116_v34 = vld [vmem:[%s23520_s0 + $0x138] sm:$0xff]  }
 0x440   :  { %v7239_v42 = vld [vmem:[%s23521_s3 + $0x80] sm:$0xff]  ;;  %v13207_v43 = vpop.f32.mrf.mxu1  ;;  %v13369_v44 = vpop.f32.mrf.mxu0 }
 0x441   :  { %7077 = vst.msk [vmem:[%s23521_s3 + $0x90] sm:$0xff] %vm15_vm3, %v6996_v39  ;;  %v8092_v45 = vadd.f32 %v7814_v38, %v7239_v42  ;;  %v6148_v39 = vld [vmem:[%s23521_s3 + $0xc0] sm:$0xff]  ;;  %v6486_v43 = vrot.slane %v14115_v33, 2  ;;  %v7582_v44 = vrot.slane %v14116_v34, 2  ;;  %v14122_v33 = vld [vmem:[%s23520_s0 + $0x10] sm:$0xfc]  }
 0x442   :  { %v6727_v47 = vpop.f32.mrf.mxu1  ;;  %v7817_v48 = vpop.f32.mrf.mxu0 }
 0x443   :  { %8173 = vst.msk [vmem:[%s23521_s3 + $0x80] sm:$0xff] %vm15_vm3, %v8092_v45  ;;  %v6997_v49 = vadd.f32 %v6727_v47, %v6143_v46  ;;  %v6487_v53 = vsel %vm6410_vm7, %v6484_v21, %v6486_v43 }
 0x444   :  { %v7240_v54 = vld [vmem:[%s23521_s3 + $0x88] sm:$0xff]  ;;  %v13208_v55 = vpop.f32.mrf.mxu1  ;;  %v13370_v56 = vpop.f32.mrf.mxu0 }
 0x445   :  { %7078 = vst.msk [vmem:[%s23521_s3 + $0x98] sm:$0xff] %vm15_vm3, %v6997_v49  ;;  %v8093_v57 = vadd.f32 %v7817_v48, %v7240_v54  ;;  %v6149_v49 = vld [vmem:[%s23521_s3 + $0xc8] sm:$0xff]  ;;  %v7583_v54 = vsel %vm6410_vm7, %v7580_v22, %v7582_v44  ;;  %v14117_v55 = vld [vmem:[%s23520_s0 + $0x140] sm:$0xff]  }
 0x446   :  { %v6732_v59 = vpop.f32.mrf.mxu1  ;;  %13306 = vmatmul.mubr.msk.bf16.gmra.mxu1 %vm463_vm2, %v6481_v50  ;;  %v7822_v60 = vpop.f32.mrf.mxu0  ;;  %13468 = vmatmul.mubr.msk.bf16.gmra.mxu0 %vm463_vm2, %v7577_v51  ;;  %v14118_v56 = vld [vmem:[%s23520_s0 + $0x140] sm:$0xff]  }
 0x447   :  { %8174 = vst.msk [vmem:[%s23521_s3 + $0x88] sm:$0xff] %vm15_vm3, %v8093_v57  ;;  %v6998_v61 = vadd.f32 %v6732_v59, %v6144_v58  ;;  %13309 = vmatprep.mubr.msk.bf16.mxu1 %vm14207_vm1, %v14206_v0  ;;  %13471 = vmatprep.mubr.msk.bf16.mxu0 %vm14207_vm1, %v14206_v0 }
 0x448   :  { %v7241_v1 = vld [vmem:[%s23521_s3 + $0x90] sm:$0xff]  ;;  %v13211_v2 = vpop.f32.mrf.mxu1  ;;  %v13373_v3 = vpop.f32.mrf.mxu0 }
 0x449   :  { %7079 = vst.msk [vmem:[%s23521_s3 + $0xa0] sm:$0xff] %vm15_vm3, %v6998_v61  ;;  %v8094_v4 = vadd.f32 %v7822_v60, %v7241_v1  ;;  %v6150_v61 = vld [vmem:[%s23521_s3 + $0xd0] sm:$0xff]  ;;  %v6488_v2 = vrot.slane %v14117_v55, 2  ;;  %v7584_v3 = vrot.slane %v14118_v56, 2  ;;  %v6155_v56 = vld [vmem:[%s23521_s3 + $0xf8] sm:$0xff] }
 0x44a   :  { %v6735_v6 = vpop.f32.mrf.mxu1  ;;  %v7825_v7 = vpop.f32.mrf.mxu0 }
 0x44b   :  { %8175 = vst.msk [vmem:[%s23521_s3 + $0x90] sm:$0xff] %vm15_vm3, %v8094_v4  ;;  %v6999_v8 = vadd.f32 %v6735_v6, %v6145_v5  ;;  %v6489_v12 = vsel %vm6410_vm7, %v6486_v43, %v6488_v2  ;;  %v6154_v43 = vld [vmem:[%s23521_s3 + $0xf0] sm:$0xff] }
 0x44c   :  { %v7242_v13 = vld [vmem:[%s23521_s3 + $0x98] sm:$0xff]  ;;  %v13212_v14 = vpop.f32.mrf.mxu1  ;;  %v13374_v15 = vpop.f32.mrf.mxu0 }
 0x44d   :  { %7080 = vst.msk [vmem:[%s23521_s3 + $0xa8] sm:$0xff] %vm15_vm3, %v6999_v8  ;;  %v8095_v16 = vadd.f32 %v7825_v7, %v7242_v13  ;;  %v6151_v8 = vld [vmem:[%s23521_s3 + $0xd8] sm:$0xff]  ;;  %v7585_v13 = vsel %vm6410_vm7, %v7582_v44, %v7584_v3  ;;  %v20128_v14 = vld [vmem:[%s23520_s0 + $0x148] sm:$0x3f]  }
 0x44e   :  { %v6740_v18 = vpop.f32.mrf.mxu1  ;;  %13310 = vmatmul.mubr.msk.bf16.gmra.mxu1 %vm463_vm2, %v6483_v9  ;;  %v7830_v19 = vpop.f32.mrf.mxu0  ;;  %13472 = vmatmul.mubr.msk.bf16.gmra.mxu0 %vm463_vm2, %v7579_v10  ;;  %v20133_v15 = vld [vmem:[%s23520_s0 + $0x148] sm:$0xff]  }
 0x44f   :  { %8176 = vst.msk [vmem:[%s23521_s3 + $0x98] sm:$0xff] %vm15_vm3, %v8095_v16  ;;  %v7000_v20 = vadd.f32 %v6740_v18, %v6146_v17  ;;  %13313 = vmatprep.mubr.msk.bf16.mxu1 %vm14207_vm1, %v14206_v0  ;;  %13475 = vmatprep.mubr.msk.bf16.mxu0 %vm14207_vm1, %v14206_v0 }
 0x450   :  { %v7243_v24 = vld [vmem:[%s23521_s3 + $0xa0] sm:$0xff]  ;;  %v13215_v25 = vpop.f32.mrf.mxu1  ;;  %v13377_v26 = vpop.f32.mrf.mxu0 }
 0x451   :  { %7081 = vst.msk [vmem:[%s23521_s3 + $0xb0] sm:$0xff] %vm15_vm3, %v7000_v20  ;;  %v8096_v27 = vadd.f32 %v7830_v19, %v7243_v24  ;;  %v6152_v20 = vld [vmem:[%s23521_s3 + $0xe0] sm:$0xff]  ;;  %v6490_v25 = vrot.slane %v20128_v14, 2  ;;  %v7586_v26 = vrot.slane %v20133_v15, 2 }
 0x452   :  { %v6743_v23 = vpop.f32.mrf.mxu1  ;;  %v7833_v29 = vpop.f32.mrf.mxu0 }
 0x453   :  { %8177 = vst.msk [vmem:[%s23521_s3 + $0xa0] sm:$0xff] %vm15_vm3, %v8096_v27  ;;  %v7001_v30 = vadd.f32 %v6743_v23, %v6147_v28 }
 0x454   :  { %v7244_v35 = vld [vmem:[%s23521_s3 + $0xa8] sm:$0xff]  ;;  %v13216_v36 = vpop.f32.mrf.mxu1  ;;  %v13378_v37 = vpop.f32.mrf.mxu0 }
 0x455   :  { %7082 = vst.msk [vmem:[%s23521_s3 + $0xb8] sm:$0xff] %vm15_vm3, %v7001_v30  ;;  %v8097_v38 = vadd.f32 %v7833_v29, %v7244_v35  ;;  %v6153_v30 = vld [vmem:[%s23521_s3 + $0xe8] sm:$0xff]  ;;  %v6491_v35 = vsel %vm6410_vm7, %v6488_v2, %v6490_v25  ;;  %v7587_v36 = vsel %vm6410_vm7, %v7584_v3, %v7586_v26  ;;  %v20179_v37 = vld [vmem:[%s23520_s0 + $0x150] sm:$0x3f]   ;;  %v14124_v2 = vld [vmem:[%s23520_s0 + $0x20] sm:$0xff]  }
 0x456   :  { %v6748_v40 = vpop.f32.mrf.mxu1  ;;  %13314 = vmatmul.mubr.msk.bf16.gmra.mxu1 %vm463_vm2, %v6485_v31  ;;  %v7838_v41 = vpop.f32.mrf.mxu0  ;;  %13476 = vmatmul.mubr.msk.bf16.gmra.mxu0 %vm463_vm2, %v7581_v32  ;;  %v8629_v14 = vshll.u32 %v14124_v2, 16 }
 0x457   :  { %8178 = vst.msk [vmem:[%s23521_s3 + $0xa8] sm:$0xff] %vm15_vm3, %v8097_v38  ;;  %v7002_v42 = vadd.f32 %v6748_v40, %v6148_v39  ;;  %13317 = vmatprep.mubr.msk.bf16.mxu1 %vm14207_vm1, %v14206_v0  ;;  %13479 = vmatprep.mubr.msk.bf16.mxu0 %vm14207_vm1, %v14206_v0  ;;  %v14123_v38 = vld [vmem:[%s23520_s0 + $0x18] sm:$0xff]  }
 0x458   :  { %v7245_v45 = vld [vmem:[%s23521_s3 + $0xb0] sm:$0xff]  ;;  %v13219_v46 = vpop.f32.mrf.mxu1  ;;  %v13381_v47 = vpop.f32.mrf.mxu0 }
 0x459   :  { %7083 = vst.msk [vmem:[%s23521_s3 + $0xc0] sm:$0xff] %vm15_vm3, %v7002_v42  ;;  %v8098_v48 = vadd.f32 %v7838_v41, %v7245_v45  ;;  %v8609_v46 = vshrl.u32 %v14122_v33, 16  ;;  %v8612_v47 = vshll.u32 %v14122_v33, 16  ;;  %v6158_v33 = vld [vmem:[%s23521_s3 + $0x110] sm:$0xff] }
 0x45a   :  { %v6751_v50 = vpop.f32.mrf.mxu1  ;;  %v7841_v51 = vpop.f32.mrf.mxu0 }
 0x45b   :  { %8179 = vst.msk [vmem:[%s23521_s3 + $0xb0] sm:$0xff] %vm15_vm3, %v8098_v48  ;;  %v7003_v52 = vadd.f32 %v6751_v50, %v6149_v49  ;;  %v7588_v49 = vrot.slane %v20179_v37, 2  ;;  %v8617_v50 = vshrl.u32 %v14123_v38, 16 }
 0x45c   :  { %v7246_v57 = vld [vmem:[%s23521_s3 + $0xb8] sm:$0xff]  ;;  %v13220_v58 = vpop.f32.mrf.mxu1  ;;  %v13382_v59 = vpop.f32.mrf.mxu0 }
 0x45d   :  { %7084 = vst.msk [vmem:[%s23521_s3 + $0xc8] sm:$0xff] %vm15_vm3, %v7003_v52  ;;  %v8099_v60 = vadd.f32 %v7841_v51, %v7246_v57  ;;  %v8620_v51 = vshll.u32 %v14123_v38, 16  ;;  %v8611_v59 = vrot.slane %v8609_v46, 2  ;;  %v6159_v46 = vld [vmem:[%s23521_s3 + $0x118] sm:$0xff] }
 0x45e   :  { %v6756_v62 = vpop.f32.mrf.mxu1  ;;  %13318 = vmatmul.mubr.msk.bf16.gmra.mxu1 %vm463_vm2, %v6487_v53  ;;  %v7846_v63 = vpop.f32.mrf.mxu0  ;;  %13480 = vmatmul.mubr.msk.bf16.gmra.mxu0 %vm463_vm2, %v7583_v54 }
 0x45f   :  { %8180 = vst.msk [vmem:[%s23521_s3 + $0xb8] sm:$0xff] %vm15_vm3, %v8099_v60  ;;  %v7004_v1 = vadd.f32 %v6756_v62, %v6150_v61  ;;  %13321 = vmatprep.mubr.msk.bf16.mxu1 %vm14207_vm1, %v14206_v0  ;;  %13483 = vmatprep.mubr.msk.bf16.mxu0 %vm14207_vm1, %v14206_v0  ;;  %v8614_v60 = vrot.slane %v8612_v47, 3  ;;  %v7589_v62 = vsel %vm6410_vm7, %v7586_v26, %v7588_v49 }
 0x460   :  { %v7247_v4 = vld [vmem:[%s23521_s3 + $0xc0] sm:$0xff]  ;;  %v13223_v5 = vpop.f32.mrf.mxu1  ;;  %v13385_v6 = vpop.f32.mrf.mxu0 }
 0x461   :  { %7085 = vst.msk [vmem:[%s23521_s3 + $0xd0] sm:$0xff] %vm15_vm3, %v7004_v1  ;;  %v8100_v7 = vadd.f32 %v7846_v63, %v7247_v4  ;;  %v8619_v63 = vrot.slane %v8617_v50, 2  ;;  %v8622_v1 = vrot.slane %v8620_v51, 3 }
 0x462   :  { %v6759_v9 = vpop.f32.mrf.mxu1  ;;  %v7849_v10 = vpop.f32.mrf.mxu0 }
 0x463   :  { %8181 = vst.msk [vmem:[%s23521_s3 + $0xc0] sm:$0xff] %vm15_vm3, %v8100_v7  ;;  %v7005_v11 = vadd.f32 %v6759_v9, %v6151_v8  ;;  %v6156_v7 = vld [vmem:[%s23521_s3 + $0x100] sm:$0xff] }
 0x464   :  { %v7248_v16 = vld [vmem:[%s23521_s3 + $0xc8] sm:$0xff]  ;;  %v13224_v17 = vpop.f32.mrf.mxu1  ;;  %v13386_v18 = vpop.f32.mrf.mxu0 }
 0x465   :  { %7086 = vst.msk [vmem:[%s23521_s3 + $0xd8] sm:$0xff] %vm15_vm3, %v7005_v11  ;;  %v8101_v19 = vadd.f32 %v7849_v10, %v7248_v16  ;;  %v8615_v10 = vor.u32 %v8614_v60, %v8611_v59  ;;  %v6160_v60 = vld [vmem:[%s23521_s3 + $0x120] sm:$0xff] }
 0x466   :  { %v6764_v21 = vpop.f32.mrf.mxu1  ;;  %13322 = vmatmul.mubr.msk.bf16.gmra.mxu1 %vm463_vm2, %v6489_v12  ;;  %v7854_v22 = vpop.f32.mrf.mxu0  ;;  %13484 = vmatmul.mubr.msk.bf16.gmra.mxu0 %vm463_vm2, %v7585_v13  ;;  %v8623_v12 = vor.u32 %v8622_v1, %v8619_v63  ;;  %v8626_v13 = vshrl.u32 %v14124_v2, 16 }
 0x467   :  { %8182 = vst.msk [vmem:[%s23521_s3 + $0xc8] sm:$0xff] %vm15_vm3, %v8101_v19  ;;  %v7006_v24 = vadd.f32 %v6764_v21, %v6152_v20  ;;  %13325 = vmatprep.mubr.msk.bf16.mxu1 %vm14207_vm1, %v14206_v0  ;;  %13487 = vmatprep.mubr.msk.bf16.mxu0 %vm14207_vm1, %v14206_v0  ;;  %v6157_v19 = vld [vmem:[%s23521_s3 + $0x108] sm:$0xff] }
 0x468   :  { %v7249_v27 = vld [vmem:[%s23521_s3 + $0xd0] sm:$0xff]  ;;  %v13227_v28 = vpop.f32.mrf.mxu1  ;;  %v13389_v23 = vpop.f32.mrf.mxu0  ;;  %v8628_v26 = vrot.slane %v8626_v13, 2  ;;  %v14131_v13 = vld [vmem:[%s23520_s0 + $0x38] sm:$0xff]  }
 0x469   :  { %7087 = vst.msk [vmem:[%s23521_s3 + $0xe0] sm:$0xff] %vm15_vm3, %v7006_v24  ;;  %v8102_v29 = vadd.f32 %v7854_v22, %v7249_v27  ;;  %v14127_v22 = vld [vmem:[%s23520_s0 + $0x28] sm:$0xff]   ;;  %v8631_v27 = vrot.slane %v8629_v14, 3  ;;  %v14125_v28 = vld [vmem:[%s23520_s0 + $0x10] sm:$0xf8]   ;;  %v20267_v23 = vld [vmem:[%s23520_s0 + $0x18] sm:$0xff]  }
 0x46a   :  { %v6767_v31 = vpop.f32.mrf.mxu1  ;;  %v7857_v32 = vpop.f32.mrf.mxu0  ;;  %v8638_v37 = vshll.u32 %v14127_v22, 16 }
 0x46b   :  { %8183 = vst.msk [vmem:[%s23521_s3 + $0xd0] sm:$0xff] %vm15_vm3, %v8102_v29  ;;  %v7007_v34 = vadd.f32 %v6767_v31, %v6153_v30 }
 0x46c   :  { %v7250_v39 = vld [vmem:[%s23521_s3 + $0xd8] sm:$0xff]  ;;  %v13228_v40 = vpop.f32.mrf.mxu1  ;;  %v13390_v41 = vpop.f32.mrf.mxu0  ;;  %v8640_v50 = vrot.slane %v8638_v37, 3 }
 0x46d   :  { %7088 = vst.msk [vmem:[%s23521_s3 + $0xe8] sm:$0xff] %vm15_vm3, %v7007_v34  ;;  %v8103_v42 = vadd.f32 %v7857_v32, %v7250_v39  ;;  %v8632_v39 = vor.u32 %v8631_v27, %v8628_v26  ;;  %v9994_v40 = vrot.slane %v14125_v28, 3  ;;  %v9995_v41 = vrot.slane %v20267_v23, 3 }
 0x46e   :  { %v6772_v44 = vpop.f32.mrf.mxu1  ;;  %13326 = vmatmul.mubr.msk.bf16.gmra.mxu1 %vm463_vm2, %v6491_v35  ;;  %v7862_v45 = vpop.f32.mrf.mxu0  ;;  %13488 = vmatmul.mubr.msk.bf16.gmra.mxu0 %vm463_vm2, %v7587_v36  ;;  %v8635_v36 = vshrl.u32 %v14127_v22, 16  ;;  %v8653_v27 = vshrl.u32 %v14131_v13, 16  ;;  %v8656_v28 = vshll.u32 %v14131_v13, 16 }
 0x46f   :  { %8184 = vst.msk [vmem:[%s23521_s3 + $0xd8] sm:$0xff] %vm15_vm3, %v8103_v42  ;;  %v7008_v48 = vadd.f32 %v6772_v44, %v6154_v43  ;;  %13329 = vmatprep.mubr.msk.bf16.mxu1 %vm14207_vm1, %v14206_v0  ;;  %13491 = vmatprep.mubr.msk.bf16.mxu0 %vm14207_vm1, %v14206_v0 }
 0x470   :  { %v7251_v52 = vld [vmem:[%s23521_s3 + $0xe0] sm:$0xff]  ;;  %v13231_v53 = vpop.f32.mrf.mxu1  ;;  %v13393_v54 = vpop.f32.mrf.mxu0 }
 0x471   :  { %7089 = vst.msk [vmem:[%s23521_s3 + $0xf0] sm:$0xff] %vm15_vm3, %v7008_v48  ;;  %v8104_v55 = vadd.f32 %v7862_v45, %v7251_v52  ;;  %v8633_v52 = vsel %vm8607_vm8, %v8623_v12, %v8632_v39  ;;  %v9996_v53 = vsel %vm9993_vm9, %v9994_v40, %v9995_v41  ;;  %v20309_v54 = vld [vmem:[%s23520_s0 + $0x20] sm:$0xff]  }
 0x472   :  { %v6775_v57 = vpop.f32.mrf.mxu1  ;;  %v7865_v58 = vpop.f32.mrf.mxu0  ;;  %v9997_v2 = vrot.slane %v20309_v54, 3 }
 0x473   :  { %8185 = vst.msk [vmem:[%s23521_s3 + $0xe0] sm:$0xff] %vm15_vm3, %v8104_v55  ;;  %v7009_v61 = vadd.f32 %v6775_v57, %v6155_v56  ;;  %v14129_v55 = vld [vmem:[%s23520_s0 + $0x30] sm:$0xff]  }
 0x474   :  { %v7252_v3 = vld [vmem:[%s23521_s3 + $0xe8] sm:$0xff]  ;;  %v13232_v4 = vpop.f32.mrf.mxu1  ;;  %v13394_v5 = vpop.f32.mrf.mxu0 }
 0x475   :  { %7090 = vst.msk [vmem:[%s23521_s3 + $0xf8] sm:$0xff] %vm15_vm3, %v7009_v61  ;;  %v8105_v6 = vadd.f32 %v7865_v58, %v7252_v3  ;;  %v8644_v3 = vshrl.u32 %v14129_v55, 16  ;;  %v8647_v4 = vshll.u32 %v14129_v55, 16 }
 0x476   :  { %v6780_v8 = vpop.f32.mrf.mxu1  ;;  %13330 = vmatmul.mubr.msk.bf16.gmra.mxu1 %vm463_vm2, %v6490_v25  ;;  %v7870_v9 = vpop.f32.mrf.mxu0  ;;  %13492 = vmatmul.mubr.msk.bf16.gmra.mxu0 %vm463_vm2, %v7589_v62  ;;  %v8624_v25 = vsel %vm8607_vm8, %v8615_v10, %v8623_v12 }
 0x477   :  { %8186 = vst.msk [vmem:[%s23521_s3 + $0xe8] sm:$0xff] %vm15_vm3, %v8105_v6  ;;  %v7010_v11 = vadd.f32 %v6780_v8, %v6156_v7  ;;  %13495 = vmatprep.mubr.msk.bf16.mxu0 %vm14207_vm1, %v14206_v0  ;;  %13501 = vmatprep.mubr.msk.bf16.mxu1 %vm14207_vm1, %v14206_v0 }
 0x478   :  { %v7253_v15 = vld [vmem:[%s23521_s3 + $0xf0] sm:$0xff]  ;;  %v13235_v16 = vpop.f32.mrf.mxu1  ;;  %v13397_v17 = vpop.f32.mrf.mxu0 }
 0x479   :  { %7091 = vst.msk [vmem:[%s23521_s3 + $0x100] sm:$0xff] %vm15_vm3, %v7010_v11  ;;  %v8106_v18 = vadd.f32 %v7870_v9, %v7253_v15  ;;  %v6161_v9 = vld [vmem:[%s23521_s3 + $0x128] sm:$0xff]  ;;  %v9998_v15 = vsel %vm9993_vm9, %v9995_v41, %v9997_v2  ;;  %v8646_v16 = vrot.slane %v8644_v3, 2  ;;  %v8649_v17 = vrot.slane %v8647_v4, 3 }
 0x47a   :  { %v6783_v20 = vpop.f32.mrf.mxu1  ;;  %v7873_v21 = vpop.f32.mrf.mxu0 }
 0x47b   :  { %8187 = vst.msk [vmem:[%s23521_s3 + $0xf0] sm:$0xff] %vm15_vm3, %v8106_v18  ;;  %v7011_v24 = vadd.f32 %v6783_v20, %v6157_v19  ;;  %v20357_v18 = vld [vmem:[%s23520_s0 + $0x28] sm:$0xff]  }
 0x47c   :  { %v7254_v29 = vld [vmem:[%s23521_s3 + $0xf8] sm:$0xff]  ;;  %v13236_v30 = vpop.f32.mrf.mxu1  ;;  %v13398_v31 = vpop.f32.mrf.mxu0 }
 0x47d   :  { %7092 = vst.msk [vmem:[%s23521_s3 + $0x108] sm:$0xff] %vm15_vm3, %v7011_v24  ;;  %v8107_v32 = vadd.f32 %v7873_v21, %v7254_v29  ;;  %v6162_v24 = vld [vmem:[%s23521_s3 + $0x130] sm:$0xff]  ;;  %v8650_v29 = vor.u32 %v8649_v17, %v8646_v16  ;;  %v9999_v30 = vrot.slane %v20357_v18, 3 }
 0x47e   :  { %v6788_v34 = vpop.f32.mrf.mxu1  ;;  %v7878_v35 = vpop.f32.mrf.mxu0  ;;  %13496 = vmatmul.mubr.msk.bf16.gmra.mxu0 %vm463_vm2, %v7588_v49  ;;  %13502 = vmatmul.mubr.msk.bf16.vlgmr.msra.gmra.mxu1 %vm463_vm2, %v8624_v25  ;;  %v8637_v49 = vrot.slane %v8635_v36, 2 }
 0x47f   :  { %8188 = vst.msk [vmem:[%s23521_s3 + $0xf8] sm:$0xff] %vm15_vm3, %v8107_v32  ;;  %v7012_v38 = vadd.f32 %v6788_v34, %v6158_v33  ;;  %13505 = vmatprep.mubr.msk.bf16.mxu1 %vm14207_vm1, %v14206_v0  ;;  %13667 = vmatprep.mubr.msk.bf16.mxu0 %vm14207_vm1, %v14206_v0 }
 0x480   :  { %v7255_v42 = vld [vmem:[%s23521_s3 + $0x100] sm:$0xff]  ;;  %v13239_v43 = vpop.f32.mrf.mxu1  ;;  %v13401_v44 = vpop.f32.mrf.mxu0  ;;  %v8641_v63 = vor.u32 %v8640_v50, %v8637_v49 }
 0x481   :  { %7093 = vst.msk [vmem:[%s23521_s3 + $0x110] sm:$0xff] %vm15_vm3, %v7012_v38  ;;  %v8108_v45 = vadd.f32 %v7878_v35, %v7255_v42  ;;  %v6163_v35 = vld [vmem:[%s23521_s3 + $0x138] sm:$0xff]  ;;  %v8655_v38 = vrot.slane %v8653_v27, 2  ;;  %v10000_v42 = vsel %vm9993_vm9, %v9997_v2, %v9999_v30  ;;  %v20399_v43 = vld [vmem:[%s23520_s0 + $0x30] sm:$0xff]   ;;  %v14133_v44 = vld [vmem:[%s23520_s0 + $0x40] sm:$0xff]  }
 0x482   :  { %v6791_v47 = vpop.f32.mrf.mxu1  ;;  %v7881_v48 = vpop.f32.mrf.mxu0  ;;  %v8642_v12 = vsel %vm8607_vm8, %v8632_v39, %v8641_v63  ;;  %v8658_v39 = vrot.slane %v8656_v28, 3  ;;  %v8651_v41 = vsel %vm8607_vm8, %v8641_v63, %v8650_v29  ;;  %v6164_v49 = vld [vmem:[%s23521_s3 + $0x140] sm:$0xff]  ;;  %v10001_v54 = vrot.slane %v20399_v43, 3  ;;  %v14135_v2 = vld [vmem:[%s23520_s0 + $0x48] sm:$0xff]  }
 0x483   :  { %8189 = vst.msk [vmem:[%s23521_s3 + $0x100] sm:$0xff] %vm15_vm3, %v8108_v45  ;;  %v7013_v51 = vadd.f32 %v6791_v47, %v6159_v46  ;;  %v8662_v55 = vshrl.u32 %v14133_v44, 16  ;;  %v8674_v16 = vshll.u32 %v14135_v2, 16 }
 0x484   :  { %v7256_v56 = vld [vmem:[%s23521_s3 + $0x108] sm:$0xff]  ;;  %v13240_v57 = vpop.f32.mrf.mxu1  ;;  %v13402_v58 = vpop.f32.mrf.mxu0  ;;  %v10002_v4 = vsel %vm9993_vm9, %v9999_v30, %v10001_v54 }
 0x485   :  { %7094 = vst.msk [vmem:[%s23521_s3 + $0x118] sm:$0xff] %vm15_vm3, %v7013_v51  ;;  %v8109_v59 = vadd.f32 %v7881_v48, %v7256_v56  ;;  %v8665_v56 = vshll.u32 %v14133_v44, 16 }
 0x486   :  { %v6796_v61 = vpop.f32.mrf.mxu1  ;;  %v7886_v62 = vpop.f32.mrf.mxu0  ;;  %13506 = vmatmul.mubr.msk.bf16.gmra.mxu1 %vm463_vm2, %v8633_v52  ;;  %13668 = vmatmul.mubr.msk.bf16.vlgmr.msra.gmra.mxu0 %vm463_vm2, %v9996_v53  ;;  %v8659_v52 = vor.u32 %v8658_v39, %v8655_v38  ;;  %v6168_v38 = vld [vmem:[%s23521_s3 + $0x160] sm:$0xff] }
 0x487   :  { %8190 = vst.msk [vmem:[%s23521_s3 + $0x108] sm:$0xff] %vm15_vm3, %v8109_v59  ;;  %v7014_v1 = vadd.f32 %v6796_v61, %v6160_v60  ;;  %13509 = vmatprep.mubr.msk.bf16.mxu1 %vm14207_vm1, %v14206_v0  ;;  %13671 = vmatprep.mubr.msk.bf16.mxu0 %vm14207_vm1, %v14206_v0  ;;  %v6165_v61 = vld [vmem:[%s23521_s3 + $0x148] sm:$0xff] }
 0x488   :  { %v7257_v5 = vld [vmem:[%s23521_s3 + $0x110] sm:$0xff]  ;;  %v13243_v6 = vpop.f32.mrf.mxu1  ;;  %v13405_v7 = vpop.f32.mrf.mxu0 }
 0x489   :  { %7095 = vst.msk [vmem:[%s23521_s3 + $0x120] sm:$0xff] %vm15_vm3, %v7014_v1  ;;  %v8110_v8 = vadd.f32 %v7886_v62, %v7257_v5  ;;  %v8660_v1 = vsel %vm8607_vm8, %v8650_v29, %v8659_v52  ;;  %v8664_v5 = vrot.slane %v8662_v55, 2  ;;  %v8667_v6 = vrot.slane %v8665_v56, 3  ;;  %v20447_v7 = vld [vmem:[%s23520_s0 + $0x38] sm:$0xff]  }
 0x48a   :  { %v6799_v10 = vpop.f32.mrf.mxu1  ;;  %v7889_v11 = vpop.f32.mrf.mxu0 }
 0x48b   :  { %8191 = vst.msk [vmem:[%s23521_s3 + $0x110] sm:$0xff] %vm15_vm3, %v8110_v8  ;;  %v7015_v14 = vadd.f32 %v6799_v10, %v6161_v9  ;;  %v8668_v18 = vor.u32 %v8667_v6, %v8664_v5 }
 0x48c   :  { %v7258_v19 = vld [vmem:[%s23521_s3 + $0x118] sm:$0xff]  ;;  %v13244_v20 = vpop.f32.mrf.mxu1  ;;  %v13406_v21 = vpop.f32.mrf.mxu0 }
 0x48d   :  { %7096 = vst.msk [vmem:[%s23521_s3 + $0x128] sm:$0xff] %vm15_vm3, %v7015_v14  ;;  %v8111_v22 = vadd.f32 %v7889_v11, %v7258_v19  ;;  %v10003_v19 = vrot.slane %v20447_v7, 3  ;;  %v8669_v30 = vsel %vm8607_vm8, %v8659_v52, %v8668_v18 }
 0x48e   :  { %v6804_v25 = vpop.f32.mrf.mxu1  ;;  %v7894_v26 = vpop.f32.mrf.mxu0  ;;  %13510 = vmatmul.mubr.msk.bf16.gmra.mxu1 %vm463_vm2, %v8642_v12  ;;  %13672 = vmatmul.mubr.msk.bf16.gmra.mxu0 %vm463_vm2, %v9998_v15  ;;  %v6166_v12 = vld [vmem:[%s23521_s3 + $0x150] sm:$0xff]  ;;  %v8671_v15 = vshrl.u32 %v14135_v2, 16 }
 0x48f   :  { %8192 = vst.msk [vmem:[%s23521_s3 + $0x118] sm:$0xff] %vm15_vm3, %v8111_v22  ;;  %v7016_v23 = vadd.f32 %v6804_v25, %v6162_v24  ;;  %13513 = vmatprep.mubr.msk.bf16.mxu1 %vm14207_vm1, %v14206_v0  ;;  %13675 = vmatprep.mubr.msk.bf16.mxu0 %vm14207_vm1, %v14206_v0  ;;  %v6167_v25 = vld [vmem:[%s23521_s3 + $0x158] sm:$0xff] }
 0x490   :  { %v7259_v31 = vld [vmem:[%s23521_s3 + $0x120] sm:$0xff]  ;;  %v13247_v32 = vpop.f32.mrf.mxu1  ;;  %v13409_v33 = vpop.f32.mrf.mxu0  ;;  %v8673_v28 = vrot.slane %v8671_v15, 2 }
 0x491   :  { %7097 = vst.msk [vmem:[%s23521_s3 + $0x130] sm:$0xff] %vm15_vm3, %v7016_v23  ;;  %v8112_v34 = vadd.f32 %v7894_v26, %v7259_v31  ;;  %v8676_v23 = vrot.slane %v8674_v16, 3  ;;  %v10004_v31 = vsel %vm9993_vm9, %v10001_v54, %v10003_v19  ;;  %v20489_v32 = vld [vmem:[%s23520_s0 + $0x40] sm:$0xff]   ;;  %v14137_v33 = vld [vmem:[%s23520_s0 + $0x50] sm:$0xff]   ;;  %v14139_v54 = vld [vmem:[%s23520_s0 + $0x58] sm:$0xff]  }
 0x492   :  { %v6807_v36 = vpop.f32.mrf.mxu1  ;;  %v7897_v37 = vpop.f32.mrf.mxu0  ;;  %v10005_v43 = vrot.slane %v20489_v32, 3  ;;  %v8680_v44 = vshrl.u32 %v14137_v33, 16  ;;  %v8692_v5 = vshll.u32 %v14139_v54, 16 }
 0x493   :  { %8193 = vst.msk [vmem:[%s23521_s3 + $0x120] sm:$0xff] %vm15_vm3, %v8112_v34  ;;  %v7017_v40 = vadd.f32 %v6807_v36, %v6163_v35 }
 0x494   :  { %v7260_v45 = vld [vmem:[%s23521_s3 + $0x128] sm:$0xff]  ;;  %v13248_v46 = vpop.f32.mrf.mxu1  ;;  %v13410_v47 = vpop.f32.mrf.mxu0  ;;  %v10006_v56 = vsel %vm9993_vm9, %v10003_v19, %v10005_v43 }
 0x495   :  { %7098 = vst.msk [vmem:[%s23521_s3 + $0x138] sm:$0xff] %vm15_vm3, %v7017_v40  ;;  %v8113_v48 = vadd.f32 %v7897_v37, %v7260_v45  ;;  %v8683_v45 = vshll.u32 %v14137_v33, 16 }
 0x496   :  { %v6812_v50 = vpop.f32.mrf.mxu1  ;;  %v7902_v51 = vpop.f32.mrf.mxu0  ;;  %13514 = vmatmul.mubr.msk.bf16.gmra.mxu1 %vm463_vm2, %v8651_v41  ;;  %13676 = vmatmul.mubr.msk.bf16.gmra.mxu0 %vm463_vm2, %v10000_v42  ;;  %v8677_v41 = vor.u32 %v8676_v23, %v8673_v28  ;;  %v6172_v28 = vld [vmem:[%s23521_s3 + $0x180] sm:$0xff] }
 0x497   :  { %8194 = vst.msk [vmem:[%s23521_s3 + $0x128] sm:$0xff] %vm15_vm3, %v8113_v48  ;;  %v7018_v53 = vadd.f32 %v6812_v50, %v6164_v49  ;;  %13517 = vmatprep.mubr.msk.bf16.mxu1 %vm14207_vm1, %v14206_v0  ;;  %13679 = vmatprep.mubr.msk.bf16.mxu0 %vm14207_vm1, %v14206_v0  ;;  %v6169_v50 = vld [vmem:[%s23521_s3 + $0x168] sm:$0xff] }
 0x498   :  { %v7261_v57 = vld [vmem:[%s23521_s3 + $0x130] sm:$0xff]  ;;  %v13251_v58 = vpop.f32.mrf.mxu1  ;;  %v13413_v59 = vpop.f32.mrf.mxu0 }
 0x499   :  { %7099 = vst.msk [vmem:[%s23521_s3 + $0x140] sm:$0xff] %vm15_vm3, %v7018_v53  ;;  %v8114_v60 = vadd.f32 %v7902_v51, %v7261_v57  ;;  %v8678_v53 = vsel %vm8607_vm8, %v8668_v18, %v8677_v41  ;;  %v8682_v57 = vrot.slane %v8680_v44, 2  ;;  %v8685_v58 = vrot.slane %v8683_v45, 3  ;;  %v20537_v59 = vld [vmem:[%s23520_s0 + $0x48] sm:$0xff]  }
 0x49a   :  { %v6815_v62 = vpop.f32.mrf.mxu1  ;;  %v7905_v63 = vpop.f32.mrf.mxu0 }
 0x49b   :  { %8195 = vst.msk [vmem:[%s23521_s3 + $0x130] sm:$0xff] %vm15_vm3, %v8114_v60  ;;  %v7019_v3 = vadd.f32 %v6815_v62, %v6165_v61  ;;  %v8686_v7 = vor.u32 %v8685_v58, %v8682_v57 }
 0x49c   :  { %v7262_v8 = vld [vmem:[%s23521_s3 + $0x138] sm:$0xff]  ;;  %v13252_v9 = vpop.f32.mrf.mxu1  ;;  %v13414_v10 = vpop.f32.mrf.mxu0 }
 0x49d   :  { %7100 = vst.msk [vmem:[%s23521_s3 + $0x148] sm:$0xff] %vm15_vm3, %v7019_v3  ;;  %v8115_v11 = vadd.f32 %v7905_v63, %v7262_v8  ;;  %v10007_v8 = vrot.slane %v20537_v59, 3  ;;  %v8687_v19 = vsel %vm8607_vm8, %v8677_v41, %v8686_v7 }
 0x49e   :  { %v6820_v13 = vpop.f32.mrf.mxu1  ;;  %v7910_v14 = vpop.f32.mrf.mxu0  ;;  %13518 = vmatmul.mubr.msk.bf16.gmra.mxu1 %vm463_vm2, %v8660_v1  ;;  %13680 = vmatmul.mubr.msk.bf16.gmra.mxu0 %vm463_vm2, %v10002_v4  ;;  %v6170_v1 = vld [vmem:[%s23521_s3 + $0x170] sm:$0xff]  ;;  %v8689_v4 = vshrl.u32 %v14139_v54, 16 }
 0x49f   :  { %8196 = vst.msk [vmem:[%s23521_s3 + $0x138] sm:$0xff] %vm15_vm3, %v8115_v11  ;;  %v7020_v17 = vadd.f32 %v6820_v13, %v6166_v12  ;;  %13521 = vmatprep.mubr.msk.bf16.mxu1 %vm14207_vm1, %v14206_v0  ;;  %13683 = vmatprep.mubr.msk.bf16.mxu0 %vm14207_vm1, %v14206_v0  ;;  %v6171_v13 = vld [vmem:[%s23521_s3 + $0x178] sm:$0xff] }
 0x4a0   :  { %v7263_v20 = vld [vmem:[%s23521_s3 + $0x140] sm:$0xff]  ;;  %v13255_v21 = vpop.f32.mrf.mxu1  ;;  %v13417_v22 = vpop.f32.mrf.mxu0  ;;  %v8691_v16 = vrot.slane %v8689_v4, 2 }
 0x4a1   :  { %7101 = vst.msk [vmem:[%s23521_s3 + $0x150] sm:$0xff] %vm15_vm3, %v7020_v17  ;;  %v8116_v24 = vadd.f32 %v7910_v14, %v7263_v20  ;;  %v8694_v17 = vrot.slane %v8692_v5, 3  ;;  %v10008_v20 = vsel %vm9993_vm9, %v10005_v43, %v10007_v8  ;;  %v20579_v21 = vld [vmem:[%s23520_s0 + $0x50] sm:$0xff]   ;;  %v14141_v22 = vld [vmem:[%s23520_s0 + $0x60] sm:$0xff]   ;;  %v14143_v43 = vld [vmem:[%s23520_s0 + $0x68] sm:$0xff]  }
 0x4a2   :  { %v6823_v26 = vpop.f32.mrf.mxu1  ;;  %v7913_v27 = vpop.f32.mrf.mxu0  ;;  %v10009_v32 = vrot.slane %v20579_v21, 3  ;;  %v8698_v33 = vshrl.u32 %v14141_v22, 16  ;;  %v8710_v57 = vshll.u32 %v14143_v43, 16 }
 0x4a3   :  { %8197 = vst.msk [vmem:[%s23521_s3 + $0x140] sm:$0xff] %vm15_vm3, %v8116_v24  ;;  %v7021_v29 = vadd.f32 %v6823_v26, %v6167_v25 }
 0x4a4   :  { %v7264_v34 = vld [vmem:[%s23521_s3 + $0x148] sm:$0xff]  ;;  %v13256_v35 = vpop.f32.mrf.mxu1  ;;  %v13418_v36 = vpop.f32.mrf.mxu0  ;;  %v10010_v45 = vsel %vm9993_vm9, %v10007_v8, %v10009_v32 }
 0x4a5   :  { %7102 = vst.msk [vmem:[%s23521_s3 + $0x158] sm:$0xff] %vm15_vm3, %v7021_v29  ;;  %v8117_v37 = vadd.f32 %v7913_v27, %v7264_v34  ;;  %v8701_v34 = vshll.u32 %v14141_v22, 16 }
 0x4a6   :  { %v6828_v39 = vpop.f32.mrf.mxu1  ;;  %v7918_v40 = vpop.f32.mrf.mxu0  ;;  %13522 = vmatmul.mubr.msk.bf16.gmra.mxu1 %vm463_vm2, %v8669_v30  ;;  %13684 = vmatmul.mubr.msk.bf16.gmra.mxu0 %vm463_vm2, %v10004_v31  ;;  %v8695_v30 = vor.u32 %v8694_v17, %v8691_v16  ;;  %v6176_v16 = vld [vmem:[%s23521_s3 + $0x1a0] sm:$0xff] }
 0x4a7   :  { %8198 = vst.msk [vmem:[%s23521_s3 + $0x148] sm:$0xff] %vm15_vm3, %v8117_v37  ;;  %v7022_v42 = vadd.f32 %v6828_v39, %v6168_v38  ;;  %13525 = vmatprep.mubr.msk.bf16.mxu1 %vm14207_vm1, %v14206_v0  ;;  %13687 = vmatprep.mubr.msk.bf16.mxu0 %vm14207_vm1, %v14206_v0  ;;  %v6173_v39 = vld [vmem:[%s23521_s3 + $0x188] sm:$0xff] }
 0x4a8   :  { %v7265_v46 = vld [vmem:[%s23521_s3 + $0x150] sm:$0xff]  ;;  %v13259_v47 = vpop.f32.mrf.mxu1  ;;  %v13421_v48 = vpop.f32.mrf.mxu0 }
 0x4a9   :  { %7103 = vst.msk [vmem:[%s23521_s3 + $0x160] sm:$0xff] %vm15_vm3, %v7022_v42  ;;  %v8118_v49 = vadd.f32 %v7918_v40, %v7265_v46  ;;  %v8696_v42 = vsel %vm8607_vm8, %v8686_v7, %v8695_v30  ;;  %v8700_v46 = vrot.slane %v8698_v33, 2  ;;  %v8703_v47 = vrot.slane %v8701_v34, 3  ;;  %v20627_v48 = vld [vmem:[%s23520_s0 + $0x58] sm:$0xff]  }
 0x4aa   :  { %v6831_v51 = vpop.f32.mrf.mxu1  ;;  %v7921_v52 = vpop.f32.mrf.mxu0 }
 0x4ab   :  { %8199 = vst.msk [vmem:[%s23521_s3 + $0x150] sm:$0xff] %vm15_vm3, %v8118_v49  ;;  %v7023_v55 = vadd.f32 %v6831_v51, %v6169_v50  ;;  %v8704_v59 = vor.u32 %v8703_v47, %v8700_v46 }
 0x4ac   :  { %v7266_v60 = vld [vmem:[%s23521_s3 + $0x158] sm:$0xff]  ;;  %v13260_v61 = vpop.f32.mrf.mxu1  ;;  %v13422_v62 = vpop.f32.mrf.mxu0 }
 0x4ad   :  { %7104 = vst.msk [vmem:[%s23521_s3 + $0x168] sm:$0xff] %vm15_vm3, %v7023_v55  ;;  %v8119_v63 = vadd.f32 %v7921_v52, %v7266_v60  ;;  %v10011_v60 = vrot.slane %v20627_v48, 3  ;;  %v8705_v8 = vsel %vm8607_vm8, %v8695_v30, %v8704_v59 }
 0x4ae   :  { %v6836_v2 = vpop.f32.mrf.mxu1  ;;  %v7926_v3 = vpop.f32.mrf.mxu0  ;;  %13526 = vmatmul.mubr.msk.bf16.gmra.mxu1 %vm463_vm2, %v8678_v53  ;;  %13688 = vmatmul.mubr.msk.bf16.gmra.mxu0 %vm463_vm2, %v10006_v56  ;;  %v6174_v53 = vld [vmem:[%s23521_s3 + $0x190] sm:$0xff]  ;;  %v8707_v56 = vshrl.u32 %v14143_v43, 16 }
 0x4af   :  { %8200 = vst.msk [vmem:[%s23521_s3 + $0x158] sm:$0xff] %vm15_vm3, %v8119_v63  ;;  %v7024_v6 = vadd.f32 %v6836_v2, %v6170_v1  ;;  %13529 = vmatprep.mubr.msk.bf16.mxu1 %vm14207_vm1, %v14206_v0  ;;  %13691 = vmatprep.mubr.msk.bf16.mxu0 %vm14207_vm1, %v14206_v0  ;;  %v6175_v2 = vld [vmem:[%s23521_s3 + $0x198] sm:$0xff] }
 0x4b0   :  { %v7267_v9 = vld [vmem:[%s23521_s3 + $0x160] sm:$0xff]  ;;  %v13263_v10 = vpop.f32.mrf.mxu1  ;;  %v13425_v11 = vpop.f32.mrf.mxu0  ;;  %v8709_v5 = vrot.slane %v8707_v56, 2 }
 0x4b1   :  { %7105 = vst.msk [vmem:[%s23521_s3 + $0x170] sm:$0xff] %vm15_vm3, %v7024_v6  ;;  %v8120_v12 = vadd.f32 %v7926_v3, %v7267_v9  ;;  %v8712_v6 = vrot.slane %v8710_v57, 3  ;;  %v10012_v9 = vsel %vm9993_vm9, %v10009_v32, %v10011_v60  ;;  %v20669_v10 = vld [vmem:[%s23520_s0 + $0x60] sm:$0xff]   ;;  %v14145_v11 = vld [vmem:[%s23520_s0 + $0x70] sm:$0xff]   ;;  %v14147_v32 = vld [vmem:[%s23520_s0 + $0x78] sm:$0xff]  }
 0x4b2   :  { %v6839_v14 = vpop.f32.mrf.mxu1  ;;  %v7929_v15 = vpop.f32.mrf.mxu0  ;;  %v10013_v21 = vrot.slane %v20669_v10, 3  ;;  %v8716_v22 = vshrl.u32 %v14145_v11, 16  ;;  %v8728_v46 = vshll.u32 %v14147_v32, 16 }
 0x4b3   :  { %8201 = vst.msk [vmem:[%s23521_s3 + $0x160] sm:$0xff] %vm15_vm3, %v8120_v12  ;;  %v7025_v18 = vadd.f32 %v6839_v14, %v6171_v13 }
 0x4b4   :  { %v7268_v24 = vld [vmem:[%s23521_s3 + $0x168] sm:$0xff]  ;;  %v13264_v25 = vpop.f32.mrf.mxu1  ;;  %v13426_v26 = vpop.f32.mrf.mxu0  ;;  %v10014_v34 = vsel %vm9993_vm9, %v10011_v60, %v10013_v21 }
 0x4b5   :  { %7106 = vst.msk [vmem:[%s23521_s3 + $0x178] sm:$0xff] %vm15_vm3, %v7025_v18  ;;  %v8121_v27 = vadd.f32 %v7929_v15, %v7268_v24  ;;  %v8719_v24 = vshll.u32 %v14145_v11, 16 }
 0x4b6   :  { %v6844_v23 = vpop.f32.mrf.mxu1  ;;  %v7934_v29 = vpop.f32.mrf.mxu0  ;;  %13530 = vmatmul.mubr.msk.bf16.gmra.mxu1 %vm463_vm2, %v8687_v19  ;;  %13692 = vmatmul.mubr.msk.bf16.gmra.mxu0 %vm463_vm2, %v10008_v20  ;;  %v8713_v19 = vor.u32 %v8712_v6, %v8709_v5  ;;  %v6180_v5 = vld [vmem:[%s23521_s3 + $0x1c0] sm:$0xff] }
 0x4b7   :  { %8202 = vst.msk [vmem:[%s23521_s3 + $0x168] sm:$0xff] %vm15_vm3, %v8121_v27  ;;  %v7026_v31 = vadd.f32 %v6844_v23, %v6172_v28  ;;  %13533 = vmatprep.mubr.msk.bf16.mxu1 %vm14207_vm1, %v14206_v0  ;;  %13695 = vmatprep.mubr.msk.bf16.mxu0 %vm14207_vm1, %v14206_v0  ;;  %v6177_v23 = vld [vmem:[%s23521_s3 + $0x1a8] sm:$0xff] }
 0x4b8   :  { %v7269_v35 = vld [vmem:[%s23521_s3 + $0x170] sm:$0xff]  ;;  %v13267_v36 = vpop.f32.mrf.mxu1  ;;  %v13429_v37 = vpop.f32.mrf.mxu0 }
 0x4b9   :  { %7107 = vst.msk [vmem:[%s23521_s3 + $0x180] sm:$0xff] %vm15_vm3, %v7026_v31  ;;  %v8122_v38 = vadd.f32 %v7934_v29, %v7269_v35  ;;  %v8714_v31 = vsel %vm8607_vm8, %v8704_v59, %v8713_v19  ;;  %v8718_v35 = vrot.slane %v8716_v22, 2  ;;  %v8721_v36 = vrot.slane %v8719_v24, 3  ;;  %v20717_v37 = vld [vmem:[%s23520_s0 + $0x68] sm:$0xff]  }
 0x4ba   :  { %v6847_v40 = vpop.f32.mrf.mxu1  ;;  %v7937_v41 = vpop.f32.mrf.mxu0 }
 0x4bb   :  { %8203 = vst.msk [vmem:[%s23521_s3 + $0x170] sm:$0xff] %vm15_vm3, %v8122_v38  ;;  %v7027_v44 = vadd.f32 %v6847_v40, %v6173_v39  ;;  %v8722_v48 = vor.u32 %v8721_v36, %v8718_v35 }
 0x4bc   :  { %v7270_v49 = vld [vmem:[%s23521_s3 + $0x178] sm:$0xff]  ;;  %v13268_v50 = vpop.f32.mrf.mxu1  ;;  %v13430_v51 = vpop.f32.mrf.mxu0 }
 0x4bd   :  { %7108 = vst.msk [vmem:[%s23521_s3 + $0x188] sm:$0xff] %vm15_vm3, %v7027_v44  ;;  %v8123_v52 = vadd.f32 %v7937_v41, %v7270_v49  ;;  %v10015_v49 = vrot.slane %v20717_v37, 3  ;;  %v8723_v60 = vsel %vm8607_vm8, %v8713_v19, %v8722_v48 }
 0x4be   :  { %v6852_v54 = vpop.f32.mrf.mxu1  ;;  %v7942_v55 = vpop.f32.mrf.mxu0  ;;  %13534 = vmatmul.mubr.msk.bf16.gmra.mxu1 %vm463_vm2, %v8696_v42  ;;  %13696 = vmatmul.mubr.msk.bf16.gmra.mxu0 %vm463_vm2, %v10010_v45  ;;  %v6178_v42 = vld [vmem:[%s23521_s3 + $0x1b0] sm:$0xff]  ;;  %v8725_v45 = vshrl.u32 %v14147_v32, 16 }
 0x4bf   :  { %8204 = vst.msk [vmem:[%s23521_s3 + $0x178] sm:$0xff] %vm15_vm3, %v8123_v52  ;;  %v7028_v58 = vadd.f32 %v6852_v54, %v6174_v53  ;;  %13537 = vmatprep.mubr.msk.bf16.mxu1 %vm14207_vm1, %v14206_v0  ;;  %13699 = vmatprep.mubr.msk.bf16.mxu0 %vm14207_vm1, %v14206_v0  ;;  %v6179_v54 = vld [vmem:[%s23521_s3 + $0x1b8] sm:$0xff] }
 0x4c0   :  { %v7271_v61 = vld [vmem:[%s23521_s3 + $0x180] sm:$0xff]  ;;  %v13271_v62 = vpop.f32.mrf.mxu1  ;;  %v13433_v63 = vpop.f32.mrf.mxu0  ;;  %v8727_v57 = vrot.slane %v8725_v45, 2 }
 0x4c1   :  { %7109 = vst.msk [vmem:[%s23521_s3 + $0x190] sm:$0xff] %vm15_vm3, %v7028_v58  ;;  %v8124_v1 = vadd.f32 %v7942_v55, %v7271_v61  ;;  %v8730_v58 = vrot.slane %v8728_v46, 3  ;;  %v10016_v61 = vsel %vm9993_vm9, %v10013_v21, %v10015_v49  ;;  %v20759_v62 = vld [vmem:[%s23520_s0 + $0x70] sm:$0xff]   ;;  %v14149_v63 = vld [vmem:[%s23520_s0 + $0x80] sm:$0xff]   ;;  %v14151_v21 = vld [vmem:[%s23520_s0 + $0x88] sm:$0xff]  }
 0x4c2   :  { %v6855_v3 = vpop.f32.mrf.mxu1  ;;  %v7945_v4 = vpop.f32.mrf.mxu0  ;;  %v10017_v10 = vrot.slane %v20759_v62, 3  ;;  %v8734_v11 = vshrl.u32 %v14149_v63, 16  ;;  %v8746_v35 = vshll.u32 %v14151_v21, 16 }
 0x4c3   :  { %8205 = vst.msk [vmem:[%s23521_s3 + $0x180] sm:$0xff] %vm15_vm3, %v8124_v1  ;;  %v7029_v7 = vadd.f32 %v6855_v3, %v6175_v2 }
 0x4c4   :  { %v7272_v12 = vld [vmem:[%s23521_s3 + $0x188] sm:$0xff]  ;;  %v13272_v13 = vpop.f32.mrf.mxu1  ;;  %v13434_v14 = vpop.f32.mrf.mxu0  ;;  %v10018_v24 = vsel %vm9993_vm9, %v10015_v49, %v10017_v10 }
 0x4c5   :  { %7110 = vst.msk [vmem:[%s23521_s3 + $0x198] sm:$0xff] %vm15_vm3, %v7029_v7  ;;  %v8125_v15 = vadd.f32 %v7945_v4, %v7272_v12  ;;  %v8737_v12 = vshll.u32 %v14149_v63, 16 }
 0x4c6   :  { %v6860_v17 = vpop.f32.mrf.mxu1  ;;  %v7950_v18 = vpop.f32.mrf.mxu0  ;;  %13538 = vmatmul.mubr.msk.bf16.gmra.mxu1 %vm463_vm2, %v8705_v8  ;;  %13700 = vmatmul.mubr.msk.bf16.gmra.mxu0 %vm463_vm2, %v10012_v9  ;;  %v8731_v8 = vor.u32 %v8730_v58, %v8727_v57  ;;  %v6184_v57 = vld [vmem:[%s23521_s3 + $0x1e0] sm:$0xff] }
 0x4c7   :  { %8206 = vst.msk [vmem:[%s23521_s3 + $0x188] sm:$0xff] %vm15_vm3, %v8125_v15  ;;  %v7030_v20 = vadd.f32 %v6860_v17, %v6176_v16  ;;  %13541 = vmatprep.mubr.msk.bf16.mxu1 %vm14207_vm1, %v14206_v0  ;;  %13703 = vmatprep.mubr.msk.bf16.mxu0 %vm14207_vm1, %v14206_v0  ;;  %v6181_v17 = vld [vmem:[%s23521_s3 + $0x1c8] sm:$0xff] }
 0x4c8   :  { %v7273_v25 = vld [vmem:[%s23521_s3 + $0x190] sm:$0xff]  ;;  %v13275_v26 = vpop.f32.mrf.mxu1  ;;  %v13437_v27 = vpop.f32.mrf.mxu0 }
 0x4c9   :  { %7111 = vst.msk [vmem:[%s23521_s3 + $0x1a0] sm:$0xff] %vm15_vm3, %v7030_v20  ;;  %v8126_v28 = vadd.f32 %v7950_v18, %v7273_v25  ;;  %v8732_v20 = vsel %vm8607_vm8, %v8722_v48, %v8731_v8  ;;  %v8736_v25 = vrot.slane %v8734_v11, 2  ;;  %v8739_v26 = vrot.slane %v8737_v12, 3  ;;  %v20807_v27 = vld [vmem:[%s23520_s0 + $0x78] sm:$0xff]  }
 0x4ca   :  { %v6863_v29 = vpop.f32.mrf.mxu1  ;;  %v7953_v30 = vpop.f32.mrf.mxu0 }
 0x4cb   :  { %8207 = vst.msk [vmem:[%s23521_s3 + $0x190] sm:$0xff] %vm15_vm3, %v8126_v28  ;;  %v7031_v33 = vadd.f32 %v6863_v29, %v6177_v23  ;;  %v8740_v37 = vor.u32 %v8739_v26, %v8736_v25 }
 0x4cc   :  { %v7274_v38 = vld [vmem:[%s23521_s3 + $0x198] sm:$0xff]  ;;  %v13276_v39 = vpop.f32.mrf.mxu1  ;;  %v13438_v40 = vpop.f32.mrf.mxu0 }
 0x4cd   :  { %7112 = vst.msk [vmem:[%s23521_s3 + $0x1a8] sm:$0xff] %vm15_vm3, %v7031_v33  ;;  %v8127_v41 = vadd.f32 %v7953_v30, %v7274_v38  ;;  %v10019_v38 = vrot.slane %v20807_v27, 3  ;;  %v8741_v49 = vsel %vm8607_vm8, %v8731_v8, %v8740_v37 }
 0x4ce   :  { %v6868_v43 = vpop.f32.mrf.mxu1  ;;  %v7958_v44 = vpop.f32.mrf.mxu0  ;;  %13542 = vmatmul.mubr.msk.bf16.gmra.mxu1 %vm463_vm2, %v8714_v31  ;;  %13704 = vmatmul.mubr.msk.bf16.gmra.mxu0 %vm463_vm2, %v10014_v34  ;;  %v6182_v31 = vld [vmem:[%s23521_s3 + $0x1d0] sm:$0xff]  ;;  %v8743_v34 = vshrl.u32 %v14151_v21, 16 }
 0x4cf   :  { %8208 = vst.msk [vmem:[%s23521_s3 + $0x198] sm:$0xff] %vm15_vm3, %v8127_v41  ;;  %v7032_v47 = vadd.f32 %v6868_v43, %v6178_v42  ;;  %13545 = vmatprep.mubr.msk.bf16.mxu1 %vm14207_vm1, %v14206_v0  ;;  %13707 = vmatprep.mubr.msk.bf16.mxu0 %vm14207_vm1, %v14206_v0  ;;  %v6183_v43 = vld [vmem:[%s23521_s3 + $0x1d8] sm:$0xff] }
 0x4d0   :  { %v7275_v50 = vld [vmem:[%s23521_s3 + $0x1a0] sm:$0xff]  ;;  %v13279_v51 = vpop.f32.mrf.mxu1  ;;  %v13441_v52 = vpop.f32.mrf.mxu0  ;;  %v8745_v46 = vrot.slane %v8743_v34, 2 }
 0x4d1   :  { %7113 = vst.msk [vmem:[%s23521_s3 + $0x1b0] sm:$0xff] %vm15_vm3, %v7032_v47  ;;  %v8128_v53 = vadd.f32 %v7958_v44, %v7275_v50  ;;  %v8748_v47 = vrot.slane %v8746_v35, 3  ;;  %v10020_v50 = vsel %vm9993_vm9, %v10017_v10, %v10019_v38  ;;  %v20849_v51 = vld [vmem:[%s23520_s0 + $0x80] sm:$0xff]   ;;  %v14153_v52 = vld [vmem:[%s23520_s0 + $0x90] sm:$0xff]   ;;  %v14155_v10 = vld [vmem:[%s23520_s0 + $0x98] sm:$0xff]  }
 0x4d2   :  { %v6871_v55 = vpop.f32.mrf.mxu1  ;;  %v7961_v56 = vpop.f32.mrf.mxu0  ;;  %v10021_v62 = vrot.slane %v20849_v51, 3  ;;  %v8752_v63 = vshrl.u32 %v14153_v52, 16  ;;  %v8764_v25 = vshll.u32 %v14155_v10, 16 }
 0x4d3   :  { %8209 = vst.msk [vmem:[%s23521_s3 + $0x1a0] sm:$0xff] %vm15_vm3, %v8128_v53  ;;  %v7033_v59 = vadd.f32 %v6871_v55, %v6179_v54 }
 0x4d4   :  { %v7276_v1 = vld [vmem:[%s23521_s3 + $0x1a8] sm:$0xff]  ;;  %v13280_v2 = vpop.f32.mrf.mxu1  ;;  %v13442_v3 = vpop.f32.mrf.mxu0  ;;  %v10022_v12 = vsel %vm9993_vm9, %v10019_v38, %v10021_v62 }
 0x4d5   :  { %7114 = vst.msk [vmem:[%s23521_s3 + $0x1b8] sm:$0xff] %vm15_vm3, %v7033_v59  ;;  %v8129_v4 = vadd.f32 %v7961_v56, %v7276_v1  ;;  %v8755_v1 = vshll.u32 %v14153_v52, 16 }
 0x4d6   :  { %v6876_v6 = vpop.f32.mrf.mxu1  ;;  %v7966_v7 = vpop.f32.mrf.mxu0  ;;  %13546 = vmatmul.mubr.msk.bf16.gmra.mxu1 %vm463_vm2, %v8723_v60  ;;  %13708 = vmatmul.mubr.msk.bf16.gmra.mxu0 %vm463_vm2, %v10016_v61  ;;  %v8749_v60 = vor.u32 %v8748_v47, %v8745_v46  ;;  %v6188_v46 = vld [vmem:[%s23521_s3 + $0x200] sm:$0xff] }
 0x4d7   :  { %8210 = vst.msk [vmem:[%s23521_s3 + $0x1a8] sm:$0xff] %vm15_vm3, %v8129_v4  ;;  %v7034_v9 = vadd.f32 %v6876_v6, %v6180_v5  ;;  %13549 = vmatprep.mubr.msk.bf16.mxu1 %vm14207_vm1, %v14206_v0  ;;  %13711 = vmatprep.mubr.msk.bf16.mxu0 %vm14207_vm1, %v14206_v0  ;;  %v6185_v6 = vld [vmem:[%s23521_s3 + $0x1e8] sm:$0xff] }
 0x4d8   :  { %v7277_v13 = vld [vmem:[%s23521_s3 + $0x1b0] sm:$0xff]  ;;  %v13283_v14 = vpop.f32.mrf.mxu1  ;;  %v13445_v15 = vpop.f32.mrf.mxu0 }
 0x4d9   :  { %7115 = vst.msk [vmem:[%s23521_s3 + $0x1c0] sm:$0xff] %vm15_vm3, %v7034_v9  ;;  %v8130_v16 = vadd.f32 %v7966_v7, %v7277_v13  ;;  %v8750_v9 = vsel %vm8607_vm8, %v8740_v37, %v8749_v60  ;;  %v8754_v13 = vrot.slane %v8752_v63, 2  ;;  %v8757_v14 = vrot.slane %v8755_v1, 3  ;;  %v20897_v15 = vld [vmem:[%s23520_s0 + $0x88] sm:$0xff]  }
 0x4da   :  { %v6879_v18 = vpop.f32.mrf.mxu1  ;;  %v7969_v19 = vpop.f32.mrf.mxu0 }
 0x4db   :  { %8211 = vst.msk [vmem:[%s23521_s3 + $0x1b0] sm:$0xff] %vm15_vm3, %v8130_v16  ;;  %v7035_v22 = vadd.f32 %v6879_v18, %v6181_v17  ;;  %v8758_v27 = vor.u32 %v8757_v14, %v8754_v13 }
 0x4dc   :  { %v7278_v28 = vld [vmem:[%s23521_s3 + $0x1b8] sm:$0xff]  ;;  %v13284_v23 = vpop.f32.mrf.mxu1  ;;  %v13446_v29 = vpop.f32.mrf.mxu0 }
 0x4dd   :  { %7116 = vst.msk [vmem:[%s23521_s3 + $0x1c8] sm:$0xff] %vm15_vm3, %v7035_v22  ;;  %v8131_v30 = vadd.f32 %v7969_v19, %v7278_v28  ;;  %v10023_v28 = vrot.slane %v20897_v15, 3  ;;  %v8759_v38 = vsel %vm8607_vm8, %v8749_v60, %v8758_v27 }
 0x4de   :  { %v6884_v32 = vpop.f32.mrf.mxu1  ;;  %v7974_v33 = vpop.f32.mrf.mxu0  ;;  %13550 = vmatmul.mubr.msk.bf16.gmra.mxu1 %vm463_vm2, %v8732_v20  ;;  %13712 = vmatmul.mubr.msk.bf16.gmra.mxu0 %vm463_vm2, %v10018_v24  ;;  %v6186_v20 = vld [vmem:[%s23521_s3 + $0x1f0] sm:$0xff]  ;;  %v8761_v24 = vshrl.u32 %v14155_v10, 16 }
 0x4df   :  { %8212 = vst.msk [vmem:[%s23521_s3 + $0x1b8] sm:$0xff] %vm15_vm3, %v8131_v30  ;;  %v7036_v36 = vadd.f32 %v6884_v32, %v6182_v31  ;;  %13553 = vmatprep.mubr.msk.bf16.mxu1 %vm14207_vm1, %v14206_v0  ;;  %13715 = vmatprep.mubr.msk.bf16.mxu0 %vm14207_vm1, %v14206_v0  ;;  %v6187_v32 = vld [vmem:[%s23521_s3 + $0x1f8] sm:$0xff] }
 0x4e0   :  { %v7279_v39 = vld [vmem:[%s23521_s3 + $0x1c0] sm:$0xff]  ;;  %v13287_v40 = vpop.f32.mrf.mxu1  ;;  %v13449_v41 = vpop.f32.mrf.mxu0  ;;  %v8763_v35 = vrot.slane %v8761_v24, 2 }
 0x4e1   :  { %7117 = vst.msk [vmem:[%s23521_s3 + $0x1d0] sm:$0xff] %vm15_vm3, %v7036_v36  ;;  %v8132_v42 = vadd.f32 %v7974_v33, %v7279_v39  ;;  %v8766_v36 = vrot.slane %v8764_v25, 3  ;;  %v10024_v39 = vsel %vm9993_vm9, %v10021_v62, %v10023_v28  ;;  %v20939_v40 = vld [vmem:[%s23520_s0 + $0x90] sm:$0xff]   ;;  %v14157_v41 = vld [vmem:[%s23520_s0 + $0xa0] sm:$0xff]   ;;  %v14159_v62 = vld [vmem:[%s23520_s0 + $0xa8] sm:$0xff]  }
 0x4e2   :  { %v6887_v44 = vpop.f32.mrf.mxu1  ;;  %v7977_v45 = vpop.f32.mrf.mxu0  ;;  %v10025_v51 = vrot.slane %v20939_v40, 3  ;;  %v8770_v52 = vshrl.u32 %v14157_v41, 16  ;;  %v8782_v13 = vshll.u32 %v14159_v62, 16 }
 0x4e3   :  { %8213 = vst.msk [vmem:[%s23521_s3 + $0x1c0] sm:$0xff] %vm15_vm3, %v8132_v42  ;;  %v7037_v48 = vadd.f32 %v6887_v44, %v6183_v43 }
 0x4e4   :  { %v7280_v53 = vld [vmem:[%s23521_s3 + $0x1c8] sm:$0xff]  ;;  %v13288_v54 = vpop.f32.mrf.mxu1  ;;  %v13450_v55 = vpop.f32.mrf.mxu0  ;;  %v10026_v1 = vsel %vm9993_vm9, %v10023_v28, %v10025_v51 }
 0x4e5   :  { %7118 = vst.msk [vmem:[%s23521_s3 + $0x1d8] sm:$0xff] %vm15_vm3, %v7037_v48  ;;  %v8133_v56 = vadd.f32 %v7977_v45, %v7280_v53  ;;  %v8773_v53 = vshll.u32 %v14157_v41, 16 }
 0x4e6   :  { %v6892_v58 = vpop.f32.mrf.mxu1  ;;  %v7982_v59 = vpop.f32.mrf.mxu0  ;;  %13554 = vmatmul.mubr.msk.bf16.gmra.mxu1 %vm463_vm2, %v8741_v49  ;;  %13716 = vmatmul.mubr.msk.bf16.gmra.mxu0 %vm463_vm2, %v10020_v50  ;;  %v8767_v49 = vor.u32 %v8766_v36, %v8763_v35  ;;  %v6192_v35 = vld [vmem:[%s23521_s3 + $0x220] sm:$0xff] }
 0x4e7   :  { %8214 = vst.msk [vmem:[%s23521_s3 + $0x1c8] sm:$0xff] %vm15_vm3, %v8133_v56  ;;  %v7038_v61 = vadd.f32 %v6892_v58, %v6184_v57  ;;  %13557 = vmatprep.mubr.msk.bf16.mxu1 %vm14207_vm1, %v14206_v0  ;;  %13719 = vmatprep.mubr.msk.bf16.mxu0 %vm14207_vm1, %v14206_v0  ;;  %v6189_v58 = vld [vmem:[%s23521_s3 + $0x208] sm:$0xff] }
 0x4e8   :  { %v7281_v2 = vld [vmem:[%s23521_s3 + $0x1d0] sm:$0xff]  ;;  %v13291_v3 = vpop.f32.mrf.mxu1  ;;  %v13453_v4 = vpop.f32.mrf.mxu0 }
 0x4e9   :  { %7119 = vst.msk [vmem:[%s23521_s3 + $0x1e0] sm:$0xff] %vm15_vm3, %v7038_v61  ;;  %v8134_v5 = vadd.f32 %v7982_v59, %v7281_v2  ;;  %v8768_v61 = vsel %vm8607_vm8, %v8758_v27, %v8767_v49  ;;  %v8772_v2 = vrot.slane %v8770_v52, 2  ;;  %v8775_v3 = vrot.slane %v8773_v53, 3  ;;  %v20987_v4 = vld [vmem:[%s23520_s0 + $0x98] sm:$0xff]  }
 0x4ea   :  { %v6895_v7 = vpop.f32.mrf.mxu1  ;;  %v7985_v8 = vpop.f32.mrf.mxu0 }
 0x4eb   :  { %8215 = vst.msk [vmem:[%s23521_s3 + $0x1d0] sm:$0xff] %vm15_vm3, %v8134_v5  ;;  %v7039_v11 = vadd.f32 %v6895_v7, %v6185_v6  ;;  %v8776_v15 = vor.u32 %v8775_v3, %v8772_v2 }
 0x4ec   :  { %v7282_v16 = vld [vmem:[%s23521_s3 + $0x1d8] sm:$0xff]  ;;  %v13292_v17 = vpop.f32.mrf.mxu1  ;;  %v13454_v18 = vpop.f32.mrf.mxu0 }
 0x4ed   :  { %7120 = vst.msk [vmem:[%s23521_s3 + $0x1e8] sm:$0xff] %vm15_vm3, %v7039_v11  ;;  %v8135_v19 = vadd.f32 %v7985_v8, %v7282_v16  ;;  %v10027_v16 = vrot.slane %v20987_v4, 3  ;;  %v8777_v28 = vsel %vm8607_vm8, %v8767_v49, %v8776_v15 }
 0x4ee   :  { %v6900_v21 = vpop.f32.mrf.mxu1  ;;  %v7990_v22 = vpop.f32.mrf.mxu0  ;;  %13558 = vmatmul.mubr.msk.bf16.gmra.mxu1 %vm463_vm2, %v8750_v9  ;;  %13720 = vmatmul.mubr.msk.bf16.gmra.mxu0 %vm463_vm2, %v10022_v12  ;;  %v6190_v9 = vld [vmem:[%s23521_s3 + $0x210] sm:$0xff]  ;;  %v8779_v12 = vshrl.u32 %v14159_v62, 16 }
 0x4ef   :  { %8216 = vst.msk [vmem:[%s23521_s3 + $0x1d8] sm:$0xff] %vm15_vm3, %v8135_v19  ;;  %v7040_v26 = vadd.f32 %v6900_v21, %v6186_v20  ;;  %13561 = vmatprep.mubr.msk.bf16.mxu1 %vm14207_vm1, %v14206_v0  ;;  %13723 = vmatprep.mubr.msk.bf16.mxu0 %vm14207_vm1, %v14206_v0  ;;  %v6191_v21 = vld [vmem:[%s23521_s3 + $0x218] sm:$0xff] }
 0x4f0   :  { %v7283_v23 = vld [vmem:[%s23521_s3 + $0x1e0] sm:$0xff]  ;;  %v13295_v29 = vpop.f32.mrf.mxu1  ;;  %v13457_v30 = vpop.f32.mrf.mxu0  ;;  %v8781_v25 = vrot.slane %v8779_v12, 2 }
 0x4f1   :  { %7121 = vst.msk [vmem:[%s23521_s3 + $0x1f0] sm:$0xff] %vm15_vm3, %v7040_v26  ;;  %v8136_v31 = vadd.f32 %v7990_v22, %v7283_v23  ;;  %v8784_v26 = vrot.slane %v8782_v13, 3  ;;  %v10028_v23 = vsel %vm9993_vm9, %v10025_v51, %v10027_v16  ;;  %v21029_v29 = vld [vmem:[%s23520_s0 + $0xa0] sm:$0xff]   ;;  %v14161_v30 = vld [vmem:[%s23520_s0 + $0xb0] sm:$0xff]   ;;  %v14163_v51 = vld [vmem:[%s23520_s0 + $0xb8] sm:$0xff]  }
 0x4f2   :  { %v6903_v33 = vpop.f32.mrf.mxu1  ;;  %v7993_v34 = vpop.f32.mrf.mxu0  ;;  %v10029_v40 = vrot.slane %v21029_v29, 3  ;;  %v8788_v41 = vshrl.u32 %v14161_v30, 16  ;;  %v8800_v2 = vshll.u32 %v14163_v51, 16 }
 0x4f3   :  { %8217 = vst.msk [vmem:[%s23521_s3 + $0x1e0] sm:$0xff] %vm15_vm3, %v8136_v31  ;;  %v7041_v37 = vadd.f32 %v6903_v33, %v6187_v32 }
 0x4f4   :  { %v7284_v42 = vld [vmem:[%s23521_s3 + $0x1e8] sm:$0xff]  ;;  %v13296_v43 = vpop.f32.mrf.mxu1  ;;  %v13458_v44 = vpop.f32.mrf.mxu0  ;;  %v10030_v53 = vsel %vm9993_vm9, %v10027_v16, %v10029_v40 }
 0x4f5   :  { %7122 = vst.msk [vmem:[%s23521_s3 + $0x1f8] sm:$0xff] %vm15_vm3, %v7041_v37  ;;  %v8137_v45 = vadd.f32 %v7993_v34, %v7284_v42  ;;  %v8791_v42 = vshll.u32 %v14161_v30, 16 }
 0x4f6   :  { %v6908_v47 = vpop.f32.mrf.mxu1  ;;  %v7998_v48 = vpop.f32.mrf.mxu0  ;;  %13562 = vmatmul.mubr.msk.bf16.gmra.mxu1 %vm463_vm2, %v8759_v38  ;;  %13724 = vmatmul.mubr.msk.bf16.gmra.mxu0 %vm463_vm2, %v10024_v39  ;;  %v8785_v38 = vor.u32 %v8784_v26, %v8781_v25  ;;  %v6196_v25 = vld [vmem:[%s23521_s3 + $0x240] sm:$0xff] }
 0x4f7   :  { %8218 = vst.msk [vmem:[%s23521_s3 + $0x1e8] sm:$0xff] %vm15_vm3, %v8137_v45  ;;  %v7042_v50 = vadd.f32 %v6908_v47, %v6188_v46  ;;  %13565 = vmatprep.mubr.msk.bf16.mxu1 %vm14207_vm1, %v14206_v0  ;;  %13727 = vmatprep.mubr.msk.bf16.mxu0 %vm14207_vm1, %v14206_v0  ;;  %v6193_v47 = vld [vmem:[%s23521_s3 + $0x228] sm:$0xff] }
 0x4f8   :  { %v7285_v54 = vld [vmem:[%s23521_s3 + $0x1f0] sm:$0xff]  ;;  %v13299_v55 = vpop.f32.mrf.mxu1  ;;  %v13461_v56 = vpop.f32.mrf.mxu0 }
 0x4f9   :  { %7123 = vst.msk [vmem:[%s23521_s3 + $0x200] sm:$0xff] %vm15_vm3, %v7042_v50  ;;  %v8138_v57 = vadd.f32 %v7998_v48, %v7285_v54  ;;  %v8786_v50 = vsel %vm8607_vm8, %v8776_v15, %v8785_v38  ;;  %v8790_v54 = vrot.slane %v8788_v41, 2  ;;  %v8793_v55 = vrot.slane %v8791_v42, 3  ;;  %v21077_v56 = vld [vmem:[%s23520_s0 + $0xa8] sm:$0xff]  }
 0x4fa   :  { %v6911_v59 = vpop.f32.mrf.mxu1  ;;  %v8001_v60 = vpop.f32.mrf.mxu0 }
 0x4fb   :  { %8219 = vst.msk [vmem:[%s23521_s3 + $0x1f0] sm:$0xff] %vm15_vm3, %v8138_v57  ;;  %v7043_v63 = vadd.f32 %v6911_v59, %v6189_v58  ;;  %v8794_v4 = vor.u32 %v8793_v55, %v8790_v54 }
 0x4fc   :  { %v7286_v5 = vld [vmem:[%s23521_s3 + $0x1f8] sm:$0xff]  ;;  %v13300_v6 = vpop.f32.mrf.mxu1  ;;  %v13462_v7 = vpop.f32.mrf.mxu0 }
 0x4fd   :  { %7124 = vst.msk [vmem:[%s23521_s3 + $0x208] sm:$0xff] %vm15_vm3, %v7043_v63  ;;  %v8139_v8 = vadd.f32 %v8001_v60, %v7286_v5  ;;  %v10031_v5 = vrot.slane %v21077_v56, 3  ;;  %v8795_v16 = vsel %vm8607_vm8, %v8785_v38, %v8794_v4 }
 0x4fe   :  { %v6916_v10 = vpop.f32.mrf.mxu1  ;;  %v8006_v11 = vpop.f32.mrf.mxu0  ;;  %13566 = vmatmul.mubr.msk.bf16.gmra.mxu1 %vm463_vm2, %v8768_v61  ;;  %13728 = vmatmul.mubr.msk.bf16.gmra.mxu0 %vm463_vm2, %v10026_v1  ;;  %v6194_v61 = vld [vmem:[%s23521_s3 + $0x230] sm:$0xff]  ;;  %v8797_v1 = vshrl.u32 %v14163_v51, 16 }
 0x4ff   :  { %8220 = vst.msk [vmem:[%s23521_s3 + $0x1f8] sm:$0xff] %vm15_vm3, %v8139_v8  ;;  %v7044_v14 = vadd.f32 %v6916_v10, %v6190_v9  ;;  %13569 = vmatprep.mubr.msk.bf16.mxu1 %vm14207_vm1, %v14206_v0  ;;  %13731 = vmatprep.mubr.msk.bf16.mxu0 %vm14207_vm1, %v14206_v0  ;;  %v6195_v10 = vld [vmem:[%s23521_s3 + $0x238] sm:$0xff] }
 0x500   :  { %v7287_v17 = vld [vmem:[%s23521_s3 + $0x200] sm:$0xff]  ;;  %v13303_v18 = vpop.f32.mrf.mxu1  ;;  %v13465_v19 = vpop.f32.mrf.mxu0  ;;  %v8799_v13 = vrot.slane %v8797_v1, 2 }
 0x501   :  { %7125 = vst.msk [vmem:[%s23521_s3 + $0x210] sm:$0xff] %vm15_vm3, %v7044_v14  ;;  %v8140_v20 = vadd.f32 %v8006_v11, %v7287_v17  ;;  %v8802_v14 = vrot.slane %v8800_v2, 3  ;;  %v10032_v17 = vsel %vm9993_vm9, %v10029_v40, %v10031_v5  ;;  %v21119_v18 = vld [vmem:[%s23520_s0 + $0xb0] sm:$0xff]   ;;  %v14165_v19 = vld [vmem:[%s23520_s0 + $0xc0] sm:$0xff]   ;;  %v14167_v40 = vld [vmem:[%s23520_s0 + $0xc8] sm:$0xff]  }
 0x502   :  { %v6919_v22 = vpop.f32.mrf.mxu1  ;;  %v8009_v24 = vpop.f32.mrf.mxu0  ;;  %v10033_v29 = vrot.slane %v21119_v18, 3  ;;  %v8806_v30 = vshrl.u32 %v14165_v19, 16  ;;  %v8818_v54 = vshll.u32 %v14167_v40, 16 }
 0x503   :  { %8221 = vst.msk [vmem:[%s23521_s3 + $0x200] sm:$0xff] %vm15_vm3, %v8140_v20  ;;  %v7045_v27 = vadd.f32 %v6919_v22, %v6191_v21 }
 0x504   :  { %v7288_v31 = vld [vmem:[%s23521_s3 + $0x208] sm:$0xff]  ;;  %v13304_v32 = vpop.f32.mrf.mxu1  ;;  %v13466_v33 = vpop.f32.mrf.mxu0  ;;  %v10034_v42 = vsel %vm9993_vm9, %v10031_v5, %v10033_v29 }
 0x505   :  { %7126 = vst.msk [vmem:[%s23521_s3 + $0x218] sm:$0xff] %vm15_vm3, %v7045_v27  ;;  %v8141_v34 = vadd.f32 %v8009_v24, %v7288_v31  ;;  %v8809_v31 = vshll.u32 %v14165_v19, 16 }
 0x506   :  { %v6924_v36 = vpop.f32.mrf.mxu1  ;;  %v8014_v37 = vpop.f32.mrf.mxu0  ;;  %13570 = vmatmul.mubr.msk.bf16.gmra.mxu1 %vm463_vm2, %v8777_v28  ;;  %13732 = vmatmul.mubr.msk.bf16.gmra.mxu0 %vm463_vm2, %v10028_v23  ;;  %v8803_v28 = vor.u32 %v8802_v14, %v8799_v13  ;;  %v6200_v13 = vld [vmem:[%s23521_s3 + $0x260] sm:$0xff] }
 0x507   :  { %8222 = vst.msk [vmem:[%s23521_s3 + $0x208] sm:$0xff] %vm15_vm3, %v8141_v34  ;;  %v7046_v39 = vadd.f32 %v6924_v36, %v6192_v35  ;;  %13573 = vmatprep.mubr.msk.bf16.mxu1 %vm14207_vm1, %v14206_v0  ;;  %13735 = vmatprep.mubr.msk.bf16.mxu0 %vm14207_vm1, %v14206_v0  ;;  %v6197_v36 = vld [vmem:[%s23521_s3 + $0x248] sm:$0xff] }
 0x508   :  { %v7289_v43 = vld [vmem:[%s23521_s3 + $0x210] sm:$0xff]  ;;  %v13307_v44 = vpop.f32.mrf.mxu1  ;;  %v13469_v45 = vpop.f32.mrf.mxu0 }
 0x509   :  { %7127 = vst.msk [vmem:[%s23521_s3 + $0x220] sm:$0xff] %vm15_vm3, %v7046_v39  ;;  %v8142_v46 = vadd.f32 %v8014_v37, %v7289_v43  ;;  %v8804_v39 = vsel %vm8607_vm8, %v8794_v4, %v8803_v28  ;;  %v8808_v43 = vrot.slane %v8806_v30, 2  ;;  %v8811_v44 = vrot.slane %v8809_v31, 3  ;;  %v21167_v45 = vld [vmem:[%s23520_s0 + $0xb8] sm:$0xff]  }
 0x50a   :  { %v6927_v48 = vpop.f32.mrf.mxu1  ;;  %v8017_v49 = vpop.f32.mrf.mxu0 }
 0x50b   :  { %8223 = vst.msk [vmem:[%s23521_s3 + $0x210] sm:$0xff] %vm15_vm3, %v8142_v46  ;;  %v7047_v52 = vadd.f32 %v6927_v48, %v6193_v47  ;;  %v8812_v56 = vor.u32 %v8811_v44, %v8808_v43 }
 0x50c   :  { %v7290_v57 = vld [vmem:[%s23521_s3 + $0x218] sm:$0xff]  ;;  %v13308_v58 = vpop.f32.mrf.mxu1  ;;  %v13470_v59 = vpop.f32.mrf.mxu0 }
 0x50d   :  { %7128 = vst.msk [vmem:[%s23521_s3 + $0x228] sm:$0xff] %vm15_vm3, %v7047_v52  ;;  %v8143_v60 = vadd.f32 %v8017_v49, %v7290_v57  ;;  %v10035_v57 = vrot.slane %v21167_v45, 3  ;;  %v8813_v5 = vsel %vm8607_vm8, %v8803_v28, %v8812_v56 }
 0x50e   :  { %v6932_v62 = vpop.f32.mrf.mxu1  ;;  %v8022_v63 = vpop.f32.mrf.mxu0  ;;  %13574 = vmatmul.mubr.msk.bf16.gmra.mxu1 %vm463_vm2, %v8786_v50  ;;  %13736 = vmatmul.mubr.msk.bf16.gmra.mxu0 %vm463_vm2, %v10030_v53  ;;  %v6198_v50 = vld [vmem:[%s23521_s3 + $0x250] sm:$0xff]  ;;  %v8815_v53 = vshrl.u32 %v14167_v40, 16 }
 0x50f   :  { %8224 = vst.msk [vmem:[%s23521_s3 + $0x218] sm:$0xff] %vm15_vm3, %v8143_v60  ;;  %v7048_v3 = vadd.f32 %v6932_v62, %v6194_v61  ;;  %13577 = vmatprep.mubr.msk.bf16.mxu1 %vm14207_vm1, %v14206_v0  ;;  %13739 = vmatprep.mubr.msk.bf16.mxu0 %vm14207_vm1, %v14206_v0  ;;  %v6199_v62 = vld [vmem:[%s23521_s3 + $0x258] sm:$0xff] }
 0x510   :  { %v7291_v6 = vld [vmem:[%s23521_s3 + $0x220] sm:$0xff]  ;;  %v13311_v7 = vpop.f32.mrf.mxu1  ;;  %v13473_v8 = vpop.f32.mrf.mxu0  ;;  %v8817_v2 = vrot.slane %v8815_v53, 2 }
 0x511   :  { %7129 = vst.msk [vmem:[%s23521_s3 + $0x230] sm:$0xff] %vm15_vm3, %v7048_v3  ;;  %v8144_v9 = vadd.f32 %v8022_v63, %v7291_v6  ;;  %v8820_v3 = vrot.slane %v8818_v54, 3  ;;  %v10036_v6 = vsel %vm9993_vm9, %v10033_v29, %v10035_v57  ;;  %v21209_v7 = vld [vmem:[%s23520_s0 + $0xc0] sm:$0xff]   ;;  %v14169_v8 = vld [vmem:[%s23520_s0 + $0xd0] sm:$0xff]   ;;  %v14171_v29 = vld [vmem:[%s23520_s0 + $0xd8] sm:$0xff]  }
 0x512   :  { %v6935_v11 = vpop.f32.mrf.mxu1  ;;  %v8025_v12 = vpop.f32.mrf.mxu0  ;;  %v10037_v18 = vrot.slane %v21209_v7, 3  ;;  %v8824_v19 = vshrl.u32 %v14169_v8, 16  ;;  %v8836_v43 = vshll.u32 %v14171_v29, 16 }
 0x513   :  { %8225 = vst.msk [vmem:[%s23521_s3 + $0x220] sm:$0xff] %vm15_vm3, %v8144_v9  ;;  %v7049_v15 = vadd.f32 %v6935_v11, %v6195_v10 }
 0x514   :  { %v7292_v20 = vld [vmem:[%s23521_s3 + $0x228] sm:$0xff]  ;;  %v13312_v21 = vpop.f32.mrf.mxu1  ;;  %v13474_v22 = vpop.f32.mrf.mxu0  ;;  %v10038_v31 = vsel %vm9993_vm9, %v10035_v57, %v10037_v18 }
 0x515   :  { %7130 = vst.msk [vmem:[%s23521_s3 + $0x238] sm:$0xff] %vm15_vm3, %v7049_v15  ;;  %v8145_v24 = vadd.f32 %v8025_v12, %v7292_v20  ;;  %v8827_v20 = vshll.u32 %v14169_v8, 16 }
 0x516   :  { %v6940_v26 = vpop.f32.mrf.mxu1  ;;  %v8030_v27 = vpop.f32.mrf.mxu0  ;;  %13578 = vmatmul.mubr.msk.bf16.gmra.mxu1 %vm463_vm2, %v8795_v16  ;;  %13740 = vmatmul.mubr.msk.bf16.gmra.mxu0 %vm463_vm2, %v10032_v17  ;;  %v8821_v16 = vor.u32 %v8820_v3, %v8817_v2  ;;  %v6204_v2 = vld [vmem:[%s23521_s3 + $0x280] sm:$0xff] }
 0x517   :  { %8226 = vst.msk [vmem:[%s23521_s3 + $0x228] sm:$0xff] %vm15_vm3, %v8145_v24  ;;  %v7050_v23 = vadd.f32 %v6940_v26, %v6196_v25  ;;  %13581 = vmatprep.mubr.msk.bf16.mxu1 %vm14207_vm1, %v14206_v0  ;;  %13743 = vmatprep.mubr.msk.bf16.mxu0 %vm14207_vm1, %v14206_v0  ;;  %v6201_v26 = vld [vmem:[%s23521_s3 + $0x268] sm:$0xff] }
 0x518   :  { %v7293_v32 = vld [vmem:[%s23521_s3 + $0x230] sm:$0xff]  ;;  %v13315_v33 = vpop.f32.mrf.mxu1  ;;  %v13477_v34 = vpop.f32.mrf.mxu0 }
 0x519   :  { %7131 = vst.msk [vmem:[%s23521_s3 + $0x240] sm:$0xff] %vm15_vm3, %v7050_v23  ;;  %v8146_v35 = vadd.f32 %v8030_v27, %v7293_v32  ;;  %v8822_v23 = vsel %vm8607_vm8, %v8812_v56, %v8821_v16  ;;  %v8826_v32 = vrot.slane %v8824_v19, 2  ;;  %v8829_v33 = vrot.slane %v8827_v20, 3  ;;  %v21257_v34 = vld [vmem:[%s23520_s0 + $0xc8] sm:$0xff]  }
 0x51a   :  { %v6943_v37 = vpop.f32.mrf.mxu1  ;;  %v8033_v38 = vpop.f32.mrf.mxu0 }
 0x51b   :  { %8227 = vst.msk [vmem:[%s23521_s3 + $0x230] sm:$0xff] %vm15_vm3, %v8146_v35  ;;  %v7051_v41 = vadd.f32 %v6943_v37, %v6197_v36  ;;  %v8830_v45 = vor.u32 %v8829_v33, %v8826_v32 }
 0x51c   :  { %v7294_v46 = vld [vmem:[%s23521_s3 + $0x238] sm:$0xff]  ;;  %v13316_v47 = vpop.f32.mrf.mxu1  ;;  %v13478_v48 = vpop.f32.mrf.mxu0 }
 0x51d   :  { %7132 = vst.msk [vmem:[%s23521_s3 + $0x248] sm:$0xff] %vm15_vm3, %v7051_v41  ;;  %v8147_v49 = vadd.f32 %v8033_v38, %v7294_v46  ;;  %v10039_v46 = vrot.slane %v21257_v34, 3  ;;  %v8831_v57 = vsel %vm8607_vm8, %v8821_v16, %v8830_v45  ;;  %v14175_v16 = vld [vmem:[%s23520_s0 + $0xe8] sm:$0xff]  }
 0x51e   :  { %v6948_v51 = vpop.f32.mrf.mxu1  ;;  %v8038_v52 = vpop.f32.mrf.mxu0  ;;  %13582 = vmatmul.mubr.msk.bf16.gmra.mxu1 %vm463_vm2, %v8804_v39  ;;  %13744 = vmatmul.mubr.msk.bf16.gmra.mxu0 %vm463_vm2, %v10034_v42  ;;  %v6202_v39 = vld [vmem:[%s23521_s3 + $0x270] sm:$0xff]  ;;  %v8833_v42 = vshrl.u32 %v14171_v29, 16  ;;  %v8851_v29 = vshrl.u32 %v14175_v16, 16 }
 0x51f   :  { %8228 = vst.msk [vmem:[%s23521_s3 + $0x238] sm:$0xff] %vm15_vm3, %v8147_v49  ;;  %v7052_v55 = vadd.f32 %v6948_v51, %v6198_v50  ;;  %13585 = vmatprep.mubr.msk.bf16.mxu1 %vm14207_vm1, %v14206_v0  ;;  %13747 = vmatprep.mubr.msk.bf16.mxu0 %vm14207_vm1, %v14206_v0  ;;  %v6203_v51 = vld [vmem:[%s23521_s3 + $0x278] sm:$0xff] }
 0x520   :  { %v7295_v58 = vld [vmem:[%s23521_s3 + $0x240] sm:$0xff]  ;;  %v13319_v59 = vpop.f32.mrf.mxu1  ;;  %v13481_v60 = vpop.f32.mrf.mxu0  ;;  %v8835_v54 = vrot.slane %v8833_v42, 2 }
 0x521   :  { %7133 = vst.msk [vmem:[%s23521_s3 + $0x250] sm:$0xff] %vm15_vm3, %v7052_v55  ;;  %v8148_v61 = vadd.f32 %v8038_v52, %v7295_v58  ;;  %v8838_v55 = vrot.slane %v8836_v43, 3  ;;  %v10040_v58 = vsel %vm9993_vm9, %v10037_v18, %v10039_v46  ;;  %v21299_v59 = vld [vmem:[%s23520_s0 + $0xd0] sm:$0xff]   ;;  %v14173_v60 = vld [vmem:[%s23520_s0 + $0xe0] sm:$0xff]  }
 0x522   :  { %v6951_v63 = vpop.f32.mrf.mxu1  ;;  %v8041_v1 = vpop.f32.mrf.mxu0  ;;  %v10041_v7 = vrot.slane %v21299_v59, 3  ;;  %v8842_v8 = vshrl.u32 %v14173_v60, 16 }
 0x523   :  { %8229 = vst.msk [vmem:[%s23521_s3 + $0x240] sm:$0xff] %vm15_vm3, %v8148_v61  ;;  %v7053_v4 = vadd.f32 %v6951_v63, %v6199_v62 }
 0x524   :  { %v7296_v9 = vld [vmem:[%s23521_s3 + $0x248] sm:$0xff]  ;;  %v13320_v10 = vpop.f32.mrf.mxu1  ;;  %v13482_v11 = vpop.f32.mrf.mxu0  ;;  %v10042_v18 = vsel %vm9993_vm9, %v10039_v46, %v10041_v7  ;;  %v8844_v19 = vrot.slane %v8842_v8, 2  ;;  %v21382_v46 = vld [vmem:[%s23520_s0 + $0xe0] sm:$0xff]  }
 0x525   :  { %7134 = vst.msk [vmem:[%s23521_s3 + $0x258] sm:$0xff] %vm15_vm3, %v7053_v4  ;;  %v8149_v12 = vadd.f32 %v8041_v1, %v7296_v9  ;;  %v8845_v9 = vshll.u32 %v14173_v60, 16  ;;  %v21423_v8 = vld [vmem:[%s23520_s0 + $0xe8] sm:$0xff]  }
 0x526   :  { %v6956_v14 = vpop.f32.mrf.mxu1  ;;  %v8046_v15 = vpop.f32.mrf.mxu0  ;;  %13586 = vmatmul.mubr.msk.bf16.gmra.mxu1 %vm463_vm2, %v8813_v5  ;;  %13748 = vmatmul.mubr.msk.bf16.gmra.mxu0 %vm463_vm2, %v10036_v6  ;;  %v8839_v5 = vor.u32 %v8838_v55, %v8835_v54  ;;  %v10045_v55 = vrot.slane %v21382_v46, 3 }
 0x527   :  { %8230 = vst.msk [vmem:[%s23521_s3 + $0x248] sm:$0xff] %vm15_vm3, %v8149_v12  ;;  %v7054_v17 = vadd.f32 %v6956_v14, %v6200_v13  ;;  %13589 = vmatprep.mubr.msk.bf16.mxu1 %vm14207_vm1, %v14206_v0  ;;  %13751 = vmatprep.mubr.msk.bf16.mxu0 %vm14207_vm1, %v14206_v0  ;;  %v8847_v20 = vrot.slane %v8845_v9, 3 }
 0x528   :  { %v7297_v21 = vld [vmem:[%s23521_s3 + $0x250] sm:$0xff]  ;;  %v13323_v22 = vpop.f32.mrf.mxu1  ;;  %v13485_v24 = vpop.f32.mrf.mxu0 }
 0x529   :  { %7135 = vst.msk [vmem:[%s23521_s3 + $0x260] sm:$0xff] %vm15_vm3, %v7054_v17  ;;  %v8150_v25 = vadd.f32 %v8046_v15, %v7297_v21  ;;  %v8840_v17 = vsel %vm8607_vm8, %v8830_v45, %v8839_v5  ;;  %v21344_v21 = vld [vmem:[%s23520_s0 + $0xd8] sm:$0xff]   ;;  %v8848_v32 = vor.u32 %v8847_v20, %v8844_v19  ;;  %v10047_v20 = vrot.slane %v21423_v8, 3 }
 0x52a   :  { %v6959_v27 = vpop.f32.mrf.mxu1  ;;  %v8049_v28 = vpop.f32.mrf.mxu0  ;;  %v10043_v33 = vrot.slane %v21344_v21, 3  ;;  %v21449_v21 = vld [vmem:[%s23522_s2] ss:$0 sm:$0xff] }
 0x52b   :  { %8231 = vst.msk [vmem:[%s23521_s3 + $0x250] sm:$0xff] %vm15_vm3, %v8150_v25  ;;  %v7055_v30 = vadd.f32 %v6959_v27, %v6201_v26 }
 0x52c   :  { %v7298_v35 = vld [vmem:[%s23521_s3 + $0x258] sm:$0xff]  ;;  %v13324_v36 = vpop.f32.mrf.mxu1  ;;  %v13486_v37 = vpop.f32.mrf.mxu0  ;;  %v10044_v45 = vsel %vm9993_vm9, %v10041_v7, %v10043_v33 }
 0x52d   :  { %7136 = vst.msk [vmem:[%s23521_s3 + $0x268] sm:$0xff] %vm15_vm3, %v7055_v30  ;;  %v8151_v38 = vadd.f32 %v8049_v28, %v7298_v35  ;;  %v8321_v28 = vld [vmem:[%s23521_s3] sm:$0xff]  ;;  %v8854_v30 = vshll.u32 %v14175_v16, 16 }
 0x52e   :  { %v6964_v40 = vpop.f32.mrf.mxu1  ;;  %v8054_v41 = vpop.f32.mrf.mxu0  ;;  %13590 = vmatmul.mubr.msk.bf16.gmra.mxu1 %vm463_vm2, %v8822_v23  ;;  %13752 = vmatmul.mubr.msk.bf16.gmra.mxu0 %vm463_vm2, %v10038_v31 }
 0x52f   :  { %8232 = vst.msk [vmem:[%s23521_s3 + $0x258] sm:$0xff] %vm15_vm3, %v8151_v38  ;;  %v7056_v44 = vadd.f32 %v6964_v40, %v6202_v39  ;;  %13593 = vmatprep.mubr.msk.bf16.mxu1 %vm14207_vm1, %v14206_v0  ;;  %13755 = vmatprep.mubr.msk.bf16.mxu0 %vm14207_vm1, %v14206_v0  ;;  %v8322_v39 = vld [vmem:[%s23521_s3 + $0x8] sm:$0xff]  ;;  %v8856_v42 = vrot.slane %v8854_v30, 3 }
 0x530   :  { %v7299_v47 = vld [vmem:[%s23521_s3 + $0x260] sm:$0xff]  ;;  %v13327_v48 = vpop.f32.mrf.mxu1  ;;  %v13489_v49 = vpop.f32.mrf.mxu0 }
 0x531   :  { %7137 = vst.msk [vmem:[%s23521_s3 + $0x270] sm:$0xff] %vm15_vm3, %v7056_v44  ;;  %v8152_v50 = vadd.f32 %v8054_v41, %v7299_v47  ;;  %v8853_v41 = vrot.slane %v8851_v29, 2  ;;  %v8849_v44 = vsel %vm8607_vm8, %v8839_v5, %v8848_v32  ;;  %v14177_v47 = vld [vmem:[%s23520_s0 + $0xf0] sm:$0xff]   ;;  %v10046_v5 = vsel %vm9993_vm9, %v10043_v33, %v10045_v55 }
 0x532   :  { %v6967_v52 = vpop.f32.mrf.mxu1  ;;  %v8057_v53 = vpop.f32.mrf.mxu0 }
 0x533   :  { %8233 = vst.msk [vmem:[%s23521_s3 + $0x260] sm:$0xff] %vm15_vm3, %v8152_v50  ;;  %v7057_v56 = vadd.f32 %v6967_v52, %v6203_v51  ;;  %v8323_v50 = vld [vmem:[%s23521_s3 + $0x10] sm:$0xff] }
 0x534   :  { %v7300_v61 = vld [vmem:[%s23521_s3 + $0x268] sm:$0xff]  ;;  %v13328_v62 = vpop.f32.mrf.mxu1  ;;  %v13490_v63 = vpop.f32.mrf.mxu0 }
 0x535   :  { %7138 = vst.msk [vmem:[%s23521_s3 + $0x278] sm:$0xff] %vm15_vm3, %v7057_v56  ;;  %v8153_v1 = vadd.f32 %v8057_v53, %v7300_v61  ;;  %v8857_v53 = vor.u32 %v8856_v42, %v8853_v41  ;;  %v8860_v56 = vshrl.u32 %v14177_v47, 16  ;;  %v8324_v62 = vld [vmem:[%s23521_s3 + $0x18] sm:$0xff] }
 0x536   :  { %v6972_v3 = vpop.f32.mrf.mxu1  ;;  %v8062_v4 = vpop.f32.mrf.mxu0  ;;  %13594 = vmatmul.mubr.msk.bf16.gmra.mxu1 %vm463_vm2, %v8831_v57  ;;  %13756 = vmatmul.mubr.msk.bf16.gmra.mxu0 %vm463_vm2, %v10040_v58  ;;  %v8863_v57 = vshll.u32 %v14177_v47, 16 }
 0x537   :  { %8234 = vst.msk [vmem:[%s23521_s3 + $0x268] sm:$0xff] %vm15_vm3, %v8153_v1  ;;  %v7058_v6 = vadd.f32 %v6972_v3, %v6204_v2  ;;  %13597 = vmatprep.mubr.msk.bf16.mxu1 %vm14207_vm1, %v14206_v0  ;;  %13759 = vmatprep.mubr.msk.bf16.mxu0 %vm14207_vm1, %v14206_v0  ;;  %v8858_v2 = vsel %vm8607_vm8, %v8848_v32, %v8857_v53  ;;  %v14179_v3 = vld [vmem:[%s23520_s0 + $0xf8] sm:$0xff]   ;;  %v14181_v32 = vld [vmem:[%s23520_s0 + $0x100] sm:$0xff]  }
 0x538   :  { %v7301_v10 = vld [vmem:[%s23521_s3 + $0x270] sm:$0xff]  ;;  %v13331_v11 = vpop.f32.mrf.mxu1  ;;  %v13493_v12 = vpop.f32.mrf.mxu0  ;;  %v8865_v7 = vrot.slane %v8863_v57, 3  ;;  %v8869_v16 = vshrl.u32 %v14179_v3, 16 }
 0x539   :  { %7139 = vst.msk [vmem:[%s23521_s3 + $0x280] sm:$0xff] %vm15_vm3, %v7058_v6  ;;  %v8154_v13 = vadd.f32 %v8062_v4, %v7301_v10  ;;  %v8862_v6 = vrot.slane %v8860_v56, 2 }
 0x53a   :  { %v6975_v14 = vpop.f32.mrf.mxu1  ;;  %v8065_v15 = vpop.f32.mrf.mxu0  ;;  %v8871_v30 = vrot.slane %v8869_v16, 2 }
 0x53b   :  { %8235 = vst.msk [vmem:[%s23521_s3 + $0x270] sm:$0xff] %vm15_vm3, %v8154_v13  ;;  %v8325_v13 = vld [vmem:[%s23521_s3 + $0x20] sm:$0xff]  ;;  %v8866_v19 = vor.u32 %v8865_v7, %v8862_v6 }
 0x53c   :  { %v7302_v22 = vld [vmem:[%s23521_s3 + $0x278] sm:$0xff]  ;;  %v13332_v24 = vpop.f32.mrf.mxu1  ;;  %v13494_v25 = vpop.f32.mrf.mxu0 }
 0x53d   :  { %v8155_v26 = vadd.f32 %v8065_v15, %v7302_v22 }
 0x53e   :  { %v8070_v27 = vpop.f32.mrf.mxu0  ;;  %v9136_v23 = vpop.f32.mrf.mxu1  ;;  %13598 = vmatmul.mubr.msk.bf16.gmra.mxu1 %vm463_vm2, %v8840_v17  ;;  %13760 = vmatmul.mubr.msk.bf16.gmra.mxu0 %vm463_vm2, %v10042_v18  ;;  %v8872_v17 = vshll.u32 %v14179_v3, 16  ;;  %v14183_v3 = vld [vmem:[%s23520_s0 + $0x108] sm:$0xff]  }
 0x53f   :  { %8236 = vst.msk [vmem:[%s23521_s3 + $0x278] sm:$0xff] %vm15_vm3, %v8155_v26  ;;  %v9462_v31 = vadd.f32 %v9136_v23, %v8321_v28  ;;  %13601 = vmatprep.mubr.msk.bf16.mxu1 %vm14207_vm1, %v14206_v0  ;;  %13763 = vmatprep.mubr.msk.bf16.mxu0 %vm14207_vm1, %v14206_v0  ;;  %v8326_v28 = vld [vmem:[%s23521_s3 + $0x28] sm:$0xff] }
 0x540   :  { %v7303_v34 = vld [vmem:[%s23521_s3 + $0x280] sm:$0xff]  ;;  %v13497_v35 = vpop.f32.mrf.mxu0  ;;  %v13503_v36 = vpop.f32.mrf.mxu1 }
 0x541   :  { %v8156_v37 = vadd.f32 %v8070_v27, %v7303_v34  ;;  %9543 = vst.msk [vmem:[%s23521_s3] sm:$0xff] %vm15_vm3, %v9462_v31  ;;  %v8874_v31 = vrot.slane %v8872_v17, 3  ;;  %v8867_v35 = vsel %vm8607_vm8, %v8857_v53, %v8866_v19  ;;  %v10048_v36 = vsel %vm9993_vm9, %v10045_v55, %v10047_v20 }
 0x542   :  { %v8073_v38 = vpop.f32.mrf.mxu0  ;;  %v9139_v40 = vpop.f32.mrf.mxu1 }
 0x543   :  { %8237 = vst.msk [vmem:[%s23521_s3 + $0x280] sm:$0xff] %vm15_vm3, %v8156_v37  ;;  %v9463_v43 = vadd.f32 %v9139_v40, %v8322_v39  ;;  %v21479_v37 = vld [vmem:[%s23520_s0 + $0xf0] sm:$0xff]   ;;  %v21496_v47 = vor.u32 %v8874_v31, %v8871_v30 }
 0x544   :  { %v13498_v48 = vpop.f32.mrf.mxu0  ;;  %v13504_v49 = vpop.f32.mrf.mxu1  ;;  %v10049_v53 = vrot.slane %v21479_v37, 3 }
 0x545   :  { %9544 = vst.msk [vmem:[%s23521_s3 + $0x8] sm:$0xff] %vm15_vm3, %v9463_v43  ;;  %v8878_v48 = vshrl.u32 %v14181_v32, 16  ;;  %v8881_v49 = vshll.u32 %v14181_v32, 16  ;;  %v8330_v32 = vld [vmem:[%s23521_s3 + $0x48] sm:$0xff] }
 0x546   :  { %v9144_v51 = vpop.f32.mrf.mxu1  ;;  %13602 = vmatmul.mubr.msk.bf16.gmra.mxu1 %vm463_vm2, %v8849_v44  ;;  %v10235_v52 = vpop.f32.mrf.mxu0  ;;  %13764 = vmatmul.mubr.msk.bf16.gmra.mxu0 %vm463_vm2, %v10044_v45  ;;  %v8327_v44 = vld [vmem:[%s23521_s3 + $0x30] sm:$0xff]  ;;  %v10050_v7 = vsel %vm9993_vm9, %v10047_v20, %v10049_v53  ;;  %v8890_v20 = vshll.u32 %v14183_v3, 16 }
 0x547   :  { %v9464_v54 = vadd.f32 %v9144_v51, %v8323_v50  ;;  %13605 = vmatprep.mubr.msk.bf16.mxu1 %vm14207_vm1, %v14206_v0  ;;  %13767 = vmatprep.mubr.msk.bf16.mxu0 %vm14207_vm1, %v14206_v0 }
 0x548   :  { %v9707_v58 = vld [vmem:[%s23521_s3] sm:$0xff]  ;;  %v13507_v59 = vpop.f32.mrf.mxu1  ;;  %v13669_v60 = vpop.f32.mrf.mxu0 }
 0x549   :  { %9545 = vst.msk [vmem:[%s23521_s3 + $0x10] sm:$0xff] %vm15_vm3, %v9464_v54  ;;  %v10561_v61 = vadd.f32 %v10235_v52, %v9707_v58  ;;  %v8328_v60 = vld [vmem:[%s23521_s3 + $0x38] sm:$0xff] }
 0x54a   :  { %v9147_v63 = vpop.f32.mrf.mxu1  ;;  %v10238_v1 = vpop.f32.mrf.mxu0 }
 0x54b   :  { %10642 = vst.msk [vmem:[%s23521_s3] sm:$0xff] %vm15_vm3, %v10561_v61  ;;  %v9465_v4 = vadd.f32 %v9147_v63, %v8324_v62  ;;  %v8876_v63 = vsel %vm8607_vm8, %v8866_v19, %v21496_v47  ;;  %v8887_v19 = vshrl.u32 %v14183_v3, 16  ;;  %v8332_v3 = vld [vmem:[%s23521_s3 + $0x58] sm:$0xff] }
 0x54c   :  { %v9708_v9 = vld [vmem:[%s23521_s3 + $0x8] sm:$0xff]  ;;  %v13508_v10 = vpop.f32.mrf.mxu1  ;;  %v13670_v11 = vpop.f32.mrf.mxu0 }
 0x54d   :  { %9546 = vst.msk [vmem:[%s23521_s3 + $0x18] sm:$0xff] %vm15_vm3, %v9465_v4  ;;  %v10562_v12 = vadd.f32 %v10238_v1, %v9708_v9  ;;  %v8880_v1 = vrot.slane %v8878_v48, 2  ;;  %v21543_v9 = vld [vmem:[%s23520_s0 + $0xf8] sm:$0xff]  }
 0x54e   :  { %v9152_v14 = vpop.f32.mrf.mxu1  ;;  %13606 = vmatmul.mubr.msk.bf16.gmra.mxu1 %vm463_vm2, %v8858_v2  ;;  %v10243_v15 = vpop.f32.mrf.mxu0  ;;  %13768 = vmatmul.mubr.msk.bf16.gmra.mxu0 %vm463_vm2, %v10046_v5  ;;  %v8883_v2 = vrot.slane %v8881_v49, 3 }
 0x54f   :  { %10643 = vst.msk [vmem:[%s23521_s3 + $0x8] sm:$0xff] %vm15_vm3, %v10562_v12  ;;  %v9466_v18 = vadd.f32 %v9152_v14, %v8325_v13  ;;  %13609 = vmatprep.mubr.msk.bf16.mxu1 %vm14207_vm1, %v14206_v0  ;;  %13771 = vmatprep.mubr.msk.bf16.mxu0 %vm14207_vm1, %v14206_v0 }
 0x550   :  { %v9709_v22 = vld [vmem:[%s23521_s3 + $0x10] sm:$0xff]  ;;  %v13511_v24 = vpop.f32.mrf.mxu1  ;;  %v13673_v25 = vpop.f32.mrf.mxu0 }
 0x551   :  { %9547 = vst.msk [vmem:[%s23521_s3 + $0x20] sm:$0xff] %vm15_vm3, %v9466_v18  ;;  %v10563_v26 = vadd.f32 %v10243_v15, %v9709_v22  ;;  %v8329_v15 = vld [vmem:[%s23521_s3 + $0x40] sm:$0xff]  ;;  %v21564_v18 = vor.u32 %v8883_v2, %v8880_v1 }
 0x552   :  { %v10723_v27 = vld [vmem:[%s23521_s3] sm:$0xff]  ;;  %v9155_v23 = vpop.f32.mrf.mxu1  ;;  %v10246_v29 = vpop.f32.mrf.mxu0 }
 0x553   :  { %v10811_v33 = vadd.f32 %v21449_v21, %v10723_v27  ;;  %10644 = vst.msk [vmem:[%s23521_s3 + $0x10] sm:$0xff] %vm15_vm3, %v10563_v26  ;;  %v9467_v34 = vadd.f32 %v9155_v23, %v8326_v28  ;;  %v10051_v26 = vrot.slane %v21543_v9, 3 }
 0x554   :  { %v9710_v38 = vld [vmem:[%s23521_s3 + $0x18] sm:$0xff]  ;;  %v13512_v39 = vpop.f32.mrf.mxu1  ;;  %v13674_v40 = vpop.f32.mrf.mxu0 }
 0x555   :  { %vm10892_vm10 = vcmp.gt.f32.partialorder %v10811_v33, 0.0  ;;  %v10973_v41 = vmul.f32 0.1, %v10811_v33  ;;  %9548 = vst.msk [vmem:[%s23521_s3 + $0x28] sm:$0xff] %vm15_vm3, %v9467_v34  ;;  %v10564_v42 = vadd.f32 %v10246_v29, %v9710_v38  ;;  %v8892_v38 = vrot.slane %v8890_v20, 3  ;;  %v14185_v39 = vld [vmem:[%s23520_s0 + $0x110] sm:$0xff]  }
 0x556   :  { %v10724_v43 = vld [vmem:[%s23521_s3 + $0x8] sm:$0xff]  ;;  %v9160_v45 = vpop.f32.mrf.mxu1  ;;  %13610 = vmatmul.mubr.msk.bf16.gmra.mxu1 %vm463_vm2, %v8867_v35  ;;  %v10251_v46 = vpop.f32.mrf.mxu0  ;;  %13772 = vmatmul.mubr.msk.bf16.gmra.mxu0 %vm463_vm2, %v10048_v36  ;;  %v8885_v35 = vsel %vm8607_vm8, %v21496_v47, %v21564_v18  ;;  %v8889_v36 = vrot.slane %v8887_v19, 2 }
 0x557   :  { %v11054_v50 = vsel %vm10892_vm10, %v10811_v33, %v10973_v41  ;;  %v10812_v51 = vadd.f32 %v21449_v21, %v10724_v43  ;;  %10645 = vst.msk [vmem:[%s23521_s3 + $0x18] sm:$0xff] %vm15_vm3, %v10564_v42  ;;  %v9468_v52 = vadd.f32 %v9160_v45, %v8327_v44  ;;  %13613 = vmatprep.mubr.msk.bf16.mxu1 %vm14207_vm1, %v14206_v0  ;;  %v21612_v44 = vld [vmem:[%s23520_s0 + $0x100] sm:$0xff]  }
 0x558   :  { %13775 = vmatprep.mubr.msk.bf16.mxu0 %vm14207_vm1, %v14206_v0  ;;  %11135 = vst.msk [vmem:[%s23521_s3] sm:$0xff] %vm15_vm3, %v11054_v50  ;;  %v9711_v54 = vld [vmem:[%s23521_s3 + $0x20] sm:$0xff]  ;;  %v13515_v55 = vpop.f32.mrf.mxu1  ;;  %v13677_v56 = vpop.f32.mrf.mxu0  ;;  %v10052_v43 = vsel %vm9993_vm9, %v10049_v53, %v10051_v26  ;;  %v8331_v50 = vld [vmem:[%s23521_s3 + $0x50] sm:$0xff]  ;;  %v21633_v53 = vor.u32 %v8892_v38, %v8889_v36 }
 0x559   :  { %vm10893_vm11 = vcmp.gt.f32.partialorder %v10812_v51, 0.0  ;;  %v10974_v57 = vmul.f32 0.1, %v10812_v51  ;;  %9549 = vst.msk [vmem:[%s23521_s3 + $0x30] sm:$0xff] %vm15_vm3, %v9468_v52  ;;  %v10565_v58 = vadd.f32 %v10251_v46, %v9711_v54  ;;  %v8896_v54 = vshrl.u32 %v14185_v39, 16 }
 0x55a   :  { %v10725_v59 = vld [vmem:[%s23521_s3 + $0x10] sm:$0xff]  ;;  %v9163_v61 = vpop.f32.mrf.mxu1  ;;  %v10254_v62 = vpop.f32.mrf.mxu0  ;;  %v8899_v55 = vshll.u32 %v14185_v39, 16  ;;  %v8334_v39 = vld [vmem:[%s23521_s3 + $0x68] sm:$0xff] }
 0x55b   :  { %v11055_v4 = vsel %vm10893_vm11, %v10812_v51, %v10974_v57  ;;  %v10813_v5 = vadd.f32 %v21449_v21, %v10725_v59  ;;  %10646 = vst.msk [vmem:[%s23521_s3 + $0x20] sm:$0xff] %vm15_vm3, %v10565_v58  ;;  %v9469_v6 = vadd.f32 %v9163_v61, %v8328_v60  ;;  %v10053_v59 = vrot.slane %v21612_v44, 3 }
 0x55c   :  { %11136 = vst.msk [vmem:[%s23521_s3 + $0x8] sm:$0xff] %vm15_vm3, %v11055_v4  ;;  %v9712_v10 = vld [vmem:[%s23521_s3 + $0x28] sm:$0xff]  ;;  %v13516_v11 = vpop.f32.mrf.mxu1  ;;  %v13678_v12 = vpop.f32.mrf.mxu0 }
 0x55d   :  { %vm10894_vm12 = vcmp.gt.f32.partialorder %v10813_v5, 0.0  ;;  %v10975_v8 = vmul.f32 0.1, %v10813_v5  ;;  %9550 = vst.msk [vmem:[%s23521_s3 + $0x38] sm:$0xff] %vm15_vm3, %v9469_v6  ;;  %v10566_v13 = vadd.f32 %v10254_v62, %v9712_v10  ;;  %v8894_v6 = vsel %vm8607_vm8, %v21564_v18, %v21633_v53  ;;  %v14187_v11 = vld [vmem:[%s23520_s0 + $0x118] sm:$0xff]  }
 0x55e   :  { %v10726_v14 = vld [vmem:[%s23521_s3 + $0x18] sm:$0xff]  ;;  %v9168_v16 = vpop.f32.mrf.mxu1  ;;  %13614 = vmatmul.mubr.msk.bf16.gmra.mxu1 %vm463_vm2, %v8876_v63  ;;  %v10259_v17 = vpop.f32.mrf.mxu0  ;;  %13776 = vmatmul.mubr.msk.bf16.gmra.mxu0 %vm463_vm2, %v10050_v7  ;;  %v8898_v7 = vrot.slane %v8896_v54, 2  ;;  %v8901_v10 = vrot.slane %v8899_v55, 3 }
 0x55f   :  { %v11056_v22 = vsel %vm10894_vm12, %v10813_v5, %v10975_v8  ;;  %v10814_v24 = vadd.f32 %v21449_v21, %v10726_v14  ;;  %10647 = vst.msk [vmem:[%s23521_s3 + $0x28] sm:$0xff] %vm15_vm3, %v10566_v13  ;;  %v9470_v25 = vadd.f32 %v9168_v16, %v8329_v15  ;;  %13617 = vmatprep.mubr.msk.bf16.mxu1 %vm14207_vm1, %v14206_v0  ;;  %v21681_v15 = vld [vmem:[%s23520_s0 + $0x108] sm:$0xff]  }
 0x560   :  { %13779 = vmatprep.mubr.msk.bf16.mxu0 %vm14207_vm1, %v14206_v0  ;;  %11137 = vst.msk [vmem:[%s23521_s3 + $0x10] sm:$0xff] %vm15_vm3, %v11056_v22  ;;  %v9713_v27 = vld [vmem:[%s23521_s3 + $0x30] sm:$0xff]  ;;  %v13519_v28 = vpop.f32.mrf.mxu1  ;;  %v13681_v23 = vpop.f32.mrf.mxu0  ;;  %v10054_v14 = vsel %vm9993_vm9, %v10051_v26, %v10053_v59  ;;  %v8333_v22 = vld [vmem:[%s23521_s3 + $0x60] sm:$0xff]  ;;  %v21702_v26 = vor.u32 %v8901_v10, %v8898_v7 }
 0x561   :  { %vm10895_vm13 = vcmp.gt.f32.partialorder %v10814_v24, 0.0  ;;  %v10976_v29 = vmul.f32 0.1, %v10814_v24  ;;  %9551 = vst.msk [vmem:[%s23521_s3 + $0x40] sm:$0xff] %vm15_vm3, %v9470_v25  ;;  %v10567_v30 = vadd.f32 %v10259_v17, %v9713_v27  ;;  %v8905_v27 = vshrl.u32 %v14187_v11, 16 }
 0x562   :  { %v10727_v31 = vld [vmem:[%s23521_s3 + $0x20] sm:$0xff]  ;;  %v9171_v33 = vpop.f32.mrf.mxu1  ;;  %v10262_v34 = vpop.f32.mrf.mxu0  ;;  %v8908_v28 = vshll.u32 %v14187_v11, 16  ;;  %v8336_v11 = vld [vmem:[%s23521_s3 + $0x78] sm:$0xff] }
 0x563   :  { %v11057_v40 = vsel %vm10895_vm13, %v10814_v24, %v10976_v29  ;;  %v10815_v41 = vadd.f32 %v21449_v21, %v10727_v31  ;;  %10648 = vst.msk [vmem:[%s23521_s3 + $0x30] sm:$0xff] %vm15_vm3, %v10567_v30  ;;  %v9471_v42 = vadd.f32 %v9171_v33, %v8330_v32  ;;  %v10055_v31 = vrot.slane %v21681_v15, 3 }
 0x564   :  { %11138 = vst.msk [vmem:[%s23521_s3 + $0x18] sm:$0xff] %vm15_vm3, %v11057_v40  ;;  %v9714_v45 = vld [vmem:[%s23521_s3 + $0x38] sm:$0xff]  ;;  %v13520_v46 = vpop.f32.mrf.mxu1  ;;  %v13682_v47 = vpop.f32.mrf.mxu0 }
 0x565   :  { %vm10896_vm14 = vcmp.gt.f32.partialorder %v10815_v41, 0.0  ;;  %v10977_v37 = vmul.f32 0.1, %v10815_v41  ;;  %9552 = vst.msk [vmem:[%s23521_s3 + $0x48] sm:$0xff] %vm15_vm3, %v9471_v42  ;;  %v10568_v48 = vadd.f32 %v10262_v34, %v9714_v45  ;;  %v8903_v42 = vsel %vm8607_vm8, %v21633_v53, %v21702_v26  ;;  %v14189_v46 = vld [vmem:[%s23520_s0 + $0x120] sm:$0xff]  }
 0x566   :  { %v10728_v49 = vld [vmem:[%s23521_s3 + $0x28] sm:$0xff]  ;;  %v9176_v51 = vpop.f32.mrf.mxu1  ;;  %13618 = vmatmul.mubr.msk.bf16.gmra.mxu1 %vm463_vm2, %v8885_v35  ;;  %v10267_v52 = vpop.f32.mrf.mxu0  ;;  %13780 = vmatmul.mubr.msk.bf16.gmra.mxu0 %vm463_vm2, %v10052_v43  ;;  %v8907_v43 = vrot.slane %v8905_v27, 2  ;;  %v8910_v45 = vrot.slane %v8908_v28, 3 }
 0x567   :  { %v11058_v56 = vsel %vm10896_vm14, %v10815_v41, %v10977_v37  ;;  %v10816_v57 = vadd.f32 %v21449_v21, %v10728_v49  ;;  %10649 = vst.msk [vmem:[%s23521_s3 + $0x38] sm:$0xff] %vm15_vm3, %v10568_v48  ;;  %v9472_v58 = vadd.f32 %v9176_v51, %v8331_v50  ;;  %13621 = vmatprep.mubr.msk.bf16.mxu1 %vm14207_vm1, %v14206_v0  ;;  %v21750_v50 = vld [vmem:[%s23520_s0 + $0x110] sm:$0xff]  }
 0x568   :  { %13783 = vmatprep.mubr.msk.bf16.mxu0 %vm14207_vm1, %v14206_v0  ;;  %11139 = vst.msk [vmem:[%s23521_s3 + $0x20] sm:$0xff] %vm15_vm3, %v11058_v56  ;;  %v9715_v60 = vld [vmem:[%s23521_s3 + $0x40] sm:$0xff]  ;;  %v13523_v61 = vpop.f32.mrf.mxu1  ;;  %v13685_v62 = vpop.f32.mrf.mxu0  ;;  %v10056_v49 = vsel %vm9993_vm9, %v10053_v59, %v10055_v31  ;;  %v8335_v56 = vld [vmem:[%s23521_s3 + $0x70] sm:$0xff]  ;;  %v21771_v59 = vor.u32 %v8910_v45, %v8907_v43 }
 0x569   :  { %vm10897_vm15 = vcmp.gt.f32.partialorder %v10816_v57, 0.0  ;;  %v10978_v63 = vmul.f32 0.1, %v10816_v57  ;;  %9553 = vst.msk [vmem:[%s23521_s3 + $0x50] sm:$0xff] %vm15_vm3, %v9472_v58  ;;  %v10569_v1 = vadd.f32 %v10267_v52, %v9715_v60  ;;  %v8914_v60 = vshrl.u32 %v14189_v46, 16 }
 0x56a   :  { %v10729_v2 = vld [vmem:[%s23521_s3 + $0x30] sm:$0xff]  ;;  %v9179_v4 = vpop.f32.mrf.mxu1  ;;  %v10270_v5 = vpop.f32.mrf.mxu0  ;;  %v8917_v61 = vshll.u32 %v14189_v46, 16  ;;  %v8338_v46 = vld [vmem:[%s23521_s3 + $0x88] sm:$0xff] }
 0x56b   :  { %v11059_v12 = vsel %vm10897_vm15, %v10816_v57, %v10978_v63  ;;  %v10817_v8 = vadd.f32 %v21449_v21, %v10729_v2  ;;  %10650 = vst.msk [vmem:[%s23521_s3 + $0x40] sm:$0xff] %vm15_vm3, %v10569_v1  ;;  %v9473_v13 = vadd.f32 %v9179_v4, %v8332_v3  ;;  %v10057_v2 = vrot.slane %v21750_v50, 3 }
 0x56c   :  { %11140 = vst.msk [vmem:[%s23521_s3 + $0x28] sm:$0xff] %vm15_vm3, %v11059_v12  ;;  %v9716_v16 = vld [vmem:[%s23521_s3 + $0x48] sm:$0xff]  ;;  %v13524_v17 = vpop.f32.mrf.mxu1  ;;  %v13686_v18 = vpop.f32.mrf.mxu0 }
 0x56d   :  { %vm10898_vm0 = vcmp.gt.f32.partialorder %v10817_v8, 0.0  ;;  %v10979_v9 = vmul.f32 0.1, %v10817_v8  ;;  %9554 = vst.msk [vmem:[%s23521_s3 + $0x58] sm:$0xff] %vm15_vm3, %v9473_v13  ;;  %v10570_v19 = vadd.f32 %v10270_v5, %v9716_v16  ;;  %v8912_v13 = vsel %vm8607_vm8, %v21702_v26, %v21771_v59  ;;  %v14191_v17 = vld [vmem:[%s23520_s0 + $0x128] sm:$0xff]  }
 0x56e   :  { %v10730_v20 = vld [vmem:[%s23521_s3 + $0x38] sm:$0xff]  ;;  %v9184_v24 = vpop.f32.mrf.mxu1  ;;  %13622 = vmatmul.mubr.msk.bf16.gmra.mxu1 %vm463_vm2, %v8894_v6  ;;  %v10275_v25 = vpop.f32.mrf.mxu0  ;;  %13784 = vmatmul.mubr.msk.bf16.gmra.mxu0 %vm463_vm2, %v10054_v14  ;;  %v8916_v14 = vrot.slane %v8914_v60, 2  ;;  %v8919_v16 = vrot.slane %v8917_v61, 3 }
 0x56f   :  { %v11060_v23 = vsel %vm10898_vm0, %v10817_v8, %v10979_v9  ;;  %v10818_v29 = vadd.f32 %v21449_v21, %v10730_v20  ;;  %10651 = vst.msk [vmem:[%s23521_s3 + $0x48] sm:$0xff] %vm15_vm3, %v10570_v19  ;;  %v9474_v30 = vadd.f32 %v9184_v24, %v8333_v22  ;;  %13625 = vmatprep.mubr.msk.bf16.mxu1 %vm14207_vm1, %v14206_v0  ;;  %v21819_v22 = vld [vmem:[%s23520_s0 + $0x118] sm:$0xff]  }
 0x570   :  { %13787 = vmatprep.mubr.msk.bf16.mxu0 %vm14207_vm1, %v14206_v0  ;;  %11141 = vst.msk [vmem:[%s23521_s3 + $0x30] sm:$0xff] %vm15_vm3, %v11060_v23  ;;  %v9717_v32 = vld [vmem:[%s23521_s3 + $0x50] sm:$0xff]  ;;  %v13527_v33 = vpop.f32.mrf.mxu1  ;;  %v13689_v34 = vpop.f32.mrf.mxu0  ;;  %v10058_v20 = vsel %vm9993_vm9, %v10055_v31, %v10057_v2  ;;  %v8337_v23 = vld [vmem:[%s23521_s3 + $0x80] sm:$0xff]  ;;  %v21840_v31 = vor.u32 %v8919_v16, %v8916_v14 }
 0x571   :  { %vm10899_vm4 = vcmp.gt.f32.partialorder %v10818_v29, 0.0  ;;  %v10980_v35 = vmul.f32 0.1, %v10818_v29  ;;  %9555 = vst.msk [vmem:[%s23521_s3 + $0x60] sm:$0xff] %vm15_vm3, %v9474_v30  ;;  %v10571_v36 = vadd.f32 %v10275_v25, %v9717_v32  ;;  %v8923_v32 = vshrl.u32 %v14191_v17, 16 }
 0x572   :  { %v10731_v38 = vld [vmem:[%s23521_s3 + $0x40] sm:$0xff]  ;;  %v9187_v40 = vpop.f32.mrf.mxu1  ;;  %v10278_v41 = vpop.f32.mrf.mxu0  ;;  %v8926_v33 = vshll.u32 %v14191_v17, 16  ;;  %v8340_v17 = vld [vmem:[%s23521_s3 + $0x98] sm:$0xff] }
 0x573   :  { %v11061_v47 = vsel %vm10899_vm4, %v10818_v29, %v10980_v35  ;;  %v10819_v37 = vadd.f32 %v21449_v21, %v10731_v38  ;;  %10652 = vst.msk [vmem:[%s23521_s3 + $0x50] sm:$0xff] %vm15_vm3, %v10571_v36  ;;  %v9475_v48 = vadd.f32 %v9187_v40, %v8334_v39  ;;  %v10059_v38 = vrot.slane %v21819_v22, 3 }
 0x574   :  { %11142 = vst.msk [vmem:[%s23521_s3 + $0x38] sm:$0xff] %vm15_vm3, %v11061_v47  ;;  %v9718_v51 = vld [vmem:[%s23521_s3 + $0x58] sm:$0xff]  ;;  %v13528_v52 = vpop.f32.mrf.mxu1  ;;  %v13690_v53 = vpop.f32.mrf.mxu0 }
 0x575   :  { %vm10900_vm5 = vcmp.gt.f32.partialorder %v10819_v37, 0.0  ;;  %v10981_v44 = vmul.f32 0.1, %v10819_v37  ;;  %9556 = vst.msk [vmem:[%s23521_s3 + $0x68] sm:$0xff] %vm15_vm3, %v9475_v48  ;;  %v10572_v54 = vadd.f32 %v10278_v41, %v9718_v51  ;;  %v8921_v48 = vsel %vm8607_vm8, %v21771_v59, %v21840_v31  ;;  %v14193_v52 = vld [vmem:[%s23520_s0 + $0x130] sm:$0xff]  }
 0x576   :  { %v10732_v55 = vld [vmem:[%s23521_s3 + $0x48] sm:$0xff]  ;;  %v9192_v57 = vpop.f32.mrf.mxu1  ;;  %13626 = vmatmul.mubr.msk.bf16.gmra.mxu1 %vm463_vm2, %v8903_v42  ;;  %v10283_v58 = vpop.f32.mrf.mxu0  ;;  %13788 = vmatmul.mubr.msk.bf16.gmra.mxu0 %vm463_vm2, %v10056_v49  ;;  %v8925_v49 = vrot.slane %v8923_v32, 2  ;;  %v8928_v51 = vrot.slane %v8926_v33, 3 }
 0x577   :  { %v11062_v62 = vsel %vm10900_vm5, %v10819_v37, %v10981_v44  ;;  %v10820_v63 = vadd.f32 %v21449_v21, %v10732_v55  ;;  %10653 = vst.msk [vmem:[%s23521_s3 + $0x58] sm:$0xff] %vm15_vm3, %v10572_v54  ;;  %v9476_v1 = vadd.f32 %v9192_v57, %v8335_v56  ;;  %13629 = vmatprep.mubr.msk.bf16.mxu1 %vm14207_vm1, %v14206_v0  ;;  %v21888_v56 = vld [vmem:[%s23520_s0 + $0x120] sm:$0xff]  }
 0x578   :  { %13791 = vmatprep.mubr.msk.bf16.mxu0 %vm14207_vm1, %v14206_v0  ;;  %11143 = vst.msk [vmem:[%s23521_s3 + $0x40] sm:$0xff] %vm15_vm3, %v11062_v62  ;;  %v9719_v3 = vld [vmem:[%s23521_s3 + $0x60] sm:$0xff]  ;;  %v13531_v4 = vpop.f32.mrf.mxu1  ;;  %v13693_v5 = vpop.f32.mrf.mxu0  ;;  %v10060_v55 = vsel %vm9993_vm9, %v10057_v2, %v10059_v38  ;;  %v8339_v62 = vld [vmem:[%s23521_s3 + $0x90] sm:$0xff]  ;;  %v21909_v2 = vor.u32 %v8928_v51, %v8925_v49 }
 0x579   :  { %vm10901_vm6 = vcmp.gt.f32.partialorder %v10820_v63, 0.0  ;;  %v10982_v6 = vmul.f32 0.1, %v10820_v63  ;;  %9557 = vst.msk [vmem:[%s23521_s3 + $0x70] sm:$0xff] %vm15_vm3, %v9476_v1  ;;  %v10573_v7 = vadd.f32 %v10283_v58, %v9719_v3  ;;  %v8932_v3 = vshrl.u32 %v14193_v52, 16 }
 0x57a   :  { %v10733_v10 = vld [vmem:[%s23521_s3 + $0x50] sm:$0xff]  ;;  %v9195_v12 = vpop.f32.mrf.mxu1  ;;  %v10286_v8 = vpop.f32.mrf.mxu0  ;;  %v8935_v4 = vshll.u32 %v14193_v52, 16  ;;  %v8342_v52 = vld [vmem:[%s23521_s3 + $0xa8] sm:$0xff] }
 0x57b   :  { %v11063_v18 = vsel %vm10901_vm6, %v10820_v63, %v10982_v6  ;;  %v10821_v9 = vadd.f32 %v21449_v21, %v10733_v10  ;;  %10654 = vst.msk [vmem:[%s23521_s3 + $0x60] sm:$0xff] %vm15_vm3, %v10573_v7  ;;  %v9477_v19 = vadd.f32 %v9195_v12, %v8336_v11  ;;  %v10061_v10 = vrot.slane %v21888_v56, 3 }
 0x57c   :  { %11144 = vst.msk [vmem:[%s23521_s3 + $0x48] sm:$0xff] %vm15_vm3, %v11063_v18  ;;  %v9720_v24 = vld [vmem:[%s23521_s3 + $0x68] sm:$0xff]  ;;  %v13532_v25 = vpop.f32.mrf.mxu1  ;;  %v13694_v26 = vpop.f32.mrf.mxu0 }
 0x57d   :  { %vm10902_vm7 = vcmp.gt.f32.partialorder %v10821_v9, 0.0  ;;  %v10983_v15 = vmul.f32 0.1, %v10821_v9  ;;  %9558 = vst.msk [vmem:[%s23521_s3 + $0x78] sm:$0xff] %vm15_vm3, %v9477_v19  ;;  %v10574_v27 = vadd.f32 %v10286_v8, %v9720_v24  ;;  %v8930_v19 = vsel %vm8607_vm8, %v21840_v31, %v21909_v2  ;;  %v14195_v25 = vld [vmem:[%s23520_s0 + $0x138] sm:$0xff]  }
 0x57e   :  { %v10734_v28 = vld [vmem:[%s23521_s3 + $0x58] sm:$0xff]  ;;  %v9200_v29 = vpop.f32.mrf.mxu1  ;;  %13630 = vmatmul.mubr.msk.bf16.gmra.mxu1 %vm463_vm2, %v8912_v13  ;;  %v10291_v30 = vpop.f32.mrf.mxu0  ;;  %13792 = vmatmul.mubr.msk.bf16.gmra.mxu0 %vm463_vm2, %v10058_v20  ;;  %v8934_v20 = vrot.slane %v8932_v3, 2  ;;  %v8937_v24 = vrot.slane %v8935_v4, 3 }
 0x57f   :  { %v11064_v34 = vsel %vm10902_vm7, %v10821_v9, %v10983_v15  ;;  %v10822_v35 = vadd.f32 %v21449_v21, %v10734_v28  ;;  %10655 = vst.msk [vmem:[%s23521_s3 + $0x68] sm:$0xff] %vm15_vm3, %v10574_v27  ;;  %v9478_v36 = vadd.f32 %v9200_v29, %v8337_v23  ;;  %13633 = vmatprep.mubr.msk.bf16.mxu1 %vm14207_vm1, %v14206_v0  ;;  %v21957_v23 = vld [vmem:[%s23520_s0 + $0x128] sm:$0xff]  }
 0x580   :  { %13795 = vmatprep.mubr.msk.bf16.mxu0 %vm14207_vm1, %v14206_v0  ;;  %11145 = vst.msk [vmem:[%s23521_s3 + $0x50] sm:$0xff] %vm15_vm3, %v11064_v34  ;;  %v9721_v39 = vld [vmem:[%s23521_s3 + $0x70] sm:$0xff]  ;;  %v13535_v40 = vpop.f32.mrf.mxu1  ;;  %v13697_v41 = vpop.f32.mrf.mxu0  ;;  %v10062_v28 = vsel %vm9993_vm9, %v10059_v38, %v10061_v10  ;;  %v8341_v34 = vld [vmem:[%s23521_s3 + $0xa0] sm:$0xff]  ;;  %v21978_v38 = vor.u32 %v8937_v24, %v8934_v20 }
 0x581   :  { %vm10903_vm10 = vcmp.gt.f32.partialorder %v10822_v35, 0.0  ;;  %v10984_v42 = vmul.f32 0.1, %v10822_v35  ;;  %9559 = vst.msk [vmem:[%s23521_s3 + $0x80] sm:$0xff] %vm15_vm3, %v9478_v36  ;;  %v10575_v43 = vadd.f32 %v10291_v30, %v9721_v39  ;;  %v8941_v39 = vshrl.u32 %v14195_v25, 16 }
 0x582   :  { %v10735_v45 = vld [vmem:[%s23521_s3 + $0x60] sm:$0xff]  ;;  %v9203_v47 = vpop.f32.mrf.mxu1  ;;  %v10294_v37 = vpop.f32.mrf.mxu0  ;;  %v8944_v40 = vshll.u32 %v14195_v25, 16  ;;  %v8344_v25 = vld [vmem:[%s23521_s3 + $0xb8] sm:$0xff] }
 0x583   :  { %v11065_v53 = vsel %vm10903_vm10, %v10822_v35, %v10984_v42  ;;  %v10823_v44 = vadd.f32 %v21449_v21, %v10735_v45  ;;  %10656 = vst.msk [vmem:[%s23521_s3 + $0x70] sm:$0xff] %vm15_vm3, %v10575_v43  ;;  %v9479_v54 = vadd.f32 %v9203_v47, %v8338_v46  ;;  %v10063_v45 = vrot.slane %v21957_v23, 3 }
 0x584   :  { %11146 = vst.msk [vmem:[%s23521_s3 + $0x58] sm:$0xff] %vm15_vm3, %v11065_v53  ;;  %v9722_v57 = vld [vmem:[%s23521_s3 + $0x78] sm:$0xff]  ;;  %v13536_v58 = vpop.f32.mrf.mxu1  ;;  %v13698_v59 = vpop.f32.mrf.mxu0 }
 0x585   :  { %vm10904_vm11 = vcmp.gt.f32.partialorder %v10823_v44, 0.0  ;;  %v10985_v50 = vmul.f32 0.1, %v10823_v44  ;;  %9560 = vst.msk [vmem:[%s23521_s3 + $0x88] sm:$0xff] %vm15_vm3, %v9479_v54  ;;  %v10576_v60 = vadd.f32 %v10294_v37, %v9722_v57  ;;  %v8939_v54 = vsel %vm8607_vm8, %v21909_v2, %v21978_v38  ;;  %v14197_v58 = vld [vmem:[%s23520_s0 + $0x140] sm:$0xff]  }
 0x586   :  { %v10736_v61 = vld [vmem:[%s23521_s3 + $0x68] sm:$0xff]  ;;  %v9208_v63 = vpop.f32.mrf.mxu1  ;;  %13634 = vmatmul.mubr.msk.bf16.gmra.mxu1 %vm463_vm2, %v8921_v48  ;;  %v10299_v1 = vpop.f32.mrf.mxu0  ;;  %13796 = vmatmul.mubr.msk.bf16.gmra.mxu0 %vm463_vm2, %v10060_v55  ;;  %v8943_v55 = vrot.slane %v8941_v39, 2  ;;  %v8946_v57 = vrot.slane %v8944_v40, 3 }
 0x587   :  { %v11066_v5 = vsel %vm10904_vm11, %v10823_v44, %v10985_v50  ;;  %v10824_v6 = vadd.f32 %v21449_v21, %v10736_v61  ;;  %10657 = vst.msk [vmem:[%s23521_s3 + $0x78] sm:$0xff] %vm15_vm3, %v10576_v60  ;;  %v9480_v7 = vadd.f32 %v9208_v63, %v8339_v62  ;;  %13637 = vmatprep.mubr.msk.bf16.mxu1 %vm14207_vm1, %v14206_v0  ;;  %v22026_v62 = vld [vmem:[%s23520_s0 + $0x130] sm:$0xff]  }
 0x588   :  { %13799 = vmatprep.mubr.msk.bf16.mxu0 %vm14207_vm1, %v14206_v0  ;;  %11147 = vst.msk [vmem:[%s23521_s3 + $0x60] sm:$0xff] %vm15_vm3, %v11066_v5  ;;  %v9723_v11 = vld [vmem:[%s23521_s3 + $0x80] sm:$0xff]  ;;  %v13539_v12 = vpop.f32.mrf.mxu1  ;;  %v13701_v8 = vpop.f32.mrf.mxu0  ;;  %v10064_v61 = vsel %vm9993_vm9, %v10061_v10, %v10063_v45  ;;  %v8343_v5 = vld [vmem:[%s23521_s3 + $0xb0] sm:$0xff]  ;;  %v22047_v10 = vor.u32 %v8946_v57, %v8943_v55 }
 0x589   :  { %vm10905_vm12 = vcmp.gt.f32.partialorder %v10824_v6, 0.0  ;;  %v10986_v13 = vmul.f32 0.1, %v10824_v6  ;;  %9561 = vst.msk [vmem:[%s23521_s3 + $0x90] sm:$0xff] %vm15_vm3, %v9480_v7  ;;  %v10577_v14 = vadd.f32 %v10299_v1, %v9723_v11  ;;  %v8950_v11 = vshrl.u32 %v14197_v58, 16 }
 0x58a   :  { %v10737_v16 = vld [vmem:[%s23521_s3 + $0x70] sm:$0xff]  ;;  %v9211_v18 = vpop.f32.mrf.mxu1  ;;  %v10302_v9 = vpop.f32.mrf.mxu0  ;;  %v8953_v12 = vshll.u32 %v14197_v58, 16  ;;  %v8346_v58 = vld [vmem:[%s23521_s3 + $0xc8] sm:$0xff] }
 0x58b   :  { %v11067_v26 = vsel %vm10905_vm12, %v10824_v6, %v10986_v13  ;;  %v10825_v15 = vadd.f32 %v21449_v21, %v10737_v16  ;;  %10658 = vst.msk [vmem:[%s23521_s3 + $0x80] sm:$0xff] %vm15_vm3, %v10577_v14  ;;  %v9481_v27 = vadd.f32 %v9211_v18, %v8340_v17  ;;  %v10065_v16 = vrot.slane %v22026_v62, 3 }
 0x58c   :  { %11148 = vst.msk [vmem:[%s23521_s3 + $0x68] sm:$0xff] %vm15_vm3, %v11067_v26  ;;  %v9724_v29 = vld [vmem:[%s23521_s3 + $0x88] sm:$0xff]  ;;  %v13540_v30 = vpop.f32.mrf.mxu1  ;;  %v13702_v31 = vpop.f32.mrf.mxu0 }
 0x58d   :  { %vm10906_vm13 = vcmp.gt.f32.partialorder %v10825_v15, 0.0  ;;  %v10987_v22 = vmul.f32 0.1, %v10825_v15  ;;  %9562 = vst.msk [vmem:[%s23521_s3 + $0x98] sm:$0xff] %vm15_vm3, %v9481_v27  ;;  %v10578_v32 = vadd.f32 %v10302_v9, %v9724_v29  ;;  %v8948_v27 = vsel %vm8607_vm8, %v21978_v38, %v22047_v10  ;;  %v14199_v30 = vld [vmem:[%s23520_s0 + $0x148] sm:$0xff]  }
 0x58e   :  { %v10738_v33 = vld [vmem:[%s23521_s3 + $0x78] sm:$0xff]  ;;  %v9216_v35 = vpop.f32.mrf.mxu1  ;;  %13638 = vmatmul.mubr.msk.bf16.gmra.mxu1 %vm463_vm2, %v8930_v19  ;;  %v10307_v36 = vpop.f32.mrf.mxu0  ;;  %13800 = vmatmul.mubr.msk.bf16.gmra.mxu0 %vm463_vm2, %v10062_v28  ;;  %v8952_v28 = vrot.slane %v8950_v11, 2  ;;  %v8955_v29 = vrot.slane %v8953_v12, 3 }
 0x58f   :  { %v11068_v41 = vsel %vm10906_vm13, %v10825_v15, %v10987_v22  ;;  %v10826_v42 = vadd.f32 %v21449_v21, %v10738_v33  ;;  %10659 = vst.msk [vmem:[%s23521_s3 + $0x88] sm:$0xff] %vm15_vm3, %v10578_v32  ;;  %v9482_v43 = vadd.f32 %v9216_v35, %v8341_v34  ;;  %13641 = vmatprep.mubr.msk.bf16.mxu1 %vm14207_vm1, %v14206_v0  ;;  %v22095_v34 = vld [vmem:[%s23520_s0 + $0x138] sm:$0xff]  }
 0x590   :  { %13803 = vmatprep.mubr.msk.bf16.mxu0 %vm14207_vm1, %v14206_v0  ;;  %11149 = vst.msk [vmem:[%s23521_s3 + $0x70] sm:$0xff] %vm15_vm3, %v11068_v41  ;;  %v9725_v46 = vld [vmem:[%s23521_s3 + $0x90] sm:$0xff]  ;;  %v13543_v47 = vpop.f32.mrf.mxu1  ;;  %v13705_v37 = vpop.f32.mrf.mxu0  ;;  %v10066_v33 = vsel %vm9993_vm9, %v10063_v45, %v10065_v16  ;;  %v8345_v41 = vld [vmem:[%s23521_s3 + $0xc0] sm:$0xff]  ;;  %v22116_v45 = vor.u32 %v8955_v29, %v8952_v28  ;;  %v8348_v29 = vld [vmem:[%s23521_s3 + $0xd8] sm:$0xff] }
 0x591   :  { %vm10907_vm14 = vcmp.gt.f32.partialorder %v10826_v42, 0.0  ;;  %v10988_v48 = vmul.f32 0.1, %v10826_v42  ;;  %9563 = vst.msk [vmem:[%s23521_s3 + $0xa0] sm:$0xff] %vm15_vm3, %v9482_v43  ;;  %v10579_v49 = vadd.f32 %v10307_v36, %v9725_v46  ;;  %v8959_v46 = vshrl.u32 %v14199_v30, 16 }
 0x592   :  { %v10739_v51 = vld [vmem:[%s23521_s3 + $0x80] sm:$0xff]  ;;  %v9219_v53 = vpop.f32.mrf.mxu1  ;;  %v10310_v44 = vpop.f32.mrf.mxu0  ;;  %v8962_v47 = vshll.u32 %v14199_v30, 16 }
 0x593   :  { %v11069_v59 = vsel %vm10907_vm14, %v10826_v42, %v10988_v48  ;;  %v10827_v50 = vadd.f32 %v21449_v21, %v10739_v51  ;;  %10660 = vst.msk [vmem:[%s23521_s3 + $0x90] sm:$0xff] %vm15_vm3, %v10579_v49  ;;  %v9483_v60 = vadd.f32 %v9219_v53, %v8342_v52  ;;  %v10067_v51 = vrot.slane %v22095_v34, 3 }
 0x594   :  { %11150 = vst.msk [vmem:[%s23521_s3 + $0x78] sm:$0xff] %vm15_vm3, %v11069_v59  ;;  %v9726_v63 = vld [vmem:[%s23521_s3 + $0x98] sm:$0xff]  ;;  %v13544_v1 = vpop.f32.mrf.mxu1  ;;  %v13706_v2 = vpop.f32.mrf.mxu0 }
 0x595   :  { %vm10908_vm15 = vcmp.gt.f32.partialorder %v10827_v50, 0.0  ;;  %v10989_v56 = vmul.f32 0.1, %v10827_v50  ;;  %9564 = vst.msk [vmem:[%s23521_s3 + $0xa8] sm:$0xff] %vm15_vm3, %v9483_v60  ;;  %v10580_v3 = vadd.f32 %v10310_v44, %v9726_v63  ;;  %v8957_v60 = vsel %vm8607_vm8, %v22047_v10, %v22116_v45  ;;  %v14201_v1 = vld [vmem:[%s23520_s0 + $0x150] sm:$0x7f]  }
 0x596   :  { %v10740_v4 = vld [vmem:[%s23521_s3 + $0x88] sm:$0xff]  ;;  %v9224_v6 = vpop.f32.mrf.mxu1  ;;  %13642 = vmatmul.mubr.msk.bf16.gmra.mxu1 %vm463_vm2, %v8939_v54  ;;  %v10315_v7 = vpop.f32.mrf.mxu0  ;;  %13804 = vmatmul.mubr.msk.bf16.gmra.mxu0 %vm463_vm2, %v10064_v61  ;;  %v8961_v61 = vrot.slane %v8959_v46, 2  ;;  %v8964_v63 = vrot.slane %v8962_v47, 3  ;;  %v8349_v47 = vld [vmem:[%s23521_s3 + $0xe0] sm:$0xff] }
 0x597   :  { %v11070_v8 = vsel %vm10908_vm15, %v10827_v50, %v10989_v56  ;;  %v10828_v13 = vadd.f32 %v21449_v21, %v10740_v4  ;;  %10661 = vst.msk [vmem:[%s23521_s3 + $0x98] sm:$0xff] %vm15_vm3, %v10580_v3  ;;  %v9484_v14 = vadd.f32 %v9224_v6, %v8343_v5  ;;  %13645 = vmatprep.mubr.msk.bf16.mxu1 %vm14207_vm1, %v14206_v0  ;;  %v22164_v5 = vld [vmem:[%s23520_s0 + $0x140] sm:$0xff]  }
 0x598   :  { %13807 = vmatprep.mubr.msk.bf16.mxu0 %vm14207_vm1, %v14206_v0  ;;  %11151 = vst.msk [vmem:[%s23521_s3 + $0x80] sm:$0xff] %vm15_vm3, %v11070_v8  ;;  %v9727_v17 = vld [vmem:[%s23521_s3 + $0xa0] sm:$0xff]  ;;  %v13547_v18 = vpop.f32.mrf.mxu1  ;;  %v13709_v9 = vpop.f32.mrf.mxu0  ;;  %v10068_v4 = vsel %vm9993_vm9, %v10065_v16, %v10067_v51  ;;  %v8347_v8 = vld [vmem:[%s23521_s3 + $0xd0] sm:$0xff]  ;;  %v22185_v16 = vor.u32 %v8964_v63, %v8961_v61 }
 0x599   :  { %vm10909_vm0 = vcmp.gt.f32.partialorder %v10828_v13, 0.0  ;;  %v10990_v19 = vmul.f32 0.1, %v10828_v13  ;;  %9565 = vst.msk [vmem:[%s23521_s3 + $0xb0] sm:$0xff] %vm15_vm3, %v9484_v14  ;;  %v10581_v20 = vadd.f32 %v10315_v7, %v9727_v17  ;;  %v8968_v17 = vshrl.u32 %v14201_v1, 16 }
 0x59a   :  { %v10741_v24 = vld [vmem:[%s23521_s3 + $0x90] sm:$0xff]  ;;  %v9227_v26 = vpop.f32.mrf.mxu1  ;;  %v10318_v15 = vpop.f32.mrf.mxu0  ;;  %v8971_v18 = vshll.u32 %v14201_v1, 16 }
 0x59b   :  { %v11071_v31 = vsel %vm10909_vm0, %v10828_v13, %v10990_v19  ;;  %v10829_v22 = vadd.f32 %v21449_v21, %v10741_v24  ;;  %10662 = vst.msk [vmem:[%s23521_s3 + $0xa0] sm:$0xff] %vm15_vm3, %v10581_v20  ;;  %v9485_v32 = vadd.f32 %v9227_v26, %v8344_v25  ;;  %v10069_v24 = vrot.slane %v22164_v5, 3 }
 0x59c   :  { %11152 = vst.msk [vmem:[%s23521_s3 + $0x88] sm:$0xff] %vm15_vm3, %v11071_v31  ;;  %v9728_v35 = vld [vmem:[%s23521_s3 + $0xa8] sm:$0xff]  ;;  %v13548_v36 = vpop.f32.mrf.mxu1  ;;  %v13710_v38 = vpop.f32.mrf.mxu0 }
 0x59d   :  { %vm10910_vm4 = vcmp.gt.f32.partialorder %v10829_v22, 0.0  ;;  %v10991_v23 = vmul.f32 0.1, %v10829_v22  ;;  %9566 = vst.msk [vmem:[%s23521_s3 + $0xb8] sm:$0xff] %vm15_vm3, %v9485_v32  ;;  %v10582_v39 = vadd.f32 %v10318_v15, %v9728_v35  ;;  %v8970_v32 = vrot.slane %v8968_v17, 2 }
 0x59e   :  { %v10742_v40 = vld [vmem:[%s23521_s3 + $0x98] sm:$0xff]  ;;  %v9232_v42 = vpop.f32.mrf.mxu1  ;;  %13646 = vmatmul.mubr.msk.bf16.gmra.mxu1 %vm463_vm2, %v8948_v27  ;;  %v10323_v43 = vpop.f32.mrf.mxu0  ;;  %13808 = vmatmul.mubr.msk.bf16.gmra.mxu0 %vm463_vm2, %v10066_v33  ;;  %v8973_v33 = vrot.slane %v8971_v18, 3  ;;  %v22220_v36 = vld [vmem:[%s23522_s2] ss:$0 sm:$0xff] }
 0x59f   :  { %v11072_v37 = vsel %vm10910_vm4, %v10829_v22, %v10991_v23  ;;  %v10830_v48 = vadd.f32 %v21449_v21, %v10742_v40  ;;  %10663 = vst.msk [vmem:[%s23521_s3 + $0xa8] sm:$0xff] %vm15_vm3, %v10582_v39  ;;  %v9486_v49 = vadd.f32 %v9232_v42, %v8345_v41  ;;  %13649 = vmatprep.mubr.msk.bf16.mxu1 %vm14207_vm1, %v14206_v0  ;;  %v22235_v40 = vld [vmem:[%s23520_s0 + $0x148] sm:$0xff]  }
 0x5a0   :  { %13811 = vmatprep.mubr.msk.bf16.mxu0 %vm14207_vm1, %v14206_v0  ;;  %11153 = vst.msk [vmem:[%s23521_s3 + $0x90] sm:$0xff] %vm15_vm3, %v11072_v37  ;;  %v9729_v52 = vld [vmem:[%s23521_s3 + $0xb0] sm:$0xff]  ;;  %v13551_v53 = vpop.f32.mrf.mxu1  ;;  %v13713_v44 = vpop.f32.mrf.mxu0  ;;  %v8966_v22 = vsel %vm8607_vm8, %v22116_v45, %v22185_v16  ;;  %v10070_v39 = vsel %vm9993_vm9, %v10067_v51, %v10069_v24 }
 0x5a1   :  { %vm10911_vm5 = vcmp.gt.f32.partialorder %v10830_v48, 0.0  ;;  %v10992_v54 = vmul.f32 0.1, %v10830_v48  ;;  %9567 = vst.msk [vmem:[%s23521_s3 + $0xc0] sm:$0xff] %vm15_vm3, %v9486_v49  ;;  %v10583_v55 = vadd.f32 %v10323_v43, %v9729_v52  ;;  %v22256_v49 = vor.u32 %v8973_v33, %v8970_v32 }
 0x5a2   :  { %v10743_v57 = vld [vmem:[%s23521_s3 + $0xa0] sm:$0xff]  ;;  %v9235_v59 = vpop.f32.mrf.mxu1  ;;  %v10326_v50 = vpop.f32.mrf.mxu0  ;;  %v10071_v44 = vrot.slane %v22235_v40, 3 }
 0x5a3   :  { %v11073_v2 = vsel %vm10911_vm5, %v10830_v48, %v10992_v54  ;;  %v10831_v56 = vadd.f32 %v21449_v21, %v10743_v57  ;;  %10664 = vst.msk [vmem:[%s23521_s3 + $0xb0] sm:$0xff] %vm15_vm3, %v10583_v55  ;;  %v9487_v3 = vadd.f32 %v9235_v59, %v8346_v58  ;;  %v8975_v1 = vsel %vm8607_vm8, %v22185_v16, %v22256_v49  ;;  %v8353_v40 = vld [vmem:[%s23521_s3 + $0x100] sm:$0xff] }
 0x5a4   :  { %11154 = vst.msk [vmem:[%s23521_s3 + $0x98] sm:$0xff] %vm15_vm3, %v11073_v2  ;;  %v9730_v6 = vld [vmem:[%s23521_s3 + $0xb8] sm:$0xff]  ;;  %v13552_v7 = vpop.f32.mrf.mxu1  ;;  %v13714_v10 = vpop.f32.mrf.mxu0 }
 0x5a5   :  { %vm10912_vm6 = vcmp.gt.f32.partialorder %v10831_v56, 0.0  ;;  %v10993_v62 = vmul.f32 0.1, %v10831_v56  ;;  %9568 = vst.msk [vmem:[%s23521_s3 + $0xc8] sm:$0xff] %vm15_vm3, %v9487_v3  ;;  %v10584_v11 = vadd.f32 %v10326_v50, %v9730_v6  ;;  %v22299_v6 = vld [vmem:[%s23520_s0 + $0x150] sm:$0x7f]  }
 0x5a6   :  { %v10744_v12 = vld [vmem:[%s23521_s3 + $0xa8] sm:$0xff]  ;;  %v9240_v13 = vpop.f32.mrf.mxu1  ;;  %13650 = vmatmul.mubr.msk.bf16.gmra.mxu1 %vm463_vm2, %v8957_v60  ;;  %v10331_v14 = vpop.f32.mrf.mxu0  ;;  %13812 = vmatmul.mubr.msk.bf16.gmra.mxu0 %vm463_vm2, %v10068_v4  ;;  %v10072_v4 = vsel %vm9993_vm9, %v10069_v24, %v10071_v44 }
 0x5a7   :  { %v11074_v9 = vsel %vm10912_vm6, %v10831_v56, %v10993_v62  ;;  %v10832_v19 = vadd.f32 %v21449_v21, %v10744_v12  ;;  %10665 = vst.msk [vmem:[%s23521_s3 + $0xb8] sm:$0xff] %vm15_vm3, %v10584_v11  ;;  %v9488_v20 = vadd.f32 %v9240_v13, %v8347_v8  ;;  %13653 = vmatprep.mubr.msk.bf16.mxu1 %vm14207_vm1, %v14206_v0  ;;  %v8350_v60 = vld [vmem:[%s23521_s3 + $0xe8] sm:$0xff]  ;;  %v8351_v8 = vld [vmem:[%s23521_s3 + $0xf0] sm:$0xff] }
 0x5a8   :  { %13815 = vmatprep.mubr.msk.bf16.mxu0 %vm14207_vm1, %v14206_v0  ;;  %11155 = vst.msk [vmem:[%s23521_s3 + $0xa0] sm:$0xff] %vm15_vm3, %v11074_v9  ;;  %v9731_v21 = vld [vmem:[%s23521_s3 + $0xc0] sm:$0xff]  ;;  %v13555_v25 = vpop.f32.mrf.mxu1  ;;  %v13717_v26 = vpop.f32.mrf.mxu0  ;;  %v10073_v9 = vrot.slane %v22299_v6, 3 }
 0x5a9   :  { %vm10913_vm7 = vcmp.gt.f32.partialorder %v10832_v19, 0.0  ;;  %v10994_v15 = vmul.f32 0.1, %v10832_v19  ;;  %9569 = vst.msk [vmem:[%s23521_s3 + $0xd0] sm:$0xff] %vm15_vm3, %v9488_v20  ;;  %v10585_v27 = vadd.f32 %v10331_v14, %v9731_v21 }
 0x5aa   :  { %v10745_v28 = vld [vmem:[%s23521_s3 + $0xb0] sm:$0xff]  ;;  %v9243_v30 = vpop.f32.mrf.mxu1  ;;  %v10334_v31 = vpop.f32.mrf.mxu0 }
 0x5ab   :  { %v11075_v35 = vsel %vm10913_vm7, %v10832_v19, %v10994_v15  ;;  %v10833_v38 = vadd.f32 %v22220_v36, %v10745_v28  ;;  %10666 = vst.msk [vmem:[%s23521_s3 + $0xc0] sm:$0xff] %vm15_vm3, %v10585_v27  ;;  %v9489_v23 = vadd.f32 %v9243_v30, %v8348_v29  ;;  %v8352_v15 = vld [vmem:[%s23521_s3 + $0xf8] sm:$0xff] }
 0x5ac   :  { %11156 = vst.msk [vmem:[%s23521_s3 + $0xa8] sm:$0xff] %vm15_vm3, %v11075_v35  ;;  %v9732_v41 = vld [vmem:[%s23521_s3 + $0xc8] sm:$0xff]  ;;  %v13556_v42 = vpop.f32.mrf.mxu1  ;;  %v13718_v43 = vpop.f32.mrf.mxu0 }
 0x5ad   :  { %vm10914_vm10 = vcmp.gt.f32.partialorder %v10833_v38, 0.0  ;;  %v10995_v34 = vmul.f32 0.1, %v10833_v38  ;;  %9570 = vst.msk [vmem:[%s23521_s3 + $0xd8] sm:$0xff] %vm15_vm3, %v9489_v23  ;;  %v10586_v45 = vadd.f32 %v10334_v31, %v9732_v41 }
 0x5ae   :  { %v10746_v46 = vld [vmem:[%s23521_s3 + $0xb8] sm:$0xff]  ;;  %v9248_v37 = vpop.f32.mrf.mxu1  ;;  %13654 = vmatmul.mubr.msk.bf16.gmra.mxu1 %vm463_vm2, %v8966_v22  ;;  %v10339_v48 = vpop.f32.mrf.mxu0  ;;  %13816 = vmatmul.mubr.msk.bf16.gmra.mxu0 %vm463_vm2, %v10070_v39  ;;  %v10074_v22 = vsel %vm9993_vm9, %v10071_v44, %v10073_v9 }
 0x5af   :  { %v11076_v51 = vsel %vm10914_vm10, %v10833_v38, %v10995_v34  ;;  %v10834_v52 = vadd.f32 %v22220_v36, %v10746_v46  ;;  %10667 = vst.msk [vmem:[%s23521_s3 + $0xc8] sm:$0xff] %vm15_vm3, %v10586_v45  ;;  %v9490_v53 = vadd.f32 %v9248_v37, %v8349_v47  ;;  %13657 = vmatprep.mubr.msk.bf16.mxu1 %vm14207_vm1, %v14206_v0 }
 0x5b0   :  { %13819 = vmatprep.mubr.msk.bf16.mxu0 %vm14207_vm1, %v14206_v0  ;;  %11157 = vst.msk [vmem:[%s23521_s3 + $0xb0] sm:$0xff] %vm15_vm3, %v11076_v51  ;;  %v9733_v54 = vld [vmem:[%s23521_s3 + $0xd0] sm:$0xff]  ;;  %v13559_v55 = vpop.f32.mrf.mxu1  ;;  %v13721_v57 = vpop.f32.mrf.mxu0  ;;  %v8354_v51 = vld [vmem:[%s23521_s3 + $0x108] sm:$0xff] }
 0x5b1   :  { %vm10915_vm11 = vcmp.gt.f32.partialorder %v10834_v52, 0.0  ;;  %v10996_v58 = vmul.f32 0.1, %v10834_v52  ;;  %9571 = vst.msk [vmem:[%s23521_s3 + $0xe0] sm:$0xff] %vm15_vm3, %v9490_v53  ;;  %v10587_v59 = vadd.f32 %v10339_v48, %v9733_v54 }
 0x5b2   :  { %v10747_v50 = vld [vmem:[%s23521_s3 + $0xc0] sm:$0xff]  ;;  %v9251_v61 = vpop.f32.mrf.mxu1  ;;  %v10342_v63 = vpop.f32.mrf.mxu0 }
 0x5b3   :  { %v11077_v2 = vsel %vm10915_vm11, %v10834_v52, %v10996_v58  ;;  %v10835_v56 = vadd.f32 %v22220_v36, %v10747_v50  ;;  %10668 = vst.msk [vmem:[%s23521_s3 + $0xd0] sm:$0xff] %vm15_vm3, %v10587_v59  ;;  %v9491_v3 = vadd.f32 %v9251_v61, %v8350_v60 }
 0x5b4   :  { %11158 = vst.msk [vmem:[%s23521_s3 + $0xb8] sm:$0xff] %vm15_vm3, %v11077_v2  ;;  %v9734_v7 = vld [vmem:[%s23521_s3 + $0xd8] sm:$0xff]  ;;  %v13560_v10 = vpop.f32.mrf.mxu1  ;;  %v13722_v62 = vpop.f32.mrf.mxu0 }
 0x5b5   :  { %vm10916_vm8 = vcmp.gt.f32.partialorder %v10835_v56, 0.0  ;;  %v10997_v5 = vmul.f32 0.1, %v10835_v56  ;;  %9572 = vst.msk [vmem:[%s23521_s3 + $0xe8] sm:$0xff] %vm15_vm3, %v9491_v3  ;;  %v10588_v11 = vadd.f32 %v10342_v63, %v9734_v7  ;;  %v8355_v63 = vld [vmem:[%s23521_s3 + $0x110] sm:$0xff] }
 0x5b6   :  { %v10748_v12 = vld [vmem:[%s23521_s3 + $0xc8] sm:$0xff]  ;;  %v9256_v13 = vpop.f32.mrf.mxu1  ;;  %13658 = vmatmul.mubr.msk.bf16.gmra.mxu1 %vm463_vm2, %v8975_v1  ;;  %v10347_v14 = vpop.f32.mrf.mxu0  ;;  %13820 = vmatmul.mubr.msk.bf16.gmra.mxu0 %vm463_vm2, %v10072_v4 }
 0x5b7   :  { %v11078_v16 = vsel %vm10916_vm8, %v10835_v56, %v10997_v5  ;;  %v10836_v17 = vadd.f32 %v22220_v36, %v10748_v12  ;;  %10669 = vst.msk [vmem:[%s23521_s3 + $0xd8] sm:$0xff] %vm15_vm3, %v10588_v11  ;;  %v9492_v18 = vadd.f32 %v9256_v13, %v8351_v8  ;;  %13661 = vmatprep.mubr.msk.bf16.mxu1 %vm14207_vm1, %v14206_v0  ;;  %v8356_v12 = vld [vmem:[%s23521_s3 + $0x118] sm:$0xff] }
 0x5b8   :  { %13823 = vmatprep.mubr.msk.bf16.mxu0 %vm14207_vm1, %v14206_v0  ;;  %11159 = vst.msk [vmem:[%s23521_s3 + $0xc0] sm:$0xff] %vm15_vm3, %v11078_v16  ;;  %v9735_v19 = vld [vmem:[%s23521_s3 + $0xe0] sm:$0xff]  ;;  %v13563_v20 = vpop.f32.mrf.mxu1  ;;  %v13725_v24 = vpop.f32.mrf.mxu0 }
 0x5b9   :  { %vm10917_vm12 = vcmp.gt.f32.partialorder %v10836_v17, 0.0  ;;  %v10998_v21 = vmul.f32 0.1, %v10836_v17  ;;  %9573 = vst.msk [vmem:[%s23521_s3 + $0xf0] sm:$0xff] %vm15_vm3, %v9492_v18  ;;  %v10589_v25 = vadd.f32 %v10347_v14, %v9735_v19 }
 0x5ba   :  { %v10749_v26 = vld [vmem:[%s23521_s3 + $0xd0] sm:$0xff]  ;;  %v9259_v27 = vpop.f32.mrf.mxu1  ;;  %v10350_v28 = vpop.f32.mrf.mxu0 }
 0x5bb   :  { %v11079_v29 = vsel %vm10917_vm12, %v10836_v17, %v10998_v21  ;;  %v10837_v30 = vadd.f32 %v22220_v36, %v10749_v26  ;;  %10670 = vst.msk [vmem:[%s23521_s3 + $0xe0] sm:$0xff] %vm15_vm3, %v10589_v25  ;;  %v9493_v31 = vadd.f32 %v9259_v27, %v8352_v15  ;;  %v8357_v25 = vld [vmem:[%s23521_s3 + $0x120] sm:$0xff] }
 0x5bc   :  { %11160 = vst.msk [vmem:[%s23521_s3 + $0xc8] sm:$0xff] %vm15_vm3, %v11079_v29  ;;  %v9736_v32 = vld [vmem:[%s23521_s3 + $0xe8] sm:$0xff]  ;;  %v13564_v33 = vpop.f32.mrf.mxu1  ;;  %v13726_v35 = vpop.f32.mrf.mxu0 }
 0x5bd   :  { %vm10918_vm13 = vcmp.gt.f32.partialorder %v10837_v30, 0.0  ;;  %v10999_v38 = vmul.f32 0.1, %v10837_v30  ;;  %9574 = vst.msk [vmem:[%s23521_s3 + $0xf8] sm:$0xff] %vm15_vm3, %v9493_v31  ;;  %v10590_v23 = vadd.f32 %v10350_v28, %v9736_v32 }
 0x5be   :  { %v10750_v39 = vld [vmem:[%s23521_s3 + $0xd8] sm:$0xff]  ;;  %v9264_v41 = vpop.f32.mrf.mxu1  ;;  %13662 = vmatmul.mubr.msk.bf16.gmra.mxu1 %vm463_vm2, %v22256_v49  ;;  %v10355_v42 = vpop.f32.mrf.mxu0  ;;  %13824 = vmatmul.mubr.msk.bf16.gmra.mxu0 %vm463_vm2, %v10074_v22 }
 0x5bf   :  { %v11080_v43 = vsel %vm10918_vm13, %v10837_v30, %v10999_v38  ;;  %v10838_v34 = vadd.f32 %v22220_v36, %v10750_v39  ;;  %10671 = vst.msk [vmem:[%s23521_s3 + $0xe8] sm:$0xff] %vm15_vm3, %v10590_v23  ;;  %v9494_v45 = vadd.f32 %v9264_v41, %v8353_v40  ;;  %13827 = vmatprep.mubr.msk.bf16.mxu0 %vm14207_vm1, %v14206_v0  ;;  %v8358_v38 = vld [vmem:[%s23521_s3 + $0x128] sm:$0xff] }
 0x5c0   :  { %11161 = vst.msk [vmem:[%s23521_s3 + $0xd0] sm:$0xff] %vm15_vm3, %v11080_v43  ;;  %v9737_v46 = vld [vmem:[%s23521_s3 + $0xf0] sm:$0xff]  ;;  %v13567_v47 = vpop.f32.mrf.mxu1  ;;  %v13729_v37 = vpop.f32.mrf.mxu0 }
 0x5c1   :  { %vm10919_vm9 = vcmp.gt.f32.partialorder %v10838_v34, 0.0  ;;  %v11000_v48 = vmul.f32 0.1, %v10838_v34  ;;  %9575 = vst.msk [vmem:[%s23521_s3 + $0x100] sm:$0xff] %vm15_vm3, %v9494_v45  ;;  %v10591_v49 = vadd.f32 %v10355_v42, %v9737_v46 }
 0x5c2   :  { %v10751_v0 = vld [vmem:[%s23521_s3 + $0xe0] sm:$0xff]  ;;  %v9267_v52 = vpop.f32.mrf.mxu1  ;;  %v10358_v53 = vpop.f32.mrf.mxu0 }
 0x5c3   :  { %v11081_v44 = vsel %vm10919_vm9, %v10838_v34, %v11000_v48  ;;  %v10839_v54 = vadd.f32 %v22220_v36, %v10751_v0  ;;  %10672 = vst.msk [vmem:[%s23521_s3 + $0xf0] sm:$0xff] %vm15_vm3, %v10591_v49  ;;  %v9495_v55 = vadd.f32 %v9267_v52, %v8354_v51  ;;  %v8359_v48 = vld [vmem:[%s23521_s3 + $0x130] sm:$0xff] }
 0x5c4   :  { %11162 = vst.msk [vmem:[%s23521_s3 + $0xd8] sm:$0xff] %vm15_vm3, %v11081_v44  ;;  %v9738_v57 = vld [vmem:[%s23521_s3 + $0xf8] sm:$0xff]  ;;  %v13568_v58 = vpop.f32.mrf.mxu1  ;;  %v13730_v59 = vpop.f32.mrf.mxu0 }
 0x5c5   :  { %vm10920_vm1 = vcmp.gt.f32.partialorder %v10839_v54, 0.0  ;;  %v11001_v50 = vmul.f32 0.1, %v10839_v54  ;;  %9576 = vst.msk [vmem:[%s23521_s3 + $0x108] sm:$0xff] %vm15_vm3, %v9495_v55  ;;  %v10592_v60 = vadd.f32 %v10358_v53, %v9738_v57 }
 0x5c6   :  { %v10752_v61 = vld [vmem:[%s23521_s3 + $0xe8] sm:$0xff]  ;;  %v9272_v1 = vpop.f32.mrf.mxu1  ;;  %v10363_v2 = vpop.f32.mrf.mxu0  ;;  %13828 = vmatmul.mubr.msk.bf16.gmra.mxu0 %vm463_vm2, %v10073_v9 }
 0x5c7   :  { %v11082_v56 = vsel %vm10920_vm1, %v10839_v54, %v11001_v50  ;;  %v10840_v3 = vadd.f32 %v22220_v36, %v10752_v61  ;;  %10673 = vst.msk [vmem:[%s23521_s3 + $0xf8] sm:$0xff] %vm15_vm3, %v10592_v60  ;;  %v9496_v4 = vadd.f32 %v9272_v1, %v8355_v63  ;;  %v8360_v50 = vld [vmem:[%s23521_s3 + $0x138] sm:$0xff] }
 0x5c8   :  { %11163 = vst.msk [vmem:[%s23521_s3 + $0xe0] sm:$0xff] %vm15_vm3, %v11082_v56  ;;  %v9739_v6 = vld [vmem:[%s23521_s3 + $0x100] sm:$0xff]  ;;  %v13571_v7 = vpop.f32.mrf.mxu1  ;;  %v13733_v10 = vpop.f32.mrf.mxu0 }
 0x5c9   :  { %vm10921_vm2 = vcmp.gt.f32.partialorder %v10840_v3, 0.0  ;;  %v11002_v62 = vmul.f32 0.1, %v10840_v3  ;;  %9577 = vst.msk [vmem:[%s23521_s3 + $0x110] sm:$0xff] %vm15_vm3, %v9496_v4  ;;  %v10593_v5 = vadd.f32 %v10363_v2, %v9739_v6 }
 0x5ca   :  { %v10753_v11 = vld [vmem:[%s23521_s3 + $0xf0] sm:$0xff]  ;;  %v9275_v8 = vpop.f32.mrf.mxu1  ;;  %v10366_v13 = vpop.f32.mrf.mxu0 }
 0x5cb   :  { %v11083_v14 = vsel %vm10921_vm2, %v10840_v3, %v11002_v62  ;;  %v10841_v16 = vadd.f32 %v22220_v36, %v10753_v11  ;;  %10674 = vst.msk [vmem:[%s23521_s3 + $0x100] sm:$0xff] %vm15_vm3, %v10593_v5  ;;  %v9497_v17 = vadd.f32 %v9275_v8, %v8356_v12  ;;  %v8361_v62 = vld [vmem:[%s23521_s3 + $0x140] sm:$0xff] }
 0x5cc   :  { %11164 = vst.msk [vmem:[%s23521_s3 + $0xe8] sm:$0xff] %vm15_vm3, %v11083_v14  ;;  %v9740_v18 = vld [vmem:[%s23521_s3 + $0x108] sm:$0xff]  ;;  %v13572_v9 = vpop.f32.mrf.mxu1  ;;  %v13734_v19 = vpop.f32.mrf.mxu0 }
 0x5cd   :  { %vm10922_vm14 = vcmp.gt.f32.partialorder %v10841_v16, 0.0  ;;  %v11003_v20 = vmul.f32 0.1, %v10841_v16  ;;  %9578 = vst.msk [vmem:[%s23521_s3 + $0x118] sm:$0xff] %vm15_vm3, %v9497_v17  ;;  %v10594_v24 = vadd.f32 %v10366_v13, %v9740_v18 }
 0x5ce   :  { %v10754_v21 = vld [vmem:[%s23521_s3 + $0xf8] sm:$0xff]  ;;  %v9280_v26 = vpop.f32.mrf.mxu1  ;;  %v10371_v15 = vpop.f32.mrf.mxu0 }
 0x5cf   :  { %v11084_v27 = vsel %vm10922_vm14, %v10841_v16, %v11003_v20  ;;  %v10842_v28 = vadd.f32 %v22220_v36, %v10754_v21  ;;  %10675 = vst.msk [vmem:[%s23521_s3 + $0x108] sm:$0xff] %vm15_vm3, %v10594_v24  ;;  %v9498_v29 = vadd.f32 %v9280_v26, %v8357_v25  ;;  %v8362_v20 = vld [vmem:[%s23521_s3 + $0x148] sm:$0xff] }
 0x5d0   :  { %11165 = vst.msk [vmem:[%s23521_s3 + $0xf0] sm:$0xff] %vm15_vm3, %v11084_v27  ;;  %v9741_v30 = vld [vmem:[%s23521_s3 + $0x110] sm:$0xff]  ;;  %v13575_v31 = vpop.f32.mrf.mxu1  ;;  %v13737_v22 = vpop.f32.mrf.mxu0 }
 0x5d1   :  { %vm10923_vm15 = vcmp.gt.f32.partialorder %v10842_v28, 0.0  ;;  %v11004_v32 = vmul.f32 0.1, %v10842_v28  ;;  %9579 = vst.msk [vmem:[%s23521_s3 + $0x120] sm:$0xff] %vm15_vm3, %v9498_v29  ;;  %v10595_v33 = vadd.f32 %v10371_v15, %v9741_v30 }
 0x5d2   :  { %v10755_v35 = vld [vmem:[%s23521_s3 + $0x100] sm:$0xff]  ;;  %v9283_v23 = vpop.f32.mrf.mxu1  ;;  %v10374_v39 = vpop.f32.mrf.mxu0 }
 0x5d3   :  { %v11085_v40 = vsel %vm10923_vm15, %v10842_v28, %v11004_v32  ;;  %v10843_v41 = vadd.f32 %v22220_v36, %v10755_v35  ;;  %10676 = vst.msk [vmem:[%s23521_s3 + $0x110] sm:$0xff] %vm15_vm3, %v10595_v33  ;;  %v9499_v42 = vadd.f32 %v9283_v23, %v8358_v38  ;;  %v8363_v32 = vld [vmem:[%s23521_s3 + $0x150] sm:$0xff] }
 0x5d4   :  { %11166 = vst.msk [vmem:[%s23521_s3 + $0xf8] sm:$0xff] %vm15_vm3, %v11085_v40  ;;  %v9742_v43 = vld [vmem:[%s23521_s3 + $0x118] sm:$0xff]  ;;  %v13576_v34 = vpop.f32.mrf.mxu1  ;;  %v13738_v45 = vpop.f32.mrf.mxu0 }
 0x5d5   :  { %vm10924_vm0 = vcmp.gt.f32.partialorder %v10843_v41, 0.0  ;;  %v11005_v46 = vmul.f32 0.1, %v10843_v41  ;;  %9580 = vst.msk [vmem:[%s23521_s3 + $0x128] sm:$0xff] %vm15_vm3, %v9499_v42  ;;  %v10596_v47 = vadd.f32 %v10374_v39, %v9742_v43 }
 0x5d6   :  { %v10756_v37 = vld [vmem:[%s23521_s3 + $0x108] sm:$0xff]  ;;  %v9288_v49 = vpop.f32.mrf.mxu1  ;;  %v10379_v0 = vpop.f32.mrf.mxu0 }
 0x5d7   :  { %v11086_v51 = vsel %vm10924_vm0, %v10843_v41, %v11005_v46  ;;  %v10844_v52 = vadd.f32 %v22220_v36, %v10756_v37  ;;  %10677 = vst.msk [vmem:[%s23521_s3 + $0x118] sm:$0xff] %vm15_vm3, %v10596_v47  ;;  %v9500_v53 = vadd.f32 %v9288_v49, %v8359_v48  ;;  %v8364_v46 = vld [vmem:[%s23521_s3 + $0x158] sm:$0xff] }
 0x5d8   :  { %11167 = vst.msk [vmem:[%s23521_s3 + $0x100] sm:$0xff] %vm15_vm3, %v11086_v51  ;;  %v9743_v44 = vld [vmem:[%s23521_s3 + $0x120] sm:$0xff]  ;;  %v13579_v54 = vpop.f32.mrf.mxu1  ;;  %v13741_v55 = vpop.f32.mrf.mxu0 }
 0x5d9   :  { %vm10925_vm4 = vcmp.gt.f32.partialorder %v10844_v52, 0.0  ;;  %v11006_v57 = vmul.f32 0.1, %v10844_v52  ;;  %9581 = vst.msk [vmem:[%s23521_s3 + $0x130] sm:$0xff] %vm15_vm3, %v9500_v53  ;;  %v10597_v58 = vadd.f32 %v10379_v0, %v9743_v44 }
 0x5da   :  { %v10757_v59 = vld [vmem:[%s23521_s3 + $0x110] sm:$0xff]  ;;  %v9291_v60 = vpop.f32.mrf.mxu1  ;;  %v10382_v61 = vpop.f32.mrf.mxu0 }
 0x5db   :  { %v11087_v63 = vsel %vm10925_vm4, %v10844_v52, %v11006_v57  ;;  %v10845_v1 = vadd.f32 %v22220_v36, %v10757_v59  ;;  %10678 = vst.msk [vmem:[%s23521_s3 + $0x120] sm:$0xff] %vm15_vm3, %v10597_v58  ;;  %v9501_v2 = vadd.f32 %v9291_v60, %v8360_v50  ;;  %v8365_v57 = vld [vmem:[%s23521_s3 + $0x160] sm:$0xff] }
 0x5dc   :  { %11168 = vst.msk [vmem:[%s23521_s3 + $0x108] sm:$0xff] %vm15_vm3, %v11087_v63  ;;  %v9744_v56 = vld [vmem:[%s23521_s3 + $0x128] sm:$0xff]  ;;  %v13580_v3 = vpop.f32.mrf.mxu1  ;;  %v13742_v4 = vpop.f32.mrf.mxu0 }
 0x5dd   :  { %vm10926_vm5 = vcmp.gt.f32.partialorder %v10845_v1, 0.0  ;;  %v11007_v6 = vmul.f32 0.1, %v10845_v1  ;;  %9582 = vst.msk [vmem:[%s23521_s3 + $0x138] sm:$0xff] %vm15_vm3, %v9501_v2  ;;  %v10598_v7 = vadd.f32 %v10382_v61, %v9744_v56 }
 0x5de   :  { %v10758_v10 = vld [vmem:[%s23521_s3 + $0x118] sm:$0xff]  ;;  %v9296_v5 = vpop.f32.mrf.mxu1  ;;  %v10387_v11 = vpop.f32.mrf.mxu0 }
 0x5df   :  { %v11088_v12 = vsel %vm10926_vm5, %v10845_v1, %v11007_v6  ;;  %v10846_v8 = vadd.f32 %v22220_v36, %v10758_v10  ;;  %10679 = vst.msk [vmem:[%s23521_s3 + $0x128] sm:$0xff] %vm15_vm3, %v10598_v7  ;;  %v9502_v13 = vadd.f32 %v9296_v5, %v8361_v62  ;;  %v8366_v6 = vld [vmem:[%s23521_s3 + $0x168] sm:$0xff] }
 0x5e0   :  { %11169 = vst.msk [vmem:[%s23521_s3 + $0x110] sm:$0xff] %vm15_vm3, %v11088_v12  ;;  %v9745_v14 = vld [vmem:[%s23521_s3 + $0x130] sm:$0xff]  ;;  %v13583_v16 = vpop.f32.mrf.mxu1  ;;  %v13745_v17 = vpop.f32.mrf.mxu0 }
 0x5e1   :  { %vm10927_vm6 = vcmp.gt.f32.partialorder %v10846_v8, 0.0  ;;  %v11008_v18 = vmul.f32 0.1, %v10846_v8  ;;  %9583 = vst.msk [vmem:[%s23521_s3 + $0x140] sm:$0xff] %vm15_vm3, %v9502_v13  ;;  %v10599_v9 = vadd.f32 %v10387_v11, %v9745_v14 }
 0x5e2   :  { %v10759_v19 = vld [vmem:[%s23521_s3 + $0x120] sm:$0xff]  ;;  %v9299_v24 = vpop.f32.mrf.mxu1  ;;  %v10390_v21 = vpop.f32.mrf.mxu0 }
 0x5e3   :  { %v11089_v25 = vsel %vm10927_vm6, %v10846_v8, %v11008_v18  ;;  %v10847_v26 = vadd.f32 %v22220_v36, %v10759_v19  ;;  %10680 = vst.msk [vmem:[%s23521_s3 + $0x130] sm:$0xff] %vm15_vm3, %v10599_v9  ;;  %v9503_v15 = vadd.f32 %v9299_v24, %v8362_v20  ;;  %v8367_v18 = vld [vmem:[%s23521_s3 + $0x170] sm:$0xff] }
 0x5e4   :  { %11170 = vst.msk [vmem:[%s23521_s3 + $0x118] sm:$0xff] %vm15_vm3, %v11089_v25  ;;  %v9746_v27 = vld [vmem:[%s23521_s3 + $0x138] sm:$0xff]  ;;  %v13584_v28 = vpop.f32.mrf.mxu1  ;;  %v13746_v29 = vpop.f32.mrf.mxu0 }
 0x5e5   :  { %vm10928_vm7 = vcmp.gt.f32.partialorder %v10847_v26, 0.0  ;;  %v11009_v30 = vmul.f32 0.1, %v10847_v26  ;;  %9584 = vst.msk [vmem:[%s23521_s3 + $0x148] sm:$0xff] %vm15_vm3, %v9503_v15  ;;  %v10600_v31 = vadd.f32 %v10390_v21, %v9746_v27 }
 0x5e6   :  { %v10760_v22 = vld [vmem:[%s23521_s3 + $0x128] sm:$0xff]  ;;  %v9304_v33 = vpop.f32.mrf.mxu1  ;;  %v10395_v35 = vpop.f32.mrf.mxu0 }
 0x5e7   :  { %v11090_v38 = vsel %vm10928_vm7, %v10847_v26, %v11009_v30  ;;  %v10848_v23 = vadd.f32 %v22220_v36, %v10760_v22  ;;  %10681 = vst.msk [vmem:[%s23521_s3 + $0x138] sm:$0xff] %vm15_vm3, %v10600_v31  ;;  %v9504_v39 = vadd.f32 %v9304_v33, %v8363_v32  ;;  %v8368_v30 = vld [vmem:[%s23521_s3 + $0x178] sm:$0xff] }
 0x5e8   :  { %11171 = vst.msk [vmem:[%s23521_s3 + $0x120] sm:$0xff] %vm15_vm3, %v11090_v38  ;;  %v9747_v40 = vld [vmem:[%s23521_s3 + $0x140] sm:$0xff]  ;;  %v13587_v41 = vpop.f32.mrf.mxu1  ;;  %v13749_v42 = vpop.f32.mrf.mxu0 }
 0x5e9   :  { %vm10929_vm10 = vcmp.gt.f32.partialorder %v10848_v23, 0.0  ;;  %v11010_v43 = vmul.f32 0.1, %v10848_v23  ;;  %9585 = vst.msk [vmem:[%s23521_s3 + $0x150] sm:$0xff] %vm15_vm3, %v9504_v39  ;;  %v10601_v34 = vadd.f32 %v10395_v35, %v9747_v40 }
 0x5ea   :  { %v10761_v45 = vld [vmem:[%s23521_s3 + $0x130] sm:$0xff]  ;;  %v9307_v47 = vpop.f32.mrf.mxu1  ;;  %v10398_v37 = vpop.f32.mrf.mxu0 }
 0x5eb   :  { %v11091_v48 = vsel %vm10929_vm10, %v10848_v23, %v11010_v43  ;;  %v10849_v49 = vadd.f32 %v22220_v36, %v10761_v45  ;;  %10682 = vst.msk [vmem:[%s23521_s3 + $0x140] sm:$0xff] %vm15_vm3, %v10601_v34  ;;  %v9505_v0 = vadd.f32 %v9307_v47, %v8364_v46  ;;  %v8369_v43 = vld [vmem:[%s23521_s3 + $0x180] sm:$0xff] }
 0x5ec   :  { %11172 = vst.msk [vmem:[%s23521_s3 + $0x128] sm:$0xff] %vm15_vm3, %v11091_v48  ;;  %v9748_v51 = vld [vmem:[%s23521_s3 + $0x148] sm:$0xff]  ;;  %v13588_v52 = vpop.f32.mrf.mxu1  ;;  %v13750_v53 = vpop.f32.mrf.mxu0 }
 0x5ed   :  { %vm10930_vm11 = vcmp.gt.f32.partialorder %v10849_v49, 0.0  ;;  %v11011_v44 = vmul.f32 0.1, %v10849_v49  ;;  %9586 = vst.msk [vmem:[%s23521_s3 + $0x158] sm:$0xff] %vm15_vm3, %v9505_v0  ;;  %v10602_v54 = vadd.f32 %v10398_v37, %v9748_v51 }
 0x5ee   :  { %v10762_v55 = vld [vmem:[%s23521_s3 + $0x138] sm:$0xff]  ;;  %v9312_v58 = vpop.f32.mrf.mxu1  ;;  %v10403_v59 = vpop.f32.mrf.mxu0 }
 0x5ef   :  { %v11092_v50 = vsel %vm10930_vm11, %v10849_v49, %v11011_v44  ;;  %v10850_v60 = vadd.f32 %v22220_v36, %v10762_v55  ;;  %10683 = vst.msk [vmem:[%s23521_s3 + $0x148] sm:$0xff] %vm15_vm3, %v10602_v54  ;;  %v9506_v61 = vadd.f32 %v9312_v58, %v8365_v57  ;;  %v8370_v44 = vld [vmem:[%s23521_s3 + $0x188] sm:$0xff] }
 0x5f0   :  { %11173 = vst.msk [vmem:[%s23521_s3 + $0x130] sm:$0xff] %vm15_vm3, %v11092_v50  ;;  %v9749_v63 = vld [vmem:[%s23521_s3 + $0x150] sm:$0xff]  ;;  %v13591_v1 = vpop.f32.mrf.mxu1  ;;  %v13753_v2 = vpop.f32.mrf.mxu0 }
 0x5f1   :  { %vm10931_vm8 = vcmp.gt.f32.partialorder %v10850_v60, 0.0  ;;  %v11012_v56 = vmul.f32 0.1, %v10850_v60  ;;  %9587 = vst.msk [vmem:[%s23521_s3 + $0x160] sm:$0xff] %vm15_vm3, %v9506_v61  ;;  %v10603_v3 = vadd.f32 %v10403_v59, %v9749_v63 }
 0x5f2   :  { %v10763_v4 = vld [vmem:[%s23521_s3 + $0x140] sm:$0xff]  ;;  %v9315_v7 = vpop.f32.mrf.mxu1  ;;  %v10406_v10 = vpop.f32.mrf.mxu0 }
 0x5f3   :  { %v11093_v62 = vsel %vm10931_vm8, %v10850_v60, %v11012_v56  ;;  %v10851_v5 = vadd.f32 %v22220_v36, %v10763_v4  ;;  %10684 = vst.msk [vmem:[%s23521_s3 + $0x150] sm:$0xff] %vm15_vm3, %v10603_v3  ;;  %v9507_v11 = vadd.f32 %v9315_v7, %v8366_v6  ;;  %v8371_v56 = vld [vmem:[%s23521_s3 + $0x190] sm:$0xff] }
 0x5f4   :  { %11174 = vst.msk [vmem:[%s23521_s3 + $0x138] sm:$0xff] %vm15_vm3, %v11093_v62  ;;  %v9750_v12 = vld [vmem:[%s23521_s3 + $0x158] sm:$0xff]  ;;  %v13592_v8 = vpop.f32.mrf.mxu1  ;;  %v13754_v13 = vpop.f32.mrf.mxu0 }
 0x5f5   :  { %vm10932_vm12 = vcmp.gt.f32.partialorder %v10851_v5, 0.0  ;;  %v11013_v14 = vmul.f32 0.1, %v10851_v5  ;;  %9588 = vst.msk [vmem:[%s23521_s3 + $0x168] sm:$0xff] %vm15_vm3, %v9507_v11  ;;  %v10604_v16 = vadd.f32 %v10406_v10, %v9750_v12 }
 0x5f6   :  { %v10764_v17 = vld [vmem:[%s23521_s3 + $0x148] sm:$0xff]  ;;  %v9320_v9 = vpop.f32.mrf.mxu1  ;;  %v10411_v19 = vpop.f32.mrf.mxu0 }
 0x5f7   :  { %v11094_v20 = vsel %vm10932_vm12, %v10851_v5, %v11013_v14  ;;  %v10852_v24 = vadd.f32 %v22220_v36, %v10764_v17  ;;  %10685 = vst.msk [vmem:[%s23521_s3 + $0x158] sm:$0xff] %vm15_vm3, %v10604_v16  ;;  %v9508_v21 = vadd.f32 %v9320_v9, %v8367_v18  ;;  %v8372_v14 = vld [vmem:[%s23521_s3 + $0x198] sm:$0xff] }
 0x5f8   :  { %11175 = vst.msk [vmem:[%s23521_s3 + $0x140] sm:$0xff] %vm15_vm3, %v11094_v20  ;;  %v9751_v25 = vld [vmem:[%s23521_s3 + $0x160] sm:$0xff]  ;;  %v13595_v26 = vpop.f32.mrf.mxu1  ;;  %v13757_v15 = vpop.f32.mrf.mxu0 }
 0x5f9   :  { %vm10933_vm13 = vcmp.gt.f32.partialorder %v10852_v24, 0.0  ;;  %v11014_v27 = vmul.f32 0.1, %v10852_v24  ;;  %9589 = vst.msk [vmem:[%s23521_s3 + $0x170] sm:$0xff] %vm15_vm3, %v9508_v21  ;;  %v10605_v28 = vadd.f32 %v10411_v19, %v9751_v25 }
 0x5fa   :  { %v10765_v29 = vld [vmem:[%s23521_s3 + $0x150] sm:$0xff]  ;;  %v9323_v31 = vpop.f32.mrf.mxu1  ;;  %v10414_v22 = vpop.f32.mrf.mxu0 }
 0x5fb   :  { %v11095_v32 = vsel %vm10933_vm13, %v10852_v24, %v11014_v27  ;;  %v10853_v33 = vadd.f32 %v22220_v36, %v10765_v29  ;;  %10686 = vst.msk [vmem:[%s23521_s3 + $0x160] sm:$0xff] %vm15_vm3, %v10605_v28  ;;  %v9509_v35 = vadd.f32 %v9323_v31, %v8368_v30  ;;  %v8373_v27 = vld [vmem:[%s23521_s3 + $0x1a0] sm:$0xff] }
 0x5fc   :  { %11176 = vst.msk [vmem:[%s23521_s3 + $0x148] sm:$0xff] %vm15_vm3, %v11095_v32  ;;  %v9752_v38 = vld [vmem:[%s23521_s3 + $0x168] sm:$0xff]  ;;  %v13596_v23 = vpop.f32.mrf.mxu1  ;;  %v13758_v39 = vpop.f32.mrf.mxu0 }
 0x5fd   :  { %vm10934_vm9 = vcmp.gt.f32.partialorder %v10853_v33, 0.0  ;;  %v11015_v40 = vmul.f32 0.1, %v10853_v33  ;;  %9590 = vst.msk [vmem:[%s23521_s3 + $0x178] sm:$0xff] %vm15_vm3, %v9509_v35  ;;  %v10606_v41 = vadd.f32 %v10414_v22, %v9752_v38 }
 0x5fe   :  { %v10766_v42 = vld [vmem:[%s23521_s3 + $0x158] sm:$0xff]  ;;  %v9328_v34 = vpop.f32.mrf.mxu1  ;;  %v10419_v45 = vpop.f32.mrf.mxu0 }
 0x5ff   :  { %v11096_v46 = vsel %vm10934_vm9, %v10853_v33, %v11015_v40  ;;  %v10854_v47 = vadd.f32 %v22220_v36, %v10766_v42  ;;  %10687 = vst.msk [vmem:[%s23521_s3 + $0x168] sm:$0xff] %vm15_vm3, %v10606_v41  ;;  %v9510_v37 = vadd.f32 %v9328_v34, %v8369_v43  ;;  %v8374_v40 = vld [vmem:[%s23521_s3 + $0x1a8] sm:$0xff] }
 0x600   :  { %11177 = vst.msk [vmem:[%s23521_s3 + $0x150] sm:$0xff] %vm15_vm3, %v11096_v46  ;;  %v9753_v48 = vld [vmem:[%s23521_s3 + $0x170] sm:$0xff]  ;;  %v13599_v49 = vpop.f32.mrf.mxu1  ;;  %v13761_v0 = vpop.f32.mrf.mxu0 }
 0x601   :  { %vm10935_vm1 = vcmp.gt.f32.partialorder %v10854_v47, 0.0  ;;  %v11016_v51 = vmul.f32 0.1, %v10854_v47  ;;  %9591 = vst.msk [vmem:[%s23521_s3 + $0x180] sm:$0xff] %vm15_vm3, %v9510_v37  ;;  %v10607_v52 = vadd.f32 %v10419_v45, %v9753_v48 }
 0x602   :  { %v10767_v53 = vld [vmem:[%s23521_s3 + $0x160] sm:$0xff]  ;;  %v9331_v54 = vpop.f32.mrf.mxu1  ;;  %v10422_v55 = vpop.f32.mrf.mxu0 }
 0x603   :  { %v11097_v57 = vsel %vm10935_vm1, %v10854_v47, %v11016_v51  ;;  %v10855_v58 = vadd.f32 %v22220_v36, %v10767_v53  ;;  %10688 = vst.msk [vmem:[%s23521_s3 + $0x170] sm:$0xff] %vm15_vm3, %v10607_v52  ;;  %v9511_v59 = vadd.f32 %v9331_v54, %v8370_v44  ;;  %v8375_v51 = vld [vmem:[%s23521_s3 + $0x1b0] sm:$0xff] }
 0x604   :  { %11178 = vst.msk [vmem:[%s23521_s3 + $0x158] sm:$0xff] %vm15_vm3, %v11097_v57  ;;  %v9754_v50 = vld [vmem:[%s23521_s3 + $0x178] sm:$0xff]  ;;  %v13600_v60 = vpop.f32.mrf.mxu1  ;;  %v13762_v61 = vpop.f32.mrf.mxu0 }
 0x605   :  { %vm10936_vm2 = vcmp.gt.f32.partialorder %v10855_v58, 0.0  ;;  %v11017_v63 = vmul.f32 0.1, %v10855_v58  ;;  %9592 = vst.msk [vmem:[%s23521_s3 + $0x188] sm:$0xff] %vm15_vm3, %v9511_v59  ;;  %v10608_v1 = vadd.f32 %v10422_v55, %v9754_v50 }
 0x606   :  { %v10768_v2 = vld [vmem:[%s23521_s3 + $0x168] sm:$0xff]  ;;  %v9336_v3 = vpop.f32.mrf.mxu1  ;;  %v10427_v4 = vpop.f32.mrf.mxu0 }
 0x607   :  { %v11098_v6 = vsel %vm10936_vm2, %v10855_v58, %v11017_v63  ;;  %v10856_v7 = vadd.f32 %v22220_v36, %v10768_v2  ;;  %10689 = vst.msk [vmem:[%s23521_s3 + $0x178] sm:$0xff] %vm15_vm3, %v10608_v1  ;;  %v9512_v10 = vadd.f32 %v9336_v3, %v8371_v56  ;;  %v8376_v63 = vld [vmem:[%s23521_s3 + $0x1b8] sm:$0xff] }
 0x608   :  { %11179 = vst.msk [vmem:[%s23521_s3 + $0x160] sm:$0xff] %vm15_vm3, %v11098_v6  ;;  %v9755_v62 = vld [vmem:[%s23521_s3 + $0x180] sm:$0xff]  ;;  %v13603_v5 = vpop.f32.mrf.mxu1  ;;  %v13765_v11 = vpop.f32.mrf.mxu0 }
 0x609   :  { %vm10937_vm14 = vcmp.gt.f32.partialorder %v10856_v7, 0.0  ;;  %v11018_v12 = vmul.f32 0.1, %v10856_v7  ;;  %9593 = vst.msk [vmem:[%s23521_s3 + $0x190] sm:$0xff] %vm15_vm3, %v9512_v10  ;;  %v10609_v8 = vadd.f32 %v10427_v4, %v9755_v62 }
 0x60a   :  { %v10769_v13 = vld [vmem:[%s23521_s3 + $0x170] sm:$0xff]  ;;  %v9339_v16 = vpop.f32.mrf.mxu1  ;;  %v10430_v17 = vpop.f32.mrf.mxu0 }
 0x60b   :  { %v11099_v18 = vsel %vm10937_vm14, %v10856_v7, %v11018_v12  ;;  %v10857_v9 = vadd.f32 %v22220_v36, %v10769_v13  ;;  %10690 = vst.msk [vmem:[%s23521_s3 + $0x180] sm:$0xff] %vm15_vm3, %v10609_v8  ;;  %v9513_v19 = vadd.f32 %v9339_v16, %v8372_v14  ;;  %v8377_v12 = vld [vmem:[%s23521_s3 + $0x1c0] sm:$0xff] }
 0x60c   :  { %11180 = vst.msk [vmem:[%s23521_s3 + $0x168] sm:$0xff] %vm15_vm3, %v11099_v18  ;;  %v9756_v20 = vld [vmem:[%s23521_s3 + $0x188] sm:$0xff]  ;;  %v13604_v24 = vpop.f32.mrf.mxu1  ;;  %v13766_v21 = vpop.f32.mrf.mxu0 }
 0x60d   :  { %vm10938_vm15 = vcmp.gt.f32.partialorder %v10857_v9, 0.0  ;;  %v11019_v25 = vmul.f32 0.1, %v10857_v9  ;;  %9594 = vst.msk [vmem:[%s23521_s3 + $0x198] sm:$0xff] %vm15_vm3, %v9513_v19  ;;  %v10610_v26 = vadd.f32 %v10430_v17, %v9756_v20 }
 0x60e   :  { %v10770_v15 = vld [vmem:[%s23521_s3 + $0x178] sm:$0xff]  ;;  %v9344_v28 = vpop.f32.mrf.mxu1  ;;  %v10435_v29 = vpop.f32.mrf.mxu0 }
 0x60f   :  { %v11100_v30 = vsel %vm10938_vm15, %v10857_v9, %v11019_v25  ;;  %v10858_v31 = vadd.f32 %v22220_v36, %v10770_v15  ;;  %10691 = vst.msk [vmem:[%s23521_s3 + $0x188] sm:$0xff] %vm15_vm3, %v10610_v26  ;;  %v9514_v22 = vadd.f32 %v9344_v28, %v8373_v27  ;;  %v8378_v25 = vld [vmem:[%s23521_s3 + $0x1c8] sm:$0xff] }
 0x610   :  { %11181 = vst.msk [vmem:[%s23521_s3 + $0x170] sm:$0xff] %vm15_vm3, %v11100_v30  ;;  %v9757_v32 = vld [vmem:[%s23521_s3 + $0x190] sm:$0xff]  ;;  %v13607_v33 = vpop.f32.mrf.mxu1  ;;  %v13769_v35 = vpop.f32.mrf.mxu0 }
 0x611   :  { %vm10939_vm0 = vcmp.gt.f32.partialorder %v10858_v31, 0.0  ;;  %v11020_v38 = vmul.f32 0.1, %v10858_v31  ;;  %9595 = vst.msk [vmem:[%s23521_s3 + $0x1a0] sm:$0xff] %vm15_vm3, %v9514_v22  ;;  %v10611_v23 = vadd.f32 %v10435_v29, %v9757_v32  ;;  %v8379_v35 = vld [vmem:[%s23521_s3 + $0x1d0] sm:$0xff] }
 0x612   :  { %v10771_v39 = vld [vmem:[%s23521_s3 + $0x180] sm:$0xff]  ;;  %v9347_v41 = vpop.f32.mrf.mxu1  ;;  %v10438_v42 = vpop.f32.mrf.mxu0 }
 0x613   :  { %v11101_v43 = vsel %vm10939_vm0, %v10858_v31, %v11020_v38  ;;  %v10859_v34 = vadd.f32 %v22220_v36, %v10771_v39  ;;  %10692 = vst.msk [vmem:[%s23521_s3 + $0x190] sm:$0xff] %vm15_vm3, %v10611_v23  ;;  %v9515_v45 = vadd.f32 %v9347_v41, %v8374_v40  ;;  %v22955_v40 = vld [vmem:[%s23522_s2] ss:$0 sm:$0xff] }
 0x614   :  { %11182 = vst.msk [vmem:[%s23521_s3 + $0x178] sm:$0xff] %vm15_vm3, %v11101_v43  ;;  %v9758_v46 = vld [vmem:[%s23521_s3 + $0x198] sm:$0xff]  ;;  %v13608_v47 = vpop.f32.mrf.mxu1  ;;  %v13770_v37 = vpop.f32.mrf.mxu0 }
 0x615   :  { %vm10940_vm4 = vcmp.gt.f32.partialorder %v10859_v34, 0.0  ;;  %v11021_v48 = vmul.f32 0.1, %v10859_v34  ;;  %9596 = vst.msk [vmem:[%s23521_s3 + $0x1a8] sm:$0xff] %vm15_vm3, %v9515_v45  ;;  %v10612_v49 = vadd.f32 %v10438_v42, %v9758_v46 }
 0x616   :  { %v10772_v0 = vld [vmem:[%s23521_s3 + $0x188] sm:$0xff]  ;;  %v9352_v52 = vpop.f32.mrf.mxu1  ;;  %v10443_v53 = vpop.f32.mrf.mxu0 }
 0x617   :  { %v11102_v44 = vsel %vm10940_vm4, %v10859_v34, %v11021_v48  ;;  %v10860_v54 = vadd.f32 %v22220_v36, %v10772_v0  ;;  %10693 = vst.msk [vmem:[%s23521_s3 + $0x198] sm:$0xff] %vm15_vm3, %v10612_v49  ;;  %v9516_v55 = vadd.f32 %v9352_v52, %v8375_v51  ;;  %v8380_v48 = vld [vmem:[%s23521_s3 + $0x1d8] sm:$0xff] }
 0x618   :  { %11183 = vst.msk [vmem:[%s23521_s3 + $0x180] sm:$0xff] %vm15_vm3, %v11102_v44  ;;  %v9759_v57 = vld [vmem:[%s23521_s3 + $0x1a0] sm:$0xff]  ;;  %v13611_v58 = vpop.f32.mrf.mxu1  ;;  %v13773_v59 = vpop.f32.mrf.mxu0 }
 0x619   :  { %vm10941_vm5 = vcmp.gt.f32.partialorder %v10860_v54, 0.0  ;;  %v11022_v50 = vmul.f32 0.1, %v10860_v54  ;;  %9597 = vst.msk [vmem:[%s23521_s3 + $0x1b0] sm:$0xff] %vm15_vm3, %v9516_v55  ;;  %v10613_v60 = vadd.f32 %v10443_v53, %v9759_v57 }
 0x61a   :  { %v10773_v61 = vld [vmem:[%s23521_s3 + $0x190] sm:$0xff]  ;;  %v9355_v1 = vpop.f32.mrf.mxu1  ;;  %v10446_v2 = vpop.f32.mrf.mxu0 }
 0x61b   :  { %v11103_v56 = vsel %vm10941_vm5, %v10860_v54, %v11022_v50  ;;  %v10861_v3 = vadd.f32 %v22220_v36, %v10773_v61  ;;  %10694 = vst.msk [vmem:[%s23521_s3 + $0x1a0] sm:$0xff] %vm15_vm3, %v10613_v60  ;;  %v9517_v4 = vadd.f32 %v9355_v1, %v8376_v63  ;;  %v8381_v50 = vld [vmem:[%s23521_s3 + $0x1e0] sm:$0xff] }
 0x61c   :  { %11184 = vst.msk [vmem:[%s23521_s3 + $0x188] sm:$0xff] %vm15_vm3, %v11103_v56  ;;  %v9760_v6 = vld [vmem:[%s23521_s3 + $0x1a8] sm:$0xff]  ;;  %v13612_v7 = vpop.f32.mrf.mxu1  ;;  %v13774_v10 = vpop.f32.mrf.mxu0 }
 0x61d   :  { %vm10942_vm6 = vcmp.gt.f32.partialorder %v10861_v3, 0.0  ;;  %v11023_v62 = vmul.f32 0.1, %v10861_v3  ;;  %9598 = vst.msk [vmem:[%s23521_s3 + $0x1b8] sm:$0xff] %vm15_vm3, %v9517_v4  ;;  %v10614_v5 = vadd.f32 %v10446_v2, %v9760_v6 }
 0x61e   :  { %v10774_v11 = vld [vmem:[%s23521_s3 + $0x198] sm:$0xff]  ;;  %v9360_v8 = vpop.f32.mrf.mxu1  ;;  %v10451_v13 = vpop.f32.mrf.mxu0 }
 0x61f   :  { %v11104_v14 = vsel %vm10942_vm6, %v10861_v3, %v11023_v62  ;;  %v10862_v16 = vadd.f32 %v22220_v36, %v10774_v11  ;;  %10695 = vst.msk [vmem:[%s23521_s3 + $0x1a8] sm:$0xff] %vm15_vm3, %v10614_v5  ;;  %v9518_v17 = vadd.f32 %v9360_v8, %v8377_v12  ;;  %v8382_v62 = vld [vmem:[%s23521_s3 + $0x1e8] sm:$0xff] }
 0x620   :  { %11185 = vst.msk [vmem:[%s23521_s3 + $0x190] sm:$0xff] %vm15_vm3, %v11104_v14  ;;  %v9761_v18 = vld [vmem:[%s23521_s3 + $0x1b0] sm:$0xff]  ;;  %v13615_v9 = vpop.f32.mrf.mxu1  ;;  %v13777_v19 = vpop.f32.mrf.mxu0 }
 0x621   :  { %vm10943_vm7 = vcmp.gt.f32.partialorder %v10862_v16, 0.0  ;;  %v11024_v20 = vmul.f32 0.1, %v10862_v16  ;;  %9599 = vst.msk [vmem:[%s23521_s3 + $0x1c0] sm:$0xff] %vm15_vm3, %v9518_v17  ;;  %v10615_v24 = vadd.f32 %v10451_v13, %v9761_v18 }
 0x622   :  { %v10775_v21 = vld [vmem:[%s23521_s3 + $0x1a0] sm:$0xff]  ;;  %v9363_v26 = vpop.f32.mrf.mxu1  ;;  %v10454_v15 = vpop.f32.mrf.mxu0 }
 0x623   :  { %v11105_v27 = vsel %vm10943_vm7, %v10862_v16, %v11024_v20  ;;  %v10863_v28 = vadd.f32 %v22220_v36, %v10775_v21  ;;  %10696 = vst.msk [vmem:[%s23521_s3 + $0x1b0] sm:$0xff] %vm15_vm3, %v10615_v24  ;;  %v9519_v29 = vadd.f32 %v9363_v26, %v8378_v25  ;;  %v8383_v20 = vld [vmem:[%s23521_s3 + $0x1f0] sm:$0xff] }
 0x624   :  { %11186 = vst.msk [vmem:[%s23521_s3 + $0x198] sm:$0xff] %vm15_vm3, %v11105_v27  ;;  %v9762_v30 = vld [vmem:[%s23521_s3 + $0x1b8] sm:$0xff]  ;;  %v13616_v31 = vpop.f32.mrf.mxu1  ;;  %v13778_v22 = vpop.f32.mrf.mxu0 }
 0x625   :  { %vm10944_vm10 = vcmp.gt.f32.partialorder %v10863_v28, 0.0  ;;  %v11025_v32 = vmul.f32 0.1, %v10863_v28  ;;  %9600 = vst.msk [vmem:[%s23521_s3 + $0x1c8] sm:$0xff] %vm15_vm3, %v9519_v29  ;;  %v10616_v36 = vadd.f32 %v10454_v15, %v9762_v30 }
 0x626   :  { %v10776_v33 = vld [vmem:[%s23521_s3 + $0x1a8] sm:$0xff]  ;;  %v9368_v38 = vpop.f32.mrf.mxu1  ;;  %v10459_v23 = vpop.f32.mrf.mxu0 }
 0x627   :  { %v11106_v39 = vsel %vm10944_vm10, %v10863_v28, %v11025_v32  ;;  %v10864_v41 = vadd.f32 %v22955_v40, %v10776_v33  ;;  %10697 = vst.msk [vmem:[%s23521_s3 + $0x1b8] sm:$0xff] %vm15_vm3, %v10616_v36  ;;  %v9520_v42 = vadd.f32 %v9368_v38, %v8379_v35  ;;  %v8384_v32 = vld [vmem:[%s23521_s3 + $0x1f8] sm:$0xff] }
 0x628   :  { %11187 = vst.msk [vmem:[%s23521_s3 + $0x1a0] sm:$0xff] %vm15_vm3, %v11106_v39  ;;  %v9763_v43 = vld [vmem:[%s23521_s3 + $0x1c0] sm:$0xff]  ;;  %v13619_v34 = vpop.f32.mrf.mxu1  ;;  %v13781_v45 = vpop.f32.mrf.mxu0 }
 0x629   :  { %vm10945_vm11 = vcmp.gt.f32.partialorder %v10864_v41, 0.0  ;;  %v11026_v46 = vmul.f32 0.1, %v10864_v41  ;;  %9601 = vst.msk [vmem:[%s23521_s3 + $0x1d0] sm:$0xff] %vm15_vm3, %v9520_v42  ;;  %v10617_v47 = vadd.f32 %v10459_v23, %v9763_v43 }
 0x62a   :  { %v10777_v37 = vld [vmem:[%s23521_s3 + $0x1b0] sm:$0xff]  ;;  %v9371_v49 = vpop.f32.mrf.mxu1  ;;  %v10462_v0 = vpop.f32.mrf.mxu0 }
 0x62b   :  { %v11107_v51 = vsel %vm10945_vm11, %v10864_v41, %v11026_v46  ;;  %v10865_v52 = vadd.f32 %v22955_v40, %v10777_v37  ;;  %10698 = vst.msk [vmem:[%s23521_s3 + $0x1c0] sm:$0xff] %vm15_vm3, %v10617_v47  ;;  %v9521_v53 = vadd.f32 %v9371_v49, %v8380_v48  ;;  %v8385_v46 = vld [vmem:[%s23521_s3 + $0x200] sm:$0xff] }
 0x62c   :  { %11188 = vst.msk [vmem:[%s23521_s3 + $0x1a8] sm:$0xff] %vm15_vm3, %v11107_v51  ;;  %v9764_v44 = vld [vmem:[%s23521_s3 + $0x1c8] sm:$0xff]  ;;  %v13620_v54 = vpop.f32.mrf.mxu1  ;;  %v13782_v55 = vpop.f32.mrf.mxu0 }
 0x62d   :  { %vm10946_vm8 = vcmp.gt.f32.partialorder %v10865_v52, 0.0  ;;  %v11027_v57 = vmul.f32 0.1, %v10865_v52  ;;  %9602 = vst.msk [vmem:[%s23521_s3 + $0x1d8] sm:$0xff] %vm15_vm3, %v9521_v53  ;;  %v10618_v58 = vadd.f32 %v10462_v0, %v9764_v44 }
 0x62e   :  { %v10778_v59 = vld [vmem:[%s23521_s3 + $0x1b8] sm:$0xff]  ;;  %v9376_v60 = vpop.f32.mrf.mxu1  ;;  %v10467_v61 = vpop.f32.mrf.mxu0 }
 0x62f   :  { %v11108_v63 = vsel %vm10946_vm8, %v10865_v52, %v11027_v57  ;;  %v10866_v1 = vadd.f32 %v22955_v40, %v10778_v59  ;;  %10699 = vst.msk [vmem:[%s23521_s3 + $0x1c8] sm:$0xff] %vm15_vm3, %v10618_v58  ;;  %v9522_v2 = vadd.f32 %v9376_v60, %v8381_v50  ;;  %v8386_v57 = vld [vmem:[%s23521_s3 + $0x208] sm:$0xff] }
 0x630   :  { %11189 = vst.msk [vmem:[%s23521_s3 + $0x1b0] sm:$0xff] %vm15_vm3, %v11108_v63  ;;  %v9765_v56 = vld [vmem:[%s23521_s3 + $0x1d0] sm:$0xff]  ;;  %v13623_v3 = vpop.f32.mrf.mxu1  ;;  %v13785_v4 = vpop.f32.mrf.mxu0 }
 0x631   :  { %vm10947_vm12 = vcmp.gt.f32.partialorder %v10866_v1, 0.0  ;;  %v11028_v6 = vmul.f32 0.1, %v10866_v1  ;;  %9603 = vst.msk [vmem:[%s23521_s3 + $0x1e0] sm:$0xff] %vm15_vm3, %v9522_v2  ;;  %v10619_v7 = vadd.f32 %v10467_v61, %v9765_v56 }
 0x632   :  { %v10779_v10 = vld [vmem:[%s23521_s3 + $0x1c0] sm:$0xff]  ;;  %v9379_v5 = vpop.f32.mrf.mxu1  ;;  %v10470_v11 = vpop.f32.mrf.mxu0 }
 0x633   :  { %v11109_v12 = vsel %vm10947_vm12, %v10866_v1, %v11028_v6  ;;  %v10867_v8 = vadd.f32 %v22955_v40, %v10779_v10  ;;  %10700 = vst.msk [vmem:[%s23521_s3 + $0x1d0] sm:$0xff] %vm15_vm3, %v10619_v7  ;;  %v9523_v13 = vadd.f32 %v9379_v5, %v8382_v62  ;;  %v8387_v6 = vld [vmem:[%s23521_s3 + $0x210] sm:$0xff] }
 0x634   :  { %11190 = vst.msk [vmem:[%s23521_s3 + $0x1b8] sm:$0xff] %vm15_vm3, %v11109_v12  ;;  %v9766_v14 = vld [vmem:[%s23521_s3 + $0x1d8] sm:$0xff]  ;;  %v13624_v16 = vpop.f32.mrf.mxu1  ;;  %v13786_v17 = vpop.f32.mrf.mxu0 }
 0x635   :  { %vm10948_vm13 = vcmp.gt.f32.partialorder %v10867_v8, 0.0  ;;  %v11029_v18 = vmul.f32 0.1, %v10867_v8  ;;  %9604 = vst.msk [vmem:[%s23521_s3 + $0x1e8] sm:$0xff] %vm15_vm3, %v9523_v13  ;;  %v10620_v9 = vadd.f32 %v10470_v11, %v9766_v14 }
 0x636   :  { %v10780_v19 = vld [vmem:[%s23521_s3 + $0x1c8] sm:$0xff]  ;;  %v9384_v24 = vpop.f32.mrf.mxu1  ;;  %v10475_v21 = vpop.f32.mrf.mxu0 }
 0x637   :  { %v11110_v25 = vsel %vm10948_vm13, %v10867_v8, %v11029_v18  ;;  %v10868_v26 = vadd.f32 %v22955_v40, %v10780_v19  ;;  %10701 = vst.msk [vmem:[%s23521_s3 + $0x1d8] sm:$0xff] %vm15_vm3, %v10620_v9  ;;  %v9524_v15 = vadd.f32 %v9384_v24, %v8383_v20  ;;  %v8388_v18 = vld [vmem:[%s23521_s3 + $0x218] sm:$0xff] }
 0x638   :  { %11191 = vst.msk [vmem:[%s23521_s3 + $0x1c0] sm:$0xff] %vm15_vm3, %v11110_v25  ;;  %v9767_v27 = vld [vmem:[%s23521_s3 + $0x1e0] sm:$0xff]  ;;  %v13627_v28 = vpop.f32.mrf.mxu1  ;;  %v13789_v29 = vpop.f32.mrf.mxu0 }
 0x639   :  { %vm10949_vm9 = vcmp.gt.f32.partialorder %v10868_v26, 0.0  ;;  %v11030_v30 = vmul.f32 0.1, %v10868_v26  ;;  %9605 = vst.msk [vmem:[%s23521_s3 + $0x1f0] sm:$0xff] %vm15_vm3, %v9524_v15  ;;  %v10621_v31 = vadd.f32 %v10475_v21, %v9767_v27 }
 0x63a   :  { %v10781_v22 = vld [vmem:[%s23521_s3 + $0x1d0] sm:$0xff]  ;;  %v9387_v36 = vpop.f32.mrf.mxu1  ;;  %v10478_v33 = vpop.f32.mrf.mxu0 }
 0x63b   :  { %v11111_v35 = vsel %vm10949_vm9, %v10868_v26, %v11030_v30  ;;  %v10869_v38 = vadd.f32 %v22955_v40, %v10781_v22  ;;  %10702 = vst.msk [vmem:[%s23521_s3 + $0x1e0] sm:$0xff] %vm15_vm3, %v10621_v31  ;;  %v9525_v23 = vadd.f32 %v9387_v36, %v8384_v32  ;;  %v8389_v30 = vld [vmem:[%s23521_s3 + $0x220] sm:$0xff] }
 0x63c   :  { %11192 = vst.msk [vmem:[%s23521_s3 + $0x1c8] sm:$0xff] %vm15_vm3, %v11111_v35  ;;  %v9768_v39 = vld [vmem:[%s23521_s3 + $0x1e8] sm:$0xff]  ;;  %v13628_v41 = vpop.f32.mrf.mxu1  ;;  %v13790_v42 = vpop.f32.mrf.mxu0 }
 0x63d   :  { %vm10950_vm1 = vcmp.gt.f32.partialorder %v10869_v38, 0.0  ;;  %v11031_v43 = vmul.f32 0.1, %v10869_v38  ;;  %9606 = vst.msk [vmem:[%s23521_s3 + $0x1f8] sm:$0xff] %vm15_vm3, %v9525_v23  ;;  %v10622_v34 = vadd.f32 %v10478_v33, %v9768_v39 }
 0x63e   :  { %v10782_v45 = vld [vmem:[%s23521_s3 + $0x1d8] sm:$0xff]  ;;  %v9392_v47 = vpop.f32.mrf.mxu1  ;;  %v10483_v37 = vpop.f32.mrf.mxu0 }
 0x63f   :  { %v11112_v48 = vsel %vm10950_vm1, %v10869_v38, %v11031_v43  ;;  %v10870_v49 = vadd.f32 %v22955_v40, %v10782_v45  ;;  %10703 = vst.msk [vmem:[%s23521_s3 + $0x1e8] sm:$0xff] %vm15_vm3, %v10622_v34  ;;  %v9526_v0 = vadd.f32 %v9392_v47, %v8385_v46  ;;  %v8390_v43 = vld [vmem:[%s23521_s3 + $0x228] sm:$0xff] }
 0x640   :  { %11193 = vst.msk [vmem:[%s23521_s3 + $0x1d0] sm:$0xff] %vm15_vm3, %v11112_v48  ;;  %v9769_v51 = vld [vmem:[%s23521_s3 + $0x1f0] sm:$0xff]  ;;  %v13631_v52 = vpop.f32.mrf.mxu1  ;;  %v13793_v53 = vpop.f32.mrf.mxu0 }
 0x641   :  { %vm10951_vm2 = vcmp.gt.f32.partialorder %v10870_v49, 0.0  ;;  %v11032_v44 = vmul.f32 0.1, %v10870_v49  ;;  %9607 = vst.msk [vmem:[%s23521_s3 + $0x200] sm:$0xff] %vm15_vm3, %v9526_v0  ;;  %v10623_v54 = vadd.f32 %v10483_v37, %v9769_v51 }
 0x642   :  { %v10783_v55 = vld [vmem:[%s23521_s3 + $0x1e0] sm:$0xff]  ;;  %v9395_v58 = vpop.f32.mrf.mxu1  ;;  %v10486_v59 = vpop.f32.mrf.mxu0 }
 0x643   :  { %v11113_v50 = vsel %vm10951_vm2, %v10870_v49, %v11032_v44  ;;  %v10871_v60 = vadd.f32 %v22955_v40, %v10783_v55  ;;  %10704 = vst.msk [vmem:[%s23521_s3 + $0x1f0] sm:$0xff] %vm15_vm3, %v10623_v54  ;;  %v9527_v61 = vadd.f32 %v9395_v58, %v8386_v57  ;;  %v8391_v44 = vld [vmem:[%s23521_s3 + $0x230] sm:$0xff] }
 0x644   :  { %11194 = vst.msk [vmem:[%s23521_s3 + $0x1d8] sm:$0xff] %vm15_vm3, %v11113_v50  ;;  %v9770_v63 = vld [vmem:[%s23521_s3 + $0x1f8] sm:$0xff]  ;;  %v13632_v1 = vpop.f32.mrf.mxu1  ;;  %v13794_v2 = vpop.f32.mrf.mxu0 }
 0x645   :  { %vm10952_vm14 = vcmp.gt.f32.partialorder %v10871_v60, 0.0  ;;  %v11033_v56 = vmul.f32 0.1, %v10871_v60  ;;  %9608 = vst.msk [vmem:[%s23521_s3 + $0x208] sm:$0xff] %vm15_vm3, %v9527_v61  ;;  %v10624_v3 = vadd.f32 %v10486_v59, %v9770_v63 }
 0x646   :  { %v10784_v4 = vld [vmem:[%s23521_s3 + $0x1e8] sm:$0xff]  ;;  %v9400_v7 = vpop.f32.mrf.mxu1  ;;  %v10491_v10 = vpop.f32.mrf.mxu0 }
 0x647   :  { %v11114_v62 = vsel %vm10952_vm14, %v10871_v60, %v11033_v56  ;;  %v10872_v5 = vadd.f32 %v22955_v40, %v10784_v4  ;;  %10705 = vst.msk [vmem:[%s23521_s3 + $0x1f8] sm:$0xff] %vm15_vm3, %v10624_v3  ;;  %v9528_v11 = vadd.f32 %v9400_v7, %v8387_v6  ;;  %v8392_v56 = vld [vmem:[%s23521_s3 + $0x238] sm:$0xff] }
 0x648   :  { %11195 = vst.msk [vmem:[%s23521_s3 + $0x1e0] sm:$0xff] %vm15_vm3, %v11114_v62  ;;  %v9771_v12 = vld [vmem:[%s23521_s3 + $0x200] sm:$0xff]  ;;  %v13635_v8 = vpop.f32.mrf.mxu1  ;;  %v13797_v13 = vpop.f32.mrf.mxu0 }
 0x649   :  { %vm10953_vm15 = vcmp.gt.f32.partialorder %v10872_v5, 0.0  ;;  %v11034_v14 = vmul.f32 0.1, %v10872_v5  ;;  %9609 = vst.msk [vmem:[%s23521_s3 + $0x210] sm:$0xff] %vm15_vm3, %v9528_v11  ;;  %v10625_v16 = vadd.f32 %v10491_v10, %v9771_v12 }
 0x64a   :  { %v10785_v17 = vld [vmem:[%s23521_s3 + $0x1f0] sm:$0xff]  ;;  %v9403_v9 = vpop.f32.mrf.mxu1  ;;  %v10494_v19 = vpop.f32.mrf.mxu0 }
 0x64b   :  { %v11115_v20 = vsel %vm10953_vm15, %v10872_v5, %v11034_v14  ;;  %v10873_v24 = vadd.f32 %v22955_v40, %v10785_v17  ;;  %10706 = vst.msk [vmem:[%s23521_s3 + $0x200] sm:$0xff] %vm15_vm3, %v10625_v16  ;;  %v9529_v21 = vadd.f32 %v9403_v9, %v8388_v18  ;;  %v8393_v14 = vld [vmem:[%s23521_s3 + $0x240] sm:$0xff] }
 0x64c   :  { %11196 = vst.msk [vmem:[%s23521_s3 + $0x1e8] sm:$0xff] %vm15_vm3, %v11115_v20  ;;  %v9772_v25 = vld [vmem:[%s23521_s3 + $0x208] sm:$0xff]  ;;  %v13636_v26 = vpop.f32.mrf.mxu1  ;;  %v13798_v15 = vpop.f32.mrf.mxu0 }
 0x64d   :  { %vm10954_vm0 = vcmp.gt.f32.partialorder %v10873_v24, 0.0  ;;  %v11035_v27 = vmul.f32 0.1, %v10873_v24  ;;  %9610 = vst.msk [vmem:[%s23521_s3 + $0x218] sm:$0xff] %vm15_vm3, %v9529_v21  ;;  %v10626_v28 = vadd.f32 %v10494_v19, %v9772_v25 }
 0x64e   :  { %v10786_v29 = vld [vmem:[%s23521_s3 + $0x1f8] sm:$0xff]  ;;  %v9408_v31 = vpop.f32.mrf.mxu1  ;;  %v10499_v22 = vpop.f32.mrf.mxu0 }
 0x64f   :  { %v11116_v32 = vsel %vm10954_vm0, %v10873_v24, %v11035_v27  ;;  %v10874_v36 = vadd.f32 %v22955_v40, %v10786_v29  ;;  %10707 = vst.msk [vmem:[%s23521_s3 + $0x208] sm:$0xff] %vm15_vm3, %v10626_v28  ;;  %v9530_v33 = vadd.f32 %v9408_v31, %v8389_v30  ;;  %v8394_v27 = vld [vmem:[%s23521_s3 + $0x248] sm:$0xff] }
 0x650   :  { %11197 = vst.msk [vmem:[%s23521_s3 + $0x1f0] sm:$0xff] %vm15_vm3, %v11116_v32  ;;  %v9773_v35 = vld [vmem:[%s23521_s3 + $0x210] sm:$0xff]  ;;  %v13639_v38 = vpop.f32.mrf.mxu1  ;;  %v13801_v23 = vpop.f32.mrf.mxu0 }
 0x651   :  { %vm10955_vm4 = vcmp.gt.f32.partialorder %v10874_v36, 0.0  ;;  %v11036_v39 = vmul.f32 0.1, %v10874_v36  ;;  %9611 = vst.msk [vmem:[%s23521_s3 + $0x220] sm:$0xff] %vm15_vm3, %v9530_v33  ;;  %v10627_v41 = vadd.f32 %v10499_v22, %v9773_v35 }
 0x652   :  { %v10787_v42 = vld [vmem:[%s23521_s3 + $0x200] sm:$0xff]  ;;  %v9411_v34 = vpop.f32.mrf.mxu1  ;;  %v10502_v45 = vpop.f32.mrf.mxu0 }
 0x653   :  { %v11117_v46 = vsel %vm10955_vm4, %v10874_v36, %v11036_v39  ;;  %v10875_v47 = vadd.f32 %v22955_v40, %v10787_v42  ;;  %10708 = vst.msk [vmem:[%s23521_s3 + $0x210] sm:$0xff] %vm15_vm3, %v10627_v41  ;;  %v9531_v37 = vadd.f32 %v9411_v34, %v8390_v43  ;;  %v8395_v39 = vld [vmem:[%s23521_s3 + $0x250] sm:$0xff] }
 0x654   :  { %11198 = vst.msk [vmem:[%s23521_s3 + $0x1f8] sm:$0xff] %vm15_vm3, %v11117_v46  ;;  %v9774_v48 = vld [vmem:[%s23521_s3 + $0x218] sm:$0xff]  ;;  %v13640_v49 = vpop.f32.mrf.mxu1  ;;  %v13802_v0 = vpop.f32.mrf.mxu0 }
 0x655   :  { %vm10956_vm5 = vcmp.gt.f32.partialorder %v10875_v47, 0.0  ;;  %v11037_v51 = vmul.f32 0.1, %v10875_v47  ;;  %9612 = vst.msk [vmem:[%s23521_s3 + $0x228] sm:$0xff] %vm15_vm3, %v9531_v37  ;;  %v10628_v52 = vadd.f32 %v10502_v45, %v9774_v48 }
 0x656   :  { %v10788_v53 = vld [vmem:[%s23521_s3 + $0x208] sm:$0xff]  ;;  %v9416_v54 = vpop.f32.mrf.mxu1  ;;  %v10507_v55 = vpop.f32.mrf.mxu0 }
 0x657   :  { %v11118_v57 = vsel %vm10956_vm5, %v10875_v47, %v11037_v51  ;;  %v10876_v58 = vadd.f32 %v22955_v40, %v10788_v53  ;;  %10709 = vst.msk [vmem:[%s23521_s3 + $0x218] sm:$0xff] %vm15_vm3, %v10628_v52  ;;  %v9532_v59 = vadd.f32 %v9416_v54, %v8391_v44  ;;  %v8396_v51 = vld [vmem:[%s23521_s3 + $0x258] sm:$0xff] }
 0x658   :  { %11199 = vst.msk [vmem:[%s23521_s3 + $0x200] sm:$0xff] %vm15_vm3, %v11118_v57  ;;  %v9775_v50 = vld [vmem:[%s23521_s3 + $0x220] sm:$0xff]  ;;  %v13643_v60 = vpop.f32.mrf.mxu1  ;;  %v13805_v61 = vpop.f32.mrf.mxu0 }
 0x659   :  { %vm10957_vm6 = vcmp.gt.f32.partialorder %v10876_v58, 0.0  ;;  %v11038_v63 = vmul.f32 0.1, %v10876_v58  ;;  %9613 = vst.msk [vmem:[%s23521_s3 + $0x230] sm:$0xff] %vm15_vm3, %v9532_v59  ;;  %v10629_v1 = vadd.f32 %v10507_v55, %v9775_v50 }
 0x65a   :  { %v10789_v2 = vld [vmem:[%s23521_s3 + $0x210] sm:$0xff]  ;;  %v9419_v3 = vpop.f32.mrf.mxu1  ;;  %v10510_v4 = vpop.f32.mrf.mxu0 }
 0x65b   :  { %v11119_v6 = vsel %vm10957_vm6, %v10876_v58, %v11038_v63  ;;  %v10877_v7 = vadd.f32 %v22955_v40, %v10789_v2  ;;  %10710 = vst.msk [vmem:[%s23521_s3 + $0x220] sm:$0xff] %vm15_vm3, %v10629_v1  ;;  %v9533_v10 = vadd.f32 %v9419_v3, %v8392_v56  ;;  %v8397_v63 = vld [vmem:[%s23521_s3 + $0x260] sm:$0xff] }
 0x65c   :  { %11200 = vst.msk [vmem:[%s23521_s3 + $0x208] sm:$0xff] %vm15_vm3, %v11119_v6  ;;  %v9776_v62 = vld [vmem:[%s23521_s3 + $0x228] sm:$0xff]  ;;  %v13644_v5 = vpop.f32.mrf.mxu1  ;;  %v13806_v11 = vpop.f32.mrf.mxu0 }
 0x65d   :  { %vm10958_vm7 = vcmp.gt.f32.partialorder %v10877_v7, 0.0  ;;  %v11039_v12 = vmul.f32 0.1, %v10877_v7  ;;  %9614 = vst.msk [vmem:[%s23521_s3 + $0x238] sm:$0xff] %vm15_vm3, %v9533_v10  ;;  %v10630_v8 = vadd.f32 %v10510_v4, %v9776_v62 }
 0x65e   :  { %v10790_v13 = vld [vmem:[%s23521_s3 + $0x218] sm:$0xff]  ;;  %v9424_v16 = vpop.f32.mrf.mxu1  ;;  %v10515_v17 = vpop.f32.mrf.mxu0 }
 0x65f   :  { %v11120_v18 = vsel %vm10958_vm7, %v10877_v7, %v11039_v12  ;;  %v10878_v9 = vadd.f32 %v22955_v40, %v10790_v13  ;;  %10711 = vst.msk [vmem:[%s23521_s3 + $0x228] sm:$0xff] %vm15_vm3, %v10630_v8  ;;  %v9534_v19 = vadd.f32 %v9424_v16, %v8393_v14  ;;  %v8398_v12 = vld [vmem:[%s23521_s3 + $0x268] sm:$0xff] }
 0x660   :  { %11201 = vst.msk [vmem:[%s23521_s3 + $0x210] sm:$0xff] %vm15_vm3, %v11120_v18  ;;  %v9777_v20 = vld [vmem:[%s23521_s3 + $0x230] sm:$0xff]  ;;  %v13647_v24 = vpop.f32.mrf.mxu1  ;;  %v13809_v21 = vpop.f32.mrf.mxu0 }
 0x661   :  { %vm10959_vm10 = vcmp.gt.f32.partialorder %v10878_v9, 0.0  ;;  %v11040_v25 = vmul.f32 0.1, %v10878_v9  ;;  %9615 = vst.msk [vmem:[%s23521_s3 + $0x240] sm:$0xff] %vm15_vm3, %v9534_v19  ;;  %v10631_v26 = vadd.f32 %v10515_v17, %v9777_v20 }
 0x662   :  { %v10791_v15 = vld [vmem:[%s23521_s3 + $0x220] sm:$0xff]  ;;  %v9427_v28 = vpop.f32.mrf.mxu1  ;;  %v10518_v29 = vpop.f32.mrf.mxu0 }
 0x663   :  { %v11121_v30 = vsel %vm10959_vm10, %v10878_v9, %v11040_v25  ;;  %v10879_v31 = vadd.f32 %v22955_v40, %v10791_v15  ;;  %10712 = vst.msk [vmem:[%s23521_s3 + $0x230] sm:$0xff] %vm15_vm3, %v10631_v26  ;;  %v9535_v22 = vadd.f32 %v9427_v28, %v8394_v27  ;;  %v8399_v25 = vld [vmem:[%s23521_s3 + $0x270] sm:$0xff] }
 0x664   :  { %11202 = vst.msk [vmem:[%s23521_s3 + $0x218] sm:$0xff] %vm15_vm3, %v11121_v30  ;;  %v9778_v32 = vld [vmem:[%s23521_s3 + $0x238] sm:$0xff]  ;;  %v13648_v36 = vpop.f32.mrf.mxu1  ;;  %v13810_v33 = vpop.f32.mrf.mxu0 }
 0x665   :  { %vm10960_vm11 = vcmp.gt.f32.partialorder %v10879_v31, 0.0  ;;  %v11041_v35 = vmul.f32 0.1, %v10879_v31  ;;  %9616 = vst.msk [vmem:[%s23521_s3 + $0x248] sm:$0xff] %vm15_vm3, %v9535_v22  ;;  %v10632_v38 = vadd.f32 %v10518_v29, %v9778_v32 }
 0x666   :  { %v10792_v23 = vld [vmem:[%s23521_s3 + $0x228] sm:$0xff]  ;;  %v9432_v41 = vpop.f32.mrf.mxu1  ;;  %v10523_v42 = vpop.f32.mrf.mxu0 }
 0x667   :  { %v11122_v43 = vsel %vm10960_vm11, %v10879_v31, %v11041_v35  ;;  %v10880_v34 = vadd.f32 %v22955_v40, %v10792_v23  ;;  %10713 = vst.msk [vmem:[%s23521_s3 + $0x238] sm:$0xff] %vm15_vm3, %v10632_v38  ;;  %v9536_v45 = vadd.f32 %v9432_v41, %v8395_v39  ;;  %v8400_v35 = vld [vmem:[%s23521_s3 + $0x278] sm:$0xff] }
 0x668   :  { %11203 = vst.msk [vmem:[%s23521_s3 + $0x220] sm:$0xff] %vm15_vm3, %v11122_v43  ;;  %v9779_v46 = vld [vmem:[%s23521_s3 + $0x240] sm:$0xff]  ;;  %v13651_v47 = vpop.f32.mrf.mxu1  ;;  %v13813_v37 = vpop.f32.mrf.mxu0 }
 0x669   :  { %vm10961_vm8 = vcmp.gt.f32.partialorder %v10880_v34, 0.0  ;;  %v11042_v48 = vmul.f32 0.1, %v10880_v34  ;;  %9617 = vst.msk [vmem:[%s23521_s3 + $0x250] sm:$0xff] %vm15_vm3, %v9536_v45  ;;  %v10633_v49 = vadd.f32 %v10523_v42, %v9779_v46 }
 0x66a   :  { %v10793_v0 = vld [vmem:[%s23521_s3 + $0x230] sm:$0xff]  ;;  %v9435_v52 = vpop.f32.mrf.mxu1  ;;  %v10526_v53 = vpop.f32.mrf.mxu0 }
 0x66b   :  { %v11123_v44 = vsel %vm10961_vm8, %v10880_v34, %v11042_v48  ;;  %v10881_v54 = vadd.f32 %v22955_v40, %v10793_v0  ;;  %10714 = vst.msk [vmem:[%s23521_s3 + $0x240] sm:$0xff] %vm15_vm3, %v10633_v49  ;;  %v9537_v55 = vadd.f32 %v9435_v52, %v8396_v51  ;;  %v8401_v48 = vld [vmem:[%s23521_s3 + $0x280] sm:$0xff] }
 0x66c   :  { %11204 = vst.msk [vmem:[%s23521_s3 + $0x228] sm:$0xff] %vm15_vm3, %v11123_v44  ;;  %v9780_v57 = vld [vmem:[%s23521_s3 + $0x248] sm:$0xff]  ;;  %v13652_v58 = vpop.f32.mrf.mxu1  ;;  %v13814_v59 = vpop.f32.mrf.mxu0 }
 0x66d   :  { %vm10962_vm12 = vcmp.gt.f32.partialorder %v10881_v54, 0.0  ;;  %v11043_v50 = vmul.f32 0.1, %v10881_v54  ;;  %9618 = vst.msk [vmem:[%s23521_s3 + $0x258] sm:$0xff] %vm15_vm3, %v9537_v55  ;;  %v10634_v60 = vadd.f32 %v10526_v53, %v9780_v57 }
 0x66e   :  { %v10794_v61 = vld [vmem:[%s23521_s3 + $0x238] sm:$0xff]  ;;  %v9440_v1 = vpop.f32.mrf.mxu1  ;;  %v10531_v2 = vpop.f32.mrf.mxu0 }
 0x66f   :  { %v11124_v56 = vsel %vm10962_vm12, %v10881_v54, %v11043_v50  ;;  %v10882_v3 = vadd.f32 %v22955_v40, %v10794_v61  ;;  %10715 = vst.msk [vmem:[%s23521_s3 + $0x248] sm:$0xff] %vm15_vm3, %v10634_v60  ;;  %v9538_v4 = vadd.f32 %v9440_v1, %v8397_v63 }
 0x670   :  { %11205 = vst.msk [vmem:[%s23521_s3 + $0x230] sm:$0xff] %vm15_vm3, %v11124_v56  ;;  %v9781_v6 = vld [vmem:[%s23521_s3 + $0x250] sm:$0xff]  ;;  %v13655_v7 = vpop.f32.mrf.mxu1  ;;  %v13817_v10 = vpop.f32.mrf.mxu0 }
 0x671   :  { %vm10963_vm13 = vcmp.gt.f32.partialorder %v10882_v3, 0.0  ;;  %v11044_v62 = vmul.f32 0.1, %v10882_v3  ;;  %9619 = vst.msk [vmem:[%s23521_s3 + $0x260] sm:$0xff] %vm15_vm3, %v9538_v4  ;;  %v10635_v5 = vadd.f32 %v10531_v2, %v9781_v6 }
 0x672   :  { %v10795_v11 = vld [vmem:[%s23521_s3 + $0x240] sm:$0xff]  ;;  %v9443_v8 = vpop.f32.mrf.mxu1  ;;  %v10534_v13 = vpop.f32.mrf.mxu0 }
 0x673   :  { %v11125_v14 = vsel %vm10963_vm13, %v10882_v3, %v11044_v62  ;;  %v10883_v16 = vadd.f32 %v22955_v40, %v10795_v11  ;;  %10716 = vst.msk [vmem:[%s23521_s3 + $0x250] sm:$0xff] %vm15_vm3, %v10635_v5  ;;  %v9539_v17 = vadd.f32 %v9443_v8, %v8398_v12 }
 0x674   :  { %11206 = vst.msk [vmem:[%s23521_s3 + $0x238] sm:$0xff] %vm15_vm3, %v11125_v14  ;;  %v9782_v18 = vld [vmem:[%s23521_s3 + $0x258] sm:$0xff]  ;;  %v13656_v9 = vpop.f32.mrf.mxu1  ;;  %v13818_v19 = vpop.f32.mrf.mxu0 }
 0x675   :  { %vm10964_vm9 = vcmp.gt.f32.partialorder %v10883_v16, 0.0  ;;  %v11045_v20 = vmul.f32 0.1, %v10883_v16  ;;  %9620 = vst.msk [vmem:[%s23521_s3 + $0x268] sm:$0xff] %vm15_vm3, %v9539_v17  ;;  %v10636_v24 = vadd.f32 %v10534_v13, %v9782_v18 }
 0x676   :  { %v10796_v21 = vld [vmem:[%s23521_s3 + $0x248] sm:$0xff]  ;;  %v9448_v26 = vpop.f32.mrf.mxu1  ;;  %v10539_v15 = vpop.f32.mrf.mxu0 }
 0x677   :  { %v11126_v27 = vsel %vm10964_vm9, %v10883_v16, %v11045_v20  ;;  %v10884_v28 = vadd.f32 %v22955_v40, %v10796_v21  ;;  %10717 = vst.msk [vmem:[%s23521_s3 + $0x258] sm:$0xff] %vm15_vm3, %v10636_v24  ;;  %v9540_v29 = vadd.f32 %v9448_v26, %v8399_v25 }
 0x678   :  { %11207 = vst.msk [vmem:[%s23521_s3 + $0x240] sm:$0xff] %vm15_vm3, %v11126_v27  ;;  %v9783_v30 = vld [vmem:[%s23521_s3 + $0x260] sm:$0xff]  ;;  %v13659_v31 = vpop.f32.mrf.mxu1  ;;  %v13821_v22 = vpop.f32.mrf.mxu0 }
 0x679   :  { %vm10965_vm1 = vcmp.gt.f32.partialorder %v10884_v28, 0.0  ;;  %v11046_v32 = vmul.f32 0.1, %v10884_v28  ;;  %9621 = vst.msk [vmem:[%s23521_s3 + $0x270] sm:$0xff] %vm15_vm3, %v9540_v29  ;;  %v10637_v36 = vadd.f32 %v10539_v15, %v9783_v30 }
 0x67a   :  { %v10797_v33 = vld [vmem:[%s23521_s3 + $0x250] sm:$0xff]  ;;  %v9451_v38 = vpop.f32.mrf.mxu1  ;;  %v10542_v23 = vpop.f32.mrf.mxu0 }
 0x67b   :  { %v11127_v39 = vsel %vm10965_vm1, %v10884_v28, %v11046_v32  ;;  %v10885_v41 = vadd.f32 %v22955_v40, %v10797_v33  ;;  %10718 = vst.msk [vmem:[%s23521_s3 + $0x260] sm:$0xff] %vm15_vm3, %v10637_v36  ;;  %v9541_v42 = vadd.f32 %v9451_v38, %v8400_v35 }
 0x67c   :  { %11208 = vst.msk [vmem:[%s23521_s3 + $0x248] sm:$0xff] %vm15_vm3, %v11127_v39  ;;  %v9784_v43 = vld [vmem:[%s23521_s3 + $0x268] sm:$0xff]  ;;  %v13660_v34 = vpop.f32.mrf.mxu1  ;;  %v13822_v45 = vpop.f32.mrf.mxu0 }
 0x67d   :  { %vm10966_vm2 = vcmp.gt.f32.partialorder %v10885_v41, 0.0  ;;  %v11047_v46 = vmul.f32 0.1, %v10885_v41  ;;  %9622 = vst.msk [vmem:[%s23521_s3 + $0x278] sm:$0xff] %vm15_vm3, %v9541_v42  ;;  %v10638_v47 = vadd.f32 %v10542_v23, %v9784_v43 }
 0x67e   :  { %v10798_v37 = vld [vmem:[%s23521_s3 + $0x258] sm:$0xff]  ;;  %v9456_v49 = vpop.f32.mrf.mxu1  ;;  %v10547_v0 = vpop.f32.mrf.mxu0 }
 0x67f   :  { %v11128_v51 = vsel %vm10966_vm2, %v10885_v41, %v11047_v46  ;;  %v10886_v52 = vadd.f32 %v22955_v40, %v10798_v37  ;;  %10719 = vst.msk [vmem:[%s23521_s3 + $0x268] sm:$0xff] %vm15_vm3, %v10638_v47  ;;  %v9542_v53 = vadd.f32 %v9456_v49, %v8401_v48 }
 0x680   :  { %11209 = vst.msk [vmem:[%s23521_s3 + $0x250] sm:$0xff] %vm15_vm3, %v11128_v51  ;;  %v9785_v44 = vld [vmem:[%s23521_s3 + $0x270] sm:$0xff]  ;;  %v13663_v54 = vpop.f32.mrf.mxu1  ;;  %v13825_v55 = vpop.f32.mrf.mxu0 }
 0x681   :  { %vm10967_vm14 = vcmp.gt.f32.partialorder %v10886_v52, 0.0  ;;  %v11048_v57 = vmul.f32 0.1, %v10886_v52  ;;  %9623 = vst.msk [vmem:[%s23521_s3 + $0x280] sm:$0xff] %vm15_vm3, %v9542_v53  ;;  %v10639_v58 = vadd.f32 %v10547_v0, %v9785_v44 }
 0x682   :  { %v10799_v59 = vld [vmem:[%s23521_s3 + $0x260] sm:$0xff]  ;;  %v9459_v50 = vpop.f32.mrf.mxu1  ;;  %v10550_v60 = vpop.f32.mrf.mxu0 }
 0x683   :  { %v11129_v61 = vsel %vm10967_vm14, %v10886_v52, %v11048_v57  ;;  %v10887_v63 = vadd.f32 %v22955_v40, %v10799_v59  ;;  %10720 = vst.msk [vmem:[%s23521_s3 + $0x270] sm:$0xff] %vm15_vm3, %v10639_v58 }
 0x684   :  { %11210 = vst.msk [vmem:[%s23521_s3 + $0x258] sm:$0xff] %vm15_vm3, %v11129_v61  ;;  %v9786_v1 = vld [vmem:[%s23521_s3 + $0x278] sm:$0xff]  ;;  %v13664_v2 = vpop.f32.mrf.mxu1  ;;  %v13826_v56 = vpop.f32.mrf.mxu0 }
 0x685   :  { %vm10968_vm15 = vcmp.gt.f32.partialorder %v10887_v63, 0.0  ;;  %v11049_v3 = vmul.f32 0.1, %v10887_v63  ;;  %v10640_v4 = vadd.f32 %v10550_v60, %v9786_v1 }
 0x686   :  { %v10800_v6 = vld [vmem:[%s23521_s3 + $0x268] sm:$0xff]  ;;  %v10555_v7 = vpop.f32.mrf.mxu0 }
 0x687   :  { %v11130_v10 = vsel %vm10968_vm15, %v10887_v63, %v11049_v3  ;;  %v10888_v62 = vadd.f32 %v22955_v40, %v10800_v6  ;;  %10721 = vst.msk [vmem:[%s23521_s3 + $0x278] sm:$0xff] %vm15_vm3, %v10640_v4 }
 0x688   :  { %11211 = vst.msk [vmem:[%s23521_s3 + $0x260] sm:$0xff] %vm15_vm3, %v11130_v10  ;;  %v9787_v5 = vld [vmem:[%s23521_s3 + $0x280] sm:$0xff]  ;;  %v13829_v11 = vpop.f32.mrf.mxu0 }
 0x689   :  { %vm10969_vm0 = vcmp.gt.f32.partialorder %v10888_v62, 0.0  ;;  %v11050_v12 = vmul.f32 0.1, %v10888_v62  ;;  %v10641_v8 = vadd.f32 %v10555_v7, %v9787_v5 }
 0x68a   :  { %v10801_v13 = vld [vmem:[%s23521_s3 + $0x270] sm:$0xff]  ;;  %v10558_v14 = vpop.f32.mrf.mxu0 }
 0x68b   :  { %v11131_v16 = vsel %vm10969_vm0, %v10888_v62, %v11050_v12  ;;  %v10889_v17 = vadd.f32 %v22955_v40, %v10801_v13  ;;  %10722 = vst.msk [vmem:[%s23521_s3 + $0x280] sm:$0xff] %vm15_vm3, %v10641_v8 }
 0x68c   :  { %11212 = vst.msk [vmem:[%s23521_s3 + $0x268] sm:$0xff] %vm15_vm3, %v11131_v16  ;;  %v13830_v18 = vpop.f32.mrf.mxu0 }
 0x68d   :  { %vm10970_vm4 = vcmp.gt.f32.partialorder %v10889_v17, 0.0  ;;  %v11051_v9 = vmul.f32 0.1, %v10889_v17 }
 0x68e   :  { %v10802_v19 = vld [vmem:[%s23521_s3 + $0x278] sm:$0xff] }
 0x68f   :  { %v11132_v20 = vsel %vm10970_vm4, %v10889_v17, %v11051_v9  ;;  %v10890_v24 = vadd.f32 %v22955_v40, %v10802_v19 }
 0x690   :  { %11213 = vst.msk [vmem:[%s23521_s3 + $0x270] sm:$0xff] %vm15_vm3, %v11132_v20 }
 0x691   :  { %vm10971_vm5 = vcmp.gt.f32.partialorder %v10890_v24, 0.0  ;;  %v11052_v21 = vmul.f32 0.1, %v10890_v24 }
 0x692   :  { %v10803_v25 = vld [vmem:[%s23521_s3 + $0x280] sm:$0xff] }
 0x693   :  { %v11133_v26 = vsel %vm10971_vm5, %v10890_v24, %v11052_v21  ;;  %v10891_v15 = vadd.f32 %v22955_v40, %v10803_v25 }
 0x694   :  { %11214 = vst.msk [vmem:[%s23521_s3 + $0x278] sm:$0xff] %vm15_vm3, %v11133_v26 }
 0x695   :  { %vm10972_vm6 = vcmp.gt.f32.partialorder %v10891_v15, 0.0  ;;  %v11053_v27 = vmul.f32 0.1, %v10891_v15 }
 0x697   :  { %v11134_v28 = vsel %vm10972_vm6, %v10891_v15, %v11053_v27 }
 0x698   :  { %11215 = vst.msk [vmem:[%s23521_s3 + $0x280] sm:$0xff] %vm15_vm3, %v11134_v28 }

</bundles_post_ra>
